<compile_context>
chip_gen: v7x
topology: tpu7x:2x2x1
jax: 0.10.0
libtpu: 0.0.40
codegen_flags: <defaults>
</compile_context>

<pallas_src>
import jax
import jax.numpy as jnp
from jax.experimental import pallas as pl
from jax.experimental.pallas import tpu as pltpu


# ----------------------------------------------------------------------------
# In-kernel helpers (Mosaic-friendly op classes only: full-ref loads/stores,
# static slices, major/sublane reshapes, sublane/lane broadcasts, 2-D dots).
# ----------------------------------------------------------------------------
def _zero_border(pad_ref):
    """Zero only the 1-px halo ring of an (Hp, Wp, C) pad scratch."""
    Hp, Wp, C = pad_ref.shape
    zrow = jnp.zeros((1, Wp, C), jnp.float32)
    zcol = jnp.zeros((Hp, 1, C), jnp.float32)
    pad_ref[0:1, :, :] = zrow
    pad_ref[Hp - 1:Hp, :, :] = zrow
    pad_ref[:, 0:1, :] = zcol
    pad_ref[:, Wp - 1:Wp, :] = zcol


def _im2col3x3(pad_ref, H, W, C):
    """(H+2, W+2, C) zero-halo pad -> (H*W, 9*C) im2col patch matrix.

    All 9 kh/kw taps are concatenated along the lane (K) dimension so the
    whole 3x3 conv becomes a single MXU GEMM with K = 9*C.
    """
    xp = pad_ref[...]                               # one full-tile load
    taps = [xp[kh:kh + H, kw:kw + W, :].reshape(H * W, C)
            for kh in range(3) for kw in range(3)]
    return jnp.concatenate(taps, axis=-1)


def _conv3x3_gemm(pad_ref, H, W, C, w_ref, b_ref):
    """3x3 'same' conv + bias + ReLU as ONE GEMM: (H*W, 9C) @ (9C, Cout)."""
    patches = _im2col3x3(pad_ref, H, W, C)
    acc = jnp.dot(patches, w_ref[...], preferred_element_type=jnp.float32)
    return jnp.maximum(acc + b_ref[...], 0.0)


def _maxpool2(x, H, W, C):
    """(H, W, C) -> (H//2, W//2, C) 2x2 max-pool; lane dim (C) untouched."""
    x = x.reshape(H // 2, 2, W, C)
    x = jnp.maximum(x[:, 0], x[:, 1])               # pair adjacent rows
    x = x.reshape(H // 2, W // 2, 2, C)
    return jnp.max(x, axis=2)                       # pair adjacent columns


def _upsample2(z, h, w, C):
    """Nearest x2 upsample (h, w, C) -> (2h, 2w, C) as a single value.

    Row doubling merges two major dims; column doubling is the register-level
    interleave broadcast (2h, w, 1, C) -> (2h, w, 2, C) -> reshape
    (2h, 2w, C), so the caller writes the result with ONE dense store.
    """
    zr = jnp.broadcast_to(z.reshape(h, 1, w, C), (h, 2, w, C)).reshape(2 * h, w, C)
    zc = jnp.broadcast_to(zr.reshape(2 * h, w, 1, C),
                          (2 * h, w, 2, C)).reshape(2 * h, 2 * w, C)
    return zc


# ----------------------------------------------------------------------------
# Fused Unet forward kernel: one image per grid step, all activations and
# weights VMEM-resident, single HBM read (input/weights) + single HBM write
# (logits) per image.
# ----------------------------------------------------------------------------
def _fused_unet_kernel(
    x_ref,
    e1w_ref, e1b_ref, e2w_ref, e2b_ref, bw_ref, bb_ref,
    d2w_ref, d2b_ref, d1w_ref, d1b_ref, hw_ref, hb_ref,
    o_ref,
    pad_x, pad_d1, pad_d2, pad_cat2, pad_cat1,
):
    _, H, W, Cin = x_ref.shape
    H2, W2, H4, W4 = H // 2, W // 2, H // 4, W // 4
    C1 = e1w_ref.shape[-1]        # encoder-1 channels
    C2 = e2w_ref.shape[-1]        # encoder-2 channels
    C3 = bw_ref.shape[-1]         # bottleneck channels
    CD2 = d2w_ref.shape[-1]       # decoder-2 channels

    # Halo ring zero every step (cheap); interiors are fully overwritten below.
    for pad in (pad_x, pad_d1, pad_d2, pad_cat2, pad_cat1):
        _zero_border(pad)

    # ---- encoder stage 1: conv -> skip slot + 2x2 max-pool -------------------
    pad_x[1:1 + H, 1:1 + W, :] = x_ref[0]
    e1 = _conv3x3_gemm(pad_x, H, W, Cin, e1w_ref, e1b_ref).reshape(H, W, C1)
    pad_cat1[1:1 + H, 1:1 + W, CD2:CD2 + C1] = e1      # skip -> decoder-1 lanes
    d1 = _maxpool2(e1, H, W, C1)                       # (H2, W2, C1)

    # ---- encoder stage 2 ------------------------------------------------------
    pad_d1[1:1 + H2, 1:1 + W2, :] = d1
    e2 = _conv3x3_gemm(pad_d1, H2, W2, C1, e2w_ref, e2b_ref).reshape(H2, W2, C2)
    pad_cat2[1:1 + H2, 1:1 + W2, C3:C3 + C2] = e2      # skip -> decoder-2 lanes
    d2 = _maxpool2(e2, H2, W2, C2)                     # (H4, W4, C2)

    # ---- bottleneck -----------------------------------------------------------
    pad_d2[1:1 + H4, 1:1 + W4, :] = d2
    bott = _conv3x3_gemm(pad_d2, H4, W4, C2, bw_ref, bb_ref).reshape(H4, W4, C3)

    # ---- decoder stage 2: upsample + skip fused into ONE GEMM (K = 9*(C3+C2)) -
    pad_cat2[1:1 + H2, 1:1 + W2, 0:C3] = _upsample2(bott, H4, W4, C3)
    dec2 = _conv3x3_gemm(pad_cat2, H2, W2, C3 + C2,
                         d2w_ref, d2b_ref).reshape(H2, W2, CD2)

    # ---- decoder stage 1 ------------------------------------------------------
    pad_cat1[1:1 + H, 1:1 + W, 0:CD2] = _upsample2(dec2, H2, W2, CD2)
    dec1 = _conv3x3_gemm(pad_cat1, H, W, CD2 + C1, d1w_ref, d1b_ref)  # (H*W, CD1)

    # ---- 1x1 classification head, emitted transposed -> lane-dense (NC, H*W) --
    out_t = jax.lax.dot_general(
        hw_ref[...], dec1,                             # (NC, CD1) x (H*W, CD1)^T
        dimension_numbers=(((1,), (1,)), ((), ())),
        preferred_element_type=jnp.float32)
    o_ref[0] = (out_t + hb_ref[...]).astype(o_ref.dtype)


# ----------------------------------------------------------------------------
# Wrapper: single pallas_call for the whole network.
# ----------------------------------------------------------------------------
def unet_forward(x_nchw, p):
    x = jnp.transpose(x_nchw, (0, 2, 3, 1)).astype(jnp.float32)  # NCHW -> NHWC
    N, H, W, Cin = x.shape
    H2, W2, H4, W4 = H // 2, W // 2, H // 4, W // 4

    C1 = p["enc1_w"].shape[-1]
    C2 = p["enc2_w"].shape[-1]
    C3 = p["bott_w"].shape[-1]
    CD2 = p["dec2_w"].shape[-1]
    CD1 = p["dec1_w"].shape[-1]
    NC = p["head_w"].shape[-1]

    # 3x3 weights flattened to (9*Cin, Cout) in (kh, kw, cin) order, matching
    # the lane-concatenated im2col patches exactly.  Decoder Cin order is
    # [upsampled | skip], matching the fused pad buffers' lane layout.
    e1w = p["enc1_w"].reshape(9 * Cin, C1)
    e2w = p["enc2_w"].reshape(9 * C1, C2)
    bw = p["bott_w"].reshape(9 * C2, C3)
    d2w = p["dec2_w"].reshape(9 * (C3 + C2), CD2)
    d1w = p["dec1_w"].reshape(9 * (CD2 + C1), CD1)
    hw_t = p["head_w"].reshape(CD1, NC).T              # (NC, CD1): head is transposed

    e1b = p["enc1_b"].reshape(1, C1)
    e2b = p["enc2_b"].reshape(1, C2)
    bb = p["bott_b"].reshape(1, C3)
    d2b = p["dec2_b"].reshape(1, CD2)
    d1b = p["dec1_b"].reshape(1, CD1)
    hb = p["head_b"].reshape(NC, 1)

    weights = (e1w, e1b, e2w, e2b, bw, bb, d2w, d2b, d1w, d1b, hw_t, hb)

    def const_map(ndim):
        return lambda n: (0,) * ndim

    def full_spec(a):
        return pl.BlockSpec(a.shape, const_map(a.ndim))

    out_flat = pl.pallas_call(
        _fused_unet_kernel,
        out_shape=jax.ShapeDtypeStruct((N, NC, H * W), jnp.float32),
        grid_spec=pltpu.PrefetchScalarGridSpec(
            num_scalar_prefetch=0,
            grid=(N,),                                  # one image per grid step
            in_specs=[pl.BlockSpec((1, H, W, Cin), lambda n: (n, 0, 0, 0))]
                     + [full_spec(a) for a in weights],
            # lane-dense output: last dim H*W = 256 -> unmasked stores, wrapper
            # only needs a free reshape back to NCHW (no output transpose op).
            out_specs=pl.BlockSpec((1, NC, H * W), lambda n: (n, 0, 0)),
            scratch_shapes=[
                pltpu.VMEM((H + 2, W + 2, Cin), jnp.float32),        # pad_x
                pltpu.VMEM((H2 + 2, W2 + 2, C1), jnp.float32),       # pad_d1
                pltpu.VMEM((H4 + 2, W4 + 2, C2), jnp.float32),       # pad_d2
                pltpu.VMEM((H2 + 2, W2 + 2, C3 + C2), jnp.float32),  # pad_cat2
                pltpu.VMEM((H + 2, W + 2, CD2 + C1), jnp.float32),   # pad_cat1
            ],
        ),
        compiler_params=pltpu.CompilerParams(
            dimension_semantics=("parallel",)),         # v7x: one image per core
    )(x, *weights)

    return out_flat.reshape(N, NC, H, W)                # free reshape, no transpose


# ----------------------------------------------------------------------------
# Deterministic parameter init (synthetic; no checkpoint loading).
# ----------------------------------------------------------------------------
def init_params(key, in_chans, num_classes):
    shapes = {
        "enc1_w": (3, 3, in_chans, 8),  "enc1_b": (8,),
        "enc2_w": (3, 3, 8, 16),        "enc2_b": (16,),
        "bott_w": (3, 3, 16, 32),       "bott_b": (32,),
        "dec2_w": (3, 3, 48, 16),       "dec2_b": (16,),
        "dec1_w": (3, 3, 24, 8),        "dec1_b": (8,),
        "head_w": (1, 1, 8, num_classes), "head_b": (num_classes,),
    }
    params = {}
    keys = jax.random.split(key, len(shapes))
    for k, (name, shp) in zip(keys, sorted(shapes.items())):
        params[name] = 0.1 * jax.random.normal(k, shp, dtype=jnp.float32)
    return params


if __name__ == "__main__":
    # cfg: in_chans=4, target_size=3, image 16x16, batch 2
    key = jax.random.PRNGKey(0)
    k_x, k_p = jax.random.split(key)
    x = jax.random.normal(k_x, (2, 4, 16, 16), dtype=jnp.float32)  # NCHW
    params = init_params(k_p, in_chans=4, num_classes=3)

    out = jax.jit(unet_forward)(x, params)
    out = jax.block_until_ready(out)
    assert out.shape == (2, 3, 16, 16), out.shape
    assert jnp.all(jnp.isfinite(out))
    print("KERNEL_OK")
</pallas_src>

<mosaic_0001>
module attributes {stable_mosaic.version = 11 : i64} {
  func.func @_fused_unet_kernel(%arg0: i32, %arg1: memref<1x16x16x4xf32, #tpu.memory_space<vmem>>, %arg2: memref<36x8xf32, #tpu.memory_space<vmem>>, %arg3: memref<1x8xf32, #tpu.memory_space<vmem>>, %arg4: memref<72x16xf32, #tpu.memory_space<vmem>>, %arg5: memref<1x16xf32, #tpu.memory_space<vmem>>, %arg6: memref<144x32xf32, #tpu.memory_space<vmem>>, %arg7: memref<1x32xf32, #tpu.memory_space<vmem>>, %arg8: memref<432x16xf32, #tpu.memory_space<vmem>>, %arg9: memref<1x16xf32, #tpu.memory_space<vmem>>, %arg10: memref<216x8xf32, #tpu.memory_space<vmem>>, %arg11: memref<1x8xf32, #tpu.memory_space<vmem>>, %arg12: memref<3x8xf32, #tpu.memory_space<vmem>>, %arg13: memref<3x1xf32, #tpu.memory_space<vmem>>, %arg14: memref<1x3x256xf32, #tpu.memory_space<vmem>>, %arg15: memref<18x18x4xf32, #tpu.memory_space<vmem>>, %arg16: memref<10x10x8xf32, #tpu.memory_space<vmem>>, %arg17: memref<6x6x16xf32, #tpu.memory_space<vmem>>, %arg18: memref<10x10x48xf32, #tpu.memory_space<vmem>>, %arg19: memref<18x18x24xf32, #tpu.memory_space<vmem>>) attributes {dimension_semantics = [#tpu.dimension_semantics<parallel>], iteration_bounds = array<i64: 2>, scalar_prefetch = 0 : i64, scratch_operands = 5 : i64, tpu.core_type = #tpu.core_type<tc>, window_params = [{transform_indices = @transform_0, window_bounds = array<i64: 1, 16, 16, 4>}, {pipeline_mode = #tpu.pipeline_mode<synchronous>, transform_indices = @transform_1, window_bounds = array<i64: 36, 8>}, {pipeline_mode = #tpu.pipeline_mode<synchronous>, transform_indices = @transform_2, window_bounds = array<i64: 1, 8>}, {pipeline_mode = #tpu.pipeline_mode<synchronous>, transform_indices = @transform_3, window_bounds = array<i64: 72, 16>}, {pipeline_mode = #tpu.pipeline_mode<synchronous>, transform_indices = @transform_4, window_bounds = array<i64: 1, 16>}, {pipeline_mode = #tpu.pipeline_mode<synchronous>, transform_indices = @transform_5, window_bounds = array<i64: 144, 32>}, {pipeline_mode = #tpu.pipeline_mode<synchronous>, transform_indices = @transform_6, window_bounds = array<i64: 1, 32>}, {pipeline_mode = #tpu.pipeline_mode<synchronous>, transform_indices = @transform_7, window_bounds = array<i64: 432, 16>}, {pipeline_mode = #tpu.pipeline_mode<synchronous>, transform_indices = @transform_8, window_bounds = array<i64: 1, 16>}, {pipeline_mode = #tpu.pipeline_mode<synchronous>, transform_indices = @transform_9, window_bounds = array<i64: 216, 8>}, {pipeline_mode = #tpu.pipeline_mode<synchronous>, transform_indices = @transform_10, window_bounds = array<i64: 1, 8>}, {pipeline_mode = #tpu.pipeline_mode<synchronous>, transform_indices = @transform_11, window_bounds = array<i64: 3, 8>}, {pipeline_mode = #tpu.pipeline_mode<synchronous>, transform_indices = @transform_12, window_bounds = array<i64: 3, 1>}, {transform_indices = @transform_13, window_bounds = array<i64: 1, 3, 256>}]} {
    %cst = arith.constant 0.000000e+00 : f32
    %0 = vector.broadcast %cst : f32 to vector<1x18x4xf32>
    %cst_0 = arith.constant 0.000000e+00 : f32
    %1 = vector.broadcast %cst_0 : f32 to vector<18x1x4xf32>
    %c0 = arith.constant 0 : index
    %c0_1 = arith.constant 0 : index
    %c0_2 = arith.constant 0 : index
    %2 = vector.load %arg15[%c0, %c0_1, %c0_2] : memref<18x18x4xf32, #tpu.memory_space<vmem>>, vector<1x18x4xf32>
    tpu.vector_store %arg15[%c0, %c0_1, %c0_2], %0 {strides = array<i32>} : memref<18x18x4xf32, #tpu.memory_space<vmem>>, vector<1x18x4xf32>,
    %c17 = arith.constant 17 : index
    %c0_3 = arith.constant 0 : index
    %c0_4 = arith.constant 0 : index
    %3 = vector.load %arg15[%c17, %c0_3, %c0_4] : memref<18x18x4xf32, #tpu.memory_space<vmem>>, vector<1x18x4xf32>
    tpu.vector_store %arg15[%c17, %c0_3, %c0_4], %0 {strides = array<i32>} : memref<18x18x4xf32, #tpu.memory_space<vmem>>, vector<1x18x4xf32>,
    %c0_5 = arith.constant 0 : index
    %c0_6 = arith.constant 0 : index
    %c0_7 = arith.constant 0 : index
    %4 = vector.load %arg15[%c0_5, %c0_6, %c0_7] : memref<18x18x4xf32, #tpu.memory_space<vmem>>, vector<18x1x4xf32>
    tpu.vector_store %arg15[%c0_5, %c0_6, %c0_7], %1 {strides = array<i32>} : memref<18x18x4xf32, #tpu.memory_space<vmem>>, vector<18x1x4xf32>,
    %c0_8 = arith.constant 0 : index
    %c17_9 = arith.constant 17 : index
    %c0_10 = arith.constant 0 : index
    %5 = vector.load %arg15[%c0_8, %c17_9, %c0_10] : memref<18x18x4xf32, #tpu.memory_space<vmem>>, vector<18x1x4xf32>
    tpu.vector_store %arg15[%c0_8, %c17_9, %c0_10], %1 {strides = array<i32>} : memref<18x18x4xf32, #tpu.memory_space<vmem>>, vector<18x1x4xf32>,
    %cst_11 = arith.constant 0.000000e+00 : f32
    %6 = vector.broadcast %cst_11 : f32 to vector<1x10x8xf32>
    %cst_12 = arith.constant 0.000000e+00 : f32
    %7 = vector.broadcast %cst_12 : f32 to vector<10x1x8xf32>
    %c0_13 = arith.constant 0 : index
    %c0_14 = arith.constant 0 : index
    %c0_15 = arith.constant 0 : index
    %8 = vector.load %arg16[%c0_13, %c0_14, %c0_15] : memref<10x10x8xf32, #tpu.memory_space<vmem>>, vector<1x10x8xf32>
    tpu.vector_store %arg16[%c0_13, %c0_14, %c0_15], %6 {strides = array<i32>} : memref<10x10x8xf32, #tpu.memory_space<vmem>>, vector<1x10x8xf32>,
    %c9 = arith.constant 9 : index
    %c0_16 = arith.constant 0 : index
    %c0_17 = arith.constant 0 : index
    %9 = vector.load %arg16[%c9, %c0_16, %c0_17] : memref<10x10x8xf32, #tpu.memory_space<vmem>>, vector<1x10x8xf32>
    tpu.vector_store %arg16[%c9, %c0_16, %c0_17], %6 {strides = array<i32>} : memref<10x10x8xf32, #tpu.memory_space<vmem>>, vector<1x10x8xf32>,
    %c0_18 = arith.constant 0 : index
    %c0_19 = arith.constant 0 : index
    %c0_20 = arith.constant 0 : index
    %10 = vector.load %arg16[%c0_18, %c0_19, %c0_20] : memref<10x10x8xf32, #tpu.memory_space<vmem>>, vector<10x1x8xf32>
    tpu.vector_store %arg16[%c0_18, %c0_19, %c0_20], %7 {strides = array<i32>} : memref<10x10x8xf32, #tpu.memory_space<vmem>>, vector<10x1x8xf32>,
    %c0_21 = arith.constant 0 : index
    %c9_22 = arith.constant 9 : index
    %c0_23 = arith.constant 0 : index
    %11 = vector.load %arg16[%c0_21, %c9_22, %c0_23] : memref<10x10x8xf32, #tpu.memory_space<vmem>>, vector<10x1x8xf32>
    tpu.vector_store %arg16[%c0_21, %c9_22, %c0_23], %7 {strides = array<i32>} : memref<10x10x8xf32, #tpu.memory_space<vmem>>, vector<10x1x8xf32>,
    %cst_24 = arith.constant 0.000000e+00 : f32
    %12 = vector.broadcast %cst_24 : f32 to vector<1x6x16xf32>
    %cst_25 = arith.constant 0.000000e+00 : f32
    %13 = vector.broadcast %cst_25 : f32 to vector<6x1x16xf32>
    %c0_26 = arith.constant 0 : index
    %c0_27 = arith.constant 0 : index
    %c0_28 = arith.constant 0 : index
    %14 = vector.load %arg17[%c0_26, %c0_27, %c0_28] : memref<6x6x16xf32, #tpu.memory_space<vmem>>, vector<1x6x16xf32>
    tpu.vector_store %arg17[%c0_26, %c0_27, %c0_28], %12 {strides = array<i32>} : memref<6x6x16xf32, #tpu.memory_space<vmem>>, vector<1x6x16xf32>,
    %c5 = arith.constant 5 : index
    %c0_29 = arith.constant 0 : index
    %c0_30 = arith.constant 0 : index
    %15 = vector.load %arg17[%c5, %c0_29, %c0_30] : memref<6x6x16xf32, #tpu.memory_space<vmem>>, vector<1x6x16xf32>
    tpu.vector_store %arg17[%c5, %c0_29, %c0_30], %12 {strides = array<i32>} : memref<6x6x16xf32, #tpu.memory_space<vmem>>, vector<1x6x16xf32>,
    %c0_31 = arith.constant 0 : index
    %c0_32 = arith.constant 0 : index
    %c0_33 = arith.constant 0 : index
    %16 = vector.load %arg17[%c0_31, %c0_32, %c0_33] : memref<6x6x16xf32, #tpu.memory_space<vmem>>, vector<6x1x16xf32>
    tpu.vector_store %arg17[%c0_31, %c0_32, %c0_33], %13 {strides = array<i32>} : memref<6x6x16xf32, #tpu.memory_space<vmem>>, vector<6x1x16xf32>,
    %c0_34 = arith.constant 0 : index
    %c5_35 = arith.constant 5 : index
    %c0_36 = arith.constant 0 : index
    %17 = vector.load %arg17[%c0_34, %c5_35, %c0_36] : memref<6x6x16xf32, #tpu.memory_space<vmem>>, vector<6x1x16xf32>
    tpu.vector_store %arg17[%c0_34, %c5_35, %c0_36], %13 {strides = array<i32>} : memref<6x6x16xf32, #tpu.memory_space<vmem>>, vector<6x1x16xf32>,
    %cst_37 = arith.constant 0.000000e+00 : f32
    %18 = vector.broadcast %cst_37 : f32 to vector<1x10x48xf32>
    %cst_38 = arith.constant 0.000000e+00 : f32
    %19 = vector.broadcast %cst_38 : f32 to vector<10x1x48xf32>
    %c0_39 = arith.constant 0 : index
    %c0_40 = arith.constant 0 : index
    %c0_41 = arith.constant 0 : index
    %20 = vector.load %arg18[%c0_39, %c0_40, %c0_41] : memref<10x10x48xf32, #tpu.memory_space<vmem>>, vector<1x10x48xf32>
    tpu.vector_store %arg18[%c0_39, %c0_40, %c0_41], %18 {strides = array<i32>} : memref<10x10x48xf32, #tpu.memory_space<vmem>>, vector<1x10x48xf32>,
    %c9_42 = arith.constant 9 : index
    %c0_43 = arith.constant 0 : index
    %c0_44 = arith.constant 0 : index
    %21 = vector.load %arg18[%c9_42, %c0_43, %c0_44] : memref<10x10x48xf32, #tpu.memory_space<vmem>>, vector<1x10x48xf32>
    tpu.vector_store %arg18[%c9_42, %c0_43, %c0_44], %18 {strides = array<i32>} : memref<10x10x48xf32, #tpu.memory_space<vmem>>, vector<1x10x48xf32>,
    %c0_45 = arith.constant 0 : index
    %c0_46 = arith.constant 0 : index
    %c0_47 = arith.constant 0 : index
    %22 = vector.load %arg18[%c0_45, %c0_46, %c0_47] : memref<10x10x48xf32, #tpu.memory_space<vmem>>, vector<10x1x48xf32>
    tpu.vector_store %arg18[%c0_45, %c0_46, %c0_47], %19 {strides = array<i32>} : memref<10x10x48xf32, #tpu.memory_space<vmem>>, vector<10x1x48xf32>,
    %c0_48 = arith.constant 0 : index
    %c9_49 = arith.constant 9 : index
    %c0_50 = arith.constant 0 : index
    %23 = vector.load %arg18[%c0_48, %c9_49, %c0_50] : memref<10x10x48xf32, #tpu.memory_space<vmem>>, vector<10x1x48xf32>
    tpu.vector_store %arg18[%c0_48, %c9_49, %c0_50], %19 {strides = array<i32>} : memref<10x10x48xf32, #tpu.memory_space<vmem>>, vector<10x1x48xf32>,
    %cst_51 = arith.constant 0.000000e+00 : f32
    %24 = vector.broadcast %cst_51 : f32 to vector<1x18x24xf32>
    %cst_52 = arith.constant 0.000000e+00 : f32
    %25 = vector.broadcast %cst_52 : f32 to vector<18x1x24xf32>
    %c0_53 = arith.constant 0 : index
    %c0_54 = arith.constant 0 : index
    %c0_55 = arith.constant 0 : index
    %26 = vector.load %arg19[%c0_53, %c0_54, %c0_55] : memref<18x18x24xf32, #tpu.memory_space<vmem>>, vector<1x18x24xf32>
    tpu.vector_store %arg19[%c0_53, %c0_54, %c0_55], %24 {strides = array<i32>} : memref<18x18x24xf32, #tpu.memory_space<vmem>>, vector<1x18x24xf32>,
    %c17_56 = arith.constant 17 : index
    %c0_57 = arith.constant 0 : index
    %c0_58 = arith.constant 0 : index
    %27 = vector.load %arg19[%c17_56, %c0_57, %c0_58] : memref<18x18x24xf32, #tpu.memory_space<vmem>>, vector<1x18x24xf32>
    tpu.vector_store %arg19[%c17_56, %c0_57, %c0_58], %24 {strides = array<i32>} : memref<18x18x24xf32, #tpu.memory_space<vmem>>, vector<1x18x24xf32>,
    %c0_59 = arith.constant 0 : index
    %c0_60 = arith.constant 0 : index
    %c0_61 = arith.constant 0 : index
    %28 = vector.load %arg19[%c0_59, %c0_60, %c0_61] : memref<18x18x24xf32, #tpu.memory_space<vmem>>, vector<18x1x24xf32>
    tpu.vector_store %arg19[%c0_59, %c0_60, %c0_61], %25 {strides = array<i32>} : memref<18x18x24xf32, #tpu.memory_space<vmem>>, vector<18x1x24xf32>,
    %c0_62 = arith.constant 0 : index
    %c17_63 = arith.constant 17 : index
    %c0_64 = arith.constant 0 : index
    %29 = vector.load %arg19[%c0_62, %c17_63, %c0_64] : memref<18x18x24xf32, #tpu.memory_space<vmem>>, vector<18x1x24xf32>
    tpu.vector_store %arg19[%c0_62, %c17_63, %c0_64], %25 {strides = array<i32>} : memref<18x18x24xf32, #tpu.memory_space<vmem>>, vector<18x1x24xf32>,
    %c0_65 = arith.constant 0 : index
    %c0_66 = arith.constant 0 : index
    %c0_67 = arith.constant 0 : index
    %c0_68 = arith.constant 0 : index
    %30 = vector.load %arg1[%c0_65, %c0_66, %c0_67, %c0_68] : memref<1x16x16x4xf32, #tpu.memory_space<vmem>>, vector<1x16x16x4xf32>
    %31 = vector.shape_cast %30 : vector<1x16x16x4xf32> to vector<16x16x4xf32>
    %c1 = arith.constant 1 : index
    %c1_69 = arith.constant 1 : index
    %c0_70 = arith.constant 0 : index
    %32 = vector.load %arg15[%c1, %c1_69, %c0_70] : memref<18x18x4xf32, #tpu.memory_space<vmem>>, vector<16x16x4xf32>
    tpu.vector_store %arg15[%c1, %c1_69, %c0_70], %31 {strides = array<i32>} : memref<18x18x4xf32, #tpu.memory_space<vmem>>, vector<16x16x4xf32>,
    %c0_71 = arith.constant 0 : index
    %c0_72 = arith.constant 0 : index
    %c0_73 = arith.constant 0 : index
    %33 = vector.load %arg15[%c0_71, %c0_72, %c0_73] : memref<18x18x4xf32, #tpu.memory_space<vmem>>, vector<18x18x4xf32>
    %34 = vector.extract_strided_slice %33 {offsets = [0, 0, 0], sizes = [16, 16, 4], strides = [1, 1, 1]} : vector<18x18x4xf32> to vector<16x16x4xf32>
    %35 = vector.shape_cast %34 : vector<16x16x4xf32> to vector<256x4xf32>
    %36 = vector.extract_strided_slice %33 {offsets = [0, 1, 0], sizes = [16, 16, 4], strides = [1, 1, 1]} : vector<18x18x4xf32> to vector<16x16x4xf32>
    %37 = vector.shape_cast %36 : vector<16x16x4xf32> to vector<256x4xf32>
    %38 = vector.extract_strided_slice %33 {offsets = [0, 2, 0], sizes = [16, 16, 4], strides = [1, 1, 1]} : vector<18x18x4xf32> to vector<16x16x4xf32>
    %39 = vector.shape_cast %38 : vector<16x16x4xf32> to vector<256x4xf32>
    %40 = vector.extract_strided_slice %33 {offsets = [1, 0, 0], sizes = [16, 16, 4], strides = [1, 1, 1]} : vector<18x18x4xf32> to vector<16x16x4xf32>
    %41 = vector.shape_cast %40 : vector<16x16x4xf32> to vector<256x4xf32>
    %42 = vector.extract_strided_slice %33 {offsets = [1, 1, 0], sizes = [16, 16, 4], strides = [1, 1, 1]} : vector<18x18x4xf32> to vector<16x16x4xf32>
    %43 = vector.shape_cast %42 : vector<16x16x4xf32> to vector<256x4xf32>
    %44 = vector.extract_strided_slice %33 {offsets = [1, 2, 0], sizes = [16, 16, 4], strides = [1, 1, 1]} : vector<18x18x4xf32> to vector<16x16x4xf32>
    %45 = vector.shape_cast %44 : vector<16x16x4xf32> to vector<256x4xf32>
    %46 = vector.extract_strided_slice %33 {offsets = [2, 0, 0], sizes = [16, 16, 4], strides = [1, 1, 1]} : vector<18x18x4xf32> to vector<16x16x4xf32>
    %47 = vector.shape_cast %46 : vector<16x16x4xf32> to vector<256x4xf32>
    %48 = vector.extract_strided_slice %33 {offsets = [2, 1, 0], sizes = [16, 16, 4], strides = [1, 1, 1]} : vector<18x18x4xf32> to vector<16x16x4xf32>
    %49 = vector.shape_cast %48 : vector<16x16x4xf32> to vector<256x4xf32>
    %50 = vector.extract_strided_slice %33 {offsets = [2, 2, 0], sizes = [16, 16, 4], strides = [1, 1, 1]} : vector<18x18x4xf32> to vector<16x16x4xf32>
    %51 = vector.shape_cast %50 : vector<16x16x4xf32> to vector<256x4xf32>
    %52 = tpu.concatenate %35, %37, %39, %41, %43, %45, %47, %49, %51 in 1 : vector<256x4xf32>, vector<256x4xf32>, vector<256x4xf32>, vector<256x4xf32>, vector<256x4xf32>, vector<256x4xf32>, vector<256x4xf32>, vector<256x4xf32>, vector<256x4xf32> -> vector<256x36xf32>
    %c0_74 = arith.constant 0 : index
    %c0_75 = arith.constant 0 : index
    %53 = vector.load %arg2[%c0_74, %c0_75] : memref<36x8xf32, #tpu.memory_space<vmem>>, vector<36x8xf32>
    %cst_76 = arith.constant dense<0.000000e+00> : vector<256x8xf32>
    %54 = tpu.matmul %52, %53, %cst_76 {dimension_numbers = #tpu.dot_dimension_numbers<[1], [0], [0], [1], [0, 0, 1, 1], [], []>} : vector<256x36xf32>, vector<36x8xf32>, vector<256x8xf32> -> vector<256x8xf32>
    %c0_77 = arith.constant 0 : index
    %c0_78 = arith.constant 0 : index
    %55 = vector.load %arg3[%c0_77, %c0_78] : memref<1x8xf32, #tpu.memory_space<vmem>>, vector<1x8xf32>
    %56 = vector.broadcast %55 : vector<1x8xf32> to vector<256x8xf32>
    %57 = arith.addf %54, %56 : vector<256x8xf32>
    %cst_79 = arith.constant 0.000000e+00 : f32
    %58 = vector.broadcast %cst_79 : f32 to vector<256x8xf32>
    %59 = arith.maximumf %57, %58 : vector<256x8xf32>
    %60 = vector.shape_cast %59 : vector<256x8xf32> to vector<16x16x8xf32>
    %c1_80 = arith.constant 1 : index
    %c1_81 = arith.constant 1 : index
    %c16 = arith.constant 16 : index
    %61 = vector.load %arg19[%c1_80, %c1_81, %c16] : memref<18x18x24xf32, #tpu.memory_space<vmem>>, vector<16x16x8xf32>
    tpu.vector_store %arg19[%c1_80, %c1_81, %c16], %60 {strides = array<i32>} : memref<18x18x24xf32, #tpu.memory_space<vmem>>, vector<16x16x8xf32>,
    %62 = vector.shape_cast %60 : vector<16x16x8xf32> to vector<8x2x16x8xf32>
    %63 = vector.extract_strided_slice %62 {offsets = [0, 0, 0, 0], sizes = [8, 1, 16, 8], strides = [1, 1, 1, 1]} : vector<8x2x16x8xf32> to vector<8x1x16x8xf32>
    %64 = vector.shape_cast %63 : vector<8x1x16x8xf32> to vector<8x16x8xf32>
    %65 = vector.extract_strided_slice %62 {offsets = [0, 1, 0, 0], sizes = [8, 1, 16, 8], strides = [1, 1, 1, 1]} : vector<8x2x16x8xf32> to vector<8x1x16x8xf32>
    %66 = vector.shape_cast %65 : vector<8x1x16x8xf32> to vector<8x16x8xf32>
    %67 = arith.maximumf %64, %66 : vector<8x16x8xf32>
    %68 = vector.shape_cast %67 : vector<8x16x8xf32> to vector<8x8x2x8xf32>
    %cst_82 = arith.constant dense<0xFF800000> : vector<8x8x8xf32>
    %69 = vector.multi_reduction <maximumf>, %68, %cst_82 [2] : vector<8x8x2x8xf32> to vector<8x8x8xf32>
    %c1_83 = arith.constant 1 : index
    %c1_84 = arith.constant 1 : index
    %c0_85 = arith.constant 0 : index
    %70 = vector.load %arg16[%c1_83, %c1_84, %c0_85] : memref<10x10x8xf32, #tpu.memory_space<vmem>>, vector<8x8x8xf32>
    tpu.vector_store %arg16[%c1_83, %c1_84, %c0_85], %69 {strides = array<i32>} : memref<10x10x8xf32, #tpu.memory_space<vmem>>, vector<8x8x8xf32>,
    %c0_86 = arith.constant 0 : index
    %c0_87 = arith.constant 0 : index
    %c0_88 = arith.constant 0 : index
    %71 = vector.load %arg16[%c0_86, %c0_87, %c0_88] : memref<10x10x8xf32, #tpu.memory_space<vmem>>, vector<10x10x8xf32>
    %72 = vector.extract_strided_slice %71 {offsets = [0, 0, 0], sizes = [8, 8, 8], strides = [1, 1, 1]} : vector<10x10x8xf32> to vector<8x8x8xf32>
    %73 = vector.shape_cast %72 : vector<8x8x8xf32> to vector<64x8xf32>
    %74 = vector.extract_strided_slice %71 {offsets = [0, 1, 0], sizes = [8, 8, 8], strides = [1, 1, 1]} : vector<10x10x8xf32> to vector<8x8x8xf32>
    %75 = vector.shape_cast %74 : vector<8x8x8xf32> to vector<64x8xf32>
    %76 = vector.extract_strided_slice %71 {offsets = [0, 2, 0], sizes = [8, 8, 8], strides = [1, 1, 1]} : vector<10x10x8xf32> to vector<8x8x8xf32>
    %77 = vector.shape_cast %76 : vector<8x8x8xf32> to vector<64x8xf32>
    %78 = vector.extract_strided_slice %71 {offsets = [1, 0, 0], sizes = [8, 8, 8], strides = [1, 1, 1]} : vector<10x10x8xf32> to vector<8x8x8xf32>
    %79 = vector.shape_cast %78 : vector<8x8x8xf32> to vector<64x8xf32>
    %80 = vector.extract_strided_slice %71 {offsets = [1, 1, 0], sizes = [8, 8, 8], strides = [1, 1, 1]} : vector<10x10x8xf32> to vector<8x8x8xf32>
    %81 = vector.shape_cast %80 : vector<8x8x8xf32> to vector<64x8xf32>
    %82 = vector.extract_strided_slice %71 {offsets = [1, 2, 0], sizes = [8, 8, 8], strides = [1, 1, 1]} : vector<10x10x8xf32> to vector<8x8x8xf32>
    %83 = vector.shape_cast %82 : vector<8x8x8xf32> to vector<64x8xf32>
    %84 = vector.extract_strided_slice %71 {offsets = [2, 0, 0], sizes = [8, 8, 8], strides = [1, 1, 1]} : vector<10x10x8xf32> to vector<8x8x8xf32>
    %85 = vector.shape_cast %84 : vector<8x8x8xf32> to vector<64x8xf32>
    %86 = vector.extract_strided_slice %71 {offsets = [2, 1, 0], sizes = [8, 8, 8], strides = [1, 1, 1]} : vector<10x10x8xf32> to vector<8x8x8xf32>
    %87 = vector.shape_cast %86 : vector<8x8x8xf32> to vector<64x8xf32>
    %88 = vector.extract_strided_slice %71 {offsets = [2, 2, 0], sizes = [8, 8, 8], strides = [1, 1, 1]} : vector<10x10x8xf32> to vector<8x8x8xf32>
    %89 = vector.shape_cast %88 : vector<8x8x8xf32> to vector<64x8xf32>
    %90 = tpu.concatenate %73, %75, %77, %79, %81, %83, %85, %87, %89 in 1 : vector<64x8xf32>, vector<64x8xf32>, vector<64x8xf32>, vector<64x8xf32>, vector<64x8xf32>, vector<64x8xf32>, vector<64x8xf32>, vector<64x8xf32>, vector<64x8xf32> -> vector<64x72xf32>
    %c0_89 = arith.constant 0 : index
    %c0_90 = arith.constant 0 : index
    %91 = vector.load %arg4[%c0_89, %c0_90] : memref<72x16xf32, #tpu.memory_space<vmem>>, vector<72x16xf32>
    %cst_91 = arith.constant dense<0.000000e+00> : vector<64x16xf32>
    %92 = tpu.matmul %90, %91, %cst_91 {dimension_numbers = #tpu.dot_dimension_numbers<[1], [0], [0], [1], [0, 0, 1, 1], [], []>} : vector<64x72xf32>, vector<72x16xf32>, vector<64x16xf32> -> vector<64x16xf32>
    %c0_92 = arith.constant 0 : index
    %c0_93 = arith.constant 0 : index
    %93 = vector.load %arg5[%c0_92, %c0_93] : memref<1x16xf32, #tpu.memory_space<vmem>>, vector<1x16xf32>
    %94 = vector.broadcast %93 : vector<1x16xf32> to vector<64x16xf32>
    %95 = arith.addf %92, %94 : vector<64x16xf32>
    %cst_94 = arith.constant 0.000000e+00 : f32
    %96 = vector.broadcast %cst_94 : f32 to vector<64x16xf32>
    %97 = arith.maximumf %95, %96 : vector<64x16xf32>
    %98 = vector.shape_cast %97 : vector<64x16xf32> to vector<8x8x16xf32>
    %c1_95 = arith.constant 1 : index
    %c1_96 = arith.constant 1 : index
    %c32 = arith.constant 32 : index
    %99 = vector.load %arg18[%c1_95, %c1_96, %c32] : memref<10x10x48xf32, #tpu.memory_space<vmem>>, vector<8x8x16xf32>
    tpu.vector_store %arg18[%c1_95, %c1_96, %c32], %98 {strides = array<i32>} : memref<10x10x48xf32, #tpu.memory_space<vmem>>, vector<8x8x16xf32>,
    %100 = vector.shape_cast %98 : vector<8x8x16xf32> to vector<4x2x8x16xf32>
    %101 = vector.extract_strided_slice %100 {offsets = [0, 0, 0, 0], sizes = [4, 1, 8, 16], strides = [1, 1, 1, 1]} : vector<4x2x8x16xf32> to vector<4x1x8x16xf32>
    %102 = vector.shape_cast %101 : vector<4x1x8x16xf32> to vector<4x8x16xf32>
    %103 = vector.extract_strided_slice %100 {offsets = [0, 1, 0, 0], sizes = [4, 1, 8, 16], strides = [1, 1, 1, 1]} : vector<4x2x8x16xf32> to vector<4x1x8x16xf32>
    %104 = vector.shape_cast %103 : vector<4x1x8x16xf32> to vector<4x8x16xf32>
    %105 = arith.maximumf %102, %104 : vector<4x8x16xf32>
    %106 = vector.shape_cast %105 : vector<4x8x16xf32> to vector<4x4x2x16xf32>
    %cst_97 = arith.constant dense<0xFF800000> : vector<4x4x16xf32>
    %107 = vector.multi_reduction <maximumf>, %106, %cst_97 [2] : vector<4x4x2x16xf32> to vector<4x4x16xf32>
    %c1_98 = arith.constant 1 : index
    %c1_99 = arith.constant 1 : index
    %c0_100 = arith.constant 0 : index
    %108 = vector.load %arg17[%c1_98, %c1_99, %c0_100] : memref<6x6x16xf32, #tpu.memory_space<vmem>>, vector<4x4x16xf32>
    tpu.vector_store %arg17[%c1_98, %c1_99, %c0_100], %107 {strides = array<i32>} : memref<6x6x16xf32, #tpu.memory_space<vmem>>, vector<4x4x16xf32>,
    %c0_101 = arith.constant 0 : index
    %c0_102 = arith.constant 0 : index
    %c0_103 = arith.constant 0 : index
    %109 = vector.load %arg17[%c0_101, %c0_102, %c0_103] : memref<6x6x16xf32, #tpu.memory_space<vmem>>, vector<6x6x16xf32>
    %110 = vector.extract_strided_slice %109 {offsets = [0, 0, 0], sizes = [4, 4, 16], strides = [1, 1, 1]} : vector<6x6x16xf32> to vector<4x4x16xf32>
    %111 = vector.shape_cast %110 : vector<4x4x16xf32> to vector<16x16xf32>
    %112 = vector.extract_strided_slice %109 {offsets = [0, 1, 0], sizes = [4, 4, 16], strides = [1, 1, 1]} : vector<6x6x16xf32> to vector<4x4x16xf32>
    %113 = vector.shape_cast %112 : vector<4x4x16xf32> to vector<16x16xf32>
    %114 = vector.extract_strided_slice %109 {offsets = [0, 2, 0], sizes = [4, 4, 16], strides = [1, 1, 1]} : vector<6x6x16xf32> to vector<4x4x16xf32>
    %115 = vector.shape_cast %114 : vector<4x4x16xf32> to vector<16x16xf32>
    %116 = vector.extract_strided_slice %109 {offsets = [1, 0, 0], sizes = [4, 4, 16], strides = [1, 1, 1]} : vector<6x6x16xf32> to vector<4x4x16xf32>
    %117 = vector.shape_cast %116 : vector<4x4x16xf32> to vector<16x16xf32>
    %118 = vector.extract_strided_slice %109 {offsets = [1, 1, 0], sizes = [4, 4, 16], strides = [1, 1, 1]} : vector<6x6x16xf32> to vector<4x4x16xf32>
    %119 = vector.shape_cast %118 : vector<4x4x16xf32> to vector<16x16xf32>
    %120 = vector.extract_strided_slice %109 {offsets = [1, 2, 0], sizes = [4, 4, 16], strides = [1, 1, 1]} : vector<6x6x16xf32> to vector<4x4x16xf32>
    %121 = vector.shape_cast %120 : vector<4x4x16xf32> to vector<16x16xf32>
    %122 = vector.extract_strided_slice %109 {offsets = [2, 0, 0], sizes = [4, 4, 16], strides = [1, 1, 1]} : vector<6x6x16xf32> to vector<4x4x16xf32>
    %123 = vector.shape_cast %122 : vector<4x4x16xf32> to vector<16x16xf32>
    %124 = vector.extract_strided_slice %109 {offsets = [2, 1, 0], sizes = [4, 4, 16], strides = [1, 1, 1]} : vector<6x6x16xf32> to vector<4x4x16xf32>
    %125 = vector.shape_cast %124 : vector<4x4x16xf32> to vector<16x16xf32>
    %126 = vector.extract_strided_slice %109 {offsets = [2, 2, 0], sizes = [4, 4, 16], strides = [1, 1, 1]} : vector<6x6x16xf32> to vector<4x4x16xf32>
    %127 = vector.shape_cast %126 : vector<4x4x16xf32> to vector<16x16xf32>
    %128 = tpu.concatenate %111, %113, %115, %117, %119, %121, %123, %125, %127 in 1 : vector<16x16xf32>, vector<16x16xf32>, vector<16x16xf32>, vector<16x16xf32>, vector<16x16xf32>, vector<16x16xf32>, vector<16x16xf32>, vector<16x16xf32>, vector<16x16xf32> -> vector<16x144xf32>
    %c0_104 = arith.constant 0 : index
    %c0_105 = arith.constant 0 : index
    %129 = vector.load %arg6[%c0_104, %c0_105] : memref<144x32xf32, #tpu.memory_space<vmem>>, vector<144x32xf32>
    %cst_106 = arith.constant dense<0.000000e+00> : vector<16x32xf32>
    %130 = tpu.matmul %128, %129, %cst_106 {dimension_numbers = #tpu.dot_dimension_numbers<[1], [0], [0], [1], [0, 0, 1, 1], [], []>} : vector<16x144xf32>, vector<144x32xf32>, vector<16x32xf32> -> vector<16x32xf32>
    %c0_107 = arith.constant 0 : index
    %c0_108 = arith.constant 0 : index
    %131 = vector.load %arg7[%c0_107, %c0_108] : memref<1x32xf32, #tpu.memory_space<vmem>>, vector<1x32xf32>
    %132 = vector.broadcast %131 : vector<1x32xf32> to vector<16x32xf32>
    %133 = arith.addf %130, %132 : vector<16x32xf32>
    %cst_109 = arith.constant 0.000000e+00 : f32
    %134 = vector.broadcast %cst_109 : f32 to vector<16x32xf32>
    %135 = arith.maximumf %133, %134 : vector<16x32xf32>
    %136 = vector.shape_cast %135 : vector<16x32xf32> to vector<4x4x32xf32>
    %137 = vector.shape_cast %136 : vector<4x4x32xf32> to vector<4x1x4x32xf32>
    %138 = vector.shape_cast %137 : vector<4x1x4x32xf32> to vector<4x1x4x32xf32>
    %139 = vector.broadcast %138 : vector<4x1x4x32xf32> to vector<4x2x4x32xf32>
    %140 = vector.shape_cast %139 : vector<4x2x4x32xf32> to vector<8x4x32xf32>
    %141 = vector.shape_cast %140 : vector<8x4x32xf32> to vector<8x4x1x32xf32>
    %142 = vector.shape_cast %141 : vector<8x4x1x32xf32> to vector<8x4x1x32xf32>
    %143 = vector.broadcast %142 : vector<8x4x1x32xf32> to vector<8x4x2x32xf32>
    %144 = vector.shape_cast %143 : vector<8x4x2x32xf32> to vector<8x8x32xf32>
    %c1_110 = arith.constant 1 : index
    %c1_111 = arith.constant 1 : index
    %c0_112 = arith.constant 0 : index
    %145 = vector.load %arg18[%c1_110, %c1_111, %c0_112] : memref<10x10x48xf32, #tpu.memory_space<vmem>>, vector<8x8x32xf32>
    tpu.vector_store %arg18[%c1_110, %c1_111, %c0_112], %144 {strides = array<i32>} : memref<10x10x48xf32, #tpu.memory_space<vmem>>, vector<8x8x32xf32>,
    %c0_113 = arith.constant 0 : index
    %c0_114 = arith.constant 0 : index
    %c0_115 = arith.constant 0 : index
    %146 = vector.load %arg18[%c0_113, %c0_114, %c0_115] : memref<10x10x48xf32, #tpu.memory_space<vmem>>, vector<10x10x48xf32>
    %147 = vector.extract_strided_slice %146 {offsets = [0, 0, 0], sizes = [8, 8, 48], strides = [1, 1, 1]} : vector<10x10x48xf32> to vector<8x8x48xf32>
    %148 = vector.shape_cast %147 : vector<8x8x48xf32> to vector<64x48xf32>
    %149 = vector.extract_strided_slice %146 {offsets = [0, 1, 0], sizes = [8, 8, 48], strides = [1, 1, 1]} : vector<10x10x48xf32> to vector<8x8x48xf32>
    %150 = vector.shape_cast %149 : vector<8x8x48xf32> to vector<64x48xf32>
    %151 = vector.extract_strided_slice %146 {offsets = [0, 2, 0], sizes = [8, 8, 48], strides = [1, 1, 1]} : vector<10x10x48xf32> to vector<8x8x48xf32>
    %152 = vector.shape_cast %151 : vector<8x8x48xf32> to vector<64x48xf32>
    %153 = vector.extract_strided_slice %146 {offsets = [1, 0, 0], sizes = [8, 8, 48], strides = [1, 1, 1]} : vector<10x10x48xf32> to vector<8x8x48xf32>
    %154 = vector.shape_cast %153 : vector<8x8x48xf32> to vector<64x48xf32>
    %155 = vector.extract_strided_slice %146 {offsets = [1, 1, 0], sizes = [8, 8, 48], strides = [1, 1, 1]} : vector<10x10x48xf32> to vector<8x8x48xf32>
    %156 = vector.shape_cast %155 : vector<8x8x48xf32> to vector<64x48xf32>
    %157 = vector.extract_strided_slice %146 {offsets = [1, 2, 0], sizes = [8, 8, 48], strides = [1, 1, 1]} : vector<10x10x48xf32> to vector<8x8x48xf32>
    %158 = vector.shape_cast %157 : vector<8x8x48xf32> to vector<64x48xf32>
    %159 = vector.extract_strided_slice %146 {offsets = [2, 0, 0], sizes = [8, 8, 48], strides = [1, 1, 1]} : vector<10x10x48xf32> to vector<8x8x48xf32>
    %160 = vector.shape_cast %159 : vector<8x8x48xf32> to vector<64x48xf32>
    %161 = vector.extract_strided_slice %146 {offsets = [2, 1, 0], sizes = [8, 8, 48], strides = [1, 1, 1]} : vector<10x10x48xf32> to vector<8x8x48xf32>
    %162 = vector.shape_cast %161 : vector<8x8x48xf32> to vector<64x48xf32>
    %163 = vector.extract_strided_slice %146 {offsets = [2, 2, 0], sizes = [8, 8, 48], strides = [1, 1, 1]} : vector<10x10x48xf32> to vector<8x8x48xf32>
    %164 = vector.shape_cast %163 : vector<8x8x48xf32> to vector<64x48xf32>
    %165 = tpu.concatenate %148, %150, %152, %154, %156, %158, %160, %162, %164 in 1 : vector<64x48xf32>, vector<64x48xf32>, vector<64x48xf32>, vector<64x48xf32>, vector<64x48xf32>, vector<64x48xf32>, vector<64x48xf32>, vector<64x48xf32>, vector<64x48xf32> -> vector<64x432xf32>
    %c0_116 = arith.constant 0 : index
    %c0_117 = arith.constant 0 : index
    %166 = vector.load %arg8[%c0_116, %c0_117] : memref<432x16xf32, #tpu.memory_space<vmem>>, vector<432x16xf32>
    %cst_118 = arith.constant dense<0.000000e+00> : vector<64x16xf32>
    %167 = tpu.matmul %165, %166, %cst_118 {dimension_numbers = #tpu.dot_dimension_numbers<[1], [0], [0], [1], [0, 0, 1, 1], [], []>} : vector<64x432xf32>, vector<432x16xf32>, vector<64x16xf32> -> vector<64x16xf32>
    %c0_119 = arith.constant 0 : index
    %c0_120 = arith.constant 0 : index
    %168 = vector.load %arg9[%c0_119, %c0_120] : memref<1x16xf32, #tpu.memory_space<vmem>>, vector<1x16xf32>
    %169 = vector.broadcast %168 : vector<1x16xf32> to vector<64x16xf32>
    %170 = arith.addf %167, %169 : vector<64x16xf32>
    %cst_121 = arith.constant 0.000000e+00 : f32
    %171 = vector.broadcast %cst_121 : f32 to vector<64x16xf32>
    %172 = arith.maximumf %170, %171 : vector<64x16xf32>
    %173 = vector.shape_cast %172 : vector<64x16xf32> to vector<8x8x16xf32>
    %174 = vector.shape_cast %173 : vector<8x8x16xf32> to vector<8x1x8x16xf32>
    %175 = vector.shape_cast %174 : vector<8x1x8x16xf32> to vector<8x1x8x16xf32>
    %176 = vector.broadcast %175 : vector<8x1x8x16xf32> to vector<8x2x8x16xf32>
    %177 = vector.shape_cast %176 : vector<8x2x8x16xf32> to vector<16x8x16xf32>
    %178 = vector.shape_cast %177 : vector<16x8x16xf32> to vector<16x8x1x16xf32>
    %179 = vector.shape_cast %178 : vector<16x8x1x16xf32> to vector<16x8x1x16xf32>
    %180 = vector.broadcast %179 : vector<16x8x1x16xf32> to vector<16x8x2x16xf32>
    %181 = vector.shape_cast %180 : vector<16x8x2x16xf32> to vector<16x16x16xf32>
    %c1_122 = arith.constant 1 : index
    %c1_123 = arith.constant 1 : index
    %c0_124 = arith.constant 0 : index
    %182 = vector.load %arg19[%c1_122, %c1_123, %c0_124] : memref<18x18x24xf32, #tpu.memory_space<vmem>>, vector<16x16x16xf32>
    tpu.vector_store %arg19[%c1_122, %c1_123, %c0_124], %181 {strides = array<i32>} : memref<18x18x24xf32, #tpu.memory_space<vmem>>, vector<16x16x16xf32>,
    %c0_125 = arith.constant 0 : index
    %c0_126 = arith.constant 0 : index
    %c0_127 = arith.constant 0 : index
    %183 = vector.load %arg19[%c0_125, %c0_126, %c0_127] : memref<18x18x24xf32, #tpu.memory_space<vmem>>, vector<18x18x24xf32>
    %184 = vector.extract_strided_slice %183 {offsets = [0, 0, 0], sizes = [16, 16, 24], strides = [1, 1, 1]} : vector<18x18x24xf32> to vector<16x16x24xf32>
    %185 = vector.shape_cast %184 : vector<16x16x24xf32> to vector<256x24xf32>
    %186 = vector.extract_strided_slice %183 {offsets = [0, 1, 0], sizes = [16, 16, 24], strides = [1, 1, 1]} : vector<18x18x24xf32> to vector<16x16x24xf32>
    %187 = vector.shape_cast %186 : vector<16x16x24xf32> to vector<256x24xf32>
    %188 = vector.extract_strided_slice %183 {offsets = [0, 2, 0], sizes = [16, 16, 24], strides = [1, 1, 1]} : vector<18x18x24xf32> to vector<16x16x24xf32>
    %189 = vector.shape_cast %188 : vector<16x16x24xf32> to vector<256x24xf32>
    %190 = vector.extract_strided_slice %183 {offsets = [1, 0, 0], sizes = [16, 16, 24], strides = [1, 1, 1]} : vector<18x18x24xf32> to vector<16x16x24xf32>
    %191 = vector.shape_cast %190 : vector<16x16x24xf32> to vector<256x24xf32>
    %192 = vector.extract_strided_slice %183 {offsets = [1, 1, 0], sizes = [16, 16, 24], strides = [1, 1, 1]} : vector<18x18x24xf32> to vector<16x16x24xf32>
    %193 = vector.shape_cast %192 : vector<16x16x24xf32> to vector<256x24xf32>
    %194 = vector.extract_strided_slice %183 {offsets = [1, 2, 0], sizes = [16, 16, 24], strides = [1, 1, 1]} : vector<18x18x24xf32> to vector<16x16x24xf32>
    %195 = vector.shape_cast %194 : vector<16x16x24xf32> to vector<256x24xf32>
    %196 = vector.extract_strided_slice %183 {offsets = [2, 0, 0], sizes = [16, 16, 24], strides = [1, 1, 1]} : vector<18x18x24xf32> to vector<16x16x24xf32>
    %197 = vector.shape_cast %196 : vector<16x16x24xf32> to vector<256x24xf32>
    %198 = vector.extract_strided_slice %183 {offsets = [2, 1, 0], sizes = [16, 16, 24], strides = [1, 1, 1]} : vector<18x18x24xf32> to vector<16x16x24xf32>
    %199 = vector.shape_cast %198 : vector<16x16x24xf32> to vector<256x24xf32>
    %200 = vector.extract_strided_slice %183 {offsets = [2, 2, 0], sizes = [16, 16, 24], strides = [1, 1, 1]} : vector<18x18x24xf32> to vector<16x16x24xf32>
    %201 = vector.shape_cast %200 : vector<16x16x24xf32> to vector<256x24xf32>
    %202 = tpu.concatenate %185, %187, %189, %191, %193, %195, %197, %199, %201 in 1 : vector<256x24xf32>, vector<256x24xf32>, vector<256x24xf32>, vector<256x24xf32>, vector<256x24xf32>, vector<256x24xf32>, vector<256x24xf32>, vector<256x24xf32>, vector<256x24xf32> -> vector<256x216xf32>
    %c0_128 = arith.constant 0 : index
    %c0_129 = arith.constant 0 : index
    %203 = vector.load %arg10[%c0_128, %c0_129] : memref<216x8xf32, #tpu.memory_space<vmem>>, vector<216x8xf32>
    %cst_130 = arith.constant dense<0.000000e+00> : vector<256x8xf32>
    %204 = tpu.matmul %202, %203, %cst_130 {dimension_numbers = #tpu.dot_dimension_numbers<[1], [0], [0], [1], [0, 0, 1, 1], [], []>} : vector<256x216xf32>, vector<216x8xf32>, vector<256x8xf32> -> vector<256x8xf32>
    %c0_131 = arith.constant 0 : index
    %c0_132 = arith.constant 0 : index
    %205 = vector.load %arg11[%c0_131, %c0_132] : memref<1x8xf32, #tpu.memory_space<vmem>>, vector<1x8xf32>
    %206 = vector.broadcast %205 : vector<1x8xf32> to vector<256x8xf32>
    %207 = arith.addf %204, %206 : vector<256x8xf32>
    %cst_133 = arith.constant 0.000000e+00 : f32
    %208 = vector.broadcast %cst_133 : f32 to vector<256x8xf32>
    %209 = arith.maximumf %207, %208 : vector<256x8xf32>
    %c0_134 = arith.constant 0 : index
    %c0_135 = arith.constant 0 : index
    %210 = vector.load %arg12[%c0_134, %c0_135] : memref<3x8xf32, #tpu.memory_space<vmem>>, vector<3x8xf32>
    %cst_136 = arith.constant dense<0.000000e+00> : vector<3x256xf32>
    %211 = tpu.matmul %210, %209, %cst_136 {dimension_numbers = #tpu.dot_dimension_numbers<[1], [1], [0], [0], [0, 0, 1, 0], [], []>} : vector<3x8xf32>, vector<256x8xf32>, vector<3x256xf32> -> vector<3x256xf32>
    %c0_137 = arith.constant 0 : index
    %c0_138 = arith.constant 0 : index
    %212 = vector.load %arg13[%c0_137, %c0_138] : memref<3x1xf32, #tpu.memory_space<vmem>>, vector<3x1xf32>
    %213 = vector.broadcast %212 : vector<3x1xf32> to vector<3x256xf32>
    %214 = arith.addf %211, %213 : vector<3x256xf32>
    %c0_139 = arith.constant 0 : index
    %c0_140 = arith.constant 0 : index
    %c0_141 = arith.constant 0 : index
    %215 = vector.load %arg14[%c0_139, %c0_140, %c0_141] : memref<1x3x256xf32, #tpu.memory_space<vmem>>, vector<1x3x256xf32>
    %216 = vector.shape_cast %215 : vector<1x3x256xf32> to vector<3x256xf32>
    %217 = vector.shape_cast %214 : vector<3x256xf32> to vector<1x3x256xf32>
    tpu.vector_store %arg14[%c0_139, %c0_140, %c0_141], %217 {strides = array<i32>} : memref<1x3x256xf32, #tpu.memory_space<vmem>>, vector<1x3x256xf32>,
    return
  }
  func.func @transform_0(%arg0: i32) -> (i32, i32, i32, i32) {
    %c0_i32 = arith.constant 0 : i32
    %c0_i32_0 = arith.constant 0 : i32
    %c0_i32_1 = arith.constant 0 : i32
    %c0_i32_2 = arith.constant 0 : i32
    return %arg0, %c0_i32, %c0_i32_0, %c0_i32_1 : i32, i32, i32, i32
  }
  func.func @transform_1(%arg0: i32) -> (i32, i32) {
    %c0_i32 = arith.constant 0 : i32
    %c0_i32_0 = arith.constant 0 : i32
    %c0_i32_1 = arith.constant 0 : i32
    return %c0_i32, %c0_i32_0 : i32, i32
  }
  func.func @transform_2(%arg0: i32) -> (i32, i32) {
    %c0_i32 = arith.constant 0 : i32
    %c0_i32_0 = arith.constant 0 : i32
    %c0_i32_1 = arith.constant 0 : i32
    return %c0_i32, %c0_i32_0 : i32, i32
  }
  func.func @transform_3(%arg0: i32) -> (i32, i32) {
    %c0_i32 = arith.constant 0 : i32
    %c0_i32_0 = arith.constant 0 : i32
    %c0_i32_1 = arith.constant 0 : i32
    return %c0_i32, %c0_i32_0 : i32, i32
  }
  func.func @transform_4(%arg0: i32) -> (i32, i32) {
    %c0_i32 = arith.constant 0 : i32
    %c0_i32_0 = arith.constant 0 : i32
    %c0_i32_1 = arith.constant 0 : i32
    return %c0_i32, %c0_i32_0 : i32, i32
  }
  func.func @transform_5(%arg0: i32) -> (i32, i32) {
    %c0_i32 = arith.constant 0 : i32
    %c0_i32_0 = arith.constant 0 : i32
    %c0_i32_1 = arith.constant 0 : i32
    return %c0_i32, %c0_i32_0 : i32, i32
  }
  func.func @transform_6(%arg0: i32) -> (i32, i32) {
    %c0_i32 = arith.constant 0 : i32
    %c0_i32_0 = arith.constant 0 : i32
    %c0_i32_1 = arith.constant 0 : i32
    return %c0_i32, %c0_i32_0 : i32, i32
  }
  func.func @transform_7(%arg0: i32) -> (i32, i32) {
    %c0_i32 = arith.constant 0 : i32
    %c0_i32_0 = arith.constant 0 : i32
    %c0_i32_1 = arith.constant 0 : i32
    return %c0_i32, %c0_i32_0 : i32, i32
  }
  func.func @transform_8(%arg0: i32) -> (i32, i32) {
    %c0_i32 = arith.constant 0 : i32
    %c0_i32_0 = arith.constant 0 : i32
    %c0_i32_1 = arith.constant 0 : i32
    return %c0_i32, %c0_i32_0 : i32, i32
  }
  func.func @transform_9(%arg0: i32) -> (i32, i32) {
    %c0_i32 = arith.constant 0 : i32
    %c0_i32_0 = arith.constant 0 : i32
    %c0_i32_1 = arith.constant 0 : i32
    return %c0_i32, %c0_i32_0 : i32, i32
  }
  func.func @transform_10(%arg0: i32) -> (i32, i32) {
    %c0_i32 = arith.constant 0 : i32
    %c0_i32_0 = arith.constant 0 : i32
    %c0_i32_1 = arith.constant 0 : i32
    return %c0_i32, %c0_i32_0 : i32, i32
  }
  func.func @transform_11(%arg0: i32) -> (i32, i32) {
    %c0_i32 = arith.constant 0 : i32
    %c0_i32_0 = arith.constant 0 : i32
    %c0_i32_1 = arith.constant 0 : i32
    return %c0_i32, %c0_i32_0 : i32, i32
  }
  func.func @transform_12(%arg0: i32) -> (i32, i32) {
    %c0_i32 = arith.constant 0 : i32
    %c0_i32_0 = arith.constant 0 : i32
    %c0_i32_1 = arith.constant 0 : i32
    return %c0_i32, %c0_i32_0 : i32, i32
  }
  func.func @transform_13(%arg0: i32) -> (i32, i32, i32) {
    %c0_i32 = arith.constant 0 : i32
    %c0_i32_0 = arith.constant 0 : i32
    %c0_i32_1 = arith.constant 0 : i32
    return %arg0, %c0_i32, %c0_i32_0 : i32, i32, i32
  }
}

</mosaic_0001>

<bundles_post_ra>
// kernel: unet_forward.1
= control target key start
LH: loop header
LB: loop body
LE: loop exit
PB: predicated region body
PF: predicated region fallthrough
CT: control target
= control target key end

     0   :  { %s9529_s25 = smov 0   ;;  %s14384_s0 = inlined_call_operand.vmem [shape: f32[2,16,16,4], index: 0, kind: input, shape index: {}]   ;;  %s14385_s1 = inlined_call_operand.vmem [shape: f32[36,8], index: 1, kind: input, shape index: {}]   ;;  %s14386_s2 = inlined_call_operand.vmem [shape: f32[1,8], index: 2, kind: input, shape index: {}]   ;;  %s14387_s3 = inlined_call_operand.vmem [shape: f32[72,16], index: 3, kind: input, shape index: {}]   ;;  %s14388_s4 = inlined_call_operand.vmem [shape: f32[1,16], index: 4, kind: input, shape index: {}]   ;;  %s14389_s5 = inlined_call_operand.vmem [shape: f32[144,32], index: 5, kind: input, shape index: {}]   ;;  %s14390_s6 = inlined_call_operand.vmem [shape: f32[1,32], index: 6, kind: input, shape index: {}]   ;;  %s14391_s7 = inlined_call_operand.vmem [shape: f32[432,16], index: 7, kind: input, shape index: {}]   ;;  %s14392_s8 = inlined_call_operand.vmem [shape: f32[1,16], index: 8, kind: input, shape index: {}]   ;;  %s14393_s9 = inlined_call_operand.vmem [shape: f32[216,8], index: 9, kind: input, shape index: {}]   ;;  %s14394_s10 = inlined_call_operand.vmem [shape: f32[1,8], index: 10, kind: input, shape index: {}]   ;;  %s14395_s11 = inlined_call_operand.vmem [shape: f32[3,8], index: 11, kind: input, shape index: {}]   ;;  %s14396_s12 = inlined_call_operand.vmem [shape: f32[3,1], index: 12, kind: input, shape index: {}]   ;;  %s14397_s13 = inlined_call_operand.vmem [shape: f32[2,3,256], index: 13, kind: output, shape index: {}]  }
   0x1 LB: > { %s8311_s26 = sadd.s32 4294967295, %s9435_s25   ;;  %p8315_p0 = scmp.ge.s32.totalorder %s9435_s25, 1  ;;  %s9435_s25 = sphi %s9529_s25, %s23_s25  }
   0x2   : > { %p387_p1 = scmp.lt.s32.totalorder %s9435_s25, 3 }
   0x4   : > { %p388_p2 = pnand %p8315_p0, %p387_p1 }
   0x6   : > { %391 = sbr.rel (%p388_p2) target bundleno = 3031 (0xbd7), region = 72 }
   0xd   : > { %vm14412_vm0 = vcmask 31744   ;;  %vm450_vm1 = vcmask 24576   ;;  %v14430_v0 = vmov 0.0   ;;  %vm444_vm2 = vcmask 25600   ;;  %p431_p3 = scmp.lt.s32.totalorder %s8311_s26, 1  ;;  %s9438_s14 = smov 8  }
   0xe   : > { %442 = vst.msk [vmem:[#allocation2] sm:$0xff] %vm14412_vm0, %v14430_v0  ;;  %443 = vst.msk [vmem:[#allocation2 + $0x8] sm:$0xff] %vm14412_vm0, %v14430_v0  ;;  %vm487_vm3 = vcmask 64512   ;;  %vm14399_vm4 = vcmask 1045504   ;;  %vm14435_vm5 = vcmask 1046528   ;;  %s9439_s15 = smov 4  }
   0xf   : > { %447 = vst.msk [vmem:[#allocation2 + $0x198] sm:$0xff] %vm14412_vm0, %v14430_v0  ;;  %448 = vst.msk [vmem:[#allocation2 + $0x1a0] sm:$0xff] %vm14412_vm0, %v14430_v0  ;;  %s14843_s26 = smov (!%p431_p3, %s8311_s26), 1  ;;  %s9440_s16 = smov 12   ;;  %vm560_vm6 = vcmask 195584   ;;  %v1990_v41 = vld [vmem:[%s14385_s1] sm:$0xff] }
  0x10   : > { %452 = vst.msk [vmem:[#allocation2 + $0x18] sm:$0x1] %vm450_vm1, %v14430_v0  ;;  %453 = vst.msk [vmem:[#allocation2 + $0x30] sm:$0x1] %vm450_vm1, %v14430_v0  ;;  %s8455_s27 = sshll.u32 %s14843_s26, 8  ;;  %s9441_s17 = smov 16  }
  0x11   : > { %454 = vst.msk [vmem:[#allocation2 + $0x48] sm:$0x1] %vm450_vm1, %v14430_v0  ;;  %455 = vst.msk [vmem:[#allocation2 + $0x60] sm:$0x1] %vm450_vm1, %v14430_v0  ;;  %s9633_s30 = scalar_lea.vmem %s14384_s0, %s8455_s27  ;;  %s9442_s18 = smov 20   ;;  %v1991_v42 = vld [vmem:[%s14385_s1 + $0x8] sm:$0xff] }
  0x12   : > { %456 = vst.msk [vmem:[#allocation2 + $0x78] sm:$0x1] %vm450_vm1, %v14430_v0  ;;  %457 = vst.msk [vmem:[#allocation2 + $0x90] sm:$0x1] %vm450_vm1, %v14430_v0  ;;  %v606_v1 = vld [vmem:[%s9633_s30] sm:$0xff]  ;;  %v607_v2 = vld [vmem:[%s9633_s30 + $0x8] sm:$0xff]  ;;  %v8689_v43 = vpack.c.bf16 %v1991_v42, %v1990_v41 }
  0x13   : > { %458 = vst.msk [vmem:[#allocation2 + $0xa8] sm:$0x1] %vm450_vm1, %v14430_v0  ;;  %459 = vst.msk [vmem:[#allocation2 + $0xc0] sm:$0x1] %vm450_vm1, %v14430_v0  ;;  %v608_v3 = vld [vmem:[%s9633_s30 + $0x10] sm:$0xff]  ;;  %v609_v5 = vld [vmem:[%s9633_s30 + $0x18] sm:$0xff] }
  0x14   : > { %460 = vst.msk [vmem:[#allocation2 + $0xd8] sm:$0x1] %vm450_vm1, %v14430_v0  ;;  %461 = vst.msk [vmem:[#allocation2 + $0xf0] sm:$0x1] %vm450_vm1, %v14430_v0  ;;  %v610_v6 = vld [vmem:[%s9633_s30 + $0x20] sm:$0xff]  ;;  %v611_v10 = vld [vmem:[%s9633_s30 + $0x28] sm:$0xff]  ;;  %8690 = vmatprep.subr.bf16.mxu0 %v8689_v43 }
  0x15   : > { %462 = vst.msk [vmem:[#allocation2 + $0x108] sm:$0x1] %vm450_vm1, %v14430_v0  ;;  %463 = vst.msk [vmem:[#allocation2 + $0x120] sm:$0x1] %vm450_vm1, %v14430_v0  ;;  %v9638_v4 = vld [vmem:[#allocation2 + $0x8] sm:$0xff]  ;;  %v612_v11 = vld [vmem:[%s9633_s30 + $0x30] sm:$0xff]  ;;  %8692 = vmatpush3.bf16.msra.mxu0 %v8689_v43 }
  0x16   : > { %464 = vst.msk [vmem:[#allocation2 + $0x138] sm:$0x1] %vm450_vm1, %v14430_v0  ;;  %465 = vst.msk [vmem:[#allocation2 + $0x150] sm:$0x1] %vm450_vm1, %v14430_v0  ;;  %v856_v8 = vrot.slane %v9638_v4, 2  ;;  %v775_v9 = vrot.slane %v9638_v4, 1 }
  0x17   : > { %466 = vst.msk [vmem:[#allocation2 + $0x168] sm:$0x1] %vm450_vm1, %v14430_v0  ;;  %467 = vst.msk [vmem:[#allocation2 + $0x180] sm:$0x1] %vm450_vm1, %v14430_v0  ;;  %v613_v15 = vld [vmem:[%s9633_s30 + $0x38] sm:$0xff]  ;;  %v614_v16 = vld [vmem:[%s9633_s30 + $0x40] sm:$0xff] }
  0x18   : > { %470 = vst.msk [vmem:[#allocation2 + $0x29] sm:$0x1] %vm450_vm1, %v14430_v0  ;;  %471 = vst.msk [vmem:[#allocation2 + $0x41] sm:$0x1] %vm450_vm1, %v14430_v0  ;;  %v615_v19 = vld [vmem:[%s9633_s30 + $0x48] sm:$0xff]  ;;  %v616_v35 = vld [vmem:[%s9633_s30 + $0x50] sm:$0xff] }
  0x19   : > { %472 = vst.msk [vmem:[#allocation2 + $0x59] sm:$0x1] %vm450_vm1, %v14430_v0  ;;  %473 = vst.msk [vmem:[#allocation2 + $0x71] sm:$0x1] %vm450_vm1, %v14430_v0  ;;  %v617_v39 = vld [vmem:[%s9633_s30 + $0x58] sm:$0xff]  ;;  %s14473_s23 = smov 24  }
  0x1a   : > { %474 = vst.msk [vmem:[#allocation2 + $0x89] sm:$0x1] %vm450_vm1, %v14430_v0  ;;  %475 = vst.msk [vmem:[#allocation2 + $0xa1] sm:$0x1] %vm450_vm1, %v14430_v0  ;;  %v1992_v46 = vld [vmem:[%s14385_s1 + $0x10] sm:$0xff]  ;;  %v1993_v47 = vld [vmem:[%s14385_s1 + $0x18] sm:$0xff] }
  0x1b   : > { %476 = vst.msk [vmem:[#allocation2 + $0xb9] sm:$0x1] %vm450_vm1, %v14430_v0  ;;  %477 = vst.msk [vmem:[#allocation2 + $0xd1] sm:$0x1] %vm450_vm1, %v14430_v0  ;;  %v8693_v49 = vpack.c.bf16 %v1993_v47, %v1992_v46  ;;  %s9444_s19 = smov 28   ;;  %vm2099_vm7 = vcmask 1043456  }
  0x1c   : > { %478 = vst.msk [vmem:[#allocation2 + $0xe9] sm:$0x1] %vm450_vm1, %v14430_v0  ;;  %479 = vst.msk [vmem:[#allocation2 + $0x101] sm:$0x1] %vm450_vm1, %v14430_v0  ;;  %v1994_v51 = vld [vmem:[%s14385_s1 + $0x20] sm:$0xf] }
  0x1d   : > { %480 = vst.msk [vmem:[#allocation2 + $0x119] sm:$0x1] %vm450_vm1, %v14430_v0  ;;  %481 = vst.msk [vmem:[#allocation2 + $0x131] sm:$0x1] %vm450_vm1, %v14430_v0  ;;  %8694 = vmatprep.subr.bf16.mxu0 %v8693_v49  ;;  %s9445_s22 = smov 32   ;;  %v618_v59 = vld [vmem:[%s9633_s30 + $0x60] sm:$0xff] }
  0x1e   : > { %482 = vst.msk [vmem:[#allocation2 + $0x149] sm:$0x1] %vm450_vm1, %v14430_v0  ;;  %483 = vst.msk [vmem:[#allocation2 + $0x161] sm:$0x1] %vm450_vm1, %v14430_v0  ;;  %8696 = vmatpush3.bf16.msra.mxu0 %v8693_v49  ;;  %v619_v61 = vld [vmem:[%s9633_s30 + $0x68] sm:$0xff]  ;;  %vm14405_vm8 = vcmask 97280  }
  0x1f   : > { %484 = vst.msk [vmem:[#allocation2 + $0x179] sm:$0x1] %vm450_vm1, %v14430_v0  ;;  %485 = vst.msk [vmem:[#allocation2 + $0x191] sm:$0x1] %vm450_vm1, %v14430_v0  ;;  %8609 = vmatprep.subr.msk.mxu0 %vm2099_vm7, %v1994_v51  ;;  %vm1826_vm9 = vcmask 130048   ;;  %vm1859_vm10 = vcmask 162816  }
  0x20   : > { %451 = vst.msk [vmem:[#allocation2] sm:$0x1] %vm450_vm1, %v14430_v0  ;;  %468 = vst.msk [vmem:[#allocation2 + $0x198] sm:$0x1] %vm450_vm1, %v14430_v0  ;;  %vm1924_vm11 = vcmask 228352   ;;  %vm14400_vm12 = vcmask 261120  }
  0x21   : > { %445 = vst.msk [vmem:[#allocation2 + $0x10] sm:$0x3] %vm444_vm2, %v14430_v0  ;;  %449 = vst.msk [vmem:[#allocation2 + $0x1a8] sm:$0x3] %vm444_vm2, %v14430_v0  ;;  %vm2002_vm13 = vcmask 293888   ;;  %vm14398_vm14 = vcmask 58368  }
  0x22   : > { %488 = vst.msk [vmem:[#allocation3] sm:$0xff] %vm487_vm3, %v14430_v0  ;;  %492 = vst.msk [vmem:[#allocation3 + $0x90] sm:$0xff] %vm487_vm3, %v14430_v0  ;;  %8610 = vmatpush3.msk.msra.mxu0 %vm2099_vm7, %v1994_v51  ;;  %vm494_vm15 = vcmask 57344   ;;  %vm14460_vm2 = vcmask 1042434   ;;  %vm14462_vm7 = vcmask 1043459   ;;  %s9450_s27 = smov 64  }
  0x23   : > { %469 = vst.msk [vmem:[#allocation2 + $0x11] sm:$0x1] %vm450_vm1, %v14430_v0  ;;  %486 = vst.msk [vmem:[#allocation2 + $0x1a9] sm:$0x1] %vm450_vm1, %v14430_v0  ;;  %vm3402_vm1 = vcmask 1041409   ;;  %s9452_s21 = smov 80  }
  0x24   : > { %639 = vst.msk [vmem:[#allocation2 + $0x19] sm:$0xff] %vm14412_vm0, %v606_v1  ;;  %640 = vst.msk [vmem:[#allocation2 + $0x21] sm:$0xff] %vm14412_vm0, %v607_v2  ;;  %s9454_s24 = smov 112   ;;  %s14734_s29 = smov 40  }
  0x25   : > { %641 = vst.msk [vmem:[#allocation2 + $0x31] sm:$0xff] %vm14412_vm0, %v608_v3  ;;  %642 = vst.msk [vmem:[#allocation2 + $0x39] sm:$0xff] %vm14412_vm0, %v609_v5 }
  0x26   : > { %643 = vst.msk [vmem:[#allocation2 + $0x49] sm:$0xff] %vm14412_vm0, %v610_v6  ;;  %644 = vst.msk [vmem:[#allocation2 + $0x51] sm:$0xff] %vm14412_vm0, %v611_v10 }
  0x27   : > { %v9645_v7 = vld [vmem:[#allocation2] sm:$0xff]  ;;  %645 = vst.msk [vmem:[#allocation2 + $0x61] sm:$0xff] %vm14412_vm0, %v612_v11  ;;  %646 = vst.msk [vmem:[#allocation2 + $0x69] sm:$0xff] %vm14412_vm0, %v613_v15  ;;  %v621_v15 = vld [vmem:[%s9633_s30 + $0x78] sm:$0xff] }
  0x28   : > { %v855_v12 = vrot.slane %v9645_v7, 2  ;;  %v774_v13 = vrot.slane %v9645_v7, 1  ;;  %647 = vst.msk [vmem:[#allocation2 + $0x79] sm:$0xff] %vm14412_vm0, %v614_v16  ;;  %648 = vst.msk [vmem:[#allocation2 + $0x81] sm:$0xff] %vm14412_vm0, %v615_v19 }
  0x29   : > { %561 = vst.msk [vmem:[#allocation6] sm:$0xff] %vm560_vm6, %v14430_v0  ;;  %562 = vst.msk [vmem:[#allocation6 + $0x8] sm:$0xff] %vm560_vm6, %v14430_v0 }
  0x2a   : > { %v673_v14 = vld [vmem:[#allocation2 + $0x10] sm:$0x3]  ;;  %v857_v20 = vsel %vm14399_vm4, %v855_v12, %v856_v8  ;;  %v776_v21 = vsel %vm14435_vm5, %v774_v13, %v775_v9  ;;  %566 = vst.msk [vmem:[#allocation6 + $0x198] sm:$0xff] %vm560_vm6, %v14430_v0  ;;  %567 = vst.msk [vmem:[#allocation6 + $0x1a0] sm:$0xff] %vm560_vm6, %v14430_v0 }
  0x2b   : > { %v858_v17 = vrot.slane %v673_v14, 2  ;;  %v777_v18 = vrot.slane %v673_v14, 1  ;;  %1057 = vrot.lane.b32.xlu1 %v857_v20, %s9438_s14  ;;  %961 = vrot.lane.b32.xlu0 %v776_v21, %s9439_s15  ;;  %v9669_v24 = vld [vmem:[#allocation2 + $0x20] sm:$0xff]  ;;  %v9671_v25 = vld [vmem:[#allocation2 + $0x18] sm:$0xff]  ;;  %v676_v28 = vld [vmem:[#allocation2 + $0x28] sm:$0x3] }
  0x2c   : > { %v779_v26 = vrot.slane %v9671_v25, 1  ;;  %v780_v27 = vrot.slane %v9669_v24, 1  ;;  %v860_v30 = vrot.slane %v9671_v25, 2  ;;  %v861_v31 = vrot.slane %v9669_v24, 2  ;;  %649 = vst.msk [vmem:[#allocation2 + $0x91] sm:$0xff] %vm14412_vm0, %v616_v35  ;;  %v9702_v37 = vld [vmem:[#allocation2 + $0x30] sm:$0xff] }
  0x2d   : > { %v859_v22 = vsel %vm14399_vm4, %v856_v8, %v858_v17  ;;  %v778_v23 = vsel %vm14435_vm5, %v775_v9, %v777_v18  ;;  %v782_v32 = vrot.slane %v676_v28, 1  ;;  %v863_v36 = vrot.slane %v676_v28, 2  ;;  %v9706_v40 = vld [vmem:[#allocation2 + $0x38] sm:$0xff]  ;;  %650 = vst.msk [vmem:[#allocation2 + $0x99] sm:$0xff] %vm14412_vm0, %v617_v39  ;;  %v679_v50 = vld [vmem:[#allocation2 + $0x40] sm:$0x3] }
  0x2e   : > { %v781_v29 = vsel %vm14435_vm5, %v779_v26, %v780_v27  ;;  %v862_v33 = vsel %vm14399_vm4, %v860_v30, %v861_v31  ;;  %v784_v44 = vrot.slane %v9702_v37, 1  ;;  %v785_v45 = vrot.slane %v9706_v40, 1  ;;  %651 = vst.msk [vmem:[#allocation2 + $0xa9] sm:$0xff] %vm14412_vm0, %v618_v59  ;;  %v9754_v60 = vld [vmem:[#allocation2 + $0x48] sm:$0xff]  ;;  %v9757_v62 = vld [vmem:[#allocation2 + $0x50] sm:$0xff]  ;;  %652 = vst.msk [vmem:[#allocation2 + $0xb1] sm:$0xff] %vm14412_vm0, %v619_v61 }
  0x2f   : > { %1059 = vrot.lane.b32.xlu1 %v859_v22, %s9438_s14  ;;  %963 = vrot.lane.b32.xlu0 %v778_v23, %s9439_s15  ;;  %v783_v34 = vsel %vm14435_vm5, %v780_v27, %v782_v32  ;;  %v864_v38 = vsel %vm14399_vm4, %v861_v31, %v863_v36  ;;  %v865_v52 = vrot.slane %v9702_v37, 2  ;;  %v866_v53 = vrot.slane %v9706_v40, 2  ;;  %v682_v3 = vld [vmem:[#allocation2 + $0x58] sm:$0x3]  ;;  %v620_v13 = vld [vmem:[%s9633_s30 + $0x70] sm:$0xff]  ;;  %v9790_v14 = vld [vmem:[#allocation2 + $0x60] sm:$0xff] }
  0x30   : > { %v786_v48 = vsel %vm14435_vm5, %v784_v44, %v785_v45  ;;  %v787_v54 = vrot.slane %v679_v50, 1  ;;  %v868_v57 = vrot.slane %v679_v50, 2  ;;  %v789_v63 = vrot.slane %v9754_v60, 1  ;;  %653 = vst.msk [vmem:[#allocation2 + $0xc1] sm:$0xff] %vm14412_vm0, %v620_v13  ;;  %v9793_v16 = vld [vmem:[#allocation2 + $0x68] sm:$0xff]  ;;  %654 = vst.msk [vmem:[#allocation2 + $0xc9] sm:$0xff] %vm14412_vm0, %v621_v15 }
  0x31   : > { %v867_v55 = vsel %vm14399_vm4, %v865_v52, %v866_v53  ;;  %v790_v1 = vrot.slane %v9757_v62, 1  ;;  %v870_v5 = vrot.slane %v9754_v60, 2  ;;  %v871_v6 = vrot.slane %v9757_v62, 2  ;;  %v685_v20 = vld [vmem:[#allocation2 + $0x70] sm:$0x3]  ;;  %v622_v30 = vld [vmem:[%s9633_s30 + $0x80] sm:$0xff] }
  0x32   : > { %v788_v56 = vsel %vm14435_vm5, %v785_v45, %v787_v54  ;;  %v869_v58 = vsel %vm14399_vm4, %v866_v53, %v868_v57  ;;  %v792_v8 = vrot.slane %v682_v3, 1  ;;  %v873_v11 = vrot.slane %v682_v3, 2  ;;  %655 = vst.msk [vmem:[#allocation2 + $0xd9] sm:$0xff] %vm14412_vm0, %v622_v30  ;;  %v688_v47 = vld [vmem:[#allocation2 + $0x88] sm:$0x3] }
  0x33   : > { %1155 = vrot.lane.b32.xlu1 %v9669_v24, %s9440_s16  ;;  %1153 = vrot.lane.b32.xlu0 %v9671_v25, %s9440_s16  ;;  %v791_v2 = vsel %vm14435_vm5, %v789_v63, %v790_v1  ;;  %v872_v9 = vsel %vm14399_vm4, %v870_v5, %v871_v6  ;;  %v794_v17 = vrot.slane %v9790_v14, 1  ;;  %v795_v18 = vrot.slane %v9793_v16, 1  ;;  %490 = vst.msk [vmem:[#allocation3 + $0x8] sm:$0x3] %vm14398_vm14, %v14430_v0 }
  0x34   : > { %v793_v10 = vsel %vm14435_vm5, %v790_v1, %v792_v8  ;;  %v874_v12 = vsel %vm14399_vm4, %v871_v6, %v873_v11  ;;  %v875_v21 = vrot.slane %v9790_v14, 2  ;;  %v876_v22 = vrot.slane %v9793_v16, 2  ;;  %493 = vst.msk [vmem:[#allocation3 + $0x98] sm:$0x3] %vm14398_vm14, %v14430_v0 }
  0x35   : > { %v796_v19 = vsel %vm14435_vm5, %v794_v17, %v795_v18  ;;  %v797_v23 = vrot.slane %v685_v20, 1  ;;  %v878_v28 = vrot.slane %v685_v20, 2  ;;  %v802_v50 = vrot.slane %v688_v47, 1  ;;  %496 = vst.msk [vmem:[#allocation3 + $0x10] sm:$0x1] %vm494_vm15, %v14430_v0 }
  0x36   : > { %v877_v26 = vsel %vm14399_vm4, %v875_v21, %v876_v22  ;;  %v883_v57 = vrot.slane %v688_v47, 2  ;;  %506 = vst.msk [vmem:[#allocation3 + $0x19] sm:$0x1] %vm494_vm15, %v14430_v0  ;;  %495 = vst.msk [vmem:[#allocation3] sm:$0x1] %vm494_vm15, %v14430_v0 }
  0x37   : > { %965 = vrot.lane.b32.xlu1 %v781_v29, %s9439_s15  ;;  %1249 = vrot.lane.b32.xlu0 %v781_v29, %s9441_s17  ;;  %v798_v27 = vsel %vm14435_vm5, %v795_v18, %v797_v23  ;;  %v879_v29 = vsel %vm14399_vm4, %v876_v22, %v878_v28  ;;  %497 = vst.msk [vmem:[#allocation3 + $0x20] sm:$0x1] %vm494_vm15, %v14430_v0  ;;  %498 = vst.msk [vmem:[#allocation3 + $0x30] sm:$0x1] %vm494_vm15, %v14430_v0 }
  0x38   : > { %499 = vst.msk [vmem:[#allocation3 + $0x40] sm:$0x1] %vm494_vm15, %v14430_v0  ;;  %500 = vst.msk [vmem:[#allocation3 + $0x50] sm:$0x1] %vm494_vm15, %v14430_v0 }
  0x39   : > { %501 = vst.msk [vmem:[#allocation3 + $0x60] sm:$0x1] %vm494_vm15, %v14430_v0  ;;  %502 = vst.msk [vmem:[#allocation3 + $0x70] sm:$0x1] %vm494_vm15, %v14430_v0 }
  0x3a   : > { %503 = vst.msk [vmem:[#allocation3 + $0x80] sm:$0x1] %vm494_vm15, %v14430_v0  ;;  %504 = vst.msk [vmem:[#allocation3 + $0x90] sm:$0x1] %vm494_vm15, %v14430_v0 }
  0x3b   : > { %1345 = vrot.lane.b32.xlu1 %v862_v33, %s9442_s18  ;;  %1251 = vrot.lane.b32.xlu0 %v783_v34, %s9441_s17  ;;  %505 = vst.msk [vmem:[#allocation3 + $0x9] sm:$0x1] %vm494_vm15, %v14430_v0  ;;  %507 = vst.msk [vmem:[#allocation3 + $0x29] sm:$0x1] %vm494_vm15, %v14430_v0 }
  0x3c   : > { %508 = vst.msk [vmem:[#allocation3 + $0x39] sm:$0x1] %vm494_vm15, %v14430_v0  ;;  %509 = vst.msk [vmem:[#allocation3 + $0x49] sm:$0x1] %vm494_vm15, %v14430_v0 }
  0x3d   : > { %510 = vst.msk [vmem:[#allocation3 + $0x59] sm:$0x1] %vm494_vm15, %v14430_v0  ;;  %511 = vst.msk [vmem:[#allocation3 + $0x69] sm:$0x1] %vm494_vm15, %v14430_v0 }
  0x3e   : > { %512 = vst.msk [vmem:[#allocation3 + $0x79] sm:$0x1] %vm494_vm15, %v14430_v0  ;;  %513 = vst.msk [vmem:[#allocation3 + $0x89] sm:$0x1] %vm494_vm15, %v14430_v0 }
  0x3f   : > { %1061 = vrot.lane.b32.xlu1 %v862_v33, %s9438_s14  ;;  %967 = vrot.lane.b32.xlu0 %v783_v34, %s9439_s15  ;;  %v9826_v33 = vld [vmem:[#allocation2 + $0x78] sm:$0xff]  ;;  %v623_v34 = vld [vmem:[%s9633_s30 + $0x88] sm:$0xff]  ;;  %514 = vst.msk [vmem:[#allocation3 + $0x99] sm:$0x1] %vm494_vm15, %v14430_v0  ;;  %vm14401_vm15 = vcmask 1044484  }
  0x40   : > { %656 = vst.msk [vmem:[#allocation2 + $0xe1] sm:$0xff] %vm14412_vm0, %v623_v34  ;;  %v799_v39 = vrot.slane %v9826_v33, 1 }
  0x43   : > { %1441 = vrot.lane.b32.xlu1 %v9702_v37, %s14473_s23  ;;  %1347 = vrot.lane.b32.xlu0 %v864_v38, %s9442_s18 }
  0x47   : > { %1157 = vrot.lane.b32.xlu1 %v9702_v37, %s9440_s16  ;;  %1063 = vrot.lane.b32.xlu0 %v864_v38, %s9438_s14  ;;  %v9833_v38 = vld [vmem:[#allocation2 + $0x80] sm:$0xff] }
  0x48   : > { %v800_v41 = vrot.slane %v9833_v38, 1  ;;  %v881_v49 = vrot.slane %v9833_v38, 2 }
  0x4a   : > { %v801_v44 = vsel %vm14435_vm5, %v799_v39, %v800_v41  ;;  %v803_v54 = vsel %vm14435_vm5, %v800_v41, %v802_v50  ;;  %v884_v61 = vsel %vm14399_vm4, %v881_v49, %v883_v57 }
  0x4b   : > { %1537 = vrot.lane.b32.xlu1 %v786_v48, %s9444_s19  ;;  %1443 = vrot.lane.b32.xlu0 %v9706_v40, %s14473_s23 }
  0x4f   : > { %1253 = vrot.lane.b32.xlu1 %v786_v48, %s9441_s17  ;;  %1159 = vrot.lane.b32.xlu0 %v9706_v40, %s9440_s16 }
  0x53   : > { %1633 = vrot.lane.b32.xlu1 %v867_v55, %s9445_s22  ;;  %1539 = vrot.lane.b32.xlu0 %v788_v56, %s9444_s19 }
  0x57   : > { %1255 = vrot.lane.b32.xlu1 %v788_v56, %s9441_s17  ;;  %969 = vrot.lane.b32.xlu0 %v786_v48, %s9439_s15  ;;  %v880_v48 = vrot.slane %v9826_v33, 2 }
  0x59   : > { %v882_v53 = vsel %vm14399_vm4, %v880_v48, %v881_v49 }
  0x5b   : > { %1635 = vrot.lane.b32.xlu1 %v869_v58, %s9445_s22  ;;  %1349 = vrot.lane.b32.xlu0 %v867_v55, %s9442_s18 }
  0x5f   : > { %1065 = vrot.lane.b32.xlu1 %v867_v55, %s9438_s14  ;;  %971 = vrot.lane.b32.xlu0 %v788_v56, %s9439_s15 }
  0x63   : > { %1445 = vrot.lane.b32.xlu1 %v9754_v60, %s14473_s23  ;;  %1351 = vrot.lane.b32.xlu0 %v869_v58, %s9442_s18 }
  0x67   : > { %1161 = vrot.lane.b32.xlu1 %v9754_v60, %s9440_s16  ;;  %1067 = vrot.lane.b32.xlu0 %v869_v58, %s9438_s14 }
  0x6b   : > { %1541 = vrot.lane.b32.xlu1 %v791_v2, %s9444_s19  ;;  %1447 = vrot.lane.b32.xlu0 %v9757_v62, %s14473_s23 }
  0x6f   : > { %1257 = vrot.lane.b32.xlu1 %v791_v2, %s9441_s17  ;;  %1163 = vrot.lane.b32.xlu0 %v9757_v62, %s9440_s16 }
  0x73   : > { %1637 = vrot.lane.b32.xlu1 %v872_v9, %s9445_s22  ;;  %1543 = vrot.lane.b32.xlu0 %v793_v10, %s9444_s19 }
  0x77   : > { %1259 = vrot.lane.b32.xlu1 %v793_v10, %s9441_s17  ;;  %973 = vrot.lane.b32.xlu0 %v791_v2, %s9439_s15  ;;  %v624_v2 = vld [vmem:[%s9633_s30 + $0x90] sm:$0xff] }
  0x78   : > { %657 = vst.msk [vmem:[#allocation2 + $0xf1] sm:$0xff] %vm14412_vm0, %v624_v2 }
  0x7b   : > { %1639 = vrot.lane.b32.xlu1 %v874_v12, %s9445_s22  ;;  %1353 = vrot.lane.b32.xlu0 %v872_v9, %s9442_s18 }
  0x7f   : > { %1069 = vrot.lane.b32.xlu1 %v872_v9, %s9438_s14  ;;  %975 = vrot.lane.b32.xlu0 %v793_v10, %s9439_s15  ;;  %v9881_v9 = vld [vmem:[#allocation2 + $0x90] sm:$0xff]  ;;  %v625_v10 = vld [vmem:[%s9633_s30 + $0x98] sm:$0xff] }
  0x80   : > { %658 = vst.msk [vmem:[#allocation2 + $0xf9] sm:$0xff] %vm14412_vm0, %v625_v10  ;;  %v885_v39 = vrot.slane %v9881_v9, 2  ;;  %v627_v10 = vld [vmem:[%s9633_s30 + $0xa8] sm:$0xff] }
  0x81   : > { %660 = vst.msk [vmem:[#allocation2 + $0x111] sm:$0xff] %vm14412_vm0, %v627_v10  ;;  %v629_v10 = vld [vmem:[%s9633_s30 + $0xb8] sm:$0xff] }
  0x82   : > { %662 = vst.msk [vmem:[#allocation2 + $0x129] sm:$0xff] %vm14412_vm0, %v629_v10  ;;  %v631_v10 = vld [vmem:[%s9633_s30 + $0xc8] sm:$0xff] }
  0x83   : > { %1449 = vrot.lane.b32.xlu1 %v9790_v14, %s14473_s23  ;;  %1355 = vrot.lane.b32.xlu0 %v874_v12, %s9442_s18  ;;  %664 = vst.msk [vmem:[#allocation2 + $0x141] sm:$0xff] %vm14412_vm0, %v631_v10 }
  0x87   : > { %1165 = vrot.lane.b32.xlu1 %v9790_v14, %s9440_s16  ;;  %1071 = vrot.lane.b32.xlu0 %v874_v12, %s9438_s14 }
  0x8b   : > { %1545 = vrot.lane.b32.xlu1 %v796_v19, %s9444_s19  ;;  %1451 = vrot.lane.b32.xlu0 %v9793_v16, %s14473_s23 }
  0x8f   : > { %1261 = vrot.lane.b32.xlu1 %v796_v19, %s9441_s17  ;;  %1167 = vrot.lane.b32.xlu0 %v9793_v16, %s9440_s16 }
  0x93   : > { %1641 = vrot.lane.b32.xlu1 %v877_v26, %s9445_s22  ;;  %1547 = vrot.lane.b32.xlu0 %v798_v27, %s9444_s19 }
  0x97   : > { %1263 = vrot.lane.b32.xlu1 %v798_v27, %s9441_s17  ;;  %977 = vrot.lane.b32.xlu0 %v796_v19, %s9439_s15  ;;  %v804_v19 = vrot.slane %v9881_v9, 1 }
  0x9b   : > { %1643 = vrot.lane.b32.xlu1 %v879_v29, %s9445_s22  ;;  %1357 = vrot.lane.b32.xlu0 %v877_v26, %s9442_s18 }
  0x9d   : > { %v1058_v31 = vpop.permute.xlu1 %1057  ;;  %v962_v32 = vpop.permute.xlu0 %961 }
  0x9e   : > { %v1729_v3 = vsel %vm14412_vm0, %v9645_v7, %v962_v32  ;;  %v9889_v7 = vld [vmem:[#allocation2 + $0x98] sm:$0xff]  ;;  %v691_v32 = vld [vmem:[#allocation2 + $0xa0] sm:$0x3] }
  0x9f   : > { %1073 = vrot.lane.b32.xlu1 %v877_v26, %s9438_s14  ;;  %979 = vrot.lane.b32.xlu0 %v798_v27, %s9439_s15  ;;  %v1761_v8 = vsel %vm487_vm3, %v1729_v3, %v1058_v31  ;;  %v805_v20 = vrot.slane %v9889_v7, 1  ;;  %v886_v41 = vrot.slane %v9889_v7, 2 }
  0xa1   : > { %v9829_v35 = vpop.permute.xlu1 %1059  ;;  %v9831_v36 = vpop.permute.xlu0 %963  ;;  %v887_v48 = vsel %vm14399_vm4, %v885_v39, %v886_v41 }
  0xa2   : > { %v1730_v21 = vsel %vm14412_vm0, %v9638_v4, %v9831_v36 }
  0xa3   : > { %1453 = vrot.lane.b32.xlu1 %v9826_v33, %s14473_s23  ;;  %1359 = vrot.lane.b32.xlu0 %v879_v29, %s9442_s18  ;;  %v1762_v28 = vsel %vm487_vm3, %v1730_v21, %v9829_v35 }
  0xa5   : > { %v9841_v42 = vpop.permute.xlu1 %1155  ;;  %v1154_v43 = vpop.permute.xlu0 %1153 }
  0xa6   : > { %v1794_v11 = vsel %vm14405_vm8, %v1761_v8, %v1154_v43  ;;  %v1795_v4 = vsel %vm14405_vm8, %v1762_v28, %v9841_v42  ;;  %v807_v42 = vrot.slane %v691_v32, 1  ;;  %v9958_v8 = vld [vmem:[#allocation2 + $0xa8] sm:$0xff] }
  0xa7   : > { %1169 = vrot.lane.b32.xlu1 %v9826_v33, %s9440_s16  ;;  %1075 = vrot.lane.b32.xlu0 %v879_v29, %s9438_s14  ;;  %v806_v29 = vsel %vm14435_vm5, %v804_v19, %v805_v20 }
  0xa8   : > { %v808_v49 = vsel %vm14435_vm5, %v805_v20, %v807_v42 }
  0xa9   : > { %v9847_v45 = vpop.permute.xlu1 %965  ;;  %v1250_v46 = vpop.permute.xlu0 %1249 }
  0xaa   : > { %v1827_v15 = vsel %vm1826_vm9, %v1794_v11, %v1250_v46 }
  0xab   : > { %1549 = vrot.lane.b32.xlu1 %v801_v44, %s9444_s19  ;;  %1455 = vrot.lane.b32.xlu0 %v9833_v38, %s14473_s23 }
  0xad   : > { %v1346_v51 = vpop.permute.xlu1 %1345  ;;  %v1252_v52 = vpop.permute.xlu0 %1251 }
  0xae   : > { %v1860_v17 = vsel %vm1859_vm10, %v1827_v15, %v1346_v51  ;;  %v1828_v34 = vsel %vm1826_vm9, %v1795_v4, %v1252_v52  ;;  %v888_v52 = vrot.slane %v691_v32, 2 }
  0xaf   : > { %1265 = vrot.lane.b32.xlu1 %v801_v44, %s9441_s17  ;;  %1171 = vrot.lane.b32.xlu0 %v9833_v38, %s9440_s16 }
  0xb0   : > { %v889_v57 = vsel %vm14399_vm4, %v886_v41, %v888_v52 }
  0xb1   : > { %v9859_v55 = vpop.permute.xlu1 %1061  ;;  %v9861_v56 = vpop.permute.xlu0 %967 }
  0xb3   : > { %1645 = vrot.lane.b32.xlu1 %v882_v53, %s9445_s22  ;;  %1551 = vrot.lane.b32.xlu0 %v803_v54, %s9444_s19 }
  0xb5   : > { %v1442_v58 = vpop.permute.xlu1 %1441  ;;  %v1348_v59 = vpop.permute.xlu0 %1347 }
  0xb6   : > { %v1892_v18 = vsel %vm560_vm6, %v1860_v17, %v1442_v58  ;;  %v1861_v36 = vsel %vm1859_vm10, %v1828_v34, %v1348_v59  ;;  %v890_v34 = vrot.slane %v9958_v8, 2 }
  0xb7   : > { %1267 = vrot.lane.b32.xlu1 %v803_v54, %s9441_s17  ;;  %981 = vrot.lane.b32.xlu0 %v801_v44, %s9439_s15 }
  0xb9   : > { %v9868_v63 = vpop.permute.xlu1 %1157  ;;  %v9870_v1 = vpop.permute.xlu0 %1063 }
  0xbb   : > { %1647 = vrot.lane.b32.xlu1 %v884_v61, %s9445_s22  ;;  %1361 = vrot.lane.b32.xlu0 %v882_v53, %s9442_s18 }
  0xbd   : > { %v1538_v5 = vpop.permute.xlu1 %1537  ;;  %v1444_v6 = vpop.permute.xlu0 %1443 }
  0xbe   : > { %v1925_v22 = vsel %vm1924_vm11, %v1892_v18, %v1538_v5  ;;  %v1893_v35 = vsel %vm560_vm6, %v1861_v36, %v1444_v6  ;;  %v1731_v5 = vsel %vm14412_vm0, %v9671_v25, %v9847_v45  ;;  %v9967_v18 = vld [vmem:[#allocation2 + $0xb0] sm:$0xff] }
  0xbf   : > { %1077 = vrot.lane.b32.xlu1 %v882_v53, %s9438_s14  ;;  %983 = vrot.lane.b32.xlu0 %v803_v54, %s9439_s15  ;;  %v1763_v6 = vsel %vm487_vm3, %v1731_v5, %v9859_v55  ;;  %v810_v19 = vrot.slane %v9967_v18, 1 }
  0xc0   : > { %v1796_v11 = vsel %vm14405_vm8, %v1763_v6, %v9868_v63  ;;  %v809_v63 = vrot.slane %v9958_v8, 1  ;;  %v10038_v6 = vld [vmem:[#allocation2 + $0xc0] sm:$0xff] }
  0xc1   : > { %v9885_v12 = vpop.permute.xlu1 %1253  ;;  %v9887_v13 = vpop.permute.xlu0 %1159 }
  0xc2   : > { %v1829_v25 = vsel %vm1826_vm9, %v1796_v11, %v9885_v12  ;;  %v1732_v12 = vsel %vm14412_vm0, %v9669_v24, %v9861_v56  ;;  %v694_v24 = vld [vmem:[#allocation2 + $0xb8] sm:$0x3] }
  0xc3   : > { %1457 = vrot.lane.b32.xlu1 %v9881_v9, %s14473_s23  ;;  %1363 = vrot.lane.b32.xlu0 %v884_v61, %s9442_s18  ;;  %v812_v36 = vrot.slane %v694_v24, 1 }
  0xc5   : > { %v1634_v23 = vpop.permute.xlu1 %1633  ;;  %v1540_v26 = vpop.permute.xlu0 %1539 }
  0xc6   : > { %v1958_v27 = vsel %vm14400_vm12, %v1925_v22, %v1634_v23  ;;  %v1926_v43 = vsel %vm1924_vm11, %v1893_v35, %v1540_v26  ;;  %v1764_v26 = vsel %vm487_vm3, %v1732_v12, %v9870_v1 }
  0xc7   : > { %1173 = vrot.lane.b32.xlu1 %v9881_v9, %s9440_s16  ;;  %1079 = vrot.lane.b32.xlu0 %v884_v61, %s9438_s14  ;;  %v626_v61 = vld [vmem:[%s9633_s30 + $0xa0] sm:$0xff]  ;;  %v1797_v28 = vsel %vm14405_vm8, %v1764_v26, %v9887_v13  ;;  %v891_v13 = vrot.slane %v9967_v18, 2 }
  0xc8   : > { %8611 = vmatprep.mubr.msk.f32.mxu0 %vm2002_vm13, %v1958_v27  ;;  %659 = vst.msk [vmem:[#allocation2 + $0x109] sm:$0xff] %vm14412_vm0, %v626_v61  ;;  %v811_v27 = vsel %vm14435_vm5, %v809_v63, %v810_v19 }
  0xc9   : > { %v9914_v30 = vpop.permute.xlu1 %1255  ;;  %v9916_v31 = vpop.permute.xlu0 %969  ;;  %v892_v42 = vsel %vm14399_vm4, %v890_v34, %v891_v13 }
  0xca   : > { %v1830_v56 = vsel %vm1826_vm9, %v1797_v28, %v9914_v30 }
  0xcb   : > { %1553 = vrot.lane.b32.xlu1 %v806_v29, %s9444_s19  ;;  %1459 = vrot.lane.b32.xlu0 %v9889_v7, %s14473_s23 }
  0xcd   : > { %v1636_v44 = vpop.permute.xlu1 %1635  ;;  %v1350_v46 = vpop.permute.xlu0 %1349 }
  0xce   : > { %v1959_v47 = vsel %vm14400_vm12, %v1926_v43, %v1636_v44  ;;  %v1862_v45 = vsel %vm1859_vm10, %v1829_v25, %v1350_v46  ;;  %v813_v43 = vsel %vm14435_vm5, %v810_v19, %v812_v36 }
  0xcf   : > { %1269 = vrot.lane.b32.xlu1 %v806_v29, %s9441_s17  ;;  %1175 = vrot.lane.b32.xlu0 %v9889_v7, %s9440_s16 }
  0xd0   : > { %8612 = vmatmul.mubr.msk.f32.vlgmr.msra.gmra.mrb[0].mxu0 %vm2002_vm13, %v1959_v47  ;;  %v893_v47 = vrot.slane %v694_v24, 2 }
  0xd1   : > { %v9934_v50 = vpop.permute.xlu1 %1065  ;;  %v9936_v51 = vpop.permute.xlu0 %971 }
  0xd2   : > { %v894_v52 = vsel %vm14399_vm4, %v891_v13, %v893_v47 }
  0xd3   : > { %1649 = vrot.lane.b32.xlu1 %v887_v48, %s9445_s22  ;;  %1555 = vrot.lane.b32.xlu0 %v808_v49, %s9444_s19 }
  0xd5   : > { %v1446_v53 = vpop.permute.xlu1 %1445  ;;  %v1352_v54 = vpop.permute.xlu0 %1351 }
  0xd6   : > { %v1894_v55 = vsel %vm560_vm6, %v1862_v45, %v1446_v53  ;;  %v1863_v32 = vsel %vm1859_vm10, %v1830_v56, %v1352_v54  ;;  %v895_v56 = vrot.slane %v10038_v6, 2 }
  0xd7   : > { %1271 = vrot.lane.b32.xlu1 %v808_v49, %s9441_s17  ;;  %985 = vrot.lane.b32.xlu0 %v806_v29, %s9439_s15 }
  0xd9   : > { %v9943_v58 = vpop.permute.xlu1 %1161  ;;  %v9945_v59 = vpop.permute.xlu0 %1067 }
  0xdb   : > { %1651 = vrot.lane.b32.xlu1 %v889_v57, %s9445_s22  ;;  %1365 = vrot.lane.b32.xlu0 %v887_v48, %s9442_s18 }
  0xdd   : > { %v1542_v2 = vpop.permute.xlu1 %1541  ;;  %v1448_v3 = vpop.permute.xlu0 %1447 }
  0xde   : > { %v1927_v20 = vsel %vm1924_vm11, %v1894_v55, %v1542_v2  ;;  %v1895_v1 = vsel %vm560_vm6, %v1863_v32, %v1448_v3  ;;  %v1733_v3 = vsel %vm14412_vm0, %v9702_v37, %v9916_v31  ;;  %v10047_v55 = vld [vmem:[#allocation2 + $0xc8] sm:$0xff] }
  0xdf   : > { %1081 = vrot.lane.b32.xlu1 %v887_v48, %s9438_s14  ;;  %987 = vrot.lane.b32.xlu0 %v808_v49, %s9439_s15  ;;  %v1765_v5 = vsel %vm487_vm3, %v1733_v3, %v9934_v50  ;;  %v815_v63 = vrot.slane %v10047_v55, 1 }
  0xe0   : > { %v1798_v11 = vsel %vm14405_vm8, %v1765_v5, %v9943_v58  ;;  %v814_v58 = vrot.slane %v10038_v6, 1  ;;  %v10118_v5 = vld [vmem:[#allocation2 + $0xd8] sm:$0xff] }
  0xe1   : > { %v9963_v15 = vpop.permute.xlu1 %1257  ;;  %v9965_v17 = vpop.permute.xlu0 %1163 }
  0xe2   : > { %v1831_v37 = vsel %vm1826_vm9, %v1798_v11, %v9963_v15  ;;  %v1734_v15 = vsel %vm14412_vm0, %v9706_v40, %v9936_v51  ;;  %v816_v12 = vsel %vm14435_vm5, %v814_v58, %v815_v63  ;;  %v697_v40 = vld [vmem:[#allocation2 + $0xd0] sm:$0x3] }
  0xe3   : > { %1461 = vrot.lane.b32.xlu1 %v9958_v8, %s14473_s23  ;;  %1367 = vrot.lane.b32.xlu0 %v889_v57, %s9442_s18  ;;  %v817_v32 = vrot.slane %v697_v40, 1 }
  0xe5   : > { %v1638_v21 = vpop.permute.xlu1 %1637  ;;  %v1544_v22 = vpop.permute.xlu0 %1543 }
  0xe6   : > { %v1960_v23 = vsel %vm14400_vm12, %v1927_v20, %v1638_v21  ;;  %v1928_v35 = vsel %vm1924_vm11, %v1895_v1, %v1544_v22 }
  0xe7   : > { %1177 = vrot.lane.b32.xlu1 %v9958_v8, %s9440_s16  ;;  %1083 = vrot.lane.b32.xlu0 %v889_v57, %s9438_s14  ;;  %v628_v57 = vld [vmem:[%s9633_s30 + $0xb0] sm:$0xff] }
  0xe8   : > { %8614 = vmatprep.mubr.msk.f32.mxu0 %vm2002_vm13, %v1960_v23  ;;  %661 = vst.msk [vmem:[#allocation2 + $0x121] sm:$0xff] %vm14412_vm0, %v628_v57  ;;  %v1766_v23 = vsel %vm487_vm3, %v1734_v15, %v9945_v59 }
  0xe9   : > { %v9993_v29 = vpop.permute.xlu1 %1259  ;;  %v9995_v4 = vpop.permute.xlu0 %973  ;;  %v1799_v26 = vsel %vm14405_vm8, %v1766_v23, %v9965_v17  ;;  %v896_v17 = vrot.slane %v10047_v55, 2 }
  0xea   : > { %v1832_v51 = vsel %vm1826_vm9, %v1799_v26, %v9993_v29 }
  0xeb   : > { %1557 = vrot.lane.b32.xlu1 %v811_v27, %s9444_s19  ;;  %1463 = vrot.lane.b32.xlu0 %v9967_v18, %s14473_s23  ;;  %v897_v36 = vsel %vm14399_vm4, %v895_v56, %v896_v17 }
  0xed   : > { %v1640_v39 = vpop.permute.xlu1 %1639  ;;  %v1354_v41 = vpop.permute.xlu0 %1353 }
  0xee   : > { %v1961_v30 = vsel %vm14400_vm12, %v1928_v35, %v1640_v39  ;;  %v1864_v31 = vsel %vm1859_vm10, %v1831_v37, %v1354_v41  ;;  %v818_v35 = vsel %vm14435_vm5, %v815_v63, %v817_v32 }
  0xef   : > { %1273 = vrot.lane.b32.xlu1 %v811_v27, %s9441_s17  ;;  %1179 = vrot.lane.b32.xlu0 %v9967_v18, %s9440_s16 }
  0xf0   : > { %8615 = vmatmul.mubr.msk.f32.gmra.mrb[2].mxu0 %vm2002_vm13, %v1961_v30  ;;  %v898_v30 = vrot.slane %v697_v40, 2 }
  0xf1   : > { %v10014_v44 = vpop.permute.xlu1 %1069  ;;  %v10016_v46 = vpop.permute.xlu0 %975 }
  0xf2   : > { %v899_v47 = vsel %vm14399_vm4, %v896_v17, %v898_v30 }
  0xf3   : > { %1653 = vrot.lane.b32.xlu1 %v892_v42, %s9445_s22  ;;  %1559 = vrot.lane.b32.xlu0 %v813_v43, %s9444_s19 }
  0xf5   : > { %v1450_v48 = vpop.permute.xlu1 %1449  ;;  %v1356_v49 = vpop.permute.xlu0 %1355 }
  0xf6   : > { %v1896_v50 = vsel %vm560_vm6, %v1864_v31, %v1450_v48  ;;  %v1865_v24 = vsel %vm1859_vm10, %v1832_v51, %v1356_v49  ;;  %v900_v51 = vrot.slane %v10118_v5, 2 }
  0xf7   : > { %1275 = vrot.lane.b32.xlu1 %v813_v43, %s9441_s17  ;;  %989 = vrot.lane.b32.xlu0 %v811_v27, %s9439_s15 }
  0xf9   : > { %v10023_v53 = vpop.permute.xlu1 %1165  ;;  %v10025_v54 = vpop.permute.xlu0 %1071 }
  0xfb   : > { %1655 = vrot.lane.b32.xlu1 %v894_v52, %s9445_s22  ;;  %1369 = vrot.lane.b32.xlu0 %v892_v42, %s9442_s18 }
  0xfd   : > { %v1546_v61 = vpop.permute.xlu1 %1545  ;;  %v1452_v2 = vpop.permute.xlu0 %1451 }
  0xfe   : > { %v1929_v19 = vsel %vm1924_vm11, %v1896_v50, %v1546_v61  ;;  %v1897_v59 = vsel %vm560_vm6, %v1865_v24, %v1452_v2  ;;  %v1735_v2 = vsel %vm14412_vm0, %v9754_v60, %v9995_v4  ;;  %v699_v50 = vld [vmem:[#allocation2 + $0xe0] sm:$0xff] }
  0xff   : > { %1085 = vrot.lane.b32.xlu1 %v892_v42, %s9438_s14  ;;  %991 = vrot.lane.b32.xlu0 %v813_v43, %s9439_s15  ;;  %v1767_v3 = vsel %vm487_vm3, %v1735_v2, %v10014_v44  ;;  %v820_v58 = vrot.slane %v699_v50, 1  ;;  %v901_v24 = vrot.slane %v699_v50, 2 }
 0x100   : > { %v1800_v11 = vsel %vm14405_vm8, %v1767_v3, %v10023_v53  ;;  %v819_v53 = vrot.slane %v10118_v5, 1  ;;  %v701_v3 = vld [vmem:[#allocation2 + $0xf0] sm:$0xff] }
 0x101   : > { %v10043_v25 = vpop.permute.xlu1 %1261  ;;  %v10045_v45 = vpop.permute.xlu0 %1167 }
 0x102   : > { %v1833_v60 = vsel %vm1826_vm9, %v1800_v11, %v10043_v25  ;;  %v1736_v25 = vsel %vm14412_vm0, %v9757_v62, %v10016_v46  ;;  %v821_v15 = vsel %vm14435_vm5, %v819_v53, %v820_v58  ;;  %v700_v62 = vld [vmem:[#allocation2 + $0xe8] sm:$0x3] }
 0x103   : > { %1465 = vrot.lane.b32.xlu1 %v10038_v6, %s14473_s23  ;;  %1371 = vrot.lane.b32.xlu0 %v894_v52, %s9442_s18 }
 0x105   : > { %v1642_v20 = vpop.permute.xlu1 %1641  ;;  %v1548_v21 = vpop.permute.xlu0 %1547 }
 0x106   : > { %v1962_v22 = vsel %vm14400_vm12, %v1929_v19, %v1642_v20  ;;  %v1930_v1 = vsel %vm1924_vm11, %v1897_v59, %v1548_v21 }
 0x107   : > { %1181 = vrot.lane.b32.xlu1 %v10038_v6, %s9440_s16  ;;  %1087 = vrot.lane.b32.xlu0 %v894_v52, %s9438_s14  ;;  %v630_v52 = vld [vmem:[%s9633_s30 + $0xc0] sm:$0xff] }
 0x108   : > { %8617 = vmatprep.mubr.msk.f32.mxu0 %vm2002_vm13, %v1962_v22  ;;  %663 = vst.msk [vmem:[#allocation2 + $0x139] sm:$0xff] %vm14412_vm0, %v630_v52  ;;  %v1768_v22 = vsel %vm487_vm3, %v1736_v25, %v10025_v54 }
 0x109   : > { %v10073_v27 = vpop.permute.xlu1 %1263  ;;  %v10075_v28 = vpop.permute.xlu0 %977  ;;  %v1801_v23 = vsel %vm14405_vm8, %v1768_v22, %v10045_v45  ;;  %v822_v45 = vrot.slane %v700_v62, 1 }
 0x10a   : > { %v1834_v46 = vsel %vm1826_vm9, %v1801_v23, %v10073_v27  ;;  %v902_v27 = vsel %vm14399_vm4, %v900_v51, %v901_v24  ;;  %v703_v23 = vld [vmem:[#allocation2 + $0x100] sm:$0x3] }
 0x10b   : > { %1561 = vrot.lane.b32.xlu1 %v816_v12, %s9444_s19  ;;  %1467 = vrot.lane.b32.xlu0 %v10047_v55, %s14473_s23 }
 0x10d   : > { %v1644_v34 = vpop.permute.xlu1 %1643  ;;  %v1358_v13 = vpop.permute.xlu0 %1357 }
 0x10e   : > { %v1963_v29 = vsel %vm14400_vm12, %v1930_v1, %v1644_v34  ;;  %v1866_v4 = vsel %vm1859_vm10, %v1833_v60, %v1358_v13  ;;  %v823_v1 = vsel %vm14435_vm5, %v820_v58, %v822_v45  ;;  %v702_v60 = vld [vmem:[#allocation2 + $0xf8] sm:$0xff] }
 0x10f   : > { %1277 = vrot.lane.b32.xlu1 %v816_v12, %s9441_s17  ;;  %1183 = vrot.lane.b32.xlu0 %v10047_v55, %s9440_s16 }
 0x110   : > { %8618 = vmatmul.mubr.msk.f32.gmra.mrb[4].mxu0 %vm2002_vm13, %v1963_v29  ;;  %v903_v29 = vrot.slane %v700_v62, 2  ;;  %v905_v62 = vrot.slane %v701_v3, 2 }
 0x111   : > { %v10094_v39 = vpop.permute.xlu1 %1073  ;;  %v10096_v41 = vpop.permute.xlu0 %979 }
 0x112   : > { %v904_v30 = vsel %vm14399_vm4, %v901_v24, %v903_v29 }
 0x113   : > { %1657 = vrot.lane.b32.xlu1 %v897_v36, %s9445_s22  ;;  %1563 = vrot.lane.b32.xlu0 %v818_v35, %s9444_s19 }
 0x115   : > { %v1454_v42 = vpop.permute.xlu1 %1453  ;;  %v1360_v43 = vpop.permute.xlu0 %1359 }
 0x116   : > { %v1898_v44 = vsel %vm560_vm6, %v1866_v4, %v1454_v42  ;;  %v1867_v40 = vsel %vm1859_vm10, %v1834_v46, %v1360_v43  ;;  %v906_v46 = vrot.slane %v702_v60, 2 }
 0x117   : > { %1279 = vrot.lane.b32.xlu1 %v818_v35, %s9441_s17  ;;  %993 = vrot.lane.b32.xlu0 %v816_v12, %s9439_s15 }
 0x119   : > { %v10103_v48 = vpop.permute.xlu1 %1169  ;;  %v10105_v49 = vpop.permute.xlu0 %1075 }
 0x11b   : > { %1659 = vrot.lane.b32.xlu1 %v899_v47, %s9445_s22  ;;  %1373 = vrot.lane.b32.xlu0 %v897_v36, %s9442_s18 }
 0x11d   : > { %v1550_v57 = vpop.permute.xlu1 %1549  ;;  %v1456_v61 = vpop.permute.xlu0 %1455 }
 0x11e   : > { %v1931_v63 = vsel %vm1924_vm11, %v1898_v44, %v1550_v57  ;;  %v1899_v54 = vsel %vm560_vm6, %v1867_v40, %v1456_v61  ;;  %v1737_v61 = vsel %vm14412_vm0, %v9790_v14, %v10075_v28  ;;  %v633_v14 = vld [vmem:[%s9633_s30 + $0xd8] sm:$0xff]  ;;  %v827_v40 = vrot.slane %v703_v23, 1 }
 0x11f   : > { %1089 = vrot.lane.b32.xlu1 %v897_v36, %s9438_s14  ;;  %995 = vrot.lane.b32.xlu0 %v818_v35, %s9439_s15  ;;  %v1769_v2 = vsel %vm487_vm3, %v1737_v61, %v10094_v39  ;;  %666 = vst.msk [vmem:[#allocation2 + $0x159] sm:$0xff] %vm14412_vm0, %v633_v14 }
 0x120   : > { %v1802_v10 = vsel %vm14405_vm8, %v1769_v2, %v10103_v48  ;;  %v824_v48 = vrot.slane %v701_v3, 1 }
 0x121   : > { %v10123_v37 = vpop.permute.xlu1 %1265  ;;  %v10125_v31 = vpop.permute.xlu0 %1171 }
 0x122   : > { %v1835_v4 = vsel %vm1826_vm9, %v1802_v10, %v10123_v37  ;;  %v825_v37 = vrot.slane %v702_v60, 1  ;;  %v10270_v10 = vld [vmem:[#allocation2 + $0x110] sm:$0xff] }
 0x123   : > { %1469 = vrot.lane.b32.xlu1 %v10118_v5, %s14473_s23  ;;  %1375 = vrot.lane.b32.xlu0 %v899_v47, %s9442_s18  ;;  %v830_v14 = vrot.slane %v10270_v10, 1 }
 0x124   : > { %v828_v45 = vsel %vm14435_vm5, %v825_v37, %v827_v40 }
 0x125   : > { %v1646_v19 = vpop.permute.xlu1 %1645  ;;  %v1552_v20 = vpop.permute.xlu0 %1551 }
 0x126   : > { %v1964_v21 = vsel %vm14400_vm12, %v1931_v63, %v1646_v19  ;;  %v1932_v59 = vsel %vm1924_vm11, %v1899_v54, %v1552_v20  ;;  %v1738_v19 = vsel %vm14412_vm0, %v9793_v16, %v10096_v41 }
 0x127   : > { %1185 = vrot.lane.b32.xlu1 %v10118_v5, %s9440_s16  ;;  %1091 = vrot.lane.b32.xlu0 %v899_v47, %s9438_s14  ;;  %v632_v47 = vld [vmem:[%s9633_s30 + $0xd0] sm:$0xff]  ;;  %v1770_v20 = vsel %vm487_vm3, %v1738_v19, %v10105_v49 }
 0x128   : > { %8620 = vmatprep.mubr.msk.f32.mxu0 %vm2002_vm13, %v1964_v21  ;;  %665 = vst.msk [vmem:[#allocation2 + $0x151] sm:$0xff] %vm14412_vm0, %v632_v47  ;;  %v826_v21 = vsel %vm14435_vm5, %v824_v48, %v825_v37  ;;  %v1803_v25 = vsel %vm14405_vm8, %v1770_v20, %v10125_v31 }
 0x129   : > { %v10150_v12 = vpop.permute.xlu1 %1267  ;;  %v10152_v26 = vpop.permute.xlu0 %981 }
 0x12a   : > { %v1836_v16 = vsel %vm1826_vm9, %v1803_v25, %v10150_v12  ;;  %v907_v12 = vsel %vm14399_vm4, %v905_v62, %v906_v46  ;;  %v1739_v47 = vsel %vm14412_vm0, %v9826_v33, %v10152_v26  ;;  %v634_v26 = vld [vmem:[%s9633_s30 + $0xe0] sm:$0xff] }
 0x12b   : > { %1565 = vrot.lane.b32.xlu1 %v821_v15, %s9444_s19  ;;  %1471 = vrot.lane.b32.xlu0 %v699_v50, %s14473_s23  ;;  %667 = vst.msk [vmem:[#allocation2 + $0x169] sm:$0xff] %vm14412_vm0, %v634_v26 }
 0x12d   : > { %v1648_v56 = vpop.permute.xlu1 %1647  ;;  %v1362_v17 = vpop.permute.xlu0 %1361 }
 0x12e   : > { %v1965_v32 = vsel %vm14400_vm12, %v1932_v59, %v1648_v56  ;;  %v1868_v28 = vsel %vm1859_vm10, %v1835_v4, %v1362_v17  ;;  %v908_v17 = vrot.slane %v703_v23, 2 }
 0x12f   : > { %1281 = vrot.lane.b32.xlu1 %v821_v15, %s9441_s17  ;;  %1187 = vrot.lane.b32.xlu0 %v699_v50, %s9440_s16 }
 0x130   : > { %8621 = vmatmul.mubr.msk.f32.gmra.mrb[6].mxu0 %vm2002_vm13, %v1965_v32 }
 0x131   : > { %v10168_v34 = vpop.permute.xlu1 %1077  ;;  %v10170_v13 = vpop.permute.xlu0 %983 }
 0x132   : > { %v1740_v37 = vsel %vm14412_vm0, %v9833_v38, %v10170_v13  ;;  %v706_v38 = vld [vmem:[#allocation2 + $0x118] sm:$0x3] }
 0x133   : > { %1661 = vrot.lane.b32.xlu1 %v902_v27, %s9445_s22  ;;  %1567 = vrot.lane.b32.xlu0 %v823_v1, %s9444_s19  ;;  %v832_v25 = vrot.slane %v706_v38, 1 }
 0x135   : > { %v1458_v36 = vpop.permute.xlu1 %1457  ;;  %v1364_v35 = vpop.permute.xlu0 %1363  ;;  %v833_v62 = vsel %vm14435_vm5, %v830_v14, %v832_v25 }
 0x136   : > { %v1900_v39 = vsel %vm560_vm6, %v1868_v28, %v1458_v36  ;;  %v1869_v41 = vsel %vm1859_vm10, %v1836_v16, %v1364_v35 }
 0x137   : > { %1283 = vrot.lane.b32.xlu1 %v823_v1, %s9441_s17  ;;  %997 = vrot.lane.b32.xlu0 %v821_v15, %s9439_s15 }
 0x139   : > { %v10177_v42 = vpop.permute.xlu1 %1173  ;;  %v10179_v43 = vpop.permute.xlu0 %1079 }
 0x13b   : > { %1663 = vrot.lane.b32.xlu1 %v904_v30, %s9445_s22  ;;  %1377 = vrot.lane.b32.xlu0 %v902_v27, %s9442_s18 }
 0x13d   : > { %v1554_v52 = vpop.permute.xlu1 %1553  ;;  %v1460_v57 = vpop.permute.xlu0 %1459 }
 0x13e   : > { %v1933_v44 = vsel %vm1924_vm11, %v1900_v39, %v1554_v52  ;;  %v1901_v49 = vsel %vm560_vm6, %v1869_v41, %v1460_v57  ;;  %v1771_v52 = vsel %vm487_vm3, %v1739_v47, %v10168_v34  ;;  %v10262_v57 = vld [vmem:[#allocation2 + $0x108] sm:$0xff] }
 0x13f   : > { %1093 = vrot.lane.b32.xlu1 %v902_v27, %s9438_s14  ;;  %999 = vrot.lane.b32.xlu0 %v823_v1, %s9439_s15  ;;  %v909_v1 = vsel %vm14399_vm4, %v906_v46, %v908_v17  ;;  %v1804_v61 = vsel %vm14405_vm8, %v1771_v52, %v10177_v42  ;;  %v829_v42 = vrot.slane %v10262_v57, 1 }
 0x141   : > { %v10194_v11 = vpop.permute.xlu1 %1269  ;;  %v10196_v50 = vpop.permute.xlu0 %1175 }
 0x142   : > { %v1837_v33 = vsel %vm1826_vm9, %v1804_v61, %v10194_v11 }
 0x143   : > { %1473 = vrot.lane.b32.xlu1 %v701_v3, %s14473_s23  ;;  %1379 = vrot.lane.b32.xlu0 %v904_v30, %s9442_s18 }
 0x145   : > { %v1650_v53 = vpop.permute.xlu1 %1649  ;;  %v1556_v58 = vpop.permute.xlu0 %1555 }
 0x146   : > { %v1966_v63 = vsel %vm14400_vm12, %v1933_v44, %v1650_v53  ;;  %v1934_v31 = vsel %vm1924_vm11, %v1901_v49, %v1556_v58  ;;  %v1772_v44 = vsel %vm487_vm3, %v1740_v37, %v10179_v43  ;;  %v831_v53 = vsel %vm14435_vm5, %v829_v42, %v830_v14 }
 0x147   : > { %1189 = vrot.lane.b32.xlu1 %v701_v3, %s9440_s16  ;;  %1095 = vrot.lane.b32.xlu0 %v904_v30, %s9438_s14  ;;  %v1805_v58 = vsel %vm14405_vm8, %v1772_v44, %v10196_v50  ;;  %v911_v50 = vrot.slane %v10270_v10, 2 }
 0x148   : > { %8623 = vmatprep.mubr.msk.f32.mxu0 %vm2002_vm13, %v1966_v63 }
 0x149   : > { %v10223_v22 = vpop.permute.xlu1 %1271  ;;  %v10225_v15 = vpop.permute.xlu0 %985 }
 0x14a   : > { %v1838_v13 = vsel %vm1826_vm9, %v1805_v58, %v10223_v22 }
 0x14b   : > { %1569 = vrot.lane.b32.xlu1 %v826_v21, %s9444_s19  ;;  %1475 = vrot.lane.b32.xlu0 %v702_v60, %s14473_s23 }
 0x14d   : > { %v1652_v54 = vpop.permute.xlu1 %1651  ;;  %v1366_v51 = vpop.permute.xlu0 %1365 }
 0x14e   : > { %v1967_v24 = vsel %vm14400_vm12, %v1934_v31, %v1652_v54  ;;  %v1870_v4 = vsel %vm1859_vm10, %v1837_v33, %v1366_v51  ;;  %v913_v31 = vrot.slane %v706_v38, 2 }
 0x14f   : > { %1285 = vrot.lane.b32.xlu1 %v826_v21, %s9441_s17  ;;  %1191 = vrot.lane.b32.xlu0 %v702_v60, %s9440_s16  ;;  %v635_v60 = vld [vmem:[%s9633_s30 + $0xe8] sm:$0xff] }
 0x150   : > { %8624 = vmatmul.mubr.msk.f32.gmra.mrb[8].mxu0 %vm2002_vm13, %v1967_v24  ;;  %668 = vst.msk [vmem:[#allocation2 + $0x171] sm:$0xff] %vm14412_vm0, %v635_v60  ;;  %v914_v24 = vsel %vm14399_vm4, %v911_v50, %v913_v31 }
 0x151   : > { %v10240_v59 = vpop.permute.xlu1 %1081  ;;  %v10242_v56 = vpop.permute.xlu0 %987 }
 0x153   : > { %1665 = vrot.lane.b32.xlu1 %v907_v12, %s9445_s22  ;;  %1571 = vrot.lane.b32.xlu0 %v828_v45, %s9444_s19 }
 0x155   : > { %v1462_v32 = vpop.permute.xlu1 %1461  ;;  %v1368_v27 = vpop.permute.xlu0 %1367 }
 0x156   : > { %v1902_v34 = vsel %vm560_vm6, %v1870_v4, %v1462_v32  ;;  %v1871_v20 = vsel %vm1859_vm10, %v1838_v13, %v1368_v27  ;;  %v1741_v27 = vsel %vm14412_vm0, %v9881_v9, %v10225_v15  ;;  %v636_v4 = vld [vmem:[%s9633_s30 + $0xf0] sm:$0xff] }
 0x157   : > { %1287 = vrot.lane.b32.xlu1 %v828_v45, %s9441_s17  ;;  %1001 = vrot.lane.b32.xlu0 %v826_v21, %s9439_s15  ;;  %v910_v21 = vrot.slane %v10262_v57, 2  ;;  %669 = vst.msk [vmem:[#allocation2 + $0x181] sm:$0xff] %vm14412_vm0, %v636_v4 }
 0x159   : > { %v10249_v29 = vpop.permute.xlu1 %1177  ;;  %v10251_v36 = vpop.permute.xlu0 %1083  ;;  %v912_v49 = vsel %vm14399_vm4, %v910_v21, %v911_v50 }
 0x15b   : > { %1667 = vrot.lane.b32.xlu1 %v909_v1, %s9445_s22  ;;  %1381 = vrot.lane.b32.xlu0 %v907_v12, %s9442_s18 }
 0x15d   : > { %v1558_v35 = vpop.permute.xlu1 %1557  ;;  %v1464_v30 = vpop.permute.xlu0 %1463 }
 0x15e   : > { %v1935_v11 = vsel %vm1924_vm11, %v1902_v34, %v1558_v35  ;;  %v1903_v43 = vsel %vm560_vm6, %v1871_v20, %v1464_v30  ;;  %v707_v35 = vld [vmem:[#allocation2 + $0x120] sm:$0xff] }
 0x15f   : > { %1097 = vrot.lane.b32.xlu1 %v907_v12, %s9438_s14  ;;  %1003 = vrot.lane.b32.xlu0 %v828_v45, %s9439_s15  ;;  %v834_v61 = vrot.slane %v707_v35, 1  ;;  %v915_v37 = vrot.slane %v707_v35, 2 }
 0x161   : > { %v10266_v2 = vpop.permute.xlu1 %1273  ;;  %v10268_v3 = vpop.permute.xlu0 %1179 }
 0x163   : > { %1477 = vrot.lane.b32.xlu1 %v10262_v57, %s14473_s23  ;;  %1383 = vrot.lane.b32.xlu0 %v909_v1, %s9442_s18 }
 0x165   : > { %v1654_v28 = vpop.permute.xlu1 %1653  ;;  %v1560_v39 = vpop.permute.xlu0 %1559 }
 0x166   : > { %v1968_v48 = vsel %vm14400_vm12, %v1935_v11, %v1654_v28  ;;  %v1936_v23 = vsel %vm1924_vm11, %v1903_v43, %v1560_v39 }
 0x167   : > { %1193 = vrot.lane.b32.xlu1 %v10262_v57, %s9440_s16  ;;  %1099 = vrot.lane.b32.xlu0 %v909_v1, %s9438_s14  ;;  %v1773_v1 = vsel %vm487_vm3, %v1741_v27, %v10240_v59  ;;  %v708_v57 = vld [vmem:[#allocation2 + $0x128] sm:$0xff]  ;;  %v711_v27 = vld [vmem:[#allocation2 + $0x140] sm:$0xff] }
 0x168   : > { %8626 = vmatprep.mubr.msk.f32.mxu0 %vm2002_vm13, %v1968_v48  ;;  %v1806_v30 = vsel %vm14405_vm8, %v1773_v1, %v10249_v29  ;;  %v916_v44 = vrot.slane %v708_v57, 2 }
 0x169   : > { %v10299_v63 = vpop.permute.xlu1 %1275  ;;  %v10301_v19 = vpop.permute.xlu0 %989  ;;  %v1839_v9 = vsel %vm1826_vm9, %v1806_v30, %v10266_v2  ;;  %v1742_v2 = vsel %vm14412_vm0, %v9889_v7, %v10242_v56  ;;  %v709_v7 = vld [vmem:[#allocation2 + $0x130] sm:$0x3]  ;;  %v840_v30 = vrot.slane %v711_v27, 1 }
 0x16a   : > { %v1774_v34 = vsel %vm487_vm3, %v1742_v2, %v10251_v36  ;;  %v637_v36 = vld [vmem:[%s9633_s30 + $0xf8] sm:$0xff]  ;;  %v917_v13 = vsel %vm14399_vm4, %v915_v37, %v916_v44  ;;  %v918_v50 = vrot.slane %v709_v7, 2  ;;  %v1743_v31 = vsel %vm14412_vm0, %v9958_v8, %v10301_v19  ;;  %s9453_s30 = smov 96  }
 0x16b   : > { %1573 = vrot.lane.b32.xlu1 %v831_v53, %s9444_s19  ;;  %1479 = vrot.lane.b32.xlu0 %v10270_v10, %s14473_s23  ;;  %v1807_v14 = vsel %vm14405_vm8, %v1774_v34, %v10268_v3  ;;  %v837_v3 = vrot.slane %v709_v7, 1  ;;  %670 = vst.msk [vmem:[#allocation2 + $0x189] sm:$0xff] %vm14412_vm0, %v637_v36  ;;  %v921_v2 = vrot.slane %v711_v27, 2 }
 0x16c   : > { %v1840_v56 = vsel %vm1826_vm9, %v1807_v14, %v10299_v63 }
 0x16d   : > { %v1656_v16 = vpop.permute.xlu1 %1655  ;;  %v1370_v41 = vpop.permute.xlu0 %1369 }
 0x16e   : > { %v1969_v22 = vsel %vm14400_vm12, %v1936_v23, %v1656_v16  ;;  %v1872_v15 = vsel %vm1859_vm10, %v1839_v9, %v1370_v41  ;;  %v919_v16 = vsel %vm14399_vm4, %v916_v44, %v918_v50 }
 0x16f   : > { %1289 = vrot.lane.b32.xlu1 %v831_v53, %s9441_s17  ;;  %1195 = vrot.lane.b32.xlu0 %v10270_v10, %s9440_s16  ;;  %v835_v10 = vrot.slane %v708_v57, 1 }
 0x170   : > { %8627 = vmatmul.mubr.msk.f32.gmra.mrb[10].mxu0 %vm2002_vm13, %v1969_v22 }
 0x171   : > { %v10360_v46 = vpop.permute.xlu1 %1085  ;;  %v10362_v40 = vpop.permute.xlu0 %991  ;;  %v836_v42 = vsel %vm14435_vm5, %v834_v61, %v835_v10  ;;  %v838_v20 = vsel %vm14435_vm5, %v835_v10, %v837_v3 }
 0x173   : > { %1669 = vrot.lane.b32.xlu1 %v912_v49, %s9445_s22  ;;  %1575 = vrot.lane.b32.xlu0 %v833_v62, %s9444_s19 }
 0x175   : > { %v1466_v54 = vpop.permute.xlu1 %1465  ;;  %v1372_v51 = vpop.permute.xlu0 %1371 }
 0x176   : > { %v1904_v59 = vsel %vm560_vm6, %v1872_v15, %v1466_v54  ;;  %v1873_v39 = vsel %vm1859_vm10, %v1840_v56, %v1372_v51  ;;  %v1775_v54 = vsel %vm487_vm3, %v1743_v31, %v10360_v46  ;;  %v710_v51 = vld [vmem:[#allocation2 + $0x138] sm:$0xff]  ;;  %v713_v31 = vld [vmem:[#allocation2 + $0x150] sm:$0xff] }
 0x177   : > { %1291 = vrot.lane.b32.xlu1 %v833_v62, %s9441_s17  ;;  %1005 = vrot.lane.b32.xlu0 %v831_v53, %s9439_s15  ;;  %v920_v4 = vrot.slane %v710_v51, 2 }
 0x179   : > { %v10369_v12 = vpop.permute.xlu1 %1181  ;;  %v10371_v45 = vpop.permute.xlu0 %1087 }
 0x17b   : > { %1671 = vrot.lane.b32.xlu1 %v914_v24, %s9445_s22  ;;  %1385 = vrot.lane.b32.xlu0 %v912_v49, %s9442_s18 }
 0x17d   : > { %v1562_v17 = vpop.permute.xlu1 %1561  ;;  %v1468_v32 = vpop.permute.xlu0 %1467 }
 0x17e   : > { %v1937_v29 = vsel %vm1924_vm11, %v1904_v59, %v1562_v17  ;;  %v1905_v48 = vsel %vm560_vm6, %v1873_v39, %v1468_v32  ;;  %v1744_v59 = vsel %vm14412_vm0, %v9967_v18, %v10362_v40 }
 0x17f   : > { %1101 = vrot.lane.b32.xlu1 %v912_v49, %s9438_s14  ;;  %1007 = vrot.lane.b32.xlu0 %v833_v62, %s9439_s15  ;;  %v1776_v61 = vsel %vm487_vm3, %v1744_v59, %v10371_v45  ;;  %v925_v59 = vrot.slane %v713_v31, 2 }
 0x181   : > { %v10384_v47 = vpop.permute.xlu1 %1277  ;;  %v10386_v52 = vpop.permute.xlu0 %1183 }
 0x183   : > { %1481 = vrot.lane.b32.xlu1 %v707_v35, %s14473_s23  ;;  %1387 = vrot.lane.b32.xlu0 %v914_v24, %s9442_s18 }
 0x185   : > { %v1658_v33 = vpop.permute.xlu1 %1657  ;;  %v1564_v26 = vpop.permute.xlu0 %1563 }
 0x186   : > { %v1970_v60 = vsel %vm14400_vm12, %v1937_v29, %v1658_v33  ;;  %v1938_v53 = vsel %vm1924_vm11, %v1905_v48, %v1564_v26  ;;  %v1809_v29 = vsel %vm14405_vm8, %v1776_v61, %v10386_v52 }
 0x187   : > { %1197 = vrot.lane.b32.xlu1 %v707_v35, %s9440_s16  ;;  %1103 = vrot.lane.b32.xlu0 %v914_v24, %s9438_s14  ;;  %v1808_v24 = vsel %vm14405_vm8, %v1775_v54, %v10369_v12  ;;  %v839_v12 = vrot.slane %v710_v51, 1 }
 0x188   : > { %8629 = vmatprep.mubr.msk.f32.mxu0 %vm2002_vm13, %v1970_v60  ;;  %v1841_v1 = vsel %vm1826_vm9, %v1808_v24, %v10384_v47  ;;  %v712_v60 = vld [vmem:[#allocation2 + $0x148] sm:$0x3] }
 0x189   : > { %v10409_v11 = vpop.permute.xlu1 %1279  ;;  %v10411_v28 = vpop.permute.xlu0 %993  ;;  %v841_v10 = vsel %vm14435_vm5, %v839_v12, %v840_v30  ;;  %v842_v34 = vrot.slane %v712_v60, 1  ;;  %v923_v48 = vrot.slane %v712_v60, 2 }
 0x18a   : > { %v1842_v18 = vsel %vm1826_vm9, %v1809_v29, %v10409_v11  ;;  %v922_v11 = vsel %vm14399_vm4, %v920_v4, %v921_v2 }
 0x18b   : > { %1577 = vrot.lane.b32.xlu1 %v836_v42, %s9444_s19  ;;  %1483 = vrot.lane.b32.xlu0 %v708_v57, %s14473_s23  ;;  %v843_v56 = vsel %vm14435_vm5, %v840_v30, %v842_v34  ;;  %v924_v3 = vsel %vm14399_vm4, %v921_v2, %v923_v48 }
 0x18d   : > { %v1660_v58 = vpop.permute.xlu1 %1659  ;;  %v1374_v38 = vpop.permute.xlu0 %1373 }
 0x18e   : > { %v1971_v63 = vsel %vm14400_vm12, %v1938_v53, %v1660_v58  ;;  %v1874_v8 = vsel %vm1859_vm10, %v1841_v1, %v1374_v38  ;;  %v9446_v38 = vmov 1983009808  }
 0x18f   : > { %1293 = vrot.lane.b32.xlu1 %v836_v42, %s9441_s17  ;;  %1199 = vrot.lane.b32.xlu0 %v708_v57, %s9440_s16 }
 0x190   : > { %8630 = vmatmul.mubr.msk.f32.gmra.mrb[12].mxu0 %vm2002_vm13, %v1971_v63  ;;  %v2556_v63 = vunpack.c.l.s4 %v9446_v38 }
 0x191   : > { %v10428_v43 = vpop.permute.xlu1 %1089  ;;  %v10430_v21 = vpop.permute.xlu0 %995 }
 0x193   : > { %1673 = vrot.lane.b32.xlu1 %v917_v13, %s9445_s22  ;;  %1579 = vrot.lane.b32.xlu0 %v838_v20, %s9444_s19 }
 0x195   : > { %v1470_v25 = vpop.permute.xlu1 %1469  ;;  %v1376_v23 = vpop.permute.xlu0 %1375 }
 0x196   : > { %v1906_v46 = vsel %vm560_vm6, %v1874_v8, %v1470_v25  ;;  %v1875_v40 = vsel %vm1859_vm10, %v1842_v18, %v1376_v23  ;;  %v1745_v25 = vsel %vm14412_vm0, %v10038_v6, %v10411_v28  ;;  %v10521_v23 = vld [vmem:[%s14386_s2] ss:$0 sm:$0xff] }
 0x197   : > { %1295 = vrot.lane.b32.xlu1 %v838_v20, %s9441_s17  ;;  %1009 = vrot.lane.b32.xlu0 %v836_v42, %s9439_s15 }
 0x199   : > { %v10437_v41 = vpop.permute.xlu1 %1185  ;;  %v10439_v22 = vpop.permute.xlu0 %1091 }
 0x19b   : > { %1675 = vrot.lane.b32.xlu1 %v919_v16, %s9445_s22  ;;  %1389 = vrot.lane.b32.xlu0 %v917_v13, %s9442_s18 }
 0x19d   : > { %v1566_v49 = vpop.permute.xlu1 %1565  ;;  %v1472_v62 = vpop.permute.xlu0 %1471 }
 0x19e   : > { %v1939_v57 = vsel %vm1924_vm11, %v1906_v46, %v1566_v49  ;;  %v1907_v45 = vsel %vm560_vm6, %v1875_v40, %v1472_v62  ;;  %v1777_v62 = vsel %vm487_vm3, %v1745_v25, %v10428_v43  ;;  %v10553_v46 = vld [vmem:[#allocation2 + $0x160] sm:$0x3] }
 0x19f   : > { %1105 = vrot.lane.b32.xlu1 %v917_v13, %s9438_s14  ;;  %1011 = vrot.lane.b32.xlu0 %v838_v20, %s9439_s15  ;;  %v2558_v13 = vlaneseq  ;;  %v1810_v54 = vsel %vm14405_vm8, %v1777_v62, %v10437_v41  ;;  %v847_v18 = vrot.slane %v10553_v46, 1 }
 0x1a1   : > { %v10452_v17 = vpop.permute.xlu1 %1281  ;;  %v10454_v32 = vpop.permute.xlu0 %1187  ;;  %v10525_v49 = vshrl.u32 %v2558_v13, 7 }
 0x1a2   : > { %v1843_v24 = vsel %vm1826_vm9, %v1810_v54, %v10452_v17 }
 0x1a3   : > { %v10459_v19 = vpop.f32.mrb[0].mxu0  ;;  %1485 = vrot.lane.b32.xlu1 %v710_v51, %s14473_s23  ;;  %1391 = vrot.lane.b32.xlu0 %v919_v16, %s9442_s18 }
 0x1a4   : > { %v10464_v35 = vpop.f32.mrb[1].mxu0 }
 0x1a5   : > { %v1662_v9 = vpop.permute.xlu1 %1661  ;;  %v1568_v15 = vpop.permute.xlu0 %1567  ;;  %v10545_v43 = vadd.f32 %v10521_v23, %v10464_v35  ;;  %v844_v35 = vrot.slane %v713_v31, 1 }
 0x1a6   : > { %v1972_v47 = vsel %vm14400_vm12, %v1939_v57, %v1662_v9  ;;  %v1940_v52 = vsel %vm1924_vm11, %v1907_v45, %v1568_v15 }
 0x1a7   : > { %1201 = vrot.lane.b32.xlu1 %v710_v51, %s9440_s16  ;;  %1107 = vrot.lane.b32.xlu0 %v919_v16, %s9438_s14  ;;  %v2557_v16 = vunpack.c.0.s8 %v2556_v63  ;;  %v10535_v51 = vld [vmem:[#allocation2 + $0x158] sm:$0xff]  ;;  %v14422_v40 = vmax.f32 %v10545_v43, 0.0 }
 0x1a8   : > { %8632 = vmatprep.mubr.msk.f32.mxu0 %vm2002_vm13, %v1972_v47  ;;  %v845_v30 = vrot.slane %v10535_v51, 1  ;;  %v926_v61 = vrot.slane %v10535_v51, 2 }
 0x1a9   : > { %v10479_v33 = vpop.permute.xlu1 %1283  ;;  %v10481_v26 = vpop.permute.xlu0 %997  ;;  %v10549_v8 = vsub.s32 %v2557_v16, %v10525_v49 }
 0x1aa   : > { %v10581_v2 = vsel %vm14435_vm5, %v844_v35, %v845_v30  ;;  %v10601_v48 = vsel %vm14435_vm5, %v845_v30, %v847_v18 }
 0x1ab   : > { %1581 = vrot.lane.b32.xlu1 %v841_v10, %s9444_s19  ;;  %1487 = vrot.lane.b32.xlu0 %v711_v27, %s14473_s23 }
 0x1ad   : > { %v1664_v42 = vpop.permute.xlu1 %1663  ;;  %v1378_v14 = vpop.permute.xlu0 %1377 }
 0x1ae   : > { %v1973_v7 = vsel %vm14400_vm12, %v1940_v52, %v1664_v42  ;;  %v1876_v1 = vsel %vm1859_vm10, %v1843_v24, %v1378_v14  ;;  %v10594_v14 = vsel %vm14399_vm4, %v925_v59, %v926_v61 }
 0x1af   : > { %1297 = vrot.lane.b32.xlu1 %v841_v10, %s9441_s17  ;;  %1203 = vrot.lane.b32.xlu0 %v711_v27, %s9440_s16  ;;  %v10541_v27 = vadd.f32 %v10459_v19, %v10521_v23 }
 0x1b0   : > { %8633 = vmatmul.mubr.msk.f32.gmra.mrb[14].mxu0 %vm2002_vm13, %v1973_v7  ;;  %v1746_v7 = vsel %vm14412_vm0, %v10047_v55, %v10430_v21  ;;  %v928_v55 = vrot.slane %v10553_v46, 2 }
 0x1b1   : > { %v10496_v39 = vpop.permute.xlu1 %1093  ;;  %v10498_v36 = vpop.permute.xlu0 %999 }
 0x1b3   : > { %1677 = vrot.lane.b32.xlu1 %v922_v11, %s9445_s22  ;;  %1583 = vrot.lane.b32.xlu0 %v843_v56, %s9444_s19 }
 0x1b5   : > { %v1474_v37 = vpop.permute.xlu1 %1473  ;;  %v10502_v44 = vpop.permute.xlu0 %1379 }
 0x1b6   : > { %v1908_v17 = vsel %vm560_vm6, %v1876_v1, %v1474_v37  ;;  %v1778_v37 = vsel %vm487_vm3, %v1746_v7, %v10439_v22 }
 0x1b7   : > { %1299 = vrot.lane.b32.xlu1 %v843_v56, %s9441_s17  ;;  %1013 = vrot.lane.b32.xlu0 %v841_v10, %s9439_s15  ;;  %v14423_v10 = vmax.f32 %v10541_v27, 0.0  ;;  %v1811_v21 = vsel %vm14405_vm8, %v1778_v37, %v10454_v32 }
 0x1b9   : > { %v10507_v53 = vpop.permute.xlu1 %1189  ;;  %v10509_v58 = vpop.permute.xlu0 %1095 }
 0x1bb   : > { %1679 = vrot.lane.b32.xlu1 %v924_v3, %s9445_s22  ;;  %1393 = vrot.lane.b32.xlu0 %v922_v11, %s9442_s18 }
 0x1bd   : > { %v1570_v20 = vpop.permute.xlu1 %1569  ;;  %v10513_v50 = vpop.permute.xlu0 %1475 }
 0x1be   : > { %v1941_v57 = vsel %vm1924_vm11, %v1908_v17, %v1570_v20 }
 0x1bf   : > { %1109 = vrot.lane.b32.xlu1 %v922_v11, %s9438_s14  ;;  %1015 = vrot.lane.b32.xlu0 %v843_v56, %s9439_s15 }
 0x1c1   : > { %v10531_v6 = vpop.permute.xlu1 %1285  ;;  %v10533_v28 = vpop.permute.xlu0 %1191 }
 0x1c3   : > { %v8616_v41 = vpop.f32.mrb[2].mxu0  ;;  %1489 = vrot.lane.b32.xlu1 %v713_v31, %s14473_s23  ;;  %1395 = vrot.lane.b32.xlu0 %v924_v3, %s9442_s18 }
 0x1c4   : > { %v10557_v19 = vadd.f32 %v8616_v41, %v10521_v23  ;;  %v2179_v12 = vpop.f32.mrb[3].mxu0 }
 0x1c5   : > { %v10562_v9 = vadd.f32 %v10521_v23, %v2179_v12  ;;  %v1666_v15 = vpop.permute.xlu1 %1665  ;;  %v10564_v47 = vpop.permute.xlu0 %1571 }
 0x1c6   : > { %v14421_v29 = vmax.f32 %v10557_v19, 0.0  ;;  %v1974_v60 = vsel %vm14400_vm12, %v1941_v57, %v1666_v15 }
 0x1c7   : > { %v14410_v45 = vmax.f32 %v10562_v9, 0.0  ;;  %1205 = vrot.lane.b32.xlu1 %v713_v31, %s9440_s16  ;;  %1111 = vrot.lane.b32.xlu0 %v924_v3, %s9438_s14 }
 0x1c8   : > { %v2523_v4 = vmax.f32 %v14423_v10, %v14421_v29  ;;  %8635 = vmatprep.mubr.msk.f32.mxu0 %vm2002_vm13, %v1974_v60  ;;  %v1844_v60 = vsel %vm1826_vm9, %v1811_v21, %v10479_v33 }
 0x1c9   : > { %v2522_v34 = vmax.f32 %v14422_v40, %v14410_v45  ;;  %v10587_v52 = vpop.permute.xlu1 %1287  ;;  %v10589_v42 = vpop.permute.xlu0 %1001  ;;  %v9388_v45 = vld [vmem:[#allocation2 + $0x108] sm:$0xff] }
 0x1ca   : > { %v2571_v11 = vcombine.high %v2523_v4, %v2523_v4  ;;  %v2578_v56 = vrot.slane %v2523_v4, %v10549_v8 }
 0x1cb   : > { %v2554_v3 = vcombine.high %v2522_v34, %v2522_v34  ;;  %v2561_v38 = vrot.slane %v2522_v34, %v10549_v8  ;;  %1585 = vrot.lane.b32.xlu1 %v10581_v2, %s9444_s19  ;;  %1491 = vrot.lane.b32.xlu0 %v10535_v51, %s14473_s23 }
 0x1cc   : > { %v2585_v63 = vrot.slane %v2571_v11, %v10549_v8  ;;  %v2586_v13 = vcombine.high %v2578_v56, %v2578_v56  ;;  %v2918_v20 = vsel %vm14398_vm14, %v2578_v56, -inf }
 0x1cd   : > { %v2919_v22 = vrot.slane %v2918_v20, 4  ;;  %v2568_v25 = vrot.slane %v2554_v3, %v10549_v8  ;;  %v2569_v16 = vcombine.high %v2561_v38, %v2561_v38  ;;  %v2890_v62 = vsel %vm14398_vm14, %v2561_v38, -inf  ;;  %v10617_v31 = vpop.permute.xlu1 %1667  ;;  %v10619_v54 = vpop.permute.xlu0 %1381 }
 0x1ce   : > { %v2587_v24 = vcombine.high %v2585_v63, %v2585_v63  ;;  %v2925_v1 = vsel %vm14398_vm14, %v2586_v13, -inf  ;;  %v2932_v32 = vsel %vm14398_vm14, %v2585_v63, -inf  ;;  %v2891_v41 = vrot.slane %v2890_v62, 4 }
 0x1cf   : > { %v2920_v46 = vmax.f32 %v2918_v20, %v2919_v22  ;;  %v2926_v17 = vrot.slane %v2925_v1, 4  ;;  %v2933_v12 = vrot.slane %v2932_v32, 4  ;;  %v2570_v35 = vcombine.high %v2568_v25, %v2568_v25  ;;  %1301 = vrot.lane.b32.xlu1 %v10581_v2, %s9441_s17  ;;  %1207 = vrot.lane.b32.xlu0 %v10535_v51, %s9440_s16 }
 0x1d0   : > { %v2939_v30 = vsel %vm14398_vm14, %v2587_v24, -inf  ;;  %v2892_v57 = vmax.f32 %v2890_v62, %v2891_v41  ;;  %v2897_v15 = vsel %vm14398_vm14, %v2569_v16, -inf  ;;  %v2904_v59 = vsel %vm14398_vm14, %v2568_v25, -inf }
 0x1d1   : > { %v2927_v18 = vmax.f32 %v2925_v1, %v2926_v17  ;;  %v2934_v4 = vmax.f32 %v2932_v32, %v2933_v12  ;;  %v2940_v34 = vrot.slane %v2939_v30, 4  ;;  %v10632_v7 = vpop.permute.xlu1 %1097  ;;  %v10634_v11 = vpop.permute.xlu0 %1003  ;;  %v2898_v37 = vrot.slane %v2897_v15, 4 }
 0x1d2   : > { %v2893_v56 = vrot.slane %v2892_v57, 2  ;;  %v2905_v3 = vrot.slane %v2904_v59, 4  ;;  %v2911_v38 = vsel %vm14398_vm14, %v2570_v35, -inf  ;;  %v1877_v63 = vsel %vm1859_vm10, %v1844_v60, %v10502_v44  ;;  %v718_v60 = vld [vmem:[#allocation2 + $0x178] sm:$0x3] }
 0x1d3   : > { %v2921_v13 = vrot.slane %v2920_v46, 2  ;;  %v2928_v20 = vrot.slane %v2927_v18, 2  ;;  %v2941_v22 = vmax.f32 %v2939_v30, %v2940_v34  ;;  %1681 = vrot.lane.b32.xlu1 %v10594_v14, %s9445_s22  ;;  %1587 = vrot.lane.b32.xlu0 %v10601_v48, %s9444_s19  ;;  %v2899_v21 = vmax.f32 %v2897_v15, %v2898_v37 }
 0x1d4   : > { %v2894_v33 = vmax.f32 %v2892_v57, %v2893_v56  ;;  %v2906_v25 = vmax.f32 %v2904_v59, %v2905_v3  ;;  %v2912_v16 = vrot.slane %v2911_v38, 4  ;;  %v1909_v62 = vsel %vm560_vm6, %v1877_v63, %v10513_v50  ;;  %v10660_v59 = vld [vmem:[#allocation2 + $0x170] sm:$0xff]  ;;  %v10669_v63 = vld [vmem:[#allocation2 + $0x168] sm:$0xff] }
 0x1d5   : > { %v2935_v24 = vrot.slane %v2934_v4, 2  ;;  %v10645_v44 = vpop.permute.xlu1 %1477  ;;  %v10647_v1 = vpop.permute.xlu0 %1383  ;;  %v10652_v32 = vsel %vm14399_vm4, %v926_v61, %v928_v55  ;;  %v2942_v41 = vrot.slane %v2941_v22, 2  ;;  %v2900_v17 = vrot.slane %v2899_v21, 2 }
 0x1d6   : > { %v2907_v12 = vrot.slane %v2906_v25, 2  ;;  %v2913_v35 = vmax.f32 %v2911_v38, %v2912_v16  ;;  %v2922_v30 = vmax.f32 %v2920_v46, %v2921_v13  ;;  %v2929_v57 = vmax.f32 %v2927_v18, %v2928_v20 }
 0x1d7   : > { %v1942_v50 = vsel %vm1924_vm11, %v1909_v62, %v10564_v47  ;;  %1397 = vrot.lane.b32.xlu1 %v10594_v14, %s9442_s18  ;;  %1303 = vrot.lane.b32.xlu0 %v10601_v48, %s9441_s17  ;;  %v2895_v51 = vrot.slane %v2894_v33, 1  ;;  %v2901_v15 = vmax.f32 %v2899_v21, %v2900_v17  ;;  %v2936_v34 = vmax.f32 %v2934_v4, %v2935_v24 }
 0x1d8   : > { %v2908_v61 = vmax.f32 %v2906_v25, %v2907_v12  ;;  %v2914_v55 = vrot.slane %v2913_v35, 2  ;;  %vm14403_vm14 = vcmask 1045509   ;;  %vm14402_vm4 = vcmask 1046534  }
 0x1d9   : > { %v1975_v46 = vsel %vm14400_vm12, %v1942_v50, %v10617_v31  ;;  %v10664_v47 = vpop.permute.xlu1 %1193  ;;  %v10666_v18 = vpop.permute.xlu0 %1099  ;;  %v2943_v56 = vmax.f32 %v2941_v22, %v2942_v41  ;;  %v2902_v37 = vrot.slane %v2901_v15, 1  ;;  %v2923_v13 = vrot.slane %v2922_v30, 1 }
 0x1da   : > { %v2909_v3 = vrot.slane %v2908_v61, 1  ;;  %v2915_v38 = vmax.f32 %v2913_v35, %v2914_v55  ;;  %8636 = vmatmul.mubr.msk.f32.gmra.mrb[16].mxu0 %vm2002_vm13, %v1975_v46  ;;  %v2930_v20 = vrot.slane %v2929_v57, 1  ;;  %v850_v4 = vrot.slane %v10660_v59, 1 }
 0x1db   : > { %1399 = vrot.lane.b32.xlu1 %v10652_v32, %s9442_s18  ;;  %v852_v31 = vrot.slane %v718_v60, 1  ;;  %v2896_v21 = vmax.f32 %v2894_v33, %v2895_v51  ;;  %v2903_v25 = vmax.f32 %v2901_v15, %v2902_v37  ;;  %1683 = vrot.lane.b32.xlu0 %v10652_v32, %s9445_s22  ;;  %v2937_v22 = vrot.slane %v2936_v34, 1 }
 0x1dc   : > { %v2910_v16 = vmax.f32 %v2908_v61, %v2909_v3  ;;  %v2916_v62 = vrot.slane %v2915_v38, 1  ;;  %vm14404_vm12 = vcmask 1047559   ;;  %v849_v17 = vrot.slane %v10669_v63, 1 }
 0x1dd   : > { %v1574_v24 = vpop.permute.xlu1 %1573  ;;  %v1480_v41 = vpop.permute.xlu0 %1479  ;;  %v931_v12 = vrot.slane %v10660_v59, 2  ;;  %v2944_v35 = vrot.slane %v2943_v56, 1  ;;  %v3403_v55 = vsel %vm3402_vm1, %v2903_v25, %v2896_v21  ;;  %v933_v46 = vrot.slane %v718_v60, 2 }
 0x1de   : > { %v2917_v50 = vmax.f32 %v2915_v38, %v2916_v62  ;;  %v1747_v33 = vsel %vm14412_vm0, %v10118_v5, %v10481_v26  ;;  %v2924_v51 = vmax.f32 %v2922_v30, %v2923_v13  ;;  %v3405_v15 = vsel %vm14460_vm2, %v2910_v16, %v3403_v55 }
 0x1df   : > { %1495 = vrot.lane.b32.xlu1 %v10660_v59, %s14473_s23  ;;  %v930_v61 = vrot.slane %v10669_v63, 2  ;;  %v1779_v37 = vsel %vm487_vm3, %v1747_v33, %v10496_v39  ;;  %v2931_v3 = vmax.f32 %v2929_v57, %v2930_v20  ;;  %1493 = vrot.lane.b32.xlu0 %v10669_v63, %s14473_s23  ;;  %v10692_v60 = vsel %vm14435_vm5, %v850_v4, %v852_v31 }
 0x1e0   : > { %v3407_v38 = vsel %vm14462_vm7, %v2917_v50, %v3405_v15  ;;  %v1812_v5 = vsel %vm14405_vm8, %v1779_v37, %v10507_v53  ;;  %v2938_v26 = vmax.f32 %v2936_v34, %v2937_v22  ;;  %v851_v39 = vsel %vm14435_vm5, %v849_v17, %v850_v4  ;;  %v9385_v50 = vld [vmem:[#allocation2 + $0xe0] sm:$0xff] }
 0x1e1   : > { %v3409_v30 = vsel %vm14401_vm15, %v2924_v51, %v3407_v38  ;;  %v10697_v13 = vpop.permute.xlu1 %1289  ;;  %v10699_v21 = vpop.permute.xlu0 %1195  ;;  %v1845_v57 = vsel %vm1826_vm9, %v1812_v5, %v10531_v6  ;;  %v2945_v20 = vmax.f32 %v2943_v56, %v2944_v35  ;;  %vm14475_vm15 = vcmask 1045504   ;;  %v719_v38 = vld [vmem:[#allocation2 + $0x180] sm:$0xff] }
 0x1e2   : > { %v3411_v25 = vsel %vm14403_vm14, %v2931_v3, %v3409_v30  ;;  %v1878_v53 = vsel %vm1859_vm10, %v1845_v57, %v10619_v54  ;;  %v10715_v6 = vsel %vm14475_vm15, %v931_v12, %v933_v46  ;;  %vm14477_vm14 = vcmask 261120  }
 0x1e3   : > { %v3413_v31 = vsel %vm14402_vm4, %v2938_v26, %v3411_v25  ;;  %v8619_v34 = vpop.f32.mrb[4].mxu0  ;;  %1591 = vrot.lane.b32.xlu1 %v10692_v60, %s9444_s19  ;;  %v1910_v4 = vsel %vm560_vm6, %v1878_v53, %v10645_v44  ;;  %1589 = vrot.lane.b32.xlu0 %v851_v39, %s9444_s19  ;;  %vm14476_vm4 = vmmov %vm14475_vm15  ;;  %v1748_v44 = vsel %vm14412_vm0, %v9385_v50, %v10498_v36  ;;  %v938_v53 = vrot.slane %v719_v38, 1 }
 0x1e4   : > { %v3415_v16 = vsel %vm14404_vm12, %v2945_v20, %v3413_v31  ;;  %v2189_v62 = vpop.f32.mrb[5].mxu0  ;;  %v1943_v56 = vsel %vm1924_vm11, %v1910_v4, %v1574_v24  ;;  %v932_v17 = vsel %vm14476_vm4, %v930_v61, %v931_v12  ;;  %v1780_v55 = vsel %vm487_vm3, %v1748_v44, %v10509_v58  ;;  %vm14478_vm4 = vmmov %vm14477_vm14 }
 0x1e5   : > { %3474 = vst.msk [vmem:[#allocation3 + $0x11] sm:$0xff] %vm487_vm3, %v3415_v16  ;;  %v1670_v54 = vpop.permute.xlu1 %1669  ;;  %v1576_v22 = vpop.permute.xlu0 %1575  ;;  %v1813_v24 = vsel %vm14405_vm8, %v1780_v55, %v10533_v28  ;;  %v10790_v57 = vadd.f32 %v8619_v34, %v10521_v23  ;;  %v943_v4 = vrot.slane %v719_v38, 2 }
 0x1e6   : > { %v1976_v35 = vsel %vm14477_vm14, %v1943_v56, %v1670_v54  ;;  %v1846_v36 = vsel %vm1826_vm9, %v1813_v24, %v10587_v52  ;;  %vm14479_vm14 = vmmov %vm14478_vm4 }
 0x1e7   : > { %1687 = vrot.lane.b32.xlu1 %v10715_v6, %s9445_s22  ;;  %8638 = vmatprep.mubr.msk.f32.mxu0 %vm2002_vm13, %v1976_v35  ;;  %v1879_v33 = vsel %vm1859_vm10, %v1846_v36, %v10647_v1 }
 0x1e8   : > { %1685 = vrot.lane.b32.xlu0 %v932_v17, %s9445_s22  ;;  %v1911_v58 = vsel %vm560_vm6, %v1879_v33, %v1480_v41 }
 0x1e9   : > { %v10731_v12 = vpop.permute.xlu1 %1291  ;;  %v10733_v46 = vpop.permute.xlu0 %1005  ;;  %v1944_v28 = vsel %vm1924_vm11, %v1911_v58, %v1576_v22 }
 0x1eb   : > { %1019 = vrot.lane.b32.xlu1 %v10601_v48, %s9439_s15 }
 0x1ec   : > { %1017 = vrot.lane.b32.xlu0 %v10581_v2, %s9439_s15 }
 0x1ed   : > { %v1672_v51 = vpop.permute.xlu1 %1671  ;;  %v1386_v15 = vpop.permute.xlu0 %1385 }
 0x1ee   : > { %v1977_v61 = vsel %vm14478_vm4, %v1944_v28, %v1672_v51  ;;  %vm14480_vm4 = vcmask 58368  }
 0x1ef   : > { %1115 = vrot.lane.b32.xlu1 %v10652_v32, %s9438_s14  ;;  %8639 = vmatmul.mubr.msk.f32.gmra.mrb[18].mxu0 %vm2002_vm13, %v1977_v61  ;;  %v9387_v61 = vld [vmem:[#allocation2 + $0xf8] sm:$0xff]  ;;  %vm14483_vm12 = vmmov %vm14480_vm4 }
 0x1f0   : > { %1113 = vrot.lane.b32.xlu0 %v10594_v14, %s9438_s14 }
 0x1f1   : > { %v10751_v52 = vpop.permute.xlu1 %1101  ;;  %v10753_v48 = vpop.permute.xlu0 %1007 }
 0x1f3   : > { %1211 = vrot.lane.b32.xlu1 %v10660_v59, %s9440_s16 }
 0x1f4   : > { %1209 = vrot.lane.b32.xlu0 %v10669_v63, %s9440_s16  ;;  %v9386_v63 = vld [vmem:[#allocation2 + $0xf0] sm:$0xff] }
 0x1f5   : > { %v1482_v2 = vpop.permute.xlu1 %1481  ;;  %v10759_v1 = vpop.permute.xlu0 %1387  ;;  %v1749_v37 = vsel %vm14412_vm0, %v9386_v63, %v10589_v42 }
 0x1f6   : > { %v1781_v3 = vsel %vm487_vm3, %v1749_v37, %v10632_v7  ;;  %v10793_v7 = vadd.f32 %v10521_v23, %v2189_v62 }
 0x1f7   : > { %1021 = vrot.lane.b32.xlu1 %v851_v39, %s9439_s15  ;;  %v1814_v5 = vsel %vm14405_vm8, %v1781_v3, %v10664_v47  ;;  %v10797_v47 = vld [vmem:[#allocation2 + $0x190] sm:$0x3] }
 0x1f8   : > { %1305 = vrot.lane.b32.xlu0 %v851_v39, %s9441_s17  ;;  %v10785_v39 = vld [vmem:[#allocation2 + $0x188] sm:$0xff]  ;;  %v1847_v42 = vsel %vm1826_vm9, %v1814_v5, %v10697_v13  ;;  %v941_v44 = vrot.slane %v10797_v47, 1  ;;  %v14407_v55 = vmax.f32 %v10793_v7, 0.0  ;;  %v946_v5 = vrot.slane %v10797_v47, 2 }
 0x1f9   : > { %v10763_v32 = vpop.permute.xlu1 %1197  ;;  %v10765_v14 = vpop.permute.xlu0 %1103  ;;  %v939_v34 = vrot.slane %v10785_v39, 1  ;;  %v944_v22 = vrot.slane %v10785_v39, 2 }
 0x1fb   : > { %1401 = vrot.lane.b32.xlu1 %v932_v17, %s9442_s18  ;;  %v940_v33 = vsel %vm14435_vm5, %v938_v53, %v939_v34  ;;  %v10845_v63 = vsel %vm14435_vm5, %v939_v34, %v941_v44 }
 0x1fc   : > { %1307 = vrot.lane.b32.xlu0 %v10692_v60, %s9441_s17 }
 0x1fd   : > { %v1578_v59 = vpop.permute.xlu1 %1577  ;;  %v10770_v41 = vpop.permute.xlu0 %1483 }
 0x1ff   : > { %1117 = vrot.lane.b32.xlu1 %v932_v17, %s9438_s14  ;;  %v14409_v17 = vmax.f32 %v10790_v57, 0.0 }
 0x200   : > { %1023 = vrot.lane.b32.xlu0 %v10692_v60, %s9439_s15  ;;  %v1880_v60 = vsel %vm1859_vm10, %v1847_v42, %v1386_v15  ;;  %v10839_v15 = vsel %vm14475_vm15, %v943_v4, %v944_v22  ;;  %vm14482_vm15 = vmmov %vm14480_vm4  ;;  %s14471_s15 = smov 40  }
 0x201   : > { %v10781_v26 = vpop.permute.xlu1 %1293  ;;  %v10783_v30 = vpop.permute.xlu0 %1199  ;;  %v1912_v25 = vsel %vm560_vm6, %v1880_v60, %v1482_v2 }
 0x202   : > { %v1945_v16 = vsel %vm1924_vm11, %v1912_v25, %v1578_v59 }
 0x203   : > { %v8622_v20 = vpop.f32.mrb[6].mxu0  ;;  %1497 = vrot.lane.b32.xlu1 %v719_v38, %s14473_s23 }
 0x204   : > { %v10801_v31 = vadd.f32 %v8622_v20, %v10521_v23  ;;  %v2199_v13 = vpop.f32.mrb[7].mxu0  ;;  %1403 = vrot.lane.b32.xlu0 %v10715_v6, %s9442_s18 }
 0x205   : > { %v10808_v62 = vadd.f32 %v10521_v23, %v2199_v13  ;;  %v1674_v56 = vpop.permute.xlu1 %1673  ;;  %v10810_v54 = vpop.permute.xlu0 %1579 }
 0x206   : > { %v14408_v35 = vmax.f32 %v10801_v31, 0.0  ;;  %v1978_v50 = vsel %vm14479_vm14, %v1945_v16, %v1674_v56  ;;  %vm14481_vm14 = vmmov %vm14480_vm4 }
 0x207   : > { %v14406_v24 = vmax.f32 %v10808_v62, 0.0  ;;  %1213 = vrot.lane.b32.xlu1 %v719_v38, %s9440_s16  ;;  %8641 = vmatprep.mubr.msk.f32.mxu0 %vm2002_vm13, %v1978_v50 }
 0x208   : > { %v2525_v36 = vmax.f32 %v14409_v17, %v14408_v35  ;;  %1119 = vrot.lane.b32.xlu0 %v10715_v6, %s9438_s14  ;;  %v1750_v6 = vsel %vm14412_vm0, %v9387_v61, %v10634_v11 }
 0x209   : > { %v2524_v58 = vmax.f32 %v14407_v55, %v14406_v24  ;;  %v10832_v28 = vpop.permute.xlu1 %1295  ;;  %v10834_v51 = vpop.permute.xlu0 %1009  ;;  %v1782_v37 = vsel %vm487_vm3, %v1750_v6, %v10666_v18 }
 0x20a   : > { %v2605_v2 = vcombine.high %v2525_v36, %v2525_v36  ;;  %v2612_v59 = vrot.slane %v2525_v36, %v10549_v8  ;;  %v1815_v42 = vsel %vm14405_vm8, %v1782_v37, %v10699_v21  ;;  %vm14484_vm8 = vmmov %vm14480_vm4 }
 0x20b   : > { %v2588_v3 = vcombine.high %v2524_v58, %v2524_v58  ;;  %v2595_v38 = vrot.slane %v2524_v58, %v10549_v8  ;;  %1593 = vrot.lane.b32.xlu1 %v940_v33, %s9444_s19  ;;  %v1848_v37 = vsel %vm1826_vm9, %v1815_v42, %v10731_v12 }
 0x20c   : > { %v2619_v11 = vrot.slane %v2605_v2, %v10549_v8  ;;  %v2620_v60 = vcombine.high %v2612_v59, %v2612_v59  ;;  %v2974_v20 = vsel %vm14480_vm4, %v2612_v59, -inf  ;;  %1499 = vrot.lane.b32.xlu0 %v10785_v39, %s14473_s23 }
 0x20d   : > { %v2975_v25 = vrot.slane %v2974_v20, 4  ;;  %v2602_v18 = vrot.slane %v2588_v3, %v10549_v8  ;;  %v2603_v53 = vcombine.high %v2595_v38, %v2595_v38  ;;  %v2946_v13 = vsel %vm14481_vm14, %v2595_v38, -inf  ;;  %v1676_v34 = vpop.permute.xlu1 %1675  ;;  %v10860_v16 = vpop.permute.xlu0 %1389  ;;  %vm14485_vm14 = vmmov %vm14480_vm4 }
 0x20e   : > { %v2621_v47 = vcombine.high %v2619_v11, %v2619_v11  ;;  %v2981_v21 = vsel %vm14482_vm15, %v2620_v60, -inf  ;;  %v2988_v4 = vsel %vm14483_vm12, %v2619_v11, -inf  ;;  %v2947_v56 = vrot.slane %v2946_v13, 4  ;;  %vm14486_vm12 = vmmov %vm14480_vm4 }
 0x20f   : > { %v2976_v50 = vmax.f32 %v2974_v20, %v2975_v25  ;;  %v2982_v44 = vrot.slane %v2981_v21, 4  ;;  %v2989_v36 = vrot.slane %v2988_v4, 4  ;;  %v2604_v58 = vcombine.high %v2602_v18, %v2602_v18  ;;  %1309 = vrot.lane.b32.xlu1 %v940_v33, %s9441_s17 }
 0x210   : > { %v2995_v61 = vsel %vm14480_vm4, %v2621_v47, -inf  ;;  %v2948_v6 = vmax.f32 %v2946_v13, %v2947_v56  ;;  %v2953_v2 = vsel %vm14484_vm8, %v2603_v53, -inf  ;;  %v2960_v59 = vsel %vm14485_vm14, %v2602_v18, -inf  ;;  %1215 = vrot.lane.b32.xlu0 %v10785_v39, %s9440_s16  ;;  %s14424_s16 = smov 48  }
 0x211   : > { %v2983_v3 = vmax.f32 %v2981_v21, %v2982_v44  ;;  %v2990_v38 = vmax.f32 %v2988_v4, %v2989_v36  ;;  %v2996_v11 = vrot.slane %v2995_v61, 4  ;;  %v10872_v60 = vpop.permute.xlu1 %1105  ;;  %v10874_v20 = vpop.permute.xlu0 %1011  ;;  %v2954_v25 = vrot.slane %v2953_v2, 4 }
 0x212   : > { %v2949_v33 = vrot.slane %v2948_v6, 2  ;;  %v2961_v13 = vrot.slane %v2960_v59, 4  ;;  %v2967_v53 = vsel %vm14486_vm12, %v2604_v58, -inf  ;;  %v1881_v18 = vsel %vm1859_vm10, %v1848_v37, %v10759_v1 }
 0x213   : > { %v2977_v47 = vrot.slane %v2976_v50, 2  ;;  %v2984_v56 = vrot.slane %v2983_v3, 2  ;;  %v2997_v24 = vmax.f32 %v2995_v61, %v2996_v11  ;;  %1689 = vrot.lane.b32.xlu1 %v10839_v15, %s9445_s22  ;;  %v2955_v42 = vmax.f32 %v2953_v2, %v2954_v25 }
 0x214   : > { %v2950_v12 = vmax.f32 %v2948_v6, %v2949_v33  ;;  %v2962_v21 = vmax.f32 %v2960_v59, %v2961_v13  ;;  %v2968_v4 = vrot.slane %v2967_v53, 4  ;;  %1595 = vrot.lane.b32.xlu0 %v10845_v63, %s9444_s19  ;;  %v1913_v44 = vsel %vm560_vm6, %v1881_v18, %v10770_v41 }
 0x215   : > { %v2991_v36 = vrot.slane %v2990_v38, 2  ;;  %v10885_v58 = vpop.permute.xlu1 %1485  ;;  %v10887_v1 = vpop.permute.xlu0 %1391  ;;  %v2998_v37 = vrot.slane %v2997_v24, 2  ;;  %v2956_v61 = vrot.slane %v2955_v42, 2  ;;  %v2978_v35 = vmax.f32 %v2976_v50, %v2977_v47  ;;  %v10900_v50 = vld [vmem:[#allocation2 + $0x1a8] sm:$0x3] }
 0x216   : > { %v2963_v11 = vrot.slane %v2962_v21, 2  ;;  %v2969_v55 = vmax.f32 %v2967_v53, %v2968_v4  ;;  %v2985_v6 = vmax.f32 %v2983_v3, %v2984_v56  ;;  %v1946_v2 = vsel %vm1924_vm11, %v1913_v44, %v10810_v54  ;;  %v10898_v53 = vld [vmem:[#allocation2 + $0x1a0] sm:$0xff]  ;;  %v722_v56 = vld [vmem:[#allocation2 + $0x198] sm:$0xff] }
 0x217   : > { %1405 = vrot.lane.b32.xlu1 %v10839_v15, %s9442_s18  ;;  %vm14487_vm8 = vcmask 1045504   ;;  %v2951_v59 = vrot.slane %v2950_v12, 1  ;;  %v2957_v33 = vmax.f32 %v2955_v42, %v2956_v61  ;;  %v2992_v3 = vmax.f32 %v2990_v38, %v2991_v36 }
 0x218   : > { %v947_v41 = vsel %vm14487_vm8, %v944_v22, %v946_v5  ;;  %v2964_v25 = vmax.f32 %v2962_v21, %v2963_v11  ;;  %v2970_v13 = vrot.slane %v2969_v55, 2  ;;  %1311 = vrot.lane.b32.xlu0 %v10845_v63, %s9441_s17  ;;  %vm14488_vm15 = vcmask 261120  }
 0x219   : > { %v1979_v54 = vsel %vm14488_vm15, %v1946_v2, %v1676_v34  ;;  %v10903_v18 = vpop.permute.xlu1 %1201  ;;  %v10905_v15 = vpop.permute.xlu0 %1107  ;;  %v2999_v39 = vmax.f32 %v2997_v24, %v2998_v37  ;;  %v2958_v22 = vrot.slane %v2957_v33, 1  ;;  %v2979_v42 = vrot.slane %v2978_v35, 1 }
 0x21a   : > { %v2965_v5 = vrot.slane %v2964_v25, 1  ;;  %v2971_v47 = vmax.f32 %v2969_v55, %v2970_v13  ;;  %8642 = vmatmul.mubr.msk.f32.gmra.mrb[20].mxu0 %vm2002_vm13, %v1979_v54  ;;  %v2986_v63 = vrot.slane %v2985_v6, 1  ;;  %v952_v21 = vrot.slane %v10898_v53, 1 }
 0x21b   : > { %1407 = vrot.lane.b32.xlu1 %v947_v41, %s9442_s18  ;;  %v954_v38 = vrot.slane %v10900_v50, 1  ;;  %v2952_v34 = vmax.f32 %v2950_v12, %v2951_v59  ;;  %v2959_v4 = vmax.f32 %v2957_v33, %v2958_v22  ;;  %v2993_v24 = vrot.slane %v2992_v3, 1  ;;  %s9449_s18 = smov 56  }
 0x21c   : > { %v2966_v44 = vmax.f32 %v2964_v25, %v2965_v5  ;;  %v2972_v36 = vrot.slane %v2971_v47, 1  ;;  %1691 = vrot.lane.b32.xlu0 %v947_v41, %s9445_s22  ;;  %v957_v61 = vrot.slane %v10898_v53, 2  ;;  %v951_v11 = vrot.slane %v722_v56, 1 }
 0x21d   : > { %v1582_v37 = vpop.permute.xlu1 %1581  ;;  %v10912_v55 = vpop.permute.xlu0 %1487  ;;  %v3000_v2 = vrot.slane %v2999_v39, 1  ;;  %v3416_v54 = vsel %vm3402_vm1, %v2959_v4, %v2952_v34  ;;  %v956_v17 = vrot.slane %v722_v56, 2  ;;  %v1751_v12 = vsel %vm14412_vm0, %v9388_v45, %v10733_v46  ;;  %v3484_v4 = vld [vmem:[#allocation3 + $0x10] sm:$0xff] }
 0x21e   : > { %v2973_v13 = vmax.f32 %v2971_v47, %v2972_v36  ;;  %v2980_v59 = vmax.f32 %v2978_v35, %v2979_v42  ;;  %v3417_v33 = vsel %vm14460_vm2, %v2966_v44, %v3416_v54  ;;  %v959_v41 = vrot.slane %v10900_v50, 2  ;;  %v3485_v44 = vld [vmem:[#allocation3 + $0x18] sm:$0x3] }
 0x21f   : > { %1503 = vrot.lane.b32.xlu1 %v10898_v53, %s14473_s23  ;;  %v1783_v25 = vsel %vm487_vm3, %v1751_v12, %v10751_v52  ;;  %v2987_v22 = vmax.f32 %v2985_v6, %v2986_v63  ;;  %v955_v47 = vsel %vm14435_vm5, %v952_v21, %v954_v38  ;;  %vm14489_vm4 = vcmask 97280   ;;  %v3482_v63 = vld [vmem:[#allocation3] sm:$0xff]  ;;  %v3483_v38 = vld [vmem:[#allocation3 + $0x8] sm:$0x3] }
 0x220   : > { %v3418_v5 = vsel %vm14462_vm7, %v2973_v13, %v3417_v33  ;;  %1501 = vrot.lane.b32.xlu0 %v722_v56, %s14473_s23  ;;  %v1816_v45 = vsel %vm14489_vm4, %v1783_v25, %v10763_v32  ;;  %v2994_v46 = vmax.f32 %v2992_v3, %v2993_v24  ;;  %vm14490_vm14 = vcmask 1044484   ;;  %v9389_v33 = vld [vmem:[#allocation2 + $0x110] sm:$0xff] }
 0x221   : > { %v3419_v35 = vsel %vm14490_vm14, %v2980_v59, %v3418_v5  ;;  %v10930_v42 = vpop.permute.xlu1 %1297  ;;  %v10932_v53 = vpop.permute.xlu0 %1203  ;;  %v953_v50 = vsel %vm14435_vm5, %v951_v11, %v952_v21  ;;  %v1849_v52 = vsel %vm1826_vm9, %v1816_v45, %v10781_v26  ;;  %v3001_v6 = vmax.f32 %v2999_v39, %v3000_v2 }
 0x222   : > { %vm14491_vm12 = vcmask 1045509   ;;  %vm14492_vm8 = vcmask 1046534   ;;  %v1882_v32 = vsel %vm1859_vm10, %v1849_v52, %v10860_v16  ;;  %vm14493_vm15 = vcmask 1047559  }
 0x223   : > { %v3420_v56 = vsel %vm14491_vm12, %v2987_v22, %v3419_v35  ;;  %v10941_v3 = vpop.f32.mrb[8].mxu0  ;;  %1599 = vrot.lane.b32.xlu1 %v955_v47, %s9444_s19  ;;  %v1914_v26 = vsel %vm560_vm6, %v1882_v32, %v10885_v58  ;;  %vm14494_vm4 = vcmask 1045504   ;;  %v3518_v13 = vrot.slane %v3482_v63, 1 }
 0x224   : > { %v3421_v34 = vsel %vm14492_vm8, %v2994_v46, %v3420_v56  ;;  %v10947_v39 = vpop.f32.mrb[9].mxu0  ;;  %1597 = vrot.lane.b32.xlu0 %v953_v50, %s9444_s19  ;;  %v960_v36 = vsel %vm14494_vm4, %v957_v61, %v959_v41  ;;  %v1947_v16 = vsel %vm1924_vm11, %v1914_v26, %v1582_v37  ;;  %vm14495_vm14 = vmmov %vm14494_vm4  ;;  %v3519_v54 = vrot.slane %v3483_v38, 1 }
 0x225   : > { %v3422_v21 = vsel %vm14493_vm15, %v3001_v6, %v3421_v34  ;;  %v1678_v24 = vpop.permute.xlu1 %1677  ;;  %v1584_v11 = vpop.permute.xlu0 %1583  ;;  %v958_v2 = vsel %vm14495_vm14, %v956_v17, %v957_v61  ;;  %vm14496_vm12 = vcmask 261120   ;;  %v3521_v59 = vrot.slane %v3484_v4, 1  ;;  %vm14498_vm15 = vmmov %vm14494_vm4 }
 0x226   : > { %3475 = vst.msk [vmem:[#allocation3 + $0x21] sm:$0xff] %vm487_vm3, %v3422_v21  ;;  %v1980_v12 = vsel %vm14496_vm12, %v1947_v16, %v1678_v24  ;;  %v3522_v58 = vrot.slane %v3485_v44, 1  ;;  %v1752_v25 = vsel %vm14412_vm0, %v9389_v33, %v10753_v48  ;;  %vm14497_vm8 = vcmask 97280   ;;  %vm14499_vm4 = vmmov %vm14496_vm12 }
 0x227   : > { %1695 = vrot.lane.b32.xlu1 %v960_v36, %s9445_s22  ;;  %8644 = vmatprep.mubr.msk.f32.mxu0 %vm2002_vm13, %v1980_v12  ;;  %v1784_v37 = vsel %vm487_vm3, %v1752_v25, %v10765_v14  ;;  %v3520_v22 = vsel %vm14435_vm5, %v3518_v13, %v3519_v54  ;;  %v3542_v5 = vrot.slane %v3482_v63, 2  ;;  %v3543_v48 = vrot.slane %v3483_v38, 2  ;;  %v9390_v12 = vld [vmem:[#allocation2 + $0x120] sm:$0xff] }
 0x228   : > { %1693 = vrot.lane.b32.xlu0 %v958_v2, %s9445_s22  ;;  %v1817_v17 = vsel %vm14497_vm8, %v1784_v37, %v10783_v30  ;;  %v3523_v45 = vsel %vm14435_vm5, %v3521_v59, %v3522_v58  ;;  %v3545_v46 = vrot.slane %v3484_v4, 2  ;;  %v3546_v14 = vrot.slane %v3485_v44, 2  ;;  %vm14500_vm8 = vmmov %vm14495_vm14 }
 0x229   : > { %v10964_v61 = vpop.permute.xlu1 %1299  ;;  %v10966_v41 = vpop.permute.xlu0 %1013  ;;  %v1850_v47 = vsel %vm1826_vm9, %v1817_v17, %v10832_v28  ;;  %v3544_v28 = vsel %vm14498_vm15, %v3542_v5, %v3543_v48  ;;  %vm14411_vm12 = vcmask 392192   ;;  %v1753_v59 = vsel %vm14412_vm0, %v9390_v12, %v10834_v51 }
 0x22a   : > { %v1883_v35 = vsel %vm1859_vm10, %v1850_v47, %v10887_v1  ;;  %v3547_v63 = vsel %vm14495_vm14, %v3545_v46, %v3546_v14  ;;  %533 = vst.msk [vmem:[#allocation5] sm:$0xff] %vm14411_vm12, %v14430_v0  ;;  %537 = vst.msk [vmem:[#allocation5 + $0x90] sm:$0xff] %vm14411_vm12, %v14430_v0  ;;  %v1785_v58 = vsel %vm487_vm3, %v1753_v59, %v10872_v60  ;;  %vm14501_vm15 = vcmask 97280  }
 0x22b   : > { %3584 = vrot.lane.b32.xlu1 %v3523_v45, %s9438_s14  ;;  %v1915_v30 = vsel %vm560_vm6, %v1883_v35, %v10912_v55  ;;  %v1818_v33 = vsel %vm14501_vm15, %v1785_v58, %v10903_v18  ;;  %v11031_v51 = vadd.f32 %v10521_v23, %v10947_v39  ;;  %vm14503_vm14 = vmmov %vm14501_vm15  ;;  %vm14505_vm15 = vcmask 58368  }
 0x22c   : > { %3582 = vrot.lane.b32.xlu0 %v3520_v22, %s9438_s14  ;;  %v1948_v50 = vsel %vm1924_vm11, %v1915_v30, %v1584_v11  ;;  %v1851_v17 = vsel %vm1826_vm9, %v1818_v33, %v10930_v42  ;;  %v11027_v22 = vadd.f32 %v10941_v3, %v10521_v23  ;;  %v9391_v30 = vld [vmem:[#allocation2 + $0x128] sm:$0xff] }
 0x22d   : > { %v1680_v52 = vpop.permute.xlu1 %1679  ;;  %v1394_v6 = vpop.permute.xlu0 %1393  ;;  %v3486_v1 = vld [vmem:[#allocation3 + $0x20] sm:$0xff]  ;;  %v3487_v38 = vld [vmem:[#allocation3 + $0x28] sm:$0x3] }
 0x22e   : > { %v1981_v56 = vsel %vm14499_vm4, %v1948_v50, %v1680_v52  ;;  %v3524_v32 = vrot.slane %v3486_v1, 1  ;;  %v3525_v44 = vrot.slane %v3487_v38, 1  ;;  %v3549_v11 = vrot.slane %v3487_v38, 2 }
 0x22f   : > { %3608 = vrot.lane.b32.xlu1 %v3547_v63, %s9441_s17  ;;  %8645 = vmatmul.mubr.msk.f32.gmra.mrb[22].mxu0 %vm2002_vm13, %v1981_v56  ;;  %v1884_v60 = vsel %vm1859_vm10, %v1851_v17, %v1394_v6  ;;  %v14420_v46 = vmax.f32 %v11027_v22, 0.0  ;;  %v1754_v50 = vsel %vm14412_vm0, %v9391_v30, %v10874_v20  ;;  %v14414_v52 = vmax.f32 %v11031_v51, 0.0 }
 0x230   : > { %3606 = vrot.lane.b32.xlu0 %v3544_v28, %s9441_s17  ;;  %v10992_v36 = vsel %vm14435_vm5, %v3524_v32, %v3525_v44 }
 0x231   : > { %v10985_v55 = vpop.permute.xlu1 %1109  ;;  %v10987_v34 = vpop.permute.xlu0 %1015 }
 0x233   : > { %3632 = vrot.lane.b32.xlu1 %v3486_v1, %s14473_s23 }
 0x234   : > { %3630 = vrot.lane.b32.xlu0 %v3484_v4, %s14473_s23  ;;  %v3548_v4 = vrot.slane %v3486_v1, 2 }
 0x235   : > { %v1490_v21 = vpop.permute.xlu1 %1489  ;;  %v1396_v26 = vpop.permute.xlu0 %1395 }
 0x236   : > { %v11009_v54 = vsel %vm14500_vm8, %v3548_v4, %v3549_v11  ;;  %v1916_v18 = vsel %vm560_vm6, %v1884_v60, %v1490_v21  ;;  %v9393_v4 = vld [vmem:[#allocation2 + $0x140] sm:$0xff]  ;;  %vm14504_vm8 = vmmov %vm14503_vm14 }
 0x237   : > { %3586 = vrot.lane.b32.xlu1 %v10992_v36, %s9438_s14 }
 0x238   : > { %3654 = vrot.lane.b32.xlu0 %v3523_v45, %s9445_s22 }
 0x239   : > { %v1206_v16 = vpop.permute.xlu1 %1205  ;;  %v11001_v24 = vpop.permute.xlu0 %1111 }
 0x23b   : > { %3678 = vrot.lane.b32.xlu1 %v3547_v63, %s14471_s15  ;;  %v9392_v63 = vld [vmem:[#allocation2 + $0x138] sm:$0xff] }
 0x23c   : > { %3656 = vrot.lane.b32.xlu0 %v10992_v36, %s9445_s22  ;;  %v1755_v20 = vsel %vm14412_vm0, %v9392_v63, %v10966_v41  ;;  %v1756_v41 = vsel %vm14412_vm0, %v9393_v4, %v10987_v34 }
 0x23d   : > { %v1586_v2 = vpop.permute.xlu1 %1585  ;;  %v11006_v13 = vpop.permute.xlu0 %1491  ;;  %v1787_v44 = vsel %vm487_vm3, %v1755_v20, %v10985_v55 }
 0x23e   : > { %v1949_v47 = vsel %vm1924_vm11, %v1916_v18, %v1586_v2  ;;  %v1820_v59 = vsel %vm14504_vm8, %v1787_v44, %v1206_v16 }
 0x23f   : > { %3610 = vrot.lane.b32.xlu1 %v11009_v54, %s9441_s17 }
 0x241   : > { %v11019_v25 = vpop.permute.xlu1 %1301  ;;  %v11021_v37 = vpop.permute.xlu0 %1207 }
 0x243   : > { %v8628_v5 = vpop.f32.mrb[10].mxu0  ;;  %3702 = vrot.lane.b32.xlu1 %v3486_v1, %s14424_s16 }
 0x244   : > { %v11037_v48 = vadd.f32 %v8628_v5, %v10521_v23  ;;  %v2219_v42 = vpop.f32.mrb[11].mxu0 }
 0x245   : > { %v11041_v3 = vadd.f32 %v10521_v23, %v2219_v42  ;;  %v1682_v45 = vpop.permute.xlu1 %1681  ;;  %v11043_v39 = vpop.permute.xlu0 %1587  ;;  %v1786_v23 = vsel %vm487_vm3, %v1754_v50, %v10905_v15 }
 0x246   : > { %v14419_v14 = vmax.f32 %v11037_v48, 0.0  ;;  %v1982_v35 = vsel %vm14499_vm4, %v1949_v47, %v1682_v45  ;;  %v1819_v56 = vsel %vm14503_vm14, %v1786_v23, %v10932_v53  ;;  %vm14506_vm4 = vmmov %vm14505_vm15 }
 0x247   : > { %14502 = vst [vmem:[#allocation7_spill] sm:$0xff] %v11041_v3  ;;  %v14413_v6 = vmax.f32 %v11041_v3, 0.0  ;;  %8647 = vmatprep.mubr.msk.f32.mxu0 %vm2002_vm13, %v1982_v35  ;;  %v1852_v32 = vsel %vm1826_vm9, %v1819_v56, %v10964_v61  ;;  %vm14507_vm14 = vmmov %vm14506_vm4 }
 0x248   : > { %v2527_v28 = vmax.f32 %v14420_v46, %v14419_v14  ;;  %v1885_v11 = vsel %vm1859_vm10, %v1852_v32, %v1396_v26  ;;  %vm14508_vm12 = vmmov %vm14506_vm4 }
 0x249   : > { %v2526_v1 = vmax.f32 %v14414_v52, %v14413_v6  ;;  %v11067_v38 = vpop.permute.xlu1 %1397  ;;  %v11069_v15 = vpop.permute.xlu0 %1303  ;;  %vm14509_vm8 = vmmov %vm14506_vm4 }
 0x24a   : > { %v2639_v53 = vcombine.high %v2527_v28, %v2527_v28  ;;  %v2646_v21 = vrot.slane %v2527_v28, %v10549_v8  ;;  %vm14511_vm0 = vmmov %vm14506_vm4 }
 0x24b   : > { %v2622_v2 = vcombine.high %v2526_v1, %v2526_v1  ;;  %v2629_v12 = vrot.slane %v2526_v1, %v10549_v8 }
 0x24c   : > { %v2653_v58 = vrot.slane %v2639_v53, %v10549_v8  ;;  %v2654_v61 = vcombine.high %v2646_v21, %v2646_v21  ;;  %v3030_v33 = vsel %vm14505_vm15, %v2646_v21, -inf  ;;  %vm14510_vm15 = vmmov %vm14506_vm4 }
 0x24d   : > { %v3031_v55 = vrot.slane %v3030_v33, 4  ;;  %v2636_v17 = vrot.slane %v2622_v2, %v10549_v8  ;;  %v2637_v60 = vcombine.high %v2629_v12, %v2629_v12  ;;  %v3002_v5 = vsel %vm14506_vm4, %v2629_v12, -inf  ;;  %v1400_v18 = vpop.permute.xlu1 %1399  ;;  %v1684_v45 = vpop.permute.xlu0 %1683 }
 0x24e   : > { %v2655_v34 = vcombine.high %v2653_v58, %v2653_v58  ;;  %v3037_v26 = vsel %vm14507_vm14, %v2654_v61, -inf  ;;  %v3044_v42 = vsel %vm14508_vm12, %v2653_v58, -inf  ;;  %v3003_v47 = vrot.slane %v3002_v5, 4  ;;  %vm14512_vm12 = vmmov %vm14511_vm0 }
 0x24f   : > { %v3032_v16 = vmax.f32 %v3030_v33, %v3031_v55  ;;  %v3038_v35 = vrot.slane %v3037_v26, 4  ;;  %v3045_v30 = vrot.slane %v3044_v42, 4  ;;  %v2638_v50 = vcombine.high %v2636_v17, %v2636_v17 }
 0x250   : > { %v3051_v23 = vsel %vm14509_vm8, %v2655_v34, -inf  ;;  %v3004_v28 = vmax.f32 %v3002_v5, %v3003_v47  ;;  %v3009_v56 = vsel %vm14510_vm15, %v2637_v60, -inf  ;;  %v3016_v63 = vsel %vm14511_vm0, %v2636_v17, -inf }
 0x251   : > { %v3033_v20 = vrot.slane %v3032_v16, 2  ;;  %v3039_v1 = vmax.f32 %v3037_v26, %v3038_v35  ;;  %v3046_v32 = vmax.f32 %v3044_v42, %v3045_v30  ;;  %v3052_v44 = vrot.slane %v3051_v23, 4  ;;  %v1496_v53 = vpop.permute.xlu1 %1495  ;;  %v1494_v58 = vpop.permute.xlu0 %1493 }
 0x252   : > { %v3005_v21 = vrot.slane %v3004_v28, 2  ;;  %v3010_v4 = vrot.slane %v3009_v56, 4  ;;  %v3017_v2 = vrot.slane %v3016_v63, 4  ;;  %v3023_v12 = vsel %vm14512_vm12, %v2638_v50, -inf }
 0x253   : > { %v1788_v61 = vsel %vm487_vm3, %v1756_v41, %v11001_v24  ;;  %v1917_v33 = vsel %vm560_vm6, %v1885_v11, %v11006_v13  ;;  %v3040_v55 = vrot.slane %v3039_v1, 2  ;;  %v3053_v60 = vmax.f32 %v3051_v23, %v3052_v44 }
 0x254   : > { %v3006_v17 = vmax.f32 %v3004_v28, %v3005_v21  ;;  %v3011_v5 = vmax.f32 %v3009_v56, %v3010_v4  ;;  %v3018_v34 = vmax.f32 %v3016_v63, %v3017_v2  ;;  %v3024_v26 = vrot.slane %v3023_v12, 4 }
 0x255   : > { %v1853_v42 = vsel %vm1826_vm9, %v1820_v59, %v11019_v25  ;;  %v3034_v47 = vmax.f32 %v3032_v16, %v3033_v20  ;;  %v3047_v35 = vrot.slane %v3046_v32, 2  ;;  %v3054_v30 = vrot.slane %v3053_v60, 2  ;;  %v1592_v50 = vpop.permute.xlu1 %1591  ;;  %v1590_v13 = vpop.permute.xlu0 %1589 }
 0x256   : > { %vm14513_vm0 = vcmask 97280   ;;  %v3012_v24 = vrot.slane %v3011_v5, 2  ;;  %v3019_v41 = vrot.slane %v3018_v34, 2  ;;  %v3025_v52 = vmax.f32 %v3023_v12, %v3024_v26 }
 0x257   : > { %v1821_v6 = vsel %vm14513_vm0, %v1788_v61, %v11021_v37  ;;  %v3041_v11 = vmax.f32 %v3039_v1, %v3040_v55  ;;  %v3007_v23 = vrot.slane %v3006_v17, 1  ;;  %v1950_v28 = vsel %vm1924_vm11, %v1917_v33, %v11043_v39 }
 0x258   : > { %v1886_v56 = vsel %vm1859_vm10, %v1853_v42, %v11067_v38  ;;  %v3013_v25 = vmax.f32 %v3011_v5, %v3012_v24  ;;  %v3020_v59 = vmax.f32 %v3018_v34, %v3019_v41  ;;  %v3026_v16 = vrot.slane %v3025_v52, 2 }
 0x259   : > { %v1854_v63 = vsel %vm1826_vm9, %v1821_v6, %v11069_v15  ;;  %v3035_v20 = vrot.slane %v3034_v47, 1  ;;  %v3048_v37 = vmax.f32 %v3046_v32, %v3047_v35  ;;  %v3055_v44 = vmax.f32 %v3053_v60, %v3054_v30  ;;  %v1688_v4 = vpop.permute.xlu1 %1687 }
 0x25a   : > { %v1887_v21 = vsel %vm1859_vm10, %v1854_v63, %v1400_v18  ;;  %v3014_v1 = vrot.slane %v3013_v25, 1  ;;  %v3021_v2 = vrot.slane %v3020_v59, 1  ;;  %v3027_v12 = vmax.f32 %v3025_v52, %v3026_v16  ;;  %v1686_v61 = vpop.permute.xlu0 %1685 }
 0x25b   : > { %vm14514_vm4 = vcmask 261120   ;;  %v3042_v33 = vrot.slane %v3041_v11, 1  ;;  %v3008_v38 = vmax.f32 %v3006_v17, %v3007_v23  ;;  %v1919_v55 = vsel %vm560_vm6, %v1887_v21, %v1496_v53 }
 0x25c   : > { %v1983_v39 = vsel %vm14514_vm4, %v1950_v28, %v1684_v45  ;;  %v1918_v6 = vsel %vm560_vm6, %v1886_v56, %v1494_v58  ;;  %v3015_v15 = vmax.f32 %v3013_v25, %v3014_v1  ;;  %v3022_v32 = vmax.f32 %v3020_v59, %v3021_v2  ;;  %vm14515_vm14 = vmmov %vm14514_vm4 }
 0x25d   : > { %8648 = vmatmul.mubr.msk.f32.gmra.mrb[24].mxu0 %vm2002_vm13, %v1983_v39  ;;  %v3028_v60 = vrot.slane %v3027_v12, 1  ;;  %v1952_v18 = vsel %vm1924_vm11, %v1919_v55, %v1592_v50  ;;  %v3049_v5 = vrot.slane %v3048_v37, 1  ;;  %v1951_v34 = vsel %vm1924_vm11, %v1918_v6, %v1590_v13  ;;  %v11113_v45 = vpop.permute.xlu1 %1019  ;;  %vm14516_vm8 = vmmov %vm14514_vm4 }
 0x25e   : > { %v1985_v52 = vsel %vm14515_vm14, %v1952_v18, %v1688_v4  ;;  %v3056_v26 = vrot.slane %v3055_v44, 1  ;;  %v3423_v42 = vsel %vm3402_vm1, %v3015_v15, %v3008_v38  ;;  %v1984_v53 = vsel %vm14516_vm8, %v1951_v34, %v1686_v61  ;;  %v1018_v35 = vpop.permute.xlu0 %1017 }
 0x25f   : > { %v3029_v17 = vmax.f32 %v3027_v12, %v3028_v60  ;;  %v3036_v58 = vmax.f32 %v3034_v47, %v3035_v20  ;;  %v3424_v30 = vsel %vm14460_vm2, %v3022_v32, %v3423_v42  ;;  %8650 = vmatprep.mubr.msk.f32.mxu0 %vm2002_vm13, %v1984_v53  ;;  %v3043_v50 = vmax.f32 %v3041_v11, %v3042_v33 }
 0x260   : > { %v3050_v41 = vmax.f32 %v3048_v37, %v3049_v5  ;;  %vm14517_vm15 = vcmask 1044484   ;;  %v3057_v28 = vmax.f32 %v3055_v44, %v3056_v26  ;;  %vm14518_vm12 = vcmask 1045509  }
 0x261   : > { %v3425_v24 = vsel %vm14462_vm7, %v3029_v17, %v3424_v30  ;;  %8651 = vmatmul.mubr.msk.f32.gmra.mrb[26].mxu0 %vm2002_vm13, %v1985_v52  ;;  %v11122_v23 = vpop.permute.xlu1 %1115  ;;  %vm14519_vm0 = vcmask 1046534   ;;  %vm14520_vm4 = vcmask 1047559   ;;  %vm14521_vm14 = vcmask 1045504   ;;  %v9394_v52 = vld [vmem:[#allocation2 + $0x150] sm:$0xff] }
 0x262   : > { %v3426_v13 = vsel %vm14517_vm15, %v3036_v58, %v3425_v24  ;;  %v1114_v25 = vpop.permute.xlu0 %1113  ;;  %vm14522_vm8 = vcmask 31744   ;;  %vm14523_vm15 = vcmask 97280  }
 0x263   : > { %v3427_v56 = vsel %vm14518_vm12, %v3043_v50, %v3426_v13  ;;  %v8631_v59 = vpop.f32.mrb[12].mxu0  ;;  %v1757_v26 = vsel %vm14522_vm8, %v9394_v52, %v1018_v35  ;;  %vm14527_vm12 = vcmask 261120  }
 0x264   : > { %v3428_v47 = vsel %vm14519_vm0, %v3050_v41, %v3427_v56  ;;  %v2229_v63 = vpop.f32.mrb[13].mxu0  ;;  %v1789_v17 = vsel %vm487_vm3, %v1757_v26, %v1114_v25  ;;  %vm14528_vm0 = vmmov %vm14522_vm8 }
 0x265   : > { %v3429_v16 = vsel %vm14520_vm4, %v3057_v28, %v3428_v47  ;;  %v1212_v11 = vpop.permute.xlu1 %1211  ;;  %vm14529_vm4 = vmmov %vm14523_vm15 }
 0x266   : > { %3476 = vst.msk [vmem:[#allocation3 + $0x31] sm:$0xff] %vm487_vm3, %v3429_v16  ;;  %v1210_v20 = vpop.permute.xlu0 %1209  ;;  %vm14531_vm8 = vmmov %vm14528_vm0 }
 0x267   : > { %v1822_v42 = vsel %vm14523_vm15, %v1789_v17, %v1210_v20  ;;  %vm14532_vm15 = vmmov %vm14529_vm4 }
 0x269   : > { %v1022_v21 = vpop.permute.xlu1 %1021 }
 0x26a   : > { %v1306_v37 = vpop.permute.xlu0 %1305 }
 0x26b   : > { %v1855_v30 = vsel %vm1826_vm9, %v1822_v42, %v1306_v37 }
 0x26d   : > { %v3488_v4 = vld [vmem:[#allocation3 + $0x30] sm:$0xff]  ;;  %v3489_v1 = vld [vmem:[#allocation3 + $0x38] sm:$0x3]  ;;  %v1402_v44 = vpop.permute.xlu1 %1401 }
 0x26e   : > { %3634 = vrot.lane.b32.xlu1 %v3488_v4, %s14473_s23  ;;  %v3527_v2 = vrot.slane %v3488_v4, 1  ;;  %v3528_v12 = vrot.slane %v3489_v1, 1  ;;  %v1308_v39 = vpop.permute.xlu0 %1307  ;;  %v3551_v55 = vrot.slane %v3488_v4, 2  ;;  %v3552_v6 = vrot.slane %v3489_v1, 2 }
 0x26f   : > { %v1888_v24 = vsel %vm1859_vm10, %v1855_v30, %v1402_v44 }
 0x270   : > { %v11130_v61 = vsel %vm14435_vm5, %v3527_v2, %v3528_v12  ;;  %v11141_v60 = vsel %vm14521_vm14, %v3551_v55, %v3552_v6  ;;  %vm14530_vm14 = vmmov %vm14528_vm0 }
 0x271   : > { %3588 = vrot.lane.b32.xlu0 %v11130_v61, %s9438_s14  ;;  %v1118_v33 = vpop.permute.xlu1 %1117 }
 0x272   : > { %3726 = vrot.lane.b32.xlu1 %v10992_v36, %s9449_s18  ;;  %v1024_v38 = vpop.permute.xlu0 %1023 }
 0x275   : > { %3680 = vrot.lane.b32.xlu0 %v11009_v54, %s14471_s15  ;;  %v1498_v15 = vpop.permute.xlu1 %1497 }
 0x276   : > { %3658 = vrot.lane.b32.xlu1 %v11130_v61, %s9445_s22  ;;  %v1404_v32 = vpop.permute.xlu0 %1403  ;;  %v1920_v13 = vsel %vm560_vm6, %v1888_v24, %v1498_v15  ;;  %v9397_v15 = vld [vmem:[#allocation2 + $0x168] sm:$0xff] }
 0x279   : > { %3612 = vrot.lane.b32.xlu0 %v11141_v60, %s9441_s17  ;;  %v1214_v36 = vpop.permute.xlu1 %1213 }
 0x27a   : > { %3750 = vrot.lane.b32.xlu1 %v11009_v54, %s9450_s27  ;;  %v11147_v18 = vpop.permute.xlu0 %1119  ;;  %v11160_v54 = vld [vmem:[%s14386_s2] ss:$0 sm:$0xff] }
 0x27b   : > { %v11163_v58 = vadd.f32 %v11160_v54, %v8631_v59  ;;  %v11169_v35 = vadd.f32 %v11160_v54, %v2229_v63 }
 0x27d   : > { %3704 = vrot.lane.b32.xlu0 %v3488_v4, %s14424_s16  ;;  %v1594_v5 = vpop.permute.xlu1 %1593  ;;  %14524 = vst [vmem:[#allocation8_spill] sm:$0xff] %v11169_v35  ;;  %v14418_v16 = vmax.f32 %v11163_v58, 0.0  ;;  %v9396_v4 = vld [vmem:[#allocation2 + $0x158] sm:$0xff]  ;;  %v14416_v44 = vmax.f32 %v11169_v35, 0.0  ;;  %s14549_s16 = smov 48  }
 0x27e   : > { %v11150_v34 = vpop.permute.xlu0 %1499  ;;  %v1953_v25 = vsel %vm1924_vm11, %v1920_v13, %v1594_v5  ;;  %v1758_v1 = vsel %vm14528_vm0, %v9396_v4, %v11113_v45  ;;  %v1759_v5 = vsel %vm14530_vm14, %v9397_v15, %v1022_v21 }
 0x27f   : > { %v1790_v12 = vsel %vm487_vm3, %v1758_v1, %v11122_v23  ;;  %v1791_v23 = vsel %vm487_vm3, %v1759_v5, %v1118_v33 }
 0x280   : > { %v1823_v6 = vsel %vm14529_vm4, %v1790_v12, %v1212_v11  ;;  %v9398_v11 = vld [vmem:[#allocation2 + $0x170] sm:$0xff] }
 0x281   : > { %v11155_v53 = vpop.permute.xlu1 %1309  ;;  %v1856_v26 = vsel %vm1826_vm9, %v1823_v6, %v1308_v39  ;;  %v1760_v24 = vsel %vm14531_vm8, %v9398_v11, %v1024_v38 }
 0x282   : > { %v11166_v50 = vpop.permute.xlu0 %1215  ;;  %v1889_v21 = vsel %vm1859_vm10, %v1856_v26, %v1404_v32  ;;  %v1792_v14 = vsel %vm487_vm3, %v1760_v24, %v11147_v18 }
 0x283   : > { %v8634_v41 = vpop.f32.mrb[14].mxu0 }
 0x284   : > { %v11174_v28 = vadd.f32 %v11160_v54, %v8634_v41  ;;  %v2239_v56 = vpop.f32.mrb[15].mxu0 }
 0x285   : > { %v11178_v47 = vadd.f32 %v11160_v54, %v2239_v56  ;;  %v1690_v59 = vpop.permute.xlu1 %1689  ;;  %v1824_v56 = vsel %vm14532_vm15, %v1791_v23, %v1214_v36 }
 0x286   : > { %14525 = vst [vmem:[#allocation9_spill] sm:$0xff] %v11174_v28  ;;  %v14417_v63 = vmax.f32 %v11174_v28, 0.0  ;;  %v1986_v20 = vsel %vm14527_vm12, %v1953_v25, %v1690_v59  ;;  %v11183_v37 = vpop.permute.xlu0 %1595  ;;  %vm14533_vm12 = vcmask 58368  }
 0x287   : > { %14526 = vst [vmem:[#allocation10_spill] sm:$0xff] %v11178_v47  ;;  %v14415_v2 = vmax.f32 %v11178_v47, 0.0  ;;  %8653 = vmatprep.mubr.msk.f32.mxu0 %vm2002_vm13, %v1986_v20  ;;  %vm14534_vm0 = vmmov %vm14533_vm12 }
 0x288   : > { %v2529_v55 = vmax.f32 %v14418_v16, %v14417_v63  ;;  %vm14535_vm4 = vmmov %vm14534_vm0 }
 0x289   : > { %v2528_v45 = vmax.f32 %v14416_v44, %v14415_v2  ;;  %v11202_v52 = vpop.permute.xlu1 %1405  ;;  %vm14536_vm14 = vmmov %vm14534_vm0 }
 0x28a   : > { %v2673_v17 = vcombine.high %v2529_v55, %v2529_v55  ;;  %v2680_v42 = vrot.slane %v2529_v55, %v10549_v8  ;;  %v11207_v30 = vpop.permute.xlu0 %1311  ;;  %vm14537_vm8 = vmmov %vm14534_vm0 }
 0x28b   : > { %v2656_v41 = vcombine.high %v2528_v45, %v2528_v45  ;;  %v2663_v13 = vrot.slane %v2528_v45, %v10549_v8  ;;  %vm14538_vm15 = vmmov %vm14534_vm0 }
 0x28c   : > { %v2687_v25 = vrot.slane %v2673_v17, %v10549_v8  ;;  %v2688_v39 = vcombine.high %v2680_v42, %v2680_v42  ;;  %v3086_v33 = vsel %vm14533_vm12, %v2680_v42, -inf  ;;  %vm14539_vm12 = vmmov %vm14534_vm0 }
 0x28d   : > { %v3087_v59 = vrot.slane %v3086_v33, 4  ;;  %v2670_v20 = vrot.slane %v2656_v41, %v10549_v8  ;;  %v2671_v4 = vcombine.high %v2663_v13, %v2663_v13  ;;  %v3058_v1 = vsel %vm14534_vm0, %v2663_v13, -inf  ;;  %v1408_v12 = vpop.permute.xlu1 %1407 }
 0x28e   : > { %v2689_v38 = vcombine.high %v2687_v25, %v2687_v25  ;;  %v3093_v32 = vsel %vm14535_vm4, %v2688_v39, -inf  ;;  %v3100_v55 = vsel %vm14536_vm14, %v2687_v25, -inf  ;;  %v3059_v6 = vrot.slane %v3058_v1, 4  ;;  %v1692_v15 = vpop.permute.xlu0 %1691 }
 0x28f   : > { %v3088_v36 = vmax.f32 %v3086_v33, %v3087_v59  ;;  %v3094_v5 = vrot.slane %v3093_v32, 4  ;;  %v3101_v45 = vrot.slane %v3100_v55, 4  ;;  %v2672_v26 = vcombine.high %v2670_v20, %v2670_v20 }
 0x290   : > { %v3107_v23 = vsel %vm14537_vm8, %v2689_v38, -inf  ;;  %v3060_v17 = vmax.f32 %v3058_v1, %v3059_v6  ;;  %v3065_v42 = vsel %vm14538_vm15, %v2671_v4, -inf  ;;  %v3072_v11 = vsel %vm14539_vm12, %v2670_v20, -inf }
 0x291   : > { %v3089_v41 = vrot.slane %v3088_v36, 2  ;;  %v3095_v13 = vmax.f32 %v3093_v32, %v3094_v5  ;;  %v3102_v2 = vmax.f32 %v3100_v55, %v3101_v45  ;;  %v3108_v44 = vrot.slane %v3107_v23, 4  ;;  %v1504_v39 = vpop.permute.xlu1 %1503 }
 0x292   : > { %v3061_v63 = vrot.slane %v3060_v17, 2  ;;  %v3066_v25 = vrot.slane %v3065_v42, 4  ;;  %v3073_v16 = vrot.slane %v3072_v11, 4  ;;  %v3079_v33 = vsel %vm14534_vm0, %v2672_v26, -inf  ;;  %v1502_v59 = vpop.permute.xlu0 %1501 }
 0x293   : > { %v1921_v1 = vsel %vm560_vm6, %v1889_v21, %v11150_v34  ;;  %v3096_v4 = vrot.slane %v3095_v13, 2  ;;  %v3109_v38 = vmax.f32 %v3107_v23, %v3108_v44  ;;  %v3080_v55 = vrot.slane %v3079_v33, 4 }
 0x294   : > { %v3062_v20 = vmax.f32 %v3060_v17, %v3061_v63  ;;  %v3067_v6 = vmax.f32 %v3065_v42, %v3066_v25  ;;  %v3074_v32 = vmax.f32 %v3072_v11, %v3073_v16  ;;  %v1857_v5 = vsel %vm1826_vm9, %v1824_v56, %v11155_v53 }
 0x295   : > { %v3090_v45 = vmax.f32 %v3088_v36, %v3089_v41  ;;  %v3103_v46 = vrot.slane %v3102_v2, 2  ;;  %v3110_v29 = vrot.slane %v3109_v38, 2  ;;  %v1600_v26 = vpop.permute.xlu1 %1599  ;;  %vm14540_vm4 = vcmask 97280  }
 0x296   : > { %v1825_v40 = vsel %vm14540_vm4, %v1792_v14, %v11166_v50  ;;  %v3068_v18 = vrot.slane %v3067_v6, 2  ;;  %v3075_v24 = vrot.slane %v3074_v32, 2  ;;  %v3081_v10 = vmax.f32 %v3079_v33, %v3080_v55  ;;  %v1598_v34 = vpop.permute.xlu0 %1597 }
 0x297   : > { %v3097_v21 = vmax.f32 %v3095_v13, %v3096_v4  ;;  %v3063_v44 = vrot.slane %v3062_v20, 1  ;;  %v1954_v16 = vsel %vm1924_vm11, %v1921_v1, %v11183_v37  ;;  %v1890_v63 = vsel %vm1859_vm10, %v1857_v5, %v11202_v52 }
 0x298   : > { %v3069_v53 = vmax.f32 %v3067_v6, %v3068_v18  ;;  %v3076_v56 = vmax.f32 %v3074_v32, %v3075_v24  ;;  %v3082_v36 = vrot.slane %v3081_v10, 2  ;;  %v1858_v23 = vsel %vm1826_vm9, %v1825_v40, %v11207_v30 }
 0x299   : > { %v3091_v17 = vrot.slane %v3090_v45, 1  ;;  %v3104_v14 = vmax.f32 %v3102_v2, %v3103_v46  ;;  %v3111_v50 = vmax.f32 %v3109_v38, %v3110_v29  ;;  %v1891_v42 = vsel %vm1859_vm10, %v1858_v23, %v1408_v12  ;;  %v1696_v37 = vpop.permute.xlu1 %1695  ;;  %v3842_v12 = vld [vmem:[%s14387_s3 + $0x8] sm:$0xff]  ;;  %v3845_v23 = vld [vmem:[%s14387_s3 + $0x20] sm:$0xff] }
 0x29a   : > { %v3070_v11 = vrot.slane %v3069_v53, 1  ;;  %v3077_v41 = vrot.slane %v3076_v56, 1  ;;  %v3083_v13 = vmax.f32 %v3081_v10, %v3082_v36  ;;  %vm14541_vm14 = vcmask 261120   ;;  %v1694_v40 = vpop.permute.xlu0 %1693  ;;  %v3841_v10 = vld [vmem:[%s14387_s3] sm:$0xff] }
 0x29b   : > { %v1987_v25 = vsel %vm14541_vm14, %v1954_v16, %v1692_v15  ;;  %v3098_v33 = vrot.slane %v3097_v21, 1  ;;  %v3064_v1 = vmax.f32 %v3062_v20, %v3063_v44  ;;  %v1923_v52 = vsel %vm560_vm6, %v1891_v42, %v1504_v39  ;;  %vm14542_vm10 = vmmov %vm14541_vm14  ;;  %v3844_v44 = vld [vmem:[%s14387_s3 + $0x18] sm:$0xff] }
 0x29c   : > { %8654 = vmatmul.mubr.msk.f32.gmra.mrb[28].mxu0 %vm2002_vm13, %v1987_v25  ;;  %v1922_v4 = vsel %vm560_vm6, %v1890_v63, %v1502_v59  ;;  %v3071_v30 = vmax.f32 %v3069_v53, %v3070_v11  ;;  %v3078_v46 = vmax.f32 %v3076_v56, %v3077_v41  ;;  %v3084_v29 = vrot.slane %v3083_v13, 1  ;;  %vm14543_vm8 = vmmov %vm14542_vm10  ;;  %v3848_v42 = vld [vmem:[%s14387_s3 + $0x38] sm:$0xff] }
 0x29d   : > { %v1956_v2 = vsel %vm1924_vm11, %v1923_v52, %v1600_v26  ;;  %v3105_v15 = vrot.slane %v3104_v14, 1  ;;  %v1955_v38 = vsel %vm1924_vm11, %v1922_v4, %v1598_v34  ;;  %v8697_v59 = vpack.c.bf16 %v3842_v12, %v3841_v10  ;;  %v3843_v34 = vld [vmem:[%s14387_s3 + $0x10] sm:$0xff]  ;;  %v3849_v52 = vld [vmem:[%s14387_s3 + $0x40] sm:$0xff] }
 0x29e   : > { %v1989_v39 = vsel %vm14542_vm10, %v1956_v2, %v1696_v37  ;;  %v3112_v20 = vrot.slane %v3111_v50, 1  ;;  %v3085_v6 = vmax.f32 %v3083_v13, %v3084_v29  ;;  %v3430_v32 = vsel %vm3402_vm1, %v3071_v30, %v3064_v1 }
 0x29f   : > { %v1988_v55 = vsel %vm14543_vm8, %v1955_v38, %v1694_v40  ;;  %v3092_v5 = vmax.f32 %v3090_v45, %v3091_v17  ;;  %v3431_v26 = vsel %vm14460_vm2, %v3078_v46, %v3430_v32  ;;  %8698 = vmatprep.subr.bf16.mxu1 %v8697_v59  ;;  %v3099_v18 = vmax.f32 %v3097_v21, %v3098_v33  ;;  %v3846_v17 = vld [vmem:[%s14387_s3 + $0x28] sm:$0xff]  ;;  %v11295_v46 = vpop.permute.xlu1 %3584 }
 0x2a0   : > { %8656 = vmatprep.mubr.msk.f32.mxu0 %vm2002_vm13, %v1988_v55  ;;  %v3432_v24 = vsel %vm14462_vm7, %v3085_v6, %v3431_v26  ;;  %8700 = vmatpush3.bf16.msra.mxu1 %v8697_v59  ;;  %v3106_v45 = vmax.f32 %v3104_v14, %v3105_v15  ;;  %vm14544_vm11 = vcmask 1044484   ;;  %v8701_v63 = vpack.c.bf16 %v3844_v44, %v3843_v34  ;;  %v3847_v14 = vld [vmem:[%s14387_s3 + $0x30] sm:$0xff] }
 0x2a1   : > { %8657 = vmatmul.mubr.msk.f32.gmra.mrb[30].mxu0 %vm2002_vm13, %v1989_v39  ;;  %v3433_v16 = vsel %vm14544_vm11, %v3092_v5, %v3432_v24  ;;  %v3113_v53 = vmax.f32 %v3111_v50, %v3112_v20  ;;  %vm14545_vm15 = vcmask 1045509   ;;  %vm14546_vm12 = vcmask 1046534  }
 0x2a2   : > { %v3434_v21 = vsel %vm14545_vm15, %v3099_v18, %v3433_v16  ;;  %8702 = vmatprep.subr.bf16.mxu1 %v8701_v63  ;;  %vm14547_vm13 = vcmask 1047559   ;;  %v8705_v50 = vpack.c.bf16 %v3846_v17, %v3845_v23  ;;  %v8709_v11 = vpack.c.bf16 %v3848_v42, %v3847_v14 }
 0x2a3   : > { %v3435_v56 = vsel %vm14546_vm12, %v3106_v45, %v3434_v21  ;;  %vm14548_vm0 = vcmask 1045504   ;;  %vm14554_vm4 = vcmask 58368  }
 0x2a4   : > { %v3436_v36 = vsel %vm14547_vm13, %v3113_v53, %v3435_v56  ;;  %8704 = vmatpush3.bf16.msra.mxu1 %v8701_v63  ;;  %vm14555_vm14 = vmmov %vm14554_vm4 }
 0x2a5   : > { %3477 = vst.msk [vmem:[#allocation3 + $0x41] sm:$0xff] %vm487_vm3, %v3436_v36  ;;  %8706 = vmatprep.subr.bf16.mxu1 %v8705_v50  ;;  %vm14556_vm10 = vmmov %vm14554_vm4 }
 0x2a6   : > { %vm14557_vm8 = vmmov %vm14554_vm4 }
 0x2a7   : > { %vm14558_vm11 = vmmov %vm14554_vm4 }
 0x2a8   : > { %8708 = vmatpush3.bf16.msra.mxu1 %v8705_v50  ;;  %vm14559_vm15 = vmmov %vm14554_vm4 }
 0x2a9   : > { %8710 = vmatprep.subr.bf16.mxu1 %v8709_v11  ;;  %vm14560_vm12 = vmmov %vm14554_vm4 }
 0x2aa   : > { %vm14561_vm13 = vmmov %vm14554_vm4 }
 0x2ac   : > { %v3490_v41 = vld [vmem:[#allocation3 + $0x40] sm:$0xff]  ;;  %v3491_v13 = vld [vmem:[#allocation3 + $0x48] sm:$0x3]  ;;  %8712 = vmatpush3.bf16.msra.mxu1 %v8709_v11 }
 0x2ad   : > { %v8637_v25 = vpop.f32.mrb[16].mxu0  ;;  %3636 = vrot.lane.b32.xlu0 %v3490_v41, %s14473_s23  ;;  %v3530_v37 = vrot.slane %v3490_v41, 1  ;;  %v3531_v33 = vrot.slane %v3491_v13, 1  ;;  %8675 = vmatprep.subr.mxu1 %v3849_v52  ;;  %v3554_v40 = vrot.slane %v3490_v41, 2  ;;  %v3555_v30 = vrot.slane %v3491_v13, 2 }
 0x2ae   : > { %v2249_v1 = vpop.f32.mrb[17].mxu0  ;;  %v11308_v2 = vadd.f32 %v11160_v54, %v8637_v25 }
 0x2af   : > { %v11285_v4 = vsel %vm14435_vm5, %v3530_v37, %v3531_v33  ;;  %v11298_v29 = vsel %vm14548_vm0, %v3554_v40, %v3555_v30  ;;  %v11311_v10 = vadd.f32 %v11160_v54, %v2249_v1  ;;  %vm14562_vm0 = vcmask 1044484  }
 0x2b0   : > { %3660 = vrot.lane.b32.xlu1 %v11285_v4, %s9445_s22  ;;  %8676 = vmatpush3.msra.mxu1 %v3849_v52  ;;  %14550 = vst [vmem:[#allocation11_spill] sm:$0xff] %v11308_v2 }
 0x2b1   : > { %3728 = vrot.lane.b32.xlu0 %v11130_v61, %s9449_s18  ;;  %v11305_v61 = vpop.permute.xlu1 %3608  ;;  %14551 = vst [vmem:[#allocation12_spill] sm:$0xff] %v11311_v10  ;;  %v14427_v6 = vmax.f32 %v11311_v10, 0.0 }
 0x2b4   : > { %3752 = vrot.lane.b32.xlu1 %v11141_v60, %s9450_s27 }
 0x2b5   : > { %3590 = vrot.lane.b32.xlu0 %v11285_v4, %s9438_s14  ;;  %v11313_v15 = vpop.permute.xlu1 %3632 }
 0x2b8   : > { %3614 = vrot.lane.b32.xlu1 %v11298_v29, %s9441_s17 }
 0x2b9   : > { %3682 = vrot.lane.b32.xlu0 %v11141_v60, %s14471_s15  ;;  %v14429_v60 = vmax.f32 %v11308_v2, 0.0  ;;  %v11333_v26 = vpop.permute.xlu1 %3586 }
 0x2bc   : > { %3706 = vrot.lane.b32.xlu1 %v3490_v41, %s14549_s16 }
 0x2bd   : > { %v11343_v25 = vpop.permute.xlu1 %3678 }
 0x2c2   : > { %v8640_v12 = vpop.f32.mrb[18].mxu0 }
 0x2c3   : > { %v11316_v38 = vadd.f32 %v11160_v54, %v8640_v12  ;;  %v2259_v39 = vpop.f32.mrb[19].mxu0 }
 0x2c4   : > { %v11319_v59 = vadd.f32 %v11160_v54, %v2259_v39 }
 0x2c5   : > { %14552 = vst [vmem:[#allocation13_spill] sm:$0xff] %v11316_v38  ;;  %v14428_v20 = vmax.f32 %v11316_v38, 0.0 }
 0x2c6   : > { %14553 = vst [vmem:[#allocation14_spill] sm:$0xff] %v11319_v59  ;;  %v14426_v32 = vmax.f32 %v11319_v59, 0.0 }
 0x2c7   : > { %v2531_v55 = vmax.f32 %v14429_v60, %v14428_v20 }
 0x2c8   : > { %v2530_v5 = vmax.f32 %v14427_v6, %v14426_v32 }
 0x2c9   : > { %v2707_v18 = vcombine.high %v2531_v55, %v2531_v55  ;;  %v2714_v24 = vrot.slane %v2531_v55, %v10549_v8 }
 0x2ca   : > { %v2690_v34 = vcombine.high %v2530_v5, %v2530_v5  ;;  %v2697_v44 = vrot.slane %v2530_v5, %v10549_v8 }
 0x2cb   : > { %v2721_v45 = vrot.slane %v2707_v18, %v10549_v8  ;;  %v2722_v16 = vcombine.high %v2714_v24, %v2714_v24  ;;  %v3142_v63 = vsel %vm14554_vm4, %v2714_v24, -inf  ;;  %vm14563_vm4 = vcmask 1045509  }
 0x2cc   : > { %v3143_v53 = vrot.slane %v3142_v63, 4  ;;  %v2704_v21 = vrot.slane %v2690_v34, %v10549_v8  ;;  %v2705_v56 = vcombine.high %v2697_v44, %v2697_v44  ;;  %v3114_v36 = vsel %vm14555_vm14, %v2697_v44, -inf }
 0x2cd   : > { %v2723_v23 = vcombine.high %v2721_v45, %v2721_v45  ;;  %v3149_v17 = vsel %vm14556_vm10, %v2722_v16, -inf  ;;  %v3156_v14 = vsel %vm14557_vm8, %v2721_v45, -inf  ;;  %v3115_v50 = vrot.slane %v3114_v36, 4  ;;  %v3583_v45 = vpop.permute.xlu0 %3582 }
 0x2ce   : > { %v3144_v42 = vmax.f32 %v3142_v63, %v3143_v53  ;;  %v3150_v11 = vrot.slane %v3149_v17, 4  ;;  %v3157_v41 = vrot.slane %v3156_v14, 4  ;;  %v2706_v13 = vcombine.high %v2704_v21, %v2704_v21 }
 0x2cf   : > { %v3163_v37 = vsel %vm14558_vm11, %v2723_v23, -inf  ;;  %v3116_v33 = vmax.f32 %v3114_v36, %v3115_v50  ;;  %v3121_v1 = vsel %vm14559_vm15, %v2705_v56, -inf  ;;  %v3128_v52 = vsel %vm14560_vm12, %v2704_v21, -inf  ;;  %v11349_v56 = vpop.permute.xlu1 %3610 }
 0x2d0   : > { %v3151_v40 = vmax.f32 %v3149_v17, %v3150_v11  ;;  %v3158_v30 = vmax.f32 %v3156_v14, %v3157_v41  ;;  %v3164_v12 = vrot.slane %v3163_v37, 4  ;;  %v3122_v55 = vrot.slane %v3121_v1, 4 }
 0x2d1   : > { %v3117_v39 = vrot.slane %v3116_v33, 2  ;;  %v3129_v5 = vrot.slane %v3128_v52, 4  ;;  %v3135_v18 = vsel %vm14561_vm13, %v2706_v13, -inf  ;;  %v3145_v24 = vrot.slane %v3144_v42, 2 }
 0x2d2   : > { %v3152_v34 = vrot.slane %v3151_v40, 2  ;;  %v3165_v44 = vmax.f32 %v3163_v37, %v3164_v12  ;;  %v3123_v63 = vmax.f32 %v3121_v1, %v3122_v55  ;;  %v3136_v36 = vrot.slane %v3135_v18, 4  ;;  %v3607_v37 = vpop.permute.xlu0 %3606 }
 0x2d3   : > { %v3118_v16 = vmax.f32 %v3116_v33, %v3117_v39  ;;  %v3130_v53 = vmax.f32 %v3128_v52, %v3129_v5  ;;  %v3159_v23 = vrot.slane %v3158_v30, 2  ;;  %v3146_v11 = vmax.f32 %v3144_v42, %v3145_v24  ;;  %v3703_v5 = vpop.permute.xlu1 %3702 }
 0x2d4   : > { %v3166_v21 = vrot.slane %v3165_v44, 2  ;;  %v3124_v17 = vrot.slane %v3123_v63, 2  ;;  %v3137_v50 = vmax.f32 %v3135_v18, %v3136_v36  ;;  %v3153_v41 = vmax.f32 %v3151_v40, %v3152_v34 }
 0x2d5   : > { %v3131_v14 = vrot.slane %v3130_v53, 2  ;;  %v3119_v32 = vrot.slane %v3118_v16, 1  ;;  %v3160_v60 = vmax.f32 %v3158_v30, %v3159_v23  ;;  %v3147_v39 = vrot.slane %v3146_v11, 1 }
 0x2d6   : > { %v3125_v6 = vmax.f32 %v3123_v63, %v3124_v17  ;;  %v3138_v20 = vrot.slane %v3137_v50, 2  ;;  %v3167_v12 = vmax.f32 %v3165_v44, %v3166_v21  ;;  %v3154_v55 = vrot.slane %v3153_v41, 1  ;;  %v3631_v63 = vpop.permute.xlu0 %3630 }
 0x2d7   : > { %v3132_v13 = vmax.f32 %v3130_v53, %v3131_v14  ;;  %v3120_v0 = vmax.f32 %v3118_v16, %v3119_v32  ;;  %v3161_v18 = vrot.slane %v3160_v60, 1  ;;  %v3148_v34 = vmax.f32 %v3146_v11, %v3147_v39 }
 0x2d8   : > { %v3126_v33 = vrot.slane %v3125_v6, 1  ;;  %v3139_v52 = vmax.f32 %v3137_v50, %v3138_v20  ;;  %v3168_v42 = vrot.slane %v3167_v12, 1  ;;  %v3155_v44 = vmax.f32 %v3153_v41, %v3154_v55 }
 0x2d9   : > { %v3133_v1 = vrot.slane %v3132_v13, 1  ;;  %v3162_v36 = vmax.f32 %v3160_v60, %v3161_v18  ;;  %vm14564_vm14 = vcmask 1046534   ;;  %vm14565_vm10 = vcmask 1047559  }
 0x2da   : > { %v3127_v59 = vmax.f32 %v3125_v6, %v3126_v33  ;;  %v3140_v38 = vrot.slane %v3139_v52, 1  ;;  %v9399_v6 = vld [vmem:[#allocation3] sm:$0xff]  ;;  %v3169_v23 = vmax.f32 %v3167_v12, %v3168_v42  ;;  %v3655_v17 = vpop.permute.xlu0 %3654  ;;  %vm3806_vm8 = vcmask 326656  }
 0x2db   : > { %v3134_v10 = vmax.f32 %v3132_v13, %v3133_v1  ;;  %v3774_v16 = vsel %vm487_vm3, %v9399_v6, %v3583_v45  ;;  %vm14566_vm11 = vcmask 261120   ;;  %vm3823_vm15 = vcmask 457728  }
 0x2dc   : > { %v3141_v40 = vmax.f32 %v3139_v52, %v3140_v38  ;;  %v3437_v24 = vsel %vm3402_vm1, %v3127_v59, %v3120_v0  ;;  %v3782_v21 = vsel %vm1826_vm9, %v3774_v16, %v3607_v37  ;;  %vm3832_vm12 = vcmask 523264  }
 0x2dd   : > { %v3438_v30 = vsel %vm14460_vm2, %v3134_v10, %v3437_v24  ;;  %v3790_v60 = vsel %vm560_vm6, %v3782_v21, %v3631_v63  ;;  %vm14567_vm13 = vcmask 392192  }
 0x2de   : > { %v3439_v53 = vsel %vm14462_vm7, %v3141_v40, %v3438_v30  ;;  %v3798_v45 = vsel %vm14566_vm11, %v3790_v60, %v3655_v17 }
 0x2df   : > { %v3440_v32 = vsel %vm14562_vm0, %v3148_v34, %v3439_v53  ;;  %v3807_v50 = vsel %vm3806_vm8, %v3798_v45, %v11343_v25  ;;  %vm3857_vm0 = vcmask 588800  }
 0x2e0   : > { %v11354_v20 = vpop.permute.xlu1 %3634  ;;  %v3441_v38 = vsel %vm14563_vm4, %v3155_v44, %v3440_v32  ;;  %v3815_v11 = vsel %vm14567_vm13, %v3807_v50, %v3703_v5  ;;  %vm14568_vm4 = vcmask 1045504  }
 0x2e1   : > { %v3442_v0 = vsel %vm14564_vm14, %v3162_v36, %v3441_v38  ;;  %vm14573_vm14 = vcmask 58368  }
 0x2e2   : > { %v3443_v59 = vsel %vm14565_vm10, %v3169_v23, %v3442_v0  ;;  %vm14574_vm10 = vmmov %vm14573_vm14 }
 0x2e3   : > { %3478 = vst.msk [vmem:[#allocation3 + $0x51] sm:$0xff] %vm487_vm3, %v3443_v59  ;;  %vm14575_vm11 = vmmov %vm14574_vm10 }
 0x2e4   : > { %v3727_v10 = vpop.permute.xlu1 %3726  ;;  %vm14576_vm13 = vmmov %vm14574_vm10 }
 0x2e5   : > { %v3824_v41 = vsel %vm3823_vm15, %v3815_v11, %v3727_v10 }
 0x2e8   : > { %v11364_v14 = vpop.permute.xlu1 %3658 }
 0x2ea   : > { %v11371_v37 = vld [vmem:[#allocation3 + $0x50] sm:$0xff]  ;;  %v3493_v12 = vld [vmem:[#allocation3 + $0x58] sm:$0x3] }
 0x2eb   : > { %3638 = vrot.lane.b32.xlu1 %v11371_v37, %s14473_s23  ;;  %v3533_v1 = vrot.slane %v11371_v37, 1  ;;  %v3534_v52 = vrot.slane %v3493_v12, 1  ;;  %v3557_v5 = vrot.slane %v11371_v37, 2  ;;  %v3558_v18 = vrot.slane %v3493_v12, 2 }
 0x2ec   : > { %v3751_v13 = vpop.permute.xlu1 %3750 }
 0x2ed   : > { %v3833_v33 = vsel %vm3832_vm12, %v3824_v41, %v3751_v13  ;;  %v8643_v39 = vpop.f32.mrb[20].mxu0  ;;  %v11379_v55 = vsel %vm14435_vm5, %v3533_v1, %v3534_v52  ;;  %v11391_v42 = vsel %vm14568_vm4, %v3557_v5, %v3558_v18  ;;  %vm14577_vm4 = vmmov %vm14574_vm10 }
 0x2ee   : > { %8677 = vmatprep.mubr.msk.f32.mxu1 %vm3857_vm0, %v3833_v33  ;;  %v2269_v25 = vpop.f32.mrb[21].mxu0  ;;  %3592 = vrot.lane.b32.xlu0 %v11379_v55, %s9438_s14  ;;  %vm14579_vm5 = vmmov %vm14577_vm4 }
 0x2ef   : > { %3730 = vrot.lane.b32.xlu1 %v11285_v4, %s9449_s18  ;;  %v11402_v4 = vadd.f32 %v11160_v54, %v8643_v39  ;;  %v11405_v40 = vadd.f32 %v11160_v54, %v2269_v25 }
 0x2f1   : > { %14569 = vst [vmem:[#allocation15_spill] sm:$0xff] %v11402_v4  ;;  %14570 = vst [vmem:[#allocation16_spill] sm:$0xff] %v11405_v40  ;;  %v14439_v44 = vmax.f32 %v11402_v4, 0.0  ;;  %v14437_v36 = vmax.f32 %v11405_v40, 0.0 }
 0x2f2   : > { %3684 = vrot.lane.b32.xlu0 %v11298_v29, %s14471_s15 }
 0x2f3   : > { %3662 = vrot.lane.b32.xlu1 %v11379_v55, %s9445_s22 }
 0x2f6   : > { %3616 = vrot.lane.b32.xlu0 %v11391_v42, %s9441_s17 }
 0x2f7   : > { %3754 = vrot.lane.b32.xlu1 %v11298_v29, %s9450_s27  ;;  %v11413_v29 = vpop.permute.xlu0 %3656 }
 0x2fa   : > { %3708 = vrot.lane.b32.xlu0 %v11371_v37, %s14549_s16 }
 0x2fb   : > { %3686 = vrot.lane.b32.xlu1 %v11391_v42, %s14471_s15  ;;  %v11427_v23 = vpop.permute.xlu0 %3588 }
 0x2ff   : > { %v11437_v18 = vpop.permute.xlu0 %3680 }
 0x302   : > { %v8646_v24 = vpop.f32.mrb[22].mxu0 }
 0x303   : > { %v11408_v34 = vadd.f32 %v11160_v54, %v8646_v24  ;;  %v2279_v30 = vpop.f32.mrb[23].mxu0 }
 0x304   : > { %v11411_v63 = vadd.f32 %v11160_v54, %v2279_v30 }
 0x305   : > { %14571 = vst [vmem:[#allocation17_spill] sm:$0xff] %v11408_v34  ;;  %v14438_v53 = vmax.f32 %v11408_v34, 0.0 }
 0x306   : > { %14572 = vst [vmem:[#allocation18_spill] sm:$0xff] %v11411_v63  ;;  %v14436_v32 = vmax.f32 %v11411_v63, 0.0 }
 0x307   : > { %v2533_v6 = vmax.f32 %v14439_v44, %v14438_v53 }
 0x308   : > { %v2532_v16 = vmax.f32 %v14437_v36, %v14436_v32 }
 0x309   : > { %v2741_v38 = vcombine.high %v2533_v6, %v2533_v6  ;;  %v2748_v0 = vrot.slane %v2533_v6, %v10549_v8 }
 0x30a   : > { %v2724_v59 = vcombine.high %v2532_v16, %v2532_v16  ;;  %v2731_v10 = vrot.slane %v2532_v16, %v10549_v8 }
 0x30b   : > { %v2755_v21 = vrot.slane %v2741_v38, %v10549_v8  ;;  %v2756_v17 = vcombine.high %v2748_v0, %v2748_v0  ;;  %v3198_v60 = vsel %vm14573_vm14, %v2748_v0, -inf  ;;  %vm14578_vm14 = vmmov %vm14577_vm4 }
 0x30c   : > { %v3199_v45 = vrot.slane %v3198_v60, 4  ;;  %v2738_v50 = vrot.slane %v2724_v59, %v10549_v8  ;;  %v2739_v11 = vcombine.high %v2731_v10, %v2731_v10  ;;  %v3170_v41 = vsel %vm14574_vm10, %v2731_v10, -inf  ;;  %vm14580_vm10 = vmmov %vm14577_vm4 }
 0x30d   : > { %v2757_v13 = vcombine.high %v2755_v21, %v2755_v21  ;;  %v3205_v12 = vsel %vm14575_vm11, %v2756_v17, -inf  ;;  %v3212_v33 = vsel %vm14576_vm13, %v2755_v21, -inf  ;;  %v3171_v1 = vrot.slane %v3170_v41, 4 }
 0x30e   : > { %v3200_v52 = vmax.f32 %v3198_v60, %v3199_v45  ;;  %v3206_v39 = vrot.slane %v3205_v12, 4  ;;  %v3213_v25 = vrot.slane %v3212_v33, 4  ;;  %v2740_v5 = vcombine.high %v2738_v50, %v2738_v50 }
 0x30f   : > { %v3219_v24 = vsel %vm14577_vm4, %v2757_v13, -inf  ;;  %v3172_v30 = vmax.f32 %v3170_v41, %v3171_v1  ;;  %v3177_v6 = vsel %vm14578_vm14, %v2739_v11, -inf  ;;  %v3184_v16 = vsel %vm14579_vm5, %v2738_v50, -inf  ;;  %v11443_v1 = vpop.permute.xlu0 %3612 }
 0x310   : > { %v3207_v38 = vmax.f32 %v3205_v12, %v3206_v39  ;;  %v3214_v0 = vmax.f32 %v3212_v33, %v3213_v25  ;;  %v3220_v59 = vrot.slane %v3219_v24, 4  ;;  %v3178_v17 = vrot.slane %v3177_v6, 4 }
 0x311   : > { %v3173_v10 = vrot.slane %v3172_v30, 2  ;;  %v3185_v21 = vrot.slane %v3184_v16, 4  ;;  %v3191_v60 = vsel %vm14580_vm10, %v2740_v5, -inf  ;;  %v3201_v45 = vrot.slane %v3200_v52, 2 }
 0x312   : > { %v3208_v32 = vrot.slane %v3207_v38, 2  ;;  %v3221_v36 = vmax.f32 %v3219_v24, %v3220_v59  ;;  %v3179_v44 = vmax.f32 %v3177_v6, %v3178_v17  ;;  %v3192_v13 = vrot.slane %v3191_v60, 4 }
 0x313   : > { %v3174_v53 = vmax.f32 %v3172_v30, %v3173_v10  ;;  %v3186_v63 = vmax.f32 %v3184_v16, %v3185_v21  ;;  %v3215_v41 = vrot.slane %v3214_v0, 2  ;;  %v3202_v39 = vmax.f32 %v3200_v52, %v3201_v45  ;;  %v3705_v10 = vpop.permute.xlu0 %3704  ;;  %v9400_v45 = vld [vmem:[#allocation3 + $0x10] sm:$0xff] }
 0x314   : > { %v3222_v11 = vrot.slane %v3221_v36, 2  ;;  %v3180_v50 = vrot.slane %v3179_v44, 2  ;;  %v3193_v33 = vmax.f32 %v3191_v60, %v3192_v13  ;;  %v3209_v25 = vmax.f32 %v3207_v38, %v3208_v32 }
 0x315   : > { %v3187_v12 = vrot.slane %v3186_v63, 2  ;;  %v3175_v40 = vrot.slane %v3174_v53, 1  ;;  %v3216_v47 = vmax.f32 %v3214_v0, %v3215_v41  ;;  %v3203_v16 = vrot.slane %v3202_v39, 1 }
 0x316   : > { %v3181_v34 = vmax.f32 %v3179_v44, %v3180_v50  ;;  %v3194_v5 = vrot.slane %v3193_v33, 2  ;;  %v3223_v2 = vmax.f32 %v3221_v36, %v3222_v11  ;;  %v3210_v59 = vrot.slane %v3209_v25, 1 }
 0x317   : > { %v3188_v4 = vmax.f32 %v3186_v63, %v3187_v12  ;;  %v3176_v17 = vmax.f32 %v3174_v53, %v3175_v40  ;;  %v3217_v3 = vrot.slane %v3216_v47, 1  ;;  %v3204_v44 = vmax.f32 %v3202_v39, %v3203_v16 }
 0x318   : > { %v3182_v24 = vrot.slane %v3181_v34, 1  ;;  %v3195_v6 = vmax.f32 %v3193_v33, %v3194_v5  ;;  %v3224_v60 = vrot.slane %v3223_v2, 1  ;;  %v3211_v38 = vmax.f32 %v3209_v25, %v3210_v59 }
 0x319   : > { %v3189_v30 = vrot.slane %v3188_v4, 1  ;;  %v3775_v40 = vsel %vm487_vm3, %v9400_v45, %v11295_v46  ;;  %vm14581_vm5 = vcmask 1044484   ;;  %vm14582_vm11 = vcmask 1045509  }
 0x31a   : > { %v3183_v21 = vmax.f32 %v3181_v34, %v3182_v24  ;;  %v3196_v28 = vrot.slane %v3195_v6, 1  ;;  %v3218_v34 = vmax.f32 %v3216_v47, %v3217_v3  ;;  %v3225_v53 = vmax.f32 %v3223_v2, %v3224_v60 }
 0x31b   : > { %v3190_v35 = vmax.f32 %v3188_v4, %v3189_v30  ;;  %vm14583_vm13 = vcmask 1046534   ;;  %vm14584_vm4 = vcmask 261120   ;;  %vm14585_vm14 = vcmask 1047559  }
 0x31c   : > { %v3197_v52 = vmax.f32 %v3195_v6, %v3196_v28  ;;  %v3444_v32 = vsel %vm3402_vm1, %v3183_v21, %v3176_v17  ;;  %v3783_v28 = vsel %vm1826_vm9, %v3775_v40, %v11305_v61  ;;  %vm14586_vm10 = vcmask 392192  }
 0x31d   : > { %v3445_v63 = vsel %vm14460_vm2, %v3190_v35, %v3444_v32  ;;  %v3791_v35 = vsel %vm560_vm6, %v3783_v28, %v11313_v15 }
 0x31e   : > { %v3446_v36 = vsel %vm14462_vm7, %v3197_v52, %v3445_v63  ;;  %v3799_v50 = vsel %vm14584_vm4, %v3791_v35, %v11413_v29 }
 0x31f   : > { %v11448_v0 = vpop.permute.xlu0 %3636  ;;  %v3447_v4 = vsel %vm14581_vm5, %v3204_v44, %v3446_v36  ;;  %v3808_v46 = vsel %vm3806_vm8, %v3799_v50, %v11437_v18  ;;  %vm14587_vm5 = vcmask 1045504  }
 0x320   : > { %v3448_v13 = vsel %vm14582_vm11, %v3211_v38, %v3447_v4  ;;  %v3816_v61 = vsel %vm14586_vm10, %v3808_v46, %v3705_v10  ;;  %vm14588_vm11 = vcmask 1046528  }
 0x321   : > { %v3449_v41 = vsel %vm14583_vm13, %v3218_v34, %v3448_v13  ;;  %vm14589_vm13 = vcmask 58368  }
 0x322   : > { %v11459_v11 = vpop.permute.xlu1 %3660  ;;  %v3450_v3 = vsel %vm14585_vm14, %v3225_v53, %v3449_v41  ;;  %vm14590_vm4 = vmmov %vm14589_vm13 }
 0x323   : > { %v3729_v47 = vpop.permute.xlu0 %3728  ;;  %3479 = vst.msk [vmem:[#allocation3 + $0x61] sm:$0xff] %vm487_vm3, %v3450_v3  ;;  %vm14591_vm14 = vmmov %vm14590_vm4 }
 0x324   : > { %v3825_v2 = vsel %vm3823_vm15, %v3816_v61, %v3729_v47  ;;  %vm14592_vm10 = vmmov %vm14590_vm4 }
 0x326   : > { %v3753_v15 = vpop.permute.xlu1 %3752 }
 0x327   : > { %v3834_v12 = vsel %vm3832_vm12, %v3825_v2, %v3753_v15 }
 0x328   : > { %8678 = vmatmul.mubr.msk.f32.vlgmr.msra.gmra.mrb[0].mxu1 %vm3857_vm0, %v3834_v12 }
 0x32a   : > { %v11471_v33 = vld [vmem:[#allocation3 + $0x60] sm:$0xff]  ;;  %v3495_v29 = vld [vmem:[#allocation3 + $0x68] sm:$0x3] }
 0x32b   : > { %3640 = vrot.lane.b32.xlu0 %v11471_v33, %s14473_s23  ;;  %v3560_v39 = vrot.slane %v11471_v33, 2  ;;  %v3561_v18 = vrot.slane %v3495_v29, 2  ;;  %v3536_v30 = vrot.slane %v11471_v33, 1  ;;  %v3537_v6 = vrot.slane %v3495_v29, 1 }
 0x32d   : > { %v11477_v5 = vsel %vm14587_vm5, %v3560_v39, %v3561_v18  ;;  %v3538_v17 = vsel %vm14588_vm11, %v3536_v30, %v3537_v6  ;;  %vm14593_vm5 = vmmov %vm14590_vm4 }
 0x32e   : > { %3688 = vrot.lane.b32.xlu1 %v11477_v5, %s14471_s15  ;;  %vm14594_vm11 = vmmov %vm14590_vm4 }
 0x32f   : > { %3732 = vrot.lane.b32.xlu0 %v11379_v55, %s9449_s18 }
 0x330   : > { %v8649_v25 = vpop.f32.mrb[24].mxu0 }
 0x331   : > { %v2289_v24 = vpop.f32.mrb[25].mxu0  ;;  %v11485_v16 = vadd.f32 %v11160_v54, %v8649_v25 }
 0x332   : > { %v11488_v59 = vadd.f32 %v11160_v54, %v2289_v24 }
 0x333   : > { %3664 = vrot.lane.b32.xlu0 %v3538_v17, %s9445_s22  ;;  %v14456_v55 = vmax.f32 %v11485_v16, 0.0 }
 0x334   : > { %v8652_v10 = vpop.f32.mrb[26].mxu0  ;;  %v14450_v44 = vmax.f32 %v11488_v59, 0.0 }
 0x335   : > { %v11492_v21 = vadd.f32 %v11160_v54, %v8652_v10  ;;  %v2299_v60 = vpop.f32.mrb[27].mxu0 }
 0x336   : > { %v11496_v52 = vadd.f32 %v11160_v54, %v2299_v60 }
 0x337   : > { %v14451_v32 = vmax.f32 %v11492_v21, 0.0  ;;  %3756 = vrot.lane.b32.xlu0 %v11391_v42, %s9450_s27 }
 0x338   : > { %v14449_v63 = vmax.f32 %v11496_v52, 0.0 }
 0x339   : > { %v2535_v38 = vmax.f32 %v14456_v55, %v14451_v32 }
 0x33a   : > { %v2534_v54 = vmax.f32 %v14450_v44, %v14449_v63 }
 0x33b   : > { %v2775_v36 = vcombine.high %v2535_v38, %v2535_v38  ;;  %v2782_v45 = vrot.slane %v2535_v38, %v10549_v8  ;;  %3710 = vrot.lane.b32.xlu0 %v11471_v33, %s14549_s16 }
 0x33c   : > { %v2758_v40 = vcombine.high %v2534_v54, %v2534_v54  ;;  %v2765_v34 = vrot.slane %v2534_v54, %v10549_v8 }
 0x33d   : > { %v2789_v4 = vrot.slane %v2775_v36, %v10549_v8  ;;  %v2790_v28 = vcombine.high %v2782_v45, %v2782_v45  ;;  %v3254_v53 = vsel %vm14589_vm13, %v2782_v45, -inf  ;;  %vm14595_vm13 = vmmov %vm14590_vm4 }
 0x33e   : > { %v3255_v42 = vrot.slane %v3254_v53, 4  ;;  %v2772_v13 = vrot.slane %v2758_v40, %v10549_v8  ;;  %v2773_v35 = vcombine.high %v2765_v34, %v2765_v34  ;;  %v3226_v41 = vsel %vm14590_vm4, %v2765_v34, -inf }
 0x33f   : > { %v2791_v50 = vcombine.high %v2789_v4, %v2789_v4  ;;  %v3261_v3 = vsel %vm14591_vm14, %v2790_v28, -inf  ;;  %v3268_v47 = vsel %vm14592_vm10, %v2789_v4, -inf  ;;  %v3227_v46 = vrot.slane %v3226_v41, 4  ;;  %3734 = vrot.lane.b32.xlu0 %v3538_v17, %s9449_s18 }
 0x340   : > { %v3256_v61 = vmax.f32 %v3254_v53, %v3255_v42  ;;  %v3262_v2 = vrot.slane %v3261_v3, 4  ;;  %v3269_v15 = vrot.slane %v3268_v47, 4  ;;  %v2774_v12 = vcombine.high %v2772_v13, %v2772_v13 }
 0x341   : > { %v3275_v29 = vsel %vm14593_vm5, %v2791_v50, -inf  ;;  %v3228_v39 = vmax.f32 %v3226_v41, %v3227_v46  ;;  %v3233_v18 = vsel %vm14594_vm11, %v2773_v35, -inf  ;;  %v3240_v25 = vsel %vm14595_vm13, %v2772_v13, -inf }
 0x342   : > { %v3263_v24 = vmax.f32 %v3261_v3, %v3262_v2  ;;  %v3270_v30 = vmax.f32 %v3268_v47, %v3269_v15  ;;  %v3276_v6 = vrot.slane %v3275_v29, 4  ;;  %v3234_v60 = vrot.slane %v3233_v18, 4 }
 0x343   : > { %v3229_v10 = vrot.slane %v3228_v39, 2  ;;  %v3241_v38 = vrot.slane %v3240_v25, 4  ;;  %v3247_v54 = vsel %vm14590_vm4, %v2774_v12, -inf  ;;  %v3257_v36 = vrot.slane %v3256_v61, 2  ;;  %3758 = vrot.lane.b32.xlu0 %v11477_v5, %s9450_s27 }
 0x344   : > { %v3264_v45 = vrot.slane %v3263_v24, 2  ;;  %v3277_v40 = vmax.f32 %v3275_v29, %v3276_v6  ;;  %v3235_v4 = vmax.f32 %v3233_v18, %v3234_v60  ;;  %v3248_v53 = vrot.slane %v3247_v54, 4 }
 0x345   : > { %v3230_v34 = vmax.f32 %v3228_v39, %v3229_v10  ;;  %v3242_v28 = vmax.f32 %v3240_v25, %v3241_v38  ;;  %v3271_v42 = vrot.slane %v3270_v30, 2  ;;  %v3258_v3 = vmax.f32 %v3256_v61, %v3257_v36 }
 0x346   : > { %v3278_v13 = vrot.slane %v3277_v40, 2  ;;  %v3236_v35 = vrot.slane %v3235_v4, 2  ;;  %v3249_v50 = vmax.f32 %v3247_v54, %v3248_v53  ;;  %v3265_v47 = vmax.f32 %v3263_v24, %v3264_v45 }
 0x347   : > { %v3243_v41 = vrot.slane %v3242_v28, 2  ;;  %v3231_v46 = vrot.slane %v3230_v34, 1  ;;  %3594 = vrot.lane.b32.xlu0 %v3538_v17, %s9438_s14  ;;  %v3272_v29 = vmax.f32 %v3270_v30, %v3271_v42  ;;  %v3259_v10 = vrot.slane %v3258_v3, 1 }
 0x348   : > { %v3237_v2 = vmax.f32 %v3235_v4, %v3236_v35  ;;  %v3250_v12 = vrot.slane %v3249_v50, 2  ;;  %v3279_v39 = vmax.f32 %v3277_v40, %v3278_v13  ;;  %v3266_v60 = vrot.slane %v3265_v47, 1 }
 0x349   : > { %v3244_v15 = vmax.f32 %v3242_v28, %v3243_v41  ;;  %v3232_v38 = vmax.f32 %v3230_v34, %v3231_v46  ;;  %v3273_v61 = vrot.slane %v3272_v29, 1  ;;  %v3260_v17 = vmax.f32 %v3258_v3, %v3259_v10  ;;  %v11551_v3 = vpop.permute.xlu0 %3590 }
 0x34a   : > { %v3238_v18 = vrot.slane %v3237_v2, 1  ;;  %v3251_v6 = vmax.f32 %v3249_v50, %v3250_v12  ;;  %v3280_v24 = vrot.slane %v3279_v39, 1  ;;  %v3267_v45 = vmax.f32 %v3265_v47, %v3266_v60  ;;  %v9401_v12 = vld [vmem:[#allocation3 + $0x20] sm:$0xff] }
 0x34b   : > { %v3245_v25 = vrot.slane %v3244_v15, 1  ;;  %3618 = vrot.lane.b32.xlu0 %v11477_v5, %s9441_s17  ;;  %v3274_v4 = vmax.f32 %v3272_v29, %v3273_v61  ;;  %vm14596_vm14 = vcmask 1044484   ;;  %vm14597_vm10 = vcmask 1045509   ;;  %v11538_v5 = vpop.permute.xlu1 %3614 }
 0x34c   : > { %v3239_v63 = vmax.f32 %v3237_v2, %v3238_v18  ;;  %v3252_v32 = vrot.slane %v3251_v6, 1  ;;  %v3281_v28 = vmax.f32 %v3279_v39, %v3280_v24  ;;  %vm14598_vm5 = vcmask 1046534  }
 0x34d   : > { %v3246_v44 = vmax.f32 %v3244_v15, %v3245_v25  ;;  %vm14599_vm11 = vcmask 1047559   ;;  %vm14600_vm13 = vcmask 1046528   ;;  %v3776_v29 = vsel %vm487_vm3, %v9401_v12, %v11333_v26  ;;  %v3683_v25 = vpop.permute.xlu0 %3682 }
 0x34e   : > { %v3253_v54 = vmax.f32 %v3251_v6, %v3252_v32  ;;  %v3451_v36 = vsel %vm3402_vm1, %v3239_v63, %v3232_v38  ;;  %vm14601_vm4 = vcmask 1045504   ;;  %v3784_v18 = vsel %vm1826_vm9, %v3776_v29, %v11349_v56 }
 0x34f   : > { %v3452_v30 = vsel %vm14460_vm2, %v3246_v44, %v3451_v36  ;;  %v3707_v63 = vpop.permute.xlu1 %3706  ;;  %v3792_v6 = vsel %vm560_vm6, %v3784_v18, %v11354_v20 }
 0x350   : > { %v3453_v40 = vsel %vm14462_vm7, %v3253_v54, %v3452_v30 }
 0x351   : > { %v3454_v34 = vsel %vm14596_vm14, %v3260_v17, %v3453_v40  ;;  %vm14602_vm14 = vcmask 261120  }
 0x352   : > { %v3455_v53 = vsel %vm14597_vm10, %v3267_v45, %v3454_v34  ;;  %v3800_v60 = vsel %vm14602_vm14, %v3792_v6, %v11364_v14  ;;  %vm14603_vm10 = vcmask 392192   ;;  %v9402_v14 = vld [vmem:[%s14386_s2] ss:$0 sm:$0xff] }
 0x353   : > { %v3456_v42 = vsel %vm14598_vm5, %v3274_v4, %v3455_v53  ;;  %v3809_v26 = vsel %vm3806_vm8, %v3800_v60, %v3683_v25  ;;  %vm14607_vm5 = vcmask 58368  }
 0x354   : > { %v3457_v32 = vsel %vm14599_vm11, %v3281_v28, %v3456_v42  ;;  %v3817_v38 = vsel %vm14603_vm10, %v3809_v26, %v3707_v63  ;;  %vm14608_vm11 = vmmov %vm14607_vm5 }
 0x355   : > { %3480 = vst.msk [vmem:[#allocation3 + $0x71] sm:$0xff] %vm487_vm3, %v3457_v32 }
 0x35c   : > { %v11542_v13 = vld [vmem:[#allocation3 + $0x70] sm:$0xff]  ;;  %v3497_v44 = vld [vmem:[#allocation3 + $0x78] sm:$0x3] }
 0x35d   : > { %3642 = vrot.lane.b32.xlu0 %v11542_v13, %s14473_s23  ;;  %3712 = vrot.lane.b32.xlu1 %v11542_v13, %s14549_s16  ;;  %v3539_v35 = vrot.slane %v11542_v13, 1  ;;  %v3540_v41 = vrot.slane %v3497_v44, 1  ;;  %v11549_v50 = vpop.permute.xlu1 %3638  ;;  %v3563_v46 = vrot.slane %v11542_v13, 2  ;;  %v3564_v2 = vrot.slane %v3497_v44, 2 }
 0x35f   : > { %v3541_v47 = vsel %vm14600_vm13, %v3539_v35, %v3540_v41  ;;  %v3565_v39 = vsel %vm14601_vm4, %v3563_v46, %v3564_v2  ;;  %vm14609_vm13 = vmmov %vm14607_vm5 }
 0x360   : > { %vm14610_vm4 = vmmov %vm14607_vm5 }
 0x361   : > { %3666 = vrot.lane.b32.xlu0 %v3541_v47, %s9445_s22  ;;  %3736 = vrot.lane.b32.xlu1 %v3541_v47, %s9449_s18  ;;  %v3731_v15 = vpop.permute.xlu1 %3730  ;;  %vm14611_vm14 = vmmov %vm14610_vm4 }
 0x362   : > { %v3826_v56 = vsel %vm3823_vm15, %v3817_v38, %v3731_v15  ;;  %vm14612_vm10 = vmmov %vm14610_vm4 }
 0x365   : > { %3690 = vrot.lane.b32.xlu0 %v3565_v39, %s14471_s15  ;;  %3760 = vrot.lane.b32.xlu1 %v3565_v39, %s9450_s27  ;;  %v11566_v10 = vpop.permute.xlu1 %3662 }
 0x369   : > { %3596 = vrot.lane.b32.xlu1 %v3541_v47, %s9438_s14  ;;  %v3755_v61 = vpop.permute.xlu1 %3754  ;;  %s14714_s14 = smov 24  }
 0x36a   : > { %v3835_v24 = vsel %vm3832_vm12, %v3826_v56, %v3755_v61 }
 0x36b   : > { %8680 = vmatprep.mubr.msk.f32.mxu1 %vm3857_vm0, %v3835_v24 }
 0x36d   : > { %3620 = vrot.lane.b32.xlu1 %v3565_v39, %s9441_s17 }
 0x36f   : > { %v8655_v20 = vpop.f32.mrb[28].mxu0 }
 0x370   : > { %v2309_v54 = vpop.f32.mrb[29].mxu0  ;;  %v11580_v36 = vadd.f32 %v9402_v14, %v8655_v20 }
 0x371   : > { %v11582_v17 = vadd.f32 %v9402_v14, %v2309_v54 }
 0x372   : > { %v14455_v34 = vmax.f32 %v11580_v36, 0.0 }
 0x373   : > { %14604 = vst [vmem:[#allocation19_spill] sm:$0xff] %v11582_v17  ;;  %v14453_v53 = vmax.f32 %v11582_v17, 0.0 }
 0x374   : > { %v8658_v30 = vpop.f32.mrb[30].mxu0 }
 0x375   : > { %v11584_v45 = vadd.f32 %v9402_v14, %v8658_v30  ;;  %v2319_v40 = vpop.f32.mrb[31].mxu0 }
 0x376   : > { %v11586_v4 = vadd.f32 %v9402_v14, %v2319_v40 }
 0x377   : > { %14605 = vst [vmem:[#allocation20_spill] sm:$0xff] %v11584_v45  ;;  %v14454_v28 = vmax.f32 %v11584_v45, 0.0 }
 0x378   : > { %14606 = vst [vmem:[#allocation21_spill] sm:$0xff] %v11586_v4  ;;  %v14452_v42 = vmax.f32 %v11586_v4, 0.0 }
 0x379   : > { %v2537_v32 = vmax.f32 %v14455_v34, %v14454_v28 }
 0x37a   : > { %v2536_v63 = vmax.f32 %v14453_v53, %v14452_v42 }
 0x37b   : > { %v2809_v44 = vcombine.high %v2537_v32, %v2537_v32  ;;  %v2816_v35 = vrot.slane %v2537_v32, %v10549_v8 }
 0x37c   : > { %v2792_v41 = vcombine.high %v2536_v63, %v2536_v63  ;;  %v2799_v47 = vrot.slane %v2536_v63, %v10549_v8 }
 0x37d   : > { %v2823_v46 = vrot.slane %v2809_v44, %v10549_v8  ;;  %v2824_v2 = vcombine.high %v2816_v35, %v2816_v35  ;;  %v3310_v15 = vsel %vm14607_vm5, %v2816_v35, -inf  ;;  %vm14613_vm5 = vmmov %vm14610_vm4 }
 0x37e   : > { %v3311_v12 = vrot.slane %v3310_v15, 4  ;;  %v2806_v29 = vrot.slane %v2792_v41, %v10549_v8  ;;  %v2807_v39 = vcombine.high %v2799_v47, %v2799_v47  ;;  %v3282_v18 = vsel %vm14608_vm11, %v2799_v47, -inf  ;;  %vm14614_vm11 = vmmov %vm14610_vm4 }
 0x37f   : > { %v2825_v25 = vcombine.high %v2823_v46, %v2823_v46  ;;  %v3317_v6 = vsel %vm14609_vm13, %v2824_v2, -inf  ;;  %v3324_v60 = vsel %vm14610_vm4, %v2823_v46, -inf  ;;  %v3283_v26 = vrot.slane %v3282_v18, 4 }
 0x380   : > { %v3312_v38 = vmax.f32 %v3310_v15, %v3311_v12  ;;  %v3318_v56 = vrot.slane %v3317_v6, 4  ;;  %v3325_v61 = vrot.slane %v3324_v60, 4  ;;  %v2808_v24 = vcombine.high %v2806_v29, %v2806_v29 }
 0x381   : > { %v3331_v20 = vsel %vm14611_vm14, %v2825_v25, -inf  ;;  %v3284_v54 = vmax.f32 %v3282_v18, %v3283_v26  ;;  %v3289_v14 = vsel %vm14612_vm10, %v2807_v39, -inf  ;;  %v3296_v30 = vsel %vm14613_vm5, %v2806_v29, -inf }
 0x382   : > { %v3319_v40 = vmax.f32 %v3317_v6, %v3318_v56  ;;  %v3326_v32 = vmax.f32 %v3324_v60, %v3325_v61  ;;  %v3332_v63 = vrot.slane %v3331_v20, 4  ;;  %v3290_v35 = vrot.slane %v3289_v14, 4  ;;  %v11612_v56 = vpop.permute.xlu0 %3592 }
 0x383   : > { %v3285_v44 = vrot.slane %v3284_v54, 2  ;;  %v3297_v41 = vrot.slane %v3296_v30, 4  ;;  %v3303_v47 = vsel %vm14614_vm11, %v2808_v24, -inf  ;;  %v3313_v46 = vrot.slane %v3312_v38, 2 }
 0x384   : > { %v3320_v2 = vrot.slane %v3319_v40, 2  ;;  %v3333_v15 = vmax.f32 %v3331_v20, %v3332_v63  ;;  %v3291_v42 = vmax.f32 %v3289_v14, %v3290_v35  ;;  %v3304_v25 = vrot.slane %v3303_v47, 4 }
 0x385   : > { %v3286_v12 = vmax.f32 %v3284_v54, %v3285_v44  ;;  %v3298_v53 = vmax.f32 %v3296_v30, %v3297_v41  ;;  %v3327_v18 = vrot.slane %v3326_v32, 2  ;;  %v3314_v6 = vmax.f32 %v3312_v38, %v3313_v46 }
 0x386   : > { %v3334_v26 = vrot.slane %v3333_v15, 2  ;;  %v3292_v39 = vrot.slane %v3291_v42, 2  ;;  %v3305_v29 = vmax.f32 %v3303_v47, %v3304_v25  ;;  %v3321_v60 = vmax.f32 %v3319_v40, %v3320_v2  ;;  %v3685_v38 = vpop.permute.xlu0 %3684 }
 0x387   : > { %v3299_v28 = vrot.slane %v3298_v53, 2  ;;  %v3287_v61 = vrot.slane %v3286_v12, 1  ;;  %v3328_v4 = vmax.f32 %v3326_v32, %v3327_v18  ;;  %v3315_v30 = vrot.slane %v3314_v6, 1 }
 0x388   : > { %v3293_v34 = vmax.f32 %v3291_v42, %v3292_v39  ;;  %v3306_v24 = vrot.slane %v3305_v29, 2  ;;  %v3335_v17 = vmax.f32 %v3333_v15, %v3334_v26  ;;  %v3322_v63 = vrot.slane %v3321_v60, 1 }
 0x389   : > { %v3300_v55 = vmax.f32 %v3298_v53, %v3299_v28  ;;  %v3288_v44 = vmax.f32 %v3286_v12, %v3287_v61  ;;  %v3329_v47 = vrot.slane %v3328_v4, 1  ;;  %v3316_v42 = vmax.f32 %v3314_v6, %v3315_v30  ;;  %v3501_v30 = vld [vmem:[#allocation3 + $0x98] sm:$0x3] }
 0x38a   : > { %v3294_v20 = vrot.slane %v3293_v34, 1  ;;  %v3307_v14 = vmax.f32 %v3305_v29, %v3306_v24  ;;  %v3336_v40 = vrot.slane %v3335_v17, 1  ;;  %v3323_v53 = vmax.f32 %v3321_v60, %v3322_v63  ;;  %v11620_v12 = vpop.permute.xlu0 %3616  ;;  %v9403_v63 = vld [vmem:[#allocation3 + $0x30] sm:$0xff] }
 0x38b   : > { %v3301_v54 = vrot.slane %v3300_v55, 1  ;;  %v3330_v15 = vmax.f32 %v3328_v4, %v3329_v47  ;;  %vm14615_vm13 = vcmask 1044484   ;;  %vm14616_vm4 = vcmask 1045509  }
 0x38c   : > { %v3295_v35 = vmax.f32 %v3293_v34, %v3294_v20  ;;  %v3308_v45 = vrot.slane %v3307_v14, 1  ;;  %v3337_v18 = vmax.f32 %v3335_v17, %v3336_v40  ;;  %vm14617_vm14 = vcmask 1046534  }
 0x38d   : > { %v3302_v41 = vmax.f32 %v3300_v55, %v3301_v54  ;;  %vm14618_vm10 = vcmask 1047559   ;;  %vm515_vm5 = vcmask 128000   ;;  %vm14619_vm11 = vcmask 1046528  }
 0x38e   : > { %v3309_v46 = vmax.f32 %v3307_v14, %v3308_v45  ;;  %v3458_v2 = vsel %vm3402_vm1, %v3295_v35, %v3288_v44  ;;  %v3709_v26 = vpop.permute.xlu0 %3708  ;;  %v14620_v61 = vmov 0.0   ;;  %v3500_v14 = vld [vmem:[#allocation3 + $0x90] sm:$0xff]  ;;  %v3777_v44 = vsel %vm487_vm3, %v9403_v63, %v11427_v23 }
 0x38f   : > { %v3459_v28 = vsel %vm14460_vm2, %v3302_v41, %v3458_v2  ;;  %516 = vst.msk [vmem:[#allocation4] sm:$0x3f] %vm515_vm5, %v14620_v61  ;;  %518 = vst.msk [vmem:[#allocation4 + $0x28] sm:$0x3f] %vm515_vm5, %v14620_v61  ;;  %v3785_v41 = vsel %vm1826_vm9, %v3777_v44, %v11443_v1  ;;  %v3576_v40 = vrot.slane %v3500_v14, 1  ;;  %v3577_v2 = vrot.slane %v3501_v30, 1 }
 0x390   : > { %v3460_v32 = vsel %vm14462_vm7, %v3309_v46, %v3459_v28  ;;  %v3793_v47 = vsel %vm560_vm6, %v3785_v41, %v11448_v0  ;;  %vm14624_vm5 = vmmov %vm14619_vm11 }
 0x391   : > { %v3461_v25 = vsel %vm14615_vm13, %v3316_v42, %v3460_v32  ;;  %vm519_vm13 = vcmask 122880   ;;  %v3578_v32 = vsel %vm14624_vm5, %v3576_v40, %v3577_v2  ;;  %vm4129_vm5 = vcmask 123904  }
 0x392   : > { %v3462_v34 = vsel %vm14616_vm4, %v3323_v53, %v3461_v25  ;;  %520 = vst.msk [vmem:[#allocation4] sm:$0x1] %vm519_vm13, %v14620_v61  ;;  %521 = vst.msk [vmem:[#allocation4 + $0x8] sm:$0x1] %vm519_vm13, %v14620_v61  ;;  %vm14621_vm4 = vcmask 1045504   ;;  %v3579_v53 = vrot.slane %v3500_v14, 2 }
 0x393   : > { %v3463_v55 = vsel %vm14617_vm14, %v3330_v15, %v3462_v34  ;;  %526 = vst.msk [vmem:[#allocation4 + $0x5] sm:$0x1] %vm519_vm13, %v14620_v61  ;;  %527 = vst.msk [vmem:[#allocation4 + $0xd] sm:$0x1] %vm519_vm13, %v14620_v61  ;;  %vm14622_vm14 = vcmask 261120   ;;  %v3580_v25 = vrot.slane %v3501_v30, 2 }
 0x394   : > { %v3464_v45 = vsel %vm14618_vm10, %v3337_v18, %v3463_v55  ;;  %522 = vst.msk [vmem:[#allocation4 + $0x10] sm:$0x1] %vm519_vm13, %v14620_v61  ;;  %523 = vst.msk [vmem:[#allocation4 + $0x18] sm:$0x1] %vm519_vm13, %v14620_v61  ;;  %v3801_v42 = vsel %vm14622_vm14, %v3793_v47, %v11459_v11  ;;  %vm14623_vm10 = vcmask 392192   ;;  %v9404_v18 = vld [vmem:[#allocation3 + $0x40] sm:$0xff] }
 0x395   : > { %3481 = vst.msk [vmem:[#allocation3 + $0x81] sm:$0xff] %vm487_vm3, %v3464_v45  ;;  %v3810_v23 = vsel %vm3806_vm8, %v3801_v42, %v3685_v38  ;;  %v3778_v34 = vsel %vm487_vm3, %v9404_v18, %v11551_v3  ;;  %v3687_v45 = vpop.permute.xlu1 %3686 }
 0x396   : > { %524 = vst.msk [vmem:[#allocation4 + $0x20] sm:$0x1] %vm519_vm13, %v14620_v61  ;;  %528 = vst.msk [vmem:[#allocation4 + $0x15] sm:$0x1] %vm519_vm13, %v14620_v61  ;;  %v3818_v28 = vsel %vm14623_vm10, %v3810_v23, %v3709_v26  ;;  %v3786_v55 = vsel %vm1826_vm9, %v3778_v34, %v11538_v5 }
 0x397   : > { %529 = vst.msk [vmem:[#allocation4 + $0x1d] sm:$0x1] %vm519_vm13, %v14620_v61  ;;  %530 = vst.msk [vmem:[#allocation4 + $0x25] sm:$0x1] %vm519_vm13, %v14620_v61  ;;  %v3794_v26 = vsel %vm560_vm6, %v3786_v55, %v11549_v50  ;;  %v3779_v50 = vsel %vm487_vm3, %v11371_v37, %v11612_v56  ;;  %v11695_v56 = vld [vmem:[%s14388_s4] ss:$0 sm:$0xff] }
 0x398   : > { %525 = vst.msk [vmem:[#allocation4 + $0x28] sm:$0x1] %vm519_vm13, %v14620_v61  ;;  %531 = vst.msk [vmem:[#allocation4 + $0x2d] sm:$0x1] %vm519_vm13, %v14620_v61 }
 0x399   : > { %vm14626_vm13 = vmmov %vm14622_vm14 }
 0x39a   : > { %vm14628_vm14 = vmmov %vm14626_vm13 }
 0x39c   : > { %v3498_v39 = vld [vmem:[#allocation3 + $0x80] sm:$0xff]  ;;  %v3499_v29 = vld [vmem:[#allocation3 + $0x88] sm:$0x3] }
 0x39d   : > { %3714 = vrot.lane.b32.xlu0 %v3498_v39, %s14549_s16  ;;  %v3568_v6 = vrot.slane %v3498_v39, 1  ;;  %3644 = vrot.lane.b32.xlu1 %v3498_v39, %s14473_s23  ;;  %v3569_v4 = vrot.slane %v3499_v29, 1  ;;  %v11626_v17 = vpop.permute.xlu0 %3640  ;;  %v3571_v24 = vrot.slane %v3498_v39, 2  ;;  %v3572_v20 = vrot.slane %v3499_v29, 2 }
 0x39e   : > { %v3802_v29 = vsel %vm14626_vm13, %v3794_v26, %v11566_v10  ;;  %v3787_v10 = vsel %vm1826_vm9, %v3779_v50, %v11620_v12 }
 0x39f   : > { %v3570_v60 = vsel %vm14619_vm11, %v3568_v6, %v3569_v4  ;;  %v3573_v35 = vsel %vm14621_vm4, %v3571_v24, %v3572_v20  ;;  %vm14625_vm11 = vmmov %vm14621_vm4  ;;  %v3811_v6 = vsel %vm3806_vm8, %v3802_v29, %v3687_v45 }
 0x3a0   : > { %v3581_v11 = vsel %vm14625_vm11, %v3579_v53, %v3580_v25  ;;  %vm14627_vm4 = vmmov %vm14623_vm10  ;;  %v3689_v5 = vpop.permute.xlu1 %3688 }
 0x3a1   : > { %3738 = vrot.lane.b32.xlu0 %v3570_v60, %s9449_s18  ;;  %3668 = vrot.lane.b32.xlu1 %v3570_v60, %s9445_s22  ;;  %v3733_v54 = vpop.permute.xlu0 %3732  ;;  %vm14629_vm10 = vmmov %vm14627_vm4 }
 0x3a2   : > { %v3827_v1 = vsel %vm3823_vm15, %v3818_v28, %v3733_v54  ;;  %v3795_v54 = vsel %vm560_vm6, %v3787_v10, %v11626_v17  ;;  %vm14630_vm11 = vmmov %vm14626_vm13  ;;  %vm14461_vm13 = vcmask 125952  }
 0x3a5   : > { %3762 = vrot.lane.b32.xlu0 %v3573_v35, %s9450_s27  ;;  %3692 = vrot.lane.b32.xlu1 %v3573_v35, %s14471_s15  ;;  %v3665_v46 = vpop.permute.xlu0 %3664 }
 0x3a9   : > { %3716 = vrot.lane.b32.xlu1 %v3500_v14, %s14549_s16  ;;  %v3757_v15 = vpop.permute.xlu0 %3756  ;;  %v3803_v14 = vsel %vm14628_vm14, %v3795_v54, %v3665_v46  ;;  %vm4313_vm14 = vcmask 1041408  }
 0x3aa   : > { %v3836_v0 = vsel %vm3832_vm12, %v3827_v1, %v3757_v15  ;;  %v3812_v63 = vsel %vm3806_vm8, %v3803_v14, %v3689_v5 }
 0x3ab   : > { %8681 = vmatmul.mubr.msk.f32.gmra.mrb[2].mxu1 %vm3857_vm0, %v3836_v0 }
 0x3ad   : > { %3740 = vrot.lane.b32.xlu1 %v3578_v32, %s9449_s18  ;;  %v3711_v38 = vpop.permute.xlu0 %3710 }
 0x3ae   : > { %v3819_v4 = vsel %vm14627_vm4, %v3811_v6, %v3711_v38 }
 0x3b1   : > { %3764 = vrot.lane.b32.xlu1 %v3581_v11, %s9450_s27  ;;  %v3735_v39 = vpop.permute.xlu0 %3734 }
 0x3b2   : > { %v3828_v60 = vsel %vm3823_vm15, %v3819_v4, %v3735_v39 }
 0x3b5   : > { %v3759_v3 = vpop.permute.xlu0 %3758 }
 0x3b6   : > { %v3837_v24 = vsel %vm3832_vm12, %v3828_v60, %v3759_v3 }
 0x3b7   : > { %8683 = vmatprep.mubr.msk.f32.mxu1 %vm3857_vm0, %v3837_v24 }
 0x3b9   : > { %v3595_v37 = vpop.permute.xlu0 %3594 }
 0x3bd   : > { %v3619_v12 = vpop.permute.xlu0 %3618 }
 0x3cf   : > { %v3713_v20 = vpop.permute.xlu1 %3712  ;;  %v3643_v23 = vpop.permute.xlu0 %3642 }
 0x3d0   : > { %v3820_v44 = vsel %vm14629_vm10, %v3812_v63, %v3713_v20  ;;  %vm4314_vm10 = vcmask 1045508  }
 0x3d3   : > { %v3737_v30 = vpop.permute.xlu1 %3736  ;;  %v3667_v15 = vpop.permute.xlu0 %3666 }
 0x3d4   : > { %v3829_v35 = vsel %vm3823_vm15, %v3820_v44, %v3737_v30 }
 0x3d7   : > { %v3761_v41 = vpop.permute.xlu1 %3760  ;;  %v3691_v5 = vpop.permute.xlu0 %3690 }
 0x3d8   : > { %v3838_v47 = vsel %vm3832_vm12, %v3829_v35, %v3761_v41 }
 0x3d9   : > { %8684 = vmatmul.mubr.msk.f32.gmra.mrb[4].mxu1 %vm3857_vm0, %v3838_v47 }
 0x3db   : > { %v11710_v25 = vpop.permute.xlu1 %3596 }
 0x3df   : > { %v3621_v50 = vpop.permute.xlu1 %3620 }
 0x3fb   : > { %v8679_v17 = vpop.f32.mrb[0].mxu1 }
 0x3fc   : > { %v11698_v40 = vadd.f32 %v8679_v17, %v11695_v56  ;;  %v3948_v46 = vpop.f32.mrb[1].mxu1  ;;  %v3780_v17 = vsel %vm487_vm3, %v11471_v33, %v3595_v37 }
 0x3fd   : > { %v11701_v2 = vadd.f32 %v11695_v56, %v3948_v46 }
 0x3fe   : > { %v3988_v42 = vmax.f32 %v11698_v40, 0.0 }
 0x3ff   : > { %v3987_v28 = vmax.f32 %v11701_v2, 0.0 }
 0x401   : > { %v4037_v1 = vmax.f32 %v3987_v28, %v3988_v42 }
 0x403   : > { %v4045_v53 = vcombine.high %v4037_v1, %v4037_v1  ;;  %v4052_v32 = vrot.slane %v4037_v1, %v10549_v8 }
 0x405   : > { %v4059_v0 = vrot.slane %v4045_v53, %v10549_v8  ;;  %v4060_v11 = vcombine.high %v4052_v32, %v4052_v32  ;;  %v4130_v38 = vsel %vm4129_vm5, %v4052_v32, -inf  ;;  %v3788_v32 = vsel %vm1826_vm9, %v3780_v17, %v3619_v12 }
 0x406   : > { %v4131_v18 = vrot.slane %v4130_v38, 4 }
 0x407   : > { %v4061_v34 = vcombine.high %v4059_v0, %v4059_v0  ;;  %v4137_v55 = vsel %vm4129_vm5, %v4060_v11, -inf  ;;  %v4144_v45 = vsel %vm4129_vm5, %v4059_v0, -inf }
 0x408   : > { %v4132_v26 = vmax.f32 %v4130_v38, %v4131_v18  ;;  %v4138_v39 = vrot.slane %v4137_v55, 4  ;;  %v4145_v29 = vrot.slane %v4144_v45, 4 }
 0x409   : > { %v4151_v6 = vsel %vm4129_vm5, %v4061_v34, -inf  ;;  %v3796_v34 = vsel %vm560_vm6, %v3788_v32, %v3643_v23 }
 0x40a   : > { %v4133_v4 = vrot.slane %v4132_v26, 2  ;;  %v4139_v60 = vmax.f32 %v4137_v55, %v4138_v39  ;;  %v4146_v3 = vmax.f32 %v4144_v45, %v4145_v29  ;;  %v4152_v24 = vrot.slane %v4151_v6, 4 }
 0x40c   : > { %v4134_v20 = vmax.f32 %v4132_v26, %v4133_v4  ;;  %v4140_v10 = vrot.slane %v4139_v60, 2  ;;  %v4147_v54 = vrot.slane %v4146_v3, 2  ;;  %v4153_v14 = vmax.f32 %v4151_v6, %v4152_v24  ;;  %v11725_v6 = vld [vmem:[#allocation4] sm:$0x3f] }
 0x40d   : > { %v3804_v26 = vsel %vm14630_vm11, %v3796_v34, %v3667_v15  ;;  %v4290_v24 = vcombine.high %v11725_v6, %v11725_v6  ;;  %vm4294_vm11 = vcmask 1042432  }
 0x40e   : > { %v4135_v30 = vrot.slane %v4134_v20, 1  ;;  %v4141_v63 = vmax.f32 %v4139_v60, %v4140_v10  ;;  %v4148_v44 = vmax.f32 %v4146_v3, %v4147_v54  ;;  %v4154_v35 = vrot.slane %v4153_v14, 2 }
 0x40f   : > { %v3645_v41 = vpop.permute.xlu1 %3644  ;;  %v3715_v47 = vpop.permute.xlu0 %3714  ;;  %v3813_v33 = vsel %vm3806_vm8, %v3804_v26, %v3691_v5  ;;  %v3781_v10 = vsel %vm487_vm3, %v11542_v13, %v11710_v25 }
 0x410   : > { %v4142_v46 = vrot.slane %v4141_v63, 1  ;;  %v4149_v1 = vrot.slane %v4148_v44, 1  ;;  %v4155_v53 = vmax.f32 %v4153_v14, %v4154_v35  ;;  %v4136_v0 = vmax.f32 %v4134_v20, %v4135_v30 }
 0x411   : > { %v3821_v4 = vsel %vm14627_vm4, %v3813_v33, %v3715_v47  ;;  %v8367_v20 = vrot.slane %v11725_v6, 10  ;;  %vm11739_vm4 = vmor %vm4313_vm14, %vm4314_vm10  ;;  %v4318_v14 = vrot.slane %v4290_v24, 6  ;;  %v8363_v30 = vrot.slane %v11725_v6, 9 }
 0x412   : > { %v4143_v11 = vmax.f32 %v4141_v63, %v4142_v46  ;;  %v4150_v38 = vmax.f32 %v4148_v44, %v4149_v1  ;;  %v4156_v18 = vrot.slane %v4155_v53, 1  ;;  %v4299_v63 = vrot.slane %v4290_v24, 5 }
 0x413   : > { %v3669_v55 = vpop.permute.xlu1 %3668  ;;  %v3739_v45 = vpop.permute.xlu0 %3738  ;;  %v3789_v44 = vsel %vm1826_vm9, %v3781_v10, %v3621_v50  ;;  %vm14639_vm14 = vcmask 125952  }
 0x414   : > { %v4157_v39 = vmax.f32 %v4155_v53, %v4156_v18  ;;  %v4258_v29 = vsel %vm3402_vm1, %v4143_v11, %v4136_v0  ;;  %v3830_v23 = vsel %vm3823_vm15, %v3821_v4, %v3739_v45  ;;  %v3797_v47 = vsel %vm560_vm6, %v3789_v44, %v3645_v41 }
 0x415   : > { %v4259_v37 = vsel %vm14460_vm2, %v4150_v38, %v4258_v29  ;;  %vm4295_vm2 = vcmask 1046532   ;;  %v4319_v53 = vsel %vm11739_vm4, %v8367_v20, %v4318_v14 }
 0x416   : > { %v4260_v12 = vsel %vm14462_vm7, %v4157_v39, %v4259_v37  ;;  %vm14635_vm7 = vcmask 261120  }
 0x417   : > { %4276 = vst.msk [vmem:[#allocation4 + $0x9] sm:$0xf] %vm14461_vm13, %v4260_v12  ;;  %v3693_v60 = vpop.permute.xlu1 %3692  ;;  %v3763_v15 = vpop.permute.xlu0 %3762  ;;  %vm11745_vm13 = vmor %vm4294_vm11, %vm4295_vm2  ;;  %v3805_v13 = vsel %vm14635_vm7, %v3797_v47, %v3669_v55  ;;  %vm14636_vm2 = vcmask 392192   ;;  %vm14637_vm7 = vcmask 1042434  }
 0x418   : > { %v3839_v3 = vsel %vm3832_vm12, %v3830_v23, %v3763_v15  ;;  %v3814_v1 = vsel %vm3806_vm8, %v3805_v13, %v3693_v60  ;;  %v4300_v50 = vsel %vm11745_vm13, %v8363_v30, %v4299_v63  ;;  %vm14640_vm10 = vmmov %vm14637_vm7 }
 0x419   : > { %8686 = vmatprep.mubr.msk.f32.mxu1 %vm3857_vm0, %v3839_v3 }
 0x41b   : > { %v3717_v5 = vpop.permute.xlu1 %3716 }
 0x41c   : > { %v3822_v38 = vsel %vm14636_vm2, %v3814_v1, %v3717_v5  ;;  %vm14642_vm2 = vmmov %vm14639_vm14 }
 0x41e   : > { %v11750_v17 = vld [vmem:[#allocation4 + $0x8] sm:$0x3f] }
 0x41f   : > { %v3741_v25 = vpop.permute.xlu1 %3740  ;;  %v4291_v46 = vcombine.high %v11750_v17, %v11750_v17  ;;  %v8368_v32 = vrot.slane %v11750_v17, 10  ;;  %v8364_v41 = vrot.slane %v11750_v17, 9 }
 0x420   : > { %v3831_v18 = vsel %vm3823_vm15, %v3822_v38, %v3741_v25  ;;  %vm14638_vm15 = vcmask 1043459  }
 0x421   : > { %v4322_v0 = vrot.slane %v4291_v46, 6  ;;  %v4303_v11 = vrot.slane %v4291_v46, 5  ;;  %vm14641_vm11 = vmmov %vm14638_vm15 }
 0x423   : > { %v3765_v34 = vpop.permute.xlu1 %3764  ;;  %v11766_v55 = vsel %vm11739_vm4, %v8368_v32, %v4322_v0  ;;  %v11770_v45 = vsel %vm11745_vm13, %v8364_v41, %v4303_v11 }
 0x424   : > { %v3840_v26 = vsel %vm3832_vm12, %v3831_v18, %v3765_v34  ;;  %v4364_v39 = vcombine.low %v4319_v53, %v11766_v55  ;;  %v4356_v29 = vcombine.low %v4300_v50, %v11770_v45 }
 0x425   : > { %8687 = vmatmul.mubr.msk.f32.gmra.mrb[6].mxu1 %vm3857_vm0, %v3840_v26 }
 0x426   : > { %4366 = vrot.lane.b32.xlu1 %v4364_v39, %s9445_s22  ;;  %4358 = vrot.lane.b32.xlu0 %v4356_v29, %s9441_s17 }
 0x47e   : > { %v8682_v33 = vpop.f32.mrb[2].mxu1 }
 0x47f   : > { %v11779_v37 = vadd.f32 %v8682_v33, %v11695_v56  ;;  %v3958_v12 = vpop.f32.mrb[3].mxu1 }
 0x480   : > { %v11782_v4 = vadd.f32 %v11695_v56, %v3958_v12 }
 0x481   : > { %v14470_v23 = vmax.f32 %v11779_v37, 0.0  ;;  %v14646_v35 = vmax.f32 %v11779_v37, 0.0  ;;  %v14652_v37 = vmax.f32 %v10541_v27, 0.0 }
 0x482   : > { %v14469_v60 = vmax.f32 %v11782_v4, 0.0 }
 0x484   : > { %v4038_v15 = vmax.f32 %v14469_v60, %v14470_v23 }
 0x486   : > { %v4062_v3 = vcombine.high %v4038_v15, %v4038_v15  ;;  %v4069_v24 = vrot.slane %v4038_v15, %v10549_v8 }
 0x488   : > { %v4076_v5 = vrot.slane %v4062_v3, %v10549_v8  ;;  %v4077_v20 = vcombine.high %v4069_v24, %v4069_v24  ;;  %v4158_v10 = vsel %vm4129_vm5, %v4069_v24, -inf }
 0x489   : > { %v4159_v14 = vrot.slane %v4158_v10, 4 }
 0x48a   : > { %v4078_v30 = vcombine.high %v4076_v5, %v4076_v5  ;;  %v4165_v63 = vsel %vm4129_vm5, %v4077_v20, -inf  ;;  %v4172_v44 = vsel %vm4129_vm5, %v4076_v5, -inf }
 0x48b   : > { %v4160_v47 = vmax.f32 %v4158_v10, %v4159_v14  ;;  %v4166_v13 = vrot.slane %v4165_v63, 4  ;;  %v4173_v25 = vrot.slane %v4172_v44, 4 }
 0x48c   : > { %v4179_v46 = vsel %vm4129_vm5, %v4078_v30, -inf }
 0x48d   : > { %v4161_v1 = vrot.slane %v4160_v47, 2  ;;  %v4167_v53 = vmax.f32 %v4165_v63, %v4166_v13  ;;  %v4174_v50 = vmax.f32 %v4172_v44, %v4173_v25  ;;  %v4180_v32 = vrot.slane %v4179_v46, 4 }
 0x48f   : > { %v4162_v0 = vmax.f32 %v4160_v47, %v4161_v1  ;;  %v4168_v41 = vrot.slane %v4167_v53, 2  ;;  %v4175_v11 = vrot.slane %v4174_v50, 2  ;;  %v4181_v38 = vmax.f32 %v4179_v46, %v4180_v32 }
 0x491   : > { %v4163_v18 = vrot.slane %v4162_v0, 1  ;;  %v4169_v34 = vmax.f32 %v4167_v53, %v4168_v41  ;;  %v4176_v26 = vmax.f32 %v4174_v50, %v4175_v11  ;;  %v4182_v39 = vrot.slane %v4181_v38, 2  ;;  %v4429_v41 = vld [vmem:[%s14389_s5 + $0x8] sm:$0xff] }
 0x492   : > { %v14463_v53 = vmov 0.0|0.0  }
 0x493   : > { %v4170_v29 = vrot.slane %v4169_v34, 1  ;;  %v4177_v33 = vrot.slane %v4176_v26, 1  ;;  %v4183_v12 = vmax.f32 %v4181_v38, %v4182_v39  ;;  %v4164_v15 = vmax.f32 %v4162_v0, %v4163_v18  ;;  %8713 = vmatprep.subr.bf16.mxu1 %v14463_v53  ;;  %8805 = vmatprep.subr.bf16.mxu0 %v14463_v53  ;;  %v4428_v0 = vld [vmem:[%s14389_s5] sm:$0xff] }
 0x494   : > { %v8714_v18 = vpack.c.bf16 %v4429_v41, %v4428_v0  ;;  %v4436_v0 = vld [vmem:[%s14389_s5 + $0x40] sm:$0xff]  ;;  %v4437_v41 = vld [vmem:[%s14389_s5 + $0x48] sm:$0xff] }
 0x495   : > { %v4171_v3 = vmax.f32 %v4169_v34, %v4170_v29  ;;  %v4178_v24 = vmax.f32 %v4176_v26, %v4177_v33  ;;  %v4184_v5 = vrot.slane %v4183_v12, 1  ;;  %v4430_v34 = vld [vmem:[%s14389_s5 + $0x10] sm:$0xff]  ;;  %v4431_v26 = vld [vmem:[%s14389_s5 + $0x18] sm:$0xff] }
 0x496   : > { %8715 = vmatpush1.bf16.msra.mxu1 %v8714_v18 }
 0x497   : > { %v4185_v20 = vmax.f32 %v4183_v12, %v4184_v5  ;;  %v4261_v10 = vsel %vm3402_vm1, %v4171_v3, %v4164_v15  ;;  %8716 = vmatprep.subr.bf16.mxu1 %v14463_v53  ;;  %v4432_v15 = vld [vmem:[%s14389_s5 + $0x20] sm:$0xff]  ;;  %v4433_v3 = vld [vmem:[%s14389_s5 + $0x28] sm:$0xff] }
 0x498   : > { %v4262_v14 = vsel %vm14637_vm7, %v4178_v24, %v4261_v10  ;;  %v8720_v5 = vpack.c.bf16 %v4433_v3, %v4432_v15  ;;  %v4434_v10 = vld [vmem:[%s14389_s5 + $0x30] sm:$0xff] }
 0x499   : > { %v4263_v30 = vsel %vm14638_vm15, %v4185_v20, %v4262_v14  ;;  %v4435_v14 = vld [vmem:[%s14389_s5 + $0x38] sm:$0xff]  ;;  %vm14645_vm15 = vmmov %vm14642_vm2 }
 0x49a   : > { %4277 = vst.msk [vmem:[#allocation4 + $0x11] sm:$0xf] %vm14639_vm14, %v4263_v30  ;;  %vm4419_vm14 = vcmask 654336  }
 0x4a1   : > { %v11800_v63 = vld [vmem:[#allocation4 + $0x10] sm:$0x3f] }
 0x4a2   : > { %v4372_v44 = vcombine.low %v11750_v17, %v11800_v63  ;;  %v4292_v47 = vcombine.high %v11800_v63, %v11800_v63  ;;  %v8369_v13 = vrot.slane %v11800_v63, 10  ;;  %v8365_v46 = vrot.slane %v11800_v63, 9 }
 0x4a4   : > { %4374 = vrot.lane.b32.xlu0 %v4372_v44, %s14549_s16  ;;  %v4326_v25 = vrot.slane %v4292_v47, 6  ;;  %v4307_v1 = vrot.slane %v4292_v47, 5  ;;  %v8723_v47 = vpack.c.bf16 %v4435_v14, %v4434_v10  ;;  %v4438_v10 = vld [vmem:[%s14389_s5 + $0x50] sm:$0xff]  ;;  %v4439_v14 = vld [vmem:[%s14389_s5 + $0x58] sm:$0xff] }
 0x4a6   : > { %v11813_v50 = vsel %vm11739_vm4, %v8369_v13, %v4326_v25  ;;  %v11817_v32 = vsel %vm11745_vm13, %v8365_v46, %v4307_v1 }
 0x4a7   : > { %v4388_v11 = vcombine.low %v11766_v55, %v11813_v50  ;;  %v4380_v38 = vcombine.low %v11770_v45, %v11817_v32  ;;  %v8717_v55 = vpack.c.bf16 %v4431_v26, %v4430_v34  ;;  %v8726_v34 = vpack.c.bf16 %v4437_v41, %v4436_v0 }
 0x4a9   : > { %4390 = vrot.lane.b32.xlu0 %v4388_v11, %s9452_s21  ;;  %4382 = vrot.lane.b32.xlu1 %v4380_v38, %s9450_s27 }
 0x4aa   : > { %8718 = vmatpush1.bf16.msra.mxu1 %v8717_v55 }
 0x4ab   : > { %8719 = vmatprep.subr.bf16.mxu1 %v14463_v53 }
 0x4ac   : > { %v8685_v39 = vpop.f32.mrb[4].mxu1 }
 0x4ad   : > { %v11839_v45 = vadd.f32 %v8685_v39, %v11695_v56  ;;  %v3968_v29 = vpop.f32.mrb[5].mxu1 }
 0x4ae   : > { %v11842_v33 = vadd.f32 %v11695_v56, %v3968_v29  ;;  %8721 = vmatpush1.bf16.msra.mxu1 %v8720_v5 }
 0x4af   : > { %v14468_v12 = vmax.f32 %v11839_v45, 0.0  ;;  %8722 = vmatprep.subr.bf16.mxu1 %v14463_v53 }
 0x4b0   : > { %v14467_v24 = vmax.f32 %v11842_v33, 0.0  ;;  %v14649_v40 = vmax.f32 %v11842_v33, 0.0  ;;  %v4352_v33 = vcombine.low %v11725_v6, %v11750_v17 }
 0x4b2   : > { %v4039_v20 = vmax.f32 %v14467_v24, %v14468_v12  ;;  %8724 = vmatpush1.bf16.msra.mxu1 %v8723_v47 }
 0x4b3   : > { %8725 = vmatprep.subr.bf16.mxu1 %v14463_v53 }
 0x4b4   : > { %v4079_v30 = vcombine.high %v4039_v20, %v4039_v20  ;;  %v4086_v44 = vrot.slane %v4039_v20, %v10549_v8 }
 0x4b6   : > { %v4093_v13 = vrot.slane %v4079_v30, %v10549_v8  ;;  %v4094_v25 = vcombine.high %v4086_v44, %v4086_v44  ;;  %v4186_v46 = vsel %vm4129_vm5, %v4086_v44, -inf  ;;  %8727 = vmatpush1.bf16.msra.mxu1 %v8726_v34  ;;  %v8729_v30 = vpack.c.bf16 %v4439_v14, %v4438_v10  ;;  %v4442_v34 = vld [vmem:[%s14389_s5 + $0x70] sm:$0xff] }
 0x4b7   : > { %v4187_v1 = vrot.slane %v4186_v46, 4  ;;  %8728 = vmatprep.subr.bf16.mxu1 %v14463_v53 }
 0x4b8   : > { %v4095_v11 = vcombine.high %v4093_v13, %v4093_v13  ;;  %v4193_v38 = vsel %vm4129_vm5, %v4094_v25, -inf  ;;  %v4200_v18 = vsel %vm4129_vm5, %v4093_v13, -inf }
 0x4b9   : > { %v4188_v26 = vmax.f32 %v4186_v46, %v4187_v1  ;;  %v4194_v39 = vrot.slane %v4193_v38, 4  ;;  %v4201_v55 = vrot.slane %v4200_v18, 4 }
 0x4ba   : > { %v4207_v29 = vsel %vm4129_vm5, %v4095_v11, -inf  ;;  %8730 = vmatpush1.bf16.msra.mxu1 %v8729_v30  ;;  %v4440_v11 = vld [vmem:[%s14389_s5 + $0x60] sm:$0xff] }
 0x4bb   : > { %v4189_v15 = vrot.slane %v4188_v26, 2  ;;  %v4195_v3 = vmax.f32 %v4193_v38, %v4194_v39  ;;  %v4202_v5 = vmax.f32 %v4200_v18, %v4201_v55  ;;  %v4208_v20 = vrot.slane %v4207_v29, 4  ;;  %v4441_v38 = vld [vmem:[%s14389_s5 + $0x68] sm:$0xff]  ;;  %8731 = vmatprep.subr.bf16.mxu1 %v14463_v53 }
 0x4bc   : > { %v8732_v18 = vpack.c.bf16 %v4441_v38, %v4440_v11 }
 0x4bd   : > { %v4190_v44 = vmax.f32 %v4188_v26, %v4189_v15  ;;  %v4196_v47 = vrot.slane %v4195_v3, 2  ;;  %v4203_v13 = vrot.slane %v4202_v5, 2  ;;  %v4209_v25 = vmax.f32 %v4207_v29, %v4208_v20  ;;  %v4443_v26 = vld [vmem:[%s14389_s5 + $0x78] sm:$0xff] }
 0x4be   : > { %8733 = vmatpush1.bf16.msra.mxu1 %v8732_v18  ;;  %v8735_v10 = vpack.c.bf16 %v4443_v26, %v4442_v34 }
 0x4bf   : > { %v4191_v46 = vrot.slane %v4190_v44, 1  ;;  %v4197_v1 = vmax.f32 %v4195_v3, %v4196_v47  ;;  %v4204_v0 = vmax.f32 %v4202_v5, %v4203_v13  ;;  %v4210_v41 = vrot.slane %v4209_v25, 2  ;;  %8734 = vmatprep.subr.bf16.mxu1 %v14463_v53  ;;  %v4444_v47 = vld [vmem:[%s14389_s5 + $0x80] sm:$0xff]  ;;  %v4445_v13 = vld [vmem:[%s14389_s5 + $0x88] sm:$0xff] }
 0x4c1   : > { %v4198_v39 = vrot.slane %v4197_v1, 1  ;;  %v4205_v55 = vrot.slane %v4204_v0, 1  ;;  %v4211_v29 = vmax.f32 %v4209_v25, %v4210_v41  ;;  %v4192_v15 = vmax.f32 %v4190_v44, %v4191_v46 }
 0x4c2   : > { %8736 = vmatpush1.bf16.msra.mxu1 %v8735_v10  ;;  %v8738_v46 = vpack.c.bf16 %v4445_v13, %v4444_v47 }
 0x4c3   : > { %v4199_v3 = vmax.f32 %v4197_v1, %v4198_v39  ;;  %v4206_v5 = vmax.f32 %v4204_v0, %v4205_v55  ;;  %v4212_v20 = vrot.slane %v4211_v29, 1  ;;  %8737 = vmatprep.subr.bf16.mxu1 %v14463_v53 }
 0x4c5   : > { %v4213_v14 = vmax.f32 %v4211_v29, %v4212_v20  ;;  %v4264_v30 = vsel %vm3402_vm1, %v4199_v3, %v4192_v15 }
 0x4c6   : > { %v4265_v44 = vsel %vm14640_vm10, %v4206_v5, %v4264_v30  ;;  %8739 = vmatpush1.bf16.msra.mxu1 %v8738_v46  ;;  %vm4422_vm10 = vcmask 785408  }
 0x4c7   : > { %v4266_v25 = vsel %vm14641_vm11, %v4213_v14, %v4265_v44 }
 0x4c8   : > { %4278 = vst.msk [vmem:[#allocation4 + $0x19] sm:$0xf] %vm14642_vm2, %v4266_v25 }
 0x4cf   : > { %v11909_v1 = vld [vmem:[#allocation4 + $0x18] sm:$0x3f] }
 0x4d0   : > { %v11913_v0 = vcombine.low %v11800_v63, %v11909_v1  ;;  %v4293_v41 = vcombine.high %v11909_v1, %v11909_v1  ;;  %v8366_v11 = vrot.slane %v11909_v1, 9  ;;  %v8370_v18 = vrot.slane %v11909_v1, 10 }
 0x4d2   : > { %4397 = vrot.lane.b32.xlu1 %v11913_v0, %s9453_s30  ;;  %v4311_v38 = vrot.slane %v4293_v41, 5  ;;  %v4330_v34 = vrot.slane %v4293_v41, 6 }
 0x4d4   : > { %v11923_v26 = vsel %vm11745_vm13, %v8366_v11, %v4311_v38  ;;  %v11927_v63 = vsel %vm11739_vm4, %v8370_v18, %v4330_v34 }
 0x4d5   : > { %v4357_v39 = vcombine.low %v11817_v32, %v11923_v26  ;;  %v4365_v55 = vcombine.low %v11813_v50, %v11927_v63 }
 0x4d7   : > { %4360 = vrot.lane.b32.xlu1 %v4357_v39, %s9441_s17  ;;  %4404 = vrot.lane.b32.xlu0 %v4357_v39, %s9454_s24 }
 0x4d8   : > { %8376 = vmatprep.mubr.msk.f32.mxu1 %vm1826_vm9, %v4365_v55 }
 0x4db   : > { %4368 = vrot.lane.b32.xlu0 %v4365_v55, %s9445_s22 }
 0x4f8   : > { %v8688_v29 = vpop.f32.mrb[6].mxu1 }
 0x4f9   : > { %v11938_v15 = vadd.f32 %v8688_v29, %v11695_v56  ;;  %v3978_v3 = vpop.f32.mrb[7].mxu1 }
 0x4fa   : > { %v11941_v5 = vadd.f32 %v11695_v56, %v3978_v3 }
 0x4fb   : > { %v14466_v32 = vmax.f32 %v11938_v15, 0.0  ;;  %v14650_v2 = vmax.f32 %v11938_v15, 0.0  ;;  %v14654_v15 = vmax.f32 %v10557_v19, 0.0 }
 0x4fc   : > { %v14465_v50 = vmax.f32 %v11941_v5, 0.0 }
 0x4fe   : > { %v4040_v20 = vmax.f32 %v14465_v50, %v14466_v32 }
 0x500   : > { %v4096_v10 = vcombine.high %v4040_v20, %v4040_v20  ;;  %v4103_v14 = vrot.slane %v4040_v20, %v10549_v8 }
 0x502   : > { %v4110_v30 = vrot.slane %v4096_v10, %v10549_v8  ;;  %v4111_v47 = vcombine.high %v4103_v14, %v4103_v14  ;;  %v4214_v13 = vsel %vm4129_vm5, %v4103_v14, -inf }
 0x503   : > { %v4215_v44 = vrot.slane %v4214_v13, 4 }
 0x504   : > { %v4112_v56 = vcombine.high %v4110_v30, %v4110_v30  ;;  %v4221_v25 = vsel %vm4129_vm5, %v4111_v47, -inf  ;;  %v4228_v46 = vsel %vm4129_vm5, %v4110_v30, -inf }
 0x505   : > { %v4216_v41 = vmax.f32 %v4214_v13, %v4215_v44  ;;  %v4222_v11 = vrot.slane %v4221_v25, 4  ;;  %v4229_v38 = vrot.slane %v4228_v46, 4 }
 0x506   : > { %v4235_v18 = vsel %vm4129_vm5, %v4112_v56, -inf  ;;  %vm14643_vm5 = vmmov %vm14637_vm7 }
 0x507   : > { %v4217_v34 = vrot.slane %v4216_v41, 2  ;;  %v4223_v39 = vmax.f32 %v4221_v25, %v4222_v11  ;;  %v4230_v55 = vmax.f32 %v4228_v46, %v4229_v38  ;;  %v4236_v29 = vrot.slane %v4235_v18, 4  ;;  %vm14644_vm7 = vmmov %vm14641_vm11  ;;  %v4285_v11 = vld [vmem:[#allocation4 + $0x28] sm:$0x3f] }
 0x508   : > { %v4343_v38 = vcombine.high %v4285_v11, %v4285_v11  ;;  %vm4425_vm11 = vcmask 916480  }
 0x509   : > { %v4218_v3 = vmax.f32 %v4216_v41, %v4217_v34  ;;  %v4224_v20 = vrot.slane %v4223_v39, 2  ;;  %v4231_v10 = vrot.slane %v4230_v55, 2  ;;  %v4237_v53 = vmax.f32 %v4235_v18, %v4236_v29 }
 0x50b   : > { %v4219_v14 = vrot.slane %v4218_v3, 1  ;;  %v4225_v50 = vmax.f32 %v4223_v39, %v4224_v20  ;;  %v4232_v32 = vmax.f32 %v4230_v55, %v4231_v10  ;;  %v4238_v24 = vrot.slane %v4237_v53, 2 }
 0x50d   : > { %v4226_v47 = vrot.slane %v4225_v50, 1  ;;  %v4233_v12 = vrot.slane %v4232_v32, 1  ;;  %v4239_v30 = vmax.f32 %v4237_v53, %v4238_v24  ;;  %v4220_v13 = vmax.f32 %v4218_v3, %v4219_v14 }
 0x50e   : > { %v8373_v53 = vrot.slane %v4285_v11, 9  ;;  %v4346_v24 = vrot.slane %v4343_v38, 5 }
 0x50f   : > { %v4227_v44 = vmax.f32 %v4225_v50, %v4226_v47  ;;  %v4234_v60 = vmax.f32 %v4232_v32, %v4233_v12  ;;  %v4240_v23 = vrot.slane %v4239_v30, 1 }
 0x511   : > { %v4241_v56 = vmax.f32 %v4239_v30, %v4240_v23  ;;  %v4267_v25 = vsel %vm3402_vm1, %v4227_v44, %v4220_v13  ;;  %vm14656_vm1 = vcmask 261120   ;;  %v4350_v13 = vrot.slane %v4343_v38, 6 }
 0x512   : > { %v4268_v46 = vsel %vm14643_vm5, %v4234_v60, %v4267_v25  ;;  %vm14658_vm2 = vmmov %vm14656_vm1  ;;  %vm4028_vm5 = vcmask 392448  }
 0x513   : > { %v4269_v41 = vsel %vm14644_vm7, %v4241_v56, %v4268_v46  ;;  %vm2489_vm7 = vcmask 195712  }
 0x514   : > { %4279 = vst.msk [vmem:[#allocation4 + $0x21] sm:$0xf] %vm14645_vm15, %v4269_v41  ;;  %vm539_vm15 = vcmask 385024  }
 0x515   : > { %541 = vst.msk [vmem:[#allocation5 + $0x10] sm:$0x1] %vm539_vm15, %v14620_v61  ;;  %542 = vst.msk [vmem:[#allocation5 + $0x20] sm:$0x1] %vm539_vm15, %v14620_v61 }
 0x516   : > { %540 = vst.msk [vmem:[#allocation5] sm:$0x1] %vm539_vm15, %v14620_v61  ;;  %543 = vst.msk [vmem:[#allocation5 + $0x30] sm:$0x1] %vm539_vm15, %v14620_v61 }
 0x517   : > { %544 = vst.msk [vmem:[#allocation5 + $0x40] sm:$0x1] %vm539_vm15, %v14620_v61  ;;  %545 = vst.msk [vmem:[#allocation5 + $0x50] sm:$0x1] %vm539_vm15, %v14620_v61 }
 0x518   : > { %546 = vst.msk [vmem:[#allocation5 + $0x60] sm:$0x1] %vm539_vm15, %v14620_v61  ;;  %547 = vst.msk [vmem:[#allocation5 + $0x70] sm:$0x1] %vm539_vm15, %v14620_v61 }
 0x519   : > { %548 = vst.msk [vmem:[#allocation5 + $0x80] sm:$0x1] %vm539_vm15, %v14620_v61  ;;  %549 = vst.msk [vmem:[#allocation5 + $0x90] sm:$0x1] %vm539_vm15, %v14620_v61 }
 0x51a   : > { %551 = vst.msk [vmem:[#allocation5 + $0x19] sm:$0x1] %vm539_vm15, %v14620_v61  ;;  %552 = vst.msk [vmem:[#allocation5 + $0x29] sm:$0x1] %vm539_vm15, %v14620_v61 }
 0x51b   : > { %v4284_v18 = vld [vmem:[#allocation4 + $0x20] sm:$0x3f]  ;;  %553 = vst.msk [vmem:[#allocation5 + $0x39] sm:$0x1] %vm539_vm15, %v14620_v61  ;;  %554 = vst.msk [vmem:[#allocation5 + $0x49] sm:$0x1] %vm539_vm15, %v14620_v61 }
 0x51c   : > { %v4373_v34 = vcombine.low %v11909_v1, %v4284_v18  ;;  %v4333_v39 = vcombine.high %v4284_v18, %v4284_v18  ;;  %v8372_v12 = vrot.slane %v4284_v18, 10  ;;  %v8371_v32 = vrot.slane %v4284_v18, 9  ;;  %555 = vst.msk [vmem:[#allocation5 + $0x59] sm:$0x1] %vm539_vm15, %v14620_v61  ;;  %556 = vst.msk [vmem:[#allocation5 + $0x69] sm:$0x1] %vm539_vm15, %v14620_v61 }
 0x51d   : > { %v4347_v1 = vsel %vm11745_vm13, %v8373_v53, %v4346_v24  ;;  %v4396_v10 = vcombine.low %v4284_v18, %v4285_v11  ;;  %557 = vst.msk [vmem:[#allocation5 + $0x79] sm:$0x1] %vm539_vm15, %v14620_v61  ;;  %558 = vst.msk [vmem:[#allocation5 + $0x89] sm:$0x1] %vm539_vm15, %v14620_v61 }
 0x51e   : > { %4376 = vrot.lane.b32.xlu1 %v4373_v34, %s14549_s16  ;;  %v4340_v23 = vrot.slane %v4333_v39, 6  ;;  %v4336_v50 = vrot.slane %v4333_v39, 5 }
 0x520   : > { %v4341_v60 = vsel %vm11739_vm4, %v8372_v12, %v4340_v23  ;;  %v4337_v55 = vsel %vm11745_vm13, %v8371_v32, %v4336_v50  ;;  %vm14657_vm13 = vcmask 392192  }
 0x521   : > { %v4389_v29 = vcombine.low %v11927_v63, %v4341_v60  ;;  %v4381_v3 = vcombine.low %v11923_v26, %v4337_v55  ;;  %v4403_v20 = vcombine.low %v4337_v55, %v4347_v1  ;;  %v14647_v26 = vmax.f32 %v11782_v4, 0.0 }
 0x522   : > { %v14648_v63 = vmax.f32 %v11839_v45, 0.0  ;;  %v14653_v4 = vmax.f32 %v10545_v43, 0.0  ;;  %v4367_v45 = vpop.permute.xlu1 %4366  ;;  %v8374_v43 = vrot.slane %v4285_v11, 10 }
 0x523   : > { %4392 = vrot.lane.b32.xlu1 %v4389_v29, %s9452_s21  ;;  %4384 = vrot.lane.b32.xlu0 %v4381_v3, %s9450_s27 }
 0x526   : > { %v4383_v47 = vpop.permute.xlu1 %4382 }
 0x527   : > { %4406 = vrot.lane.b32.xlu1 %v4403_v20, %s9454_s24  ;;  %4399 = vrot.lane.b32.xlu0 %v4396_v10, %s9453_s30 }
 0x52b   : > { %4005 = vrot.lane.b32.xlu1 %v3988_v42, %s9445_s22  ;;  %4003 = vrot.lane.b32.xlu0 %v3987_v28, %s9445_s22  ;;  %v14651_v42 = vmax.f32 %v11941_v5, 0.0  ;;  %v4359_v28 = vpop.permute.xlu0 %4358  ;;  %v14655_v5 = vmax.f32 %v10562_v9, 0.0  ;;  %v4351_v9 = vsel %vm11739_vm4, %v8374_v43, %v4350_v13  ;;  %vm14659_vm4 = vmmov %vm14657_vm13  ;;  %v5119_v43 = vld [vmem:[%s14391_s7 + $0x88] sm:$0xff] }
 0x52c   : > { %v4411_v27 = vsel %vm1826_vm9, %v4352_v33, %v4359_v28  ;;  %v4410_v11 = vcombine.low %v4341_v60, %v4351_v9  ;;  %v12086_v33 = vld [vmem:[%s14390_s6] ss:$0 sm:$0xff] }
 0x52d   : > { %v4413_v30 = vsel %vm14656_vm1, %v4411_v27, %v4367_v45  ;;  %vm534_vm1 = vcmask 386048  }
 0x52e   : > { %535 = vst.msk [vmem:[#allocation5 + $0x8] sm:$0x3] %vm534_vm1, %v14620_v61  ;;  %538 = vst.msk [vmem:[#allocation5 + $0x98] sm:$0x3] %vm534_vm1, %v14620_v61 }
 0x52f   : > { %4009 = vrot.lane.b32.xlu1 %v14646_v35, %s9445_s22  ;;  %4007 = vrot.lane.b32.xlu0 %v14647_v26, %s9445_s22  ;;  %v4375_v14 = vpop.permute.xlu0 %4374  ;;  %550 = vst.msk [vmem:[#allocation5 + $0x9] sm:$0x1] %vm539_vm15, %v14620_v61  ;;  %559 = vst.msk [vmem:[#allocation5 + $0x99] sm:$0x1] %vm539_vm15, %v14620_v61  ;;  %vm14663_vm15 = vcmask 1046528  }
 0x530   : > { %v4415_v44 = vsel %vm14657_vm13, %v4413_v30, %v4375_v14  ;;  %v5118_v30 = vld [vmem:[%s14391_s7 + $0x80] sm:$0xff]  ;;  %vm14660_vm13 = vmmov %vm14658_vm2 }
 0x531   : > { %v4417_v6 = vsel %vm3832_vm12, %v4415_v44, %v4383_v47  ;;  %vm14664_vm1 = vmmov %vm14663_vm15 }
 0x533   : > { %4013 = vrot.lane.b32.xlu1 %v14648_v63, %s9445_s22  ;;  %4011 = vrot.lane.b32.xlu0 %v14649_v40, %s9445_s22  ;;  %v4391_v17 = vpop.permute.xlu0 %4390 }
 0x534   : > { %v4420_v56 = vsel %vm4419_vm14, %v4417_v6, %v4391_v17  ;;  %v8740_v6 = vpack.c.bf16 %v5119_v43, %v5118_v30 }
 0x536   : > { %8741 = vmatprep.subr.bf16.mxu1 %v8740_v6  ;;  %v5108_v6 = vld [vmem:[%s14391_s7 + $0x30] sm:$0xff] }
 0x537   : > { %4017 = vrot.lane.b32.xlu1 %v14650_v2, %s9445_s22  ;;  %4015 = vrot.lane.b32.xlu0 %v14651_v42, %s9445_s22 }
 0x53b   : > { %2394 = vrot.lane.b32.xlu1 %v14652_v37, %s9441_s17  ;;  %2392 = vrot.lane.b32.xlu0 %v14653_v4, %s9441_s17  ;;  %v9455_v37 = vmov 1966171168  }
 0x53c   : > { %v4539_v4 = vunpack.c.l.s4 %v9455_v37  ;;  %v5106_v37 = vld [vmem:[%s14391_s7 + $0x20] sm:$0xff] }
 0x53e   : > { %v4540_v45 = vunpack.c.0.s8 %v4539_v4  ;;  %v5107_v4 = vld [vmem:[%s14391_s7 + $0x28] sm:$0xff] }
 0x53f   : > { %2398 = vrot.lane.b32.xlu1 %v14654_v15, %s9441_s17  ;;  %2396 = vrot.lane.b32.xlu0 %v14655_v5, %s9441_s17 }
 0x540   : > { %v12090_v5 = vsub.s32 %v4540_v45, %v10525_v49 }
 0x544   : > { %v4398_v19 = vpop.permute.xlu1 %4397 }
 0x545   : > { %v4423_v25 = vsel %vm4422_vm10, %v4420_v56, %v4398_v19  ;;  %v12102_v56 = vsub.s32 0, %v10525_v49  ;;  %v5121_v49 = vld [vmem:[%s14391_s7 + $0x98] sm:$0xff] }
 0x549   : > { %v4405_v46 = vpop.permute.xlu0 %4404  ;;  %v4361_v38 = vpop.permute.xlu1 %4360 }
 0x54a   : > { %v4426_v41 = vsel %vm4425_vm11, %v4423_v25, %v4405_v46  ;;  %v4412_v39 = vsel %vm1826_vm9, %v11913_v0, %v4361_v38  ;;  %v5102_v25 = vld [vmem:[%s14391_s7] sm:$0xff]  ;;  %v5103_v46 = vld [vmem:[%s14391_s7 + $0x8] sm:$0xff] }
 0x54b   : > { %4522 = vmatmul.mubr.f32.vlgmr.msra.gmra.mrb[8].mxu1 %v4426_v41  ;;  %v5120_v41 = vld [vmem:[%s14391_s7 + $0x90] sm:$0xff] }
 0x54c   : > { %8377 = vmatprep.mubr.msk.f32.mxu1 %vm1826_vm9, %v4410_v11 }
 0x54d   : > { %v4369_v34 = vpop.permute.xlu0 %4368 }
 0x54e   : > { %v4414_v54 = vsel %vm14658_vm2, %v4412_v39, %v4369_v34  ;;  %v8742_v39 = vpack.c.bf16 %v5103_v46, %v5102_v25  ;;  %v12163_v25 = vld [vmem:[#allocation5] sm:$0xff]  ;;  %v4779_v46 = vld [vmem:[#allocation5 + $0x8] sm:$0x3] }
 0x550   : > { %8743 = vmatpush3.bf16.msra.mxu1 %v8742_v39 }
 0x590   : > { %v4377_v18 = vpop.permute.xlu1 %4376 }
 0x591   : > { %v4416_v53 = vsel %vm14659_vm4, %v4414_v54, %v4377_v18  ;;  %v8744_v54 = vpack.c.bf16 %v5121_v49, %v5120_v41  ;;  %vm14661_vm4 = vmmov %vm14658_vm2  ;;  %v4815_v49 = vrot.slane %v4779_v46, 1 }
 0x593   : > { %8745 = vmatprep.subr.bf16.mxu1 %v8744_v54  ;;  %v5111_v54 = vld [vmem:[%s14391_s7 + $0x48] sm:$0xff] }
 0x595   : > { %v4393_v24 = vpop.permute.xlu1 %4392  ;;  %v4385_v12 = vpop.permute.xlu0 %4384 }
 0x596   : > { %v4418_v23 = vsel %vm3832_vm12, %v4416_v53, %v4385_v12 }
 0x597   : > { %v4421_v50 = vsel %vm4419_vm14, %v4418_v23, %v4393_v24 }
 0x599   : > { %v4407_v32 = vpop.permute.xlu1 %4406  ;;  %v4400_v60 = vpop.permute.xlu0 %4399 }
 0x59a   : > { %v4424_v55 = vsel %vm4422_vm10, %v4421_v50, %v4400_v60  ;;  %v5104_v60 = vld [vmem:[%s14391_s7 + $0x10] sm:$0xff] }
 0x59b   : > { %v4427_v29 = vsel %vm4425_vm11, %v4424_v55, %v4407_v32  ;;  %v5105_v55 = vld [vmem:[%s14391_s7 + $0x18] sm:$0xff] }
 0x59c   : > { %4527 = vmatmul.mubr.f32.gmra.mrb[10].mxu1 %v4427_v29  ;;  %v5122_v29 = vld [vmem:[%s14391_s7 + $0xa0] sm:$0xff] }
 0x59d   : > { %v4006_v3 = vpop.permute.xlu1 %4005  ;;  %v4004_v0 = vpop.permute.xlu0 %4003 }
 0x59e   : > { %4030 = vst.msk [vmem:[#allocation5 + $0x21] sm:$0xff] %vm4028_vm5, %v4006_v3  ;;  %4029 = vst.msk [vmem:[#allocation5 + $0x11] sm:$0xff] %vm4028_vm5, %v4004_v0 }
 0x5a1   : > { %v4010_v1 = vpop.permute.xlu1 %4009  ;;  %v4008_v20 = vpop.permute.xlu0 %4007 }
 0x5a2   : > { %4032 = vst.msk [vmem:[#allocation5 + $0x41] sm:$0xff] %vm4028_vm5, %v4010_v1  ;;  %4031 = vst.msk [vmem:[#allocation5 + $0x31] sm:$0xff] %vm4028_vm5, %v4008_v20 }
 0x5a5   : > { %v4014_v10 = vpop.permute.xlu1 %4013  ;;  %v4012_v35 = vpop.permute.xlu0 %4011 }
 0x5a6   : > { %4034 = vst.msk [vmem:[#allocation5 + $0x61] sm:$0xff] %vm4028_vm5, %v4014_v10  ;;  %4033 = vst.msk [vmem:[#allocation5 + $0x51] sm:$0xff] %vm4028_vm5, %v4012_v35  ;;  %v5123_v10 = vld [vmem:[%s14391_s7 + $0xa8] sm:$0xff] }
 0x5a9   : > { %v4018_v26 = vpop.permute.xlu1 %4017  ;;  %v4016_v63 = vpop.permute.xlu0 %4015 }
 0x5aa   : > { %4036 = vst.msk [vmem:[#allocation5 + $0x81] sm:$0xff] %vm4028_vm5, %v4018_v26  ;;  %4035 = vst.msk [vmem:[#allocation5 + $0x71] sm:$0xff] %vm4028_vm5, %v4016_v63  ;;  %v8746_v26 = vpack.c.bf16 %v5105_v55, %v5104_v60  ;;  %v8748_v63 = vpack.c.bf16 %v5123_v10, %v5122_v29 }
 0x5ab   : > { %vm14662_vm5 = vmmov %vm14658_vm2 }
 0x5ac   : > { %8747 = vmatpush3.bf16.msra.mxu1 %v8746_v26 }
 0x5ad   : > { %v2395_v40 = vpop.permute.xlu1 %2394  ;;  %v2393_v2 = vpop.permute.xlu0 %2392  ;;  %8749 = vmatprep.subr.bf16.mxu1 %v8748_v63 }
 0x5ae   : > { %2491 = vst.msk [vmem:[#allocation6 + $0x21] sm:$0xff] %vm2489_vm7, %v2395_v40  ;;  %2490 = vst.msk [vmem:[#allocation6 + $0x19] sm:$0xff] %vm2489_vm7, %v2393_v2 }
 0x5b1   : > { %v2399_v42 = vpop.permute.xlu1 %2398  ;;  %v2397_v28 = vpop.permute.xlu0 %2396 }
 0x5b2   : > { %2493 = vst.msk [vmem:[#allocation6 + $0x39] sm:$0xff] %vm2489_vm7, %v2399_v42  ;;  %2492 = vst.msk [vmem:[#allocation6 + $0x31] sm:$0xff] %vm2489_vm7, %v2397_v28 }
 0x61e   : > { %v4523_v14 = vpop.f32.mrb[8].mxu1 }
 0x61f   : > { %v4524_v15 = vadd.f32 %v12086_v33, %v4523_v14  ;;  %v4525_v27 = vpop.f32.mrb[9].mxu1 }
 0x620   : > { %v8750_v27 = vpack.c.bf16 %v5107_v4, %v5106_v37 }
 0x621   : > { %v4532_v47 = vmax.f32 %v4524_v15, 0.0 }
 0x622   : > { %8751 = vmatpush3.bf16.msra.mxu1 %v8750_v27 }
 0x623   : > { %v4536_v13 = vcombine.high %v4532_v47, %v4532_v47  ;;  %v4544_v44 = vrot.slane %v4532_v47, %v12090_v5 }
 0x625   : > { %v4545_v17 = vcombine.high %v4544_v44, %v4544_v44  ;;  %v4552_v19 = vrot.slane %v4544_v44, %v12090_v5  ;;  %v4568_v9 = vrot.slane %v4536_v13, %v12090_v5  ;;  %v5124_v13 = vld [vmem:[%s14391_s7 + $0xb0] sm:$0xff]  ;;  %v5125_v44 = vld [vmem:[%s14391_s7 + $0xb8] sm:$0xff] }
 0x627   : > { %v4559_v11 = vrot.slane %v4545_v17, %v12090_v5  ;;  %v4560_v38 = vcombine.high %v4552_v19, %v4552_v19  ;;  %v4569_v18 = vcombine.high %v4568_v9, %v4568_v9  ;;  %v4576_v34 = vrot.slane %v4568_v9, %v12090_v5  ;;  %v5109_v9 = vld [vmem:[%s14391_s7 + $0x38] sm:$0xff] }
 0x628   : > { %v4637_v32 = vrot.slane %v4552_v19, %v12102_v56  ;;  %v8752_v19 = vpack.c.bf16 %v5125_v44, %v5124_v13  ;;  %v8754_v41 = vpack.c.bf16 %v5109_v9, %v5108_v6  ;;  %v5129_v13 = vld [vmem:[%s14391_s7 + $0xd8] sm:$0xff]  ;;  %v5112_v44 = vld [vmem:[%s14391_s7 + $0x50] sm:$0xff]  ;;  %v12231_v9 = vld [vmem:[%s14391_s7 + $0xe0] sm:$0xff] }
 0x629   : > { %v4561_v53 = vcombine.high %v4559_v11, %v4559_v11  ;;  %v4583_v24 = vrot.slane %v4569_v18, %v12090_v5  ;;  %v4584_v12 = vcombine.high %v4576_v34, %v4576_v34  ;;  %v4641_v23 = vrot.slane %v4559_v11, %v12102_v56  ;;  %v5126_v11 = vld [vmem:[%s14391_s7 + $0xc0] sm:$0xff] }
 0x62a   : > { %v4645_v50 = vrot.slane %v4560_v38, %v12102_v56  ;;  %v4653_v1 = vrot.slane %v4576_v34, %v12102_v56  ;;  %8753 = vmatprep.subr.bf16.mxu1 %v8752_v19  ;;  %v5127_v38 = vld [vmem:[%s14391_s7 + $0xc8] sm:$0xff]  ;;  %v5110_v18 = vld [vmem:[%s14391_s7 + $0x40] sm:$0xff]  ;;  %v4814_v34 = vrot.slane %v12163_v25, 1  ;;  %v5113_v19 = vld [vmem:[%s14391_s7 + $0x58] sm:$0xff] }
 0x62b   : > { %v4585_v3 = vcombine.high %v4583_v24, %v4583_v24  ;;  %v4649_v0 = vrot.slane %v4561_v53, %v12102_v56  ;;  %v4657_v20 = vrot.slane %v4583_v24, %v12102_v56  ;;  %v4698_v35 = vcombine.low %v4637_v32, %v4641_v23  ;;  %8755 = vmatpush3.bf16.msra.mxu1 %v8754_v41 }
 0x62c   : > { %v4661_v40 = vrot.slane %v4584_v12, %v12102_v56  ;;  %v8756_v39 = vpack.c.bf16 %v5127_v38, %v5126_v11  ;;  %v8758_v53 = vpack.c.bf16 %v5111_v54, %v5110_v18  ;;  %v4838_v32 = vrot.slane %v12163_v25, 2 }
 0x62d   : > { %v4665_v2 = vrot.slane %v4585_v3, %v12102_v56  ;;  %v4699_v42 = vcombine.low %v4645_v50, %v4649_v0  ;;  %v4715_v28 = vcombine.low %v4653_v1, %v4657_v20  ;;  %v4706_v45 = vrot.slane %v4698_v35, %v10549_v8 }
 0x62e   : > { %8757 = vmatprep.subr.bf16.mxu1 %v8756_v39  ;;  %v4816_v60 = vsel %vm14663_vm15, %v4814_v34, %v4815_v49  ;;  %v4839_v35 = vrot.slane %v4779_v46, 2  ;;  %v12236_v46 = vld [vmem:[%s14391_s7 + $0xe8] sm:$0xff]  ;;  %vm14669_vm15 = vmmov %vm14664_vm1 }
 0x62f   : > { %v4713_v14 = vrot.slane %v4699_v42, %v10549_v8  ;;  %v4716_v15 = vcombine.low %v4661_v40, %v4665_v2  ;;  %v4723_v30 = vrot.slane %v4715_v28, %v10549_v8  ;;  %8759 = vmatpush3.bf16.msra.mxu1 %v8758_v53 }
 0x631   : > { %v4714_v47 = vcombine.low %v4706_v45, %v4713_v14  ;;  %v4730_v43 = vrot.slane %v4716_v15, %v10549_v8 }
 0x633   : > { %v4731_v17 = vcombine.low %v4723_v30, %v4730_v43  ;;  %4770 = vst.msk [vmem:[#allocation5 + $0x11] sm:$0xff] %vm14660_vm13, %v4714_v47  ;;  %vm14665_vm13 = vcmask 1045504   ;;  %v5128_v43 = vld [vmem:[%s14391_s7 + $0xd0] sm:$0xff] }
 0x634   : > { %4771 = vst.msk [vmem:[#allocation5 + $0x21] sm:$0xff] %vm14658_vm2, %v4714_v47  ;;  %vm14666_vm2 = vmmov %vm14665_vm13 }
 0x635   : > { %4772 = vst.msk [vmem:[#allocation5 + $0x31] sm:$0xff] %vm14661_vm4, %v4731_v17  ;;  %vm14667_vm4 = vmmov %vm14666_vm2 }
 0x636   : > { %4773 = vst.msk [vmem:[#allocation5 + $0x41] sm:$0xff] %vm14662_vm5, %v4731_v17  ;;  %v4840_v17 = vsel %vm14666_vm2, %v4838_v32, %v4839_v35  ;;  %vm14668_vm5 = vmmov %vm14666_vm2  ;;  %v8762_v32 = vpack.c.bf16 %v5113_v19, %v5112_v44  ;;  %vm563_vm2 = vcmask 189440  }
 0x637   : > { %564 = vst.msk [vmem:[#allocation6 + $0x10] sm:$0x3] %vm563_vm2, %v14620_v61  ;;  %568 = vst.msk [vmem:[#allocation6 + $0x1a8] sm:$0x3] %vm563_vm2, %v14620_v61 }
 0x63a   : > { %v12180_v24 = vld [vmem:[#allocation5 + $0x10] sm:$0xff]  ;;  %v4781_v23 = vld [vmem:[#allocation5 + $0x18] sm:$0x3] }
 0x63b   : > { %v12182_v12 = vld [vmem:[#allocation5 + $0x20] sm:$0xff]  ;;  %v4817_v55 = vrot.slane %v12180_v24, 1  ;;  %v4818_v29 = vrot.slane %v4781_v23, 1  ;;  %v4783_v3 = vld [vmem:[#allocation5 + $0x28] sm:$0x3]  ;;  %v4841_v4 = vrot.slane %v12180_v24, 2 }
 0x63c   : > { %v8922_v50 = vpack.i.bf16 %v12182_v12, %v12180_v24  ;;  %v12189_v0 = vld [vmem:[#allocation5 + $0x30] sm:$0xff]  ;;  %v4785_v20 = vld [vmem:[#allocation5 + $0x38] sm:$0x3]  ;;  %v4844_v10 = vrot.slane %v12182_v12, 2  ;;  %v4845_v40 = vrot.slane %v4783_v3, 2  ;;  %v4842_v45 = vrot.slane %v4781_v23, 2 }
 0x63d   : > { %v12191_v1 = vld [vmem:[#allocation5 + $0x40] sm:$0xff]  ;;  %v12198_v63 = vsel %vm14664_vm1, %v4817_v55, %v4818_v29  ;;  %v4847_v2 = vrot.slane %v12189_v0, 2  ;;  %v12201_v42 = vld [vmem:[#allocation5 + $0x48] sm:$0x3]  ;;  %v4848_v37 = vrot.slane %v4785_v20, 2  ;;  %v4823_v14 = vrot.slane %v12189_v0, 1 }
 0x63e   : > { %8923 = vrot.lane.b32.xlu1 %v8922_v50, %s9441_s17  ;;  %v8927_v26 = vpack.i.bf16 %v12191_v1, %v12189_v0  ;;  %v8947_v28 = vpack.i.bf16 %v12198_v63, %v4816_v60  ;;  %v4824_v15 = vrot.slane %v4785_v20, 1  ;;  %v4826_v27 = vrot.slane %v12191_v1, 1  ;;  %v5114_v60 = vld [vmem:[%s14391_s7 + $0x60] sm:$0xff]  ;;  %v5115_v55 = vld [vmem:[%s14391_s7 + $0x68] sm:$0xff]  ;;  %v5133_v20 = vld [vmem:[%s14391_s7 + $0xf8] sm:$0xff] }
 0x63f   : > { %v4827_v47 = vrot.slane %v12201_v42, 1  ;;  %v12210_v30 = vsel %vm14665_vm13, %v4847_v2, %v4848_v37  ;;  %v8932_v6 = vpack.i.bf16 %v12189_v0, %v12182_v12  ;;  %v12239_v41 = vsel %vm14667_vm4, %v4844_v10, %v4845_v40  ;;  %vm14670_vm13 = vmmov %vm14664_vm1 }
 0x640   : > { %8928 = vrot.lane.b32.xlu0 %v8927_v26, %s9441_s17  ;;  %v12242_v11 = vsel %vm14668_vm5, %v4841_v4, %v4842_v45  ;;  %v4820_v38 = vrot.slane %v12182_v12, 1  ;;  %v4821_v18 = vrot.slane %v4783_v3, 1  ;;  %v8957_v34 = vpack.i.bf16 %v12210_v30, %v12239_v41  ;;  %v5132_v3 = vld [vmem:[%s14391_s7 + $0xf0] sm:$0xff] }
 0x641   : > { %v12249_v49 = vsel %vm14669_vm15, %v4823_v14, %v4824_v15  ;;  %v12252_v39 = vsel %vm14664_vm1, %v4826_v27, %v4827_v47  ;;  %v4850_v54 = vrot.slane %v12191_v1, 2  ;;  %v4851_v53 = vrot.slane %v12201_v42, 2  ;;  %v5116_v42 = vld [vmem:[%s14391_s7 + $0x70] sm:$0xff] }
 0x642   : > { %8948 = vrot.lane.b32.xlu1 %v8947_v28, %s14549_s16  ;;  %v8760_v23 = vpack.c.bf16 %v5129_v13, %v5128_v43  ;;  %v8764_v50 = vpack.c.bf16 %v12236_v46, %v12231_v9  ;;  %v8937_v29 = vpack.i.bf16 %v12242_v11, %v4840_v17  ;;  %v4822_v10 = vsel %vm14670_vm13, %v4820_v38, %v4821_v18  ;;  %v5117_v28 = vld [vmem:[%s14391_s7 + $0x78] sm:$0xff] }
 0x643   : > { %vm569_vm4 = vcmask 188416   ;;  %v8962_v35 = vpack.i.bf16 %v12252_v39, %v12249_v49  ;;  %v8766_v26 = vpack.c.bf16 %v5115_v55, %v5114_v60  ;;  %v12347_v40 = vsel %vm14668_vm5, %v4850_v54, %v4851_v53 }
 0x644   : > { %8933 = vrot.lane.b32.xlu0 %v8932_v6, %s9445_s22  ;;  %8761 = vmatprep.subr.bf16.mxu1 %v8760_v23  ;;  %570 = vst.msk [vmem:[#allocation6] sm:$0x1] %vm569_vm4, %v14620_v61  ;;  %571 = vst.msk [vmem:[#allocation6 + $0x18] sm:$0x1] %vm569_vm4, %v14620_v61  ;;  %v8768_v2 = vpack.c.bf16 %v5133_v20, %v5132_v3  ;;  %v8942_v37 = vpack.i.bf16 %v4822_v10, %v12198_v63  ;;  %v14671_v27 = vmov 0.0|0.0   ;;  %vm14672_vm15 = vcmask 261120  }
 0x645   : > { %8763 = vmatpush3.bf16.msra.mxu1 %v8762_v32  ;;  %572 = vst.msk [vmem:[#allocation6 + $0x30] sm:$0x1] %vm569_vm4, %v14620_v61  ;;  %573 = vst.msk [vmem:[#allocation6 + $0x48] sm:$0x1] %vm569_vm4, %v14620_v61  ;;  %v8972_v4 = vpack.i.bf16 %v12347_v40, %v12210_v30  ;;  %v8770_v45 = vpack.c.bf16 %v5117_v28, %v5116_v42  ;;  %v8952_v14 = vpack.i.bf16 %v12239_v41, %v12242_v11 }
 0x646   : > { %8958 = vrot.lane.b32.xlu1 %v8957_v34, %s9453_s30  ;;  %574 = vst.msk [vmem:[#allocation6 + $0x60] sm:$0x1] %vm569_vm4, %v14620_v61  ;;  %575 = vst.msk [vmem:[#allocation6 + $0x78] sm:$0x1] %vm569_vm4, %v14620_v61  ;;  %8765 = vmatprep.subr.bf16.mxu1 %v8764_v50  ;;  %v8977_v15 = vpack.i.bf16 %v12249_v49, %v4822_v10 }
 0x647   : > { %576 = vst.msk [vmem:[#allocation6 + $0x90] sm:$0x1] %vm569_vm4, %v14620_v61  ;;  %577 = vst.msk [vmem:[#allocation6 + $0xa8] sm:$0x1] %vm569_vm4, %v14620_v61 }
 0x648   : > { %8938 = vrot.lane.b32.xlu0 %v8937_v29, %s9453_s30  ;;  %578 = vst.msk [vmem:[#allocation6 + $0xc0] sm:$0x1] %vm569_vm4, %v14620_v61  ;;  %579 = vst.msk [vmem:[#allocation6 + $0xd8] sm:$0x1] %vm569_vm4, %v14620_v61 }
 0x649   : > { %580 = vst.msk [vmem:[#allocation6 + $0xf0] sm:$0x1] %vm569_vm4, %v14620_v61  ;;  %581 = vst.msk [vmem:[#allocation6 + $0x108] sm:$0x1] %vm569_vm4, %v14620_v61  ;;  %8767 = vmatpush3.bf16.msra.mxu1 %v8766_v26 }
 0x64a   : > { %582 = vst.msk [vmem:[#allocation6 + $0x120] sm:$0x1] %vm569_vm4, %v14620_v61  ;;  %583 = vst.msk [vmem:[#allocation6 + $0x138] sm:$0x1] %vm569_vm4, %v14620_v61  ;;  %8963 = vrot.lane.b32.xlu1 %v8962_v35, %s9450_s27  ;;  %8769 = vmatprep.subr.bf16.mxu1 %v8768_v2 }
 0x64b   : > { %584 = vst.msk [vmem:[#allocation6 + $0x150] sm:$0x1] %vm569_vm4, %v14620_v61  ;;  %585 = vst.msk [vmem:[#allocation6 + $0x168] sm:$0x1] %vm569_vm4, %v14620_v61 }
 0x64c   : > { %586 = vst.msk [vmem:[#allocation6 + $0x180] sm:$0x1] %vm569_vm4, %v14620_v61  ;;  %587 = vst.msk [vmem:[#allocation6 + $0x198] sm:$0x1] %vm569_vm4, %v14620_v61  ;;  %8943 = vrot.lane.b32.xlu0 %v8942_v37, %s9450_s27 }
 0x64d   : > { %589 = vst.msk [vmem:[#allocation6 + $0x29] sm:$0x1] %vm569_vm4, %v14620_v61  ;;  %590 = vst.msk [vmem:[#allocation6 + $0x41] sm:$0x1] %vm569_vm4, %v14620_v61  ;;  %8771 = vmatpush3.bf16.msra.mxu1 %v8770_v45 }
 0x64e   : > { %591 = vst.msk [vmem:[#allocation6 + $0x59] sm:$0x1] %vm569_vm4, %v14620_v61  ;;  %592 = vst.msk [vmem:[#allocation6 + $0x71] sm:$0x1] %vm569_vm4, %v14620_v61  ;;  %8973 = vrot.lane.b32.xlu1 %v8972_v4, %s9454_s24  ;;  %8772 = vmatprep.subr.bf16.mxu1 %v14671_v27 }
 0x64f   : > { %593 = vst.msk [vmem:[#allocation6 + $0x89] sm:$0x1] %vm569_vm4, %v14620_v61  ;;  %594 = vst.msk [vmem:[#allocation6 + $0xa1] sm:$0x1] %vm569_vm4, %v14620_v61 }
 0x650   : > { %595 = vst.msk [vmem:[#allocation6 + $0xb9] sm:$0x1] %vm569_vm4, %v14620_v61  ;;  %596 = vst.msk [vmem:[#allocation6 + $0xd1] sm:$0x1] %vm569_vm4, %v14620_v61  ;;  %8953 = vrot.lane.b32.xlu0 %v8952_v14, %s9454_s24 }
 0x651   : > { %597 = vst.msk [vmem:[#allocation6 + $0xe9] sm:$0x1] %vm569_vm4, %v14620_v61  ;;  %598 = vst.msk [vmem:[#allocation6 + $0x101] sm:$0x1] %vm569_vm4, %v14620_v61 }
 0x652   : > { %599 = vst.msk [vmem:[#allocation6 + $0x119] sm:$0x1] %vm569_vm4, %v14620_v61  ;;  %600 = vst.msk [vmem:[#allocation6 + $0x131] sm:$0x1] %vm569_vm4, %v14620_v61  ;;  %8978 = vrot.lane.b32.xlu1 %v8977_v15, %s9452_s21 }
 0x653   : > { %601 = vst.msk [vmem:[#allocation6 + $0x149] sm:$0x1] %vm569_vm4, %v14620_v61  ;;  %602 = vst.msk [vmem:[#allocation6 + $0x161] sm:$0x1] %vm569_vm4, %v14620_v61 }
 0x654   : > { %603 = vst.msk [vmem:[#allocation6 + $0x179] sm:$0x1] %vm569_vm4, %v14620_v61  ;;  %604 = vst.msk [vmem:[#allocation6 + $0x191] sm:$0x1] %vm569_vm4, %v14620_v61  ;;  %8968 = vrot.lane.b32.xlu0 %v8977_v15, %s14549_s16 }
 0x655   : > { %588 = vst.msk [vmem:[#allocation6 + $0x11] sm:$0x1] %vm569_vm4, %v14620_v61  ;;  %605 = vst.msk [vmem:[#allocation6 + $0x1a9] sm:$0x1] %vm569_vm4, %v14620_v61  ;;  %vm14676_vm4 = vcmask 1046528  }
 0x656   : > { %vm14673_vm1 = vmmov %vm14672_vm15 }
 0x657   : > { %vm14674_vm13 = vmmov %vm14673_vm1 }
 0x658   : > { %vm14675_vm2 = vmmov %vm14673_vm1 }
 0x659   : > { %vm14677_vm5 = vmmov %vm14676_vm4 }
 0x66f   : > { %v4528_v63 = vpop.f32.mrb[10].mxu1 }
 0x670   : > { %v4529_v47 = vadd.f32 %v12086_v33, %v4528_v63  ;;  %v4530_v43 = vpop.f32.mrb[11].mxu1 }
 0x672   : > { %v4533_v13 = vmax.f32 %v4529_v47, 0.0 }
 0x674   : > { %v4537_v44 = vcombine.high %v4533_v13, %v4533_v13  ;;  %v4592_v6 = vrot.slane %v4533_v13, %v12090_v5 }
 0x676   : > { %v4593_v17 = vcombine.high %v4592_v6, %v4592_v6  ;;  %v4600_v19 = vrot.slane %v4592_v6, %v12090_v5  ;;  %v4616_v9 = vrot.slane %v4537_v44, %v12090_v5 }
 0x678   : > { %v4607_v46 = vrot.slane %v4593_v17, %v12090_v5  ;;  %v4608_v11 = vcombine.high %v4600_v19, %v4600_v19  ;;  %v4617_v38 = vcombine.high %v4616_v9, %v4616_v9  ;;  %v4624_v18 = vrot.slane %v4616_v9, %v12090_v5 }
 0x679   : > { %v4669_v53 = vrot.slane %v4600_v19, %v12102_v56 }
 0x67a   : > { %v4609_v34 = vcombine.high %v4607_v46, %v4607_v46  ;;  %v4631_v49 = vrot.slane %v4617_v38, %v12090_v5  ;;  %v4632_v33 = vcombine.high %v4624_v18, %v4624_v18  ;;  %v4673_v54 = vrot.slane %v4607_v46, %v12102_v56 }
 0x67b   : > { %v4677_v23 = vrot.slane %v4608_v11, %v12102_v56  ;;  %v4685_v60 = vrot.slane %v4624_v18, %v12102_v56 }
 0x67c   : > { %v4633_v32 = vcombine.high %v4631_v49, %v4631_v49  ;;  %v4681_v50 = vrot.slane %v4609_v34, %v12102_v56  ;;  %v4689_v55 = vrot.slane %v4631_v49, %v12102_v56  ;;  %v4732_v29 = vcombine.low %v4669_v53, %v4673_v54 }
 0x67d   : > { %v4693_v3 = vrot.slane %v4632_v33, %v12102_v56 }
 0x67e   : > { %v4697_v20 = vrot.slane %v4633_v32, %v12102_v56  ;;  %v4733_v10 = vcombine.low %v4677_v23, %v4681_v50  ;;  %v4749_v35 = vcombine.low %v4685_v60, %v4689_v55  ;;  %v4740_v26 = vrot.slane %v4732_v29, %v10549_v8  ;;  %v12420_v32 = vld [vmem:[#allocation5 + $0x90] sm:$0xff] }
 0x680   : > { %v4747_v2 = vrot.slane %v4733_v10, %v10549_v8  ;;  %v4750_v42 = vcombine.low %v4693_v3, %v4697_v20  ;;  %v4757_v37 = vrot.slane %v4749_v35, %v10549_v8  ;;  %v14679_v3 = vmax.f32 %v10790_v57, 0.0 }
 0x682   : > { %v4748_v28 = vcombine.low %v4740_v26, %v4747_v2  ;;  %v4764_v4 = vrot.slane %v4750_v42, %v10549_v8 }
 0x684   : > { %v4765_v45 = vcombine.low %v4757_v37, %v4764_v4  ;;  %4774 = vst.msk [vmem:[#allocation5 + $0x51] sm:$0xff] %vm14672_vm15, %v4748_v28  ;;  %vm14678_vm15 = vmmov %vm14676_vm4 }
 0x685   : > { %4775 = vst.msk [vmem:[#allocation5 + $0x61] sm:$0xff] %vm14673_vm1, %v4748_v28  ;;  %vm14680_vm1 = vcmask 1045504  }
 0x686   : > { %4776 = vst.msk [vmem:[#allocation5 + $0x71] sm:$0xff] %vm14674_vm13, %v4765_v45  ;;  %vm14681_vm13 = vmmov %vm14680_vm1 }
 0x687   : > { %4777 = vst.msk [vmem:[#allocation5 + $0x81] sm:$0xff] %vm14675_vm2, %v4765_v45  ;;  %vm14682_vm2 = vmmov %vm14680_vm1 }
 0x68b   : > { %v12395_v14 = vld [vmem:[#allocation5 + $0x50] sm:$0xff]  ;;  %v4789_v63 = vld [vmem:[#allocation5 + $0x58] sm:$0x3] }
 0x68c   : > { %v12397_v15 = vld [vmem:[#allocation5 + $0x60] sm:$0xff]  ;;  %v8987_v47 = vpack.i.bf16 %v12395_v14, %v12191_v1  ;;  %v4829_v13 = vrot.slane %v12395_v14, 1  ;;  %v4830_v44 = vrot.slane %v4789_v63, 1  ;;  %v4791_v9 = vld [vmem:[#allocation5 + $0x68] sm:$0x3]  ;;  %v4853_v23 = vrot.slane %v12395_v14, 2 }
 0x68d   : > { %v8982_v43 = vpack.i.bf16 %v12397_v15, %v12395_v14  ;;  %v12404_v6 = vld [vmem:[#allocation5 + $0x70] sm:$0xff]  ;;  %v4793_v46 = vld [vmem:[#allocation5 + $0x78] sm:$0x3]  ;;  %v4832_v18 = vrot.slane %v12397_v15, 1  ;;  %v4833_v34 = vrot.slane %v4791_v9, 1  ;;  %v4854_v50 = vrot.slane %v4789_v63, 2 }
 0x68e   : > { %v4794_v17 = vld [vmem:[#allocation5 + $0x80] sm:$0xff]  ;;  %8988 = vrot.lane.b32.xlu0 %v8987_v47, %s9445_s22  ;;  %v4831_v19 = vsel %vm14676_vm4, %v4829_v13, %v4830_v44  ;;  %v4835_v49 = vrot.slane %v12404_v6, 1  ;;  %v4836_v33 = vrot.slane %v4793_v46, 1  ;;  %v8997_v53 = vpack.i.bf16 %v12404_v6, %v12397_v15  ;;  %v4795_v20 = vld [vmem:[#allocation5 + $0x88] sm:$0x3] }
 0x68f   : > { %8983 = vrot.lane.b32.xlu1 %v8982_v43, %s9441_s17  ;;  %v9017_v11 = vpack.i.bf16 %v4831_v19, %v12252_v39  ;;  %v8992_v38 = vpack.i.bf16 %v4794_v17, %v12404_v6  ;;  %v4834_v39 = vsel %vm14678_vm15, %v4832_v18, %v4833_v34  ;;  %v4859_v60 = vrot.slane %v12404_v6, 2  ;;  %vm14699_vm15 = vmmov %vm14680_vm1 }
 0x690   : > { %v4837_v54 = vsel %vm14677_vm5, %v4835_v49, %v4836_v33  ;;  %v4860_v55 = vrot.slane %v4793_v46, 2  ;;  %v4856_v10 = vrot.slane %v12397_v15, 2  ;;  %v4857_v35 = vrot.slane %v4791_v9, 2  ;;  %vm14683_vm5 = vmmov %vm14680_vm1 }
 0x691   : > { %v12423_v29 = vpack.i.bf16 %v4837_v54, %v4834_v39  ;;  %v9002_v26 = vpack.i.bf16 %v12420_v32, %v4794_v17  ;;  %v12432_v2 = vsel %vm14680_vm1, %v4853_v23, %v4854_v50  ;;  %v4864_v28 = vrot.slane %v4794_v17, 1  ;;  %v6374_v23 = vld [vmem:[#allocation6 + $0x8] sm:$0xff] }
 0x692   : > { %8993 = vrot.lane.b32.xlu0 %v8992_v38, %s9441_s17  ;;  %v12435_v42 = vsel %vm14681_vm13, %v4859_v60, %v4860_v55  ;;  %v4865_v37 = vrot.slane %v4795_v20, 1  ;;  %v12440_v57 = vsel %vm14682_vm2, %v4856_v10, %v4857_v35  ;;  %v9007_v4 = vpack.i.bf16 %v12432_v2, %v12347_v40  ;;  %v14693_v55 = vld [vmem:[#allocation9_spill] sm:$0xff]  ;;  %vm14704_vm13 = vmmov %vm14676_vm4 }
 0x693   : > { %9018 = vrot.lane.b32.xlu1 %v9017_v11, %s14549_s16  ;;  %v9032_v45 = vpack.i.bf16 %v12435_v42, %v12440_v57  ;;  %v9012_v47 = vpack.i.bf16 %v4834_v39, %v4831_v19  ;;  %v4867_v13 = vrot.slane %v4794_v17, 2  ;;  %v4868_v44 = vrot.slane %v4795_v20, 2  ;;  %v6375_v39 = vld [vmem:[#allocation6 + $0x10] sm:$0x3] }
 0x694   : > { %v12447_v63 = vsel %vm14676_vm4, %v4864_v28, %v4865_v37  ;;  %v9022_v9 = vpack.i.bf16 %v12440_v57, %v12432_v2  ;;  %v14685_v19 = vmax.f32 %v10793_v7, 0.0  ;;  %v14686_v38 = vmax.f32 %v11027_v22, 0.0  ;;  %v14695_v28 = vld [vmem:[#allocation8_spill] sm:$0xff] }
 0x695   : > { %v9037_v43 = vpack.i.bf16 %v12447_v63, %v4837_v54  ;;  %v12457_v46 = vsel %vm14683_vm5, %v4867_v13, %v4868_v44  ;;  %v14688_v7 = vmax.f32 %v11037_v48, 0.0  ;;  %v14689_v54 = vmax.f32 %v11031_v51, 0.0  ;;  %v14691_v48 = vld [vmem:[#allocation7_spill] sm:$0xff] }
 0x696   : > { %8998 = vrot.lane.b32.xlu0 %v8997_v53, %s9445_s22  ;;  %v9047_v17 = vpack.i.bf16 %v12457_v46, %v12435_v42  ;;  %v14690_v22 = vmax.f32 %v11163_v58, 0.0  ;;  %v14692_v60 = vmax.f32 %v14691_v48, 0.0  ;;  %v6556_v20 = vrot.slane %v6374_v23, 2 }
 0x697   : > { %2402 = vrot.lane.b32.xlu1 %v14679_v3, %s9441_s17  ;;  %v14694_v3 = vmax.f32 %v14693_v55, 0.0  ;;  %v6558_v10 = vrot.slane %v6375_v39, 2  ;;  %v14696_v37 = vmax.f32 %v14695_v28, 0.0  ;;  %vm14705_vm2 = vcmask 392192  }
 0x698   : > { %vm14708_vm5 = vmmov %vm14705_vm2 }
 0x699   : > { %v6559_v13 = vsel %vm14680_vm1, %v6556_v20, %v6558_v10  ;;  %vm14717_vm1 = vmmov %vm14705_vm2 }
 0x69a   : > { %9003 = vrot.lane.b32.xlu0 %v9002_v26, %s9445_s22  ;;  %s9456_s22 = smov 72  }
 0x69b   : > { %9028 = vrot.lane.b32.xlu1 %v9017_v11, %s9452_s21  ;;  %v14684_v11 = vmax.f32 %v10801_v31, 0.0  ;;  %v14687_v31 = vmax.f32 %v10808_v62, 0.0  ;;  %v6373_v62 = vld [vmem:[#allocation6] sm:$0xff] }
 0x69c   : > { %v6555_v51 = vrot.slane %v6373_v62, 2 }
 0x69e   : > { %9008 = vrot.lane.b32.xlu0 %v9007_v4, %s9453_s30  ;;  %v14697_v4 = vld [vmem:[#allocation11_spill] sm:$0xff] }
 0x69f   : > { %9033 = vrot.lane.b32.xlu1 %v9032_v45, %s9453_s30  ;;  %v14698_v45 = vmax.f32 %v14697_v4, 0.0 }
 0x6a2   : > { %9013 = vrot.lane.b32.xlu0 %v9012_v47, %s9450_s27 }
 0x6a3   : > { %9038 = vrot.lane.b32.xlu1 %v9037_v43, %s9450_s27  ;;  %v6557_v43 = vsel %vm14699_vm15, %v6555_v51, %v6556_v20  ;;  %vm14713_vm15 = vmmov %vm14705_vm2 }
 0x6a4   : > { %v9057_v55 = vpack.i.bf16 %v6559_v13, %v6557_v43  ;;  %v5136_v43 = vld [vmem:[%s14391_s7 + $0x110] sm:$0xff]  ;;  %v5137_v13 = vld [vmem:[%s14391_s7 + $0x118] sm:$0xff] }
 0x6a6   : > { %9023 = vrot.lane.b32.xlu0 %v9022_v9, %s9454_s24  ;;  %v6475_v9 = vrot.slane %v6373_v62, 1  ;;  %v14700_v62 = vld [vmem:[#allocation10_spill] sm:$0xff] }
 0x6a7   : > { %2406 = vrot.lane.b32.xlu1 %v14684_v11, %s9441_s17  ;;  %v6476_v11 = vrot.slane %v6374_v23, 1  ;;  %v14701_v23 = vmax.f32 %v14700_v62, 0.0 }
 0x6a9   : > { %v6477_v28 = vsel %vm14704_vm13, %v6475_v9, %v6476_v11  ;;  %vm14731_vm13 = vmmov %vm14676_vm4 }
 0x6aa   : > { %2400 = vrot.lane.b32.xlu0 %v14685_v19, %s9441_s17 }
 0x6ab   : > { %9048 = vrot.lane.b32.xlu1 %v9047_v17, %s9454_s24  ;;  %s9457_s24 = smov 120  }
 0x6ae   : > { %9043 = vrot.lane.b32.xlu0 %v12423_v29, %s14549_s16 }
 0x6af   : > { %2410 = vrot.lane.b32.xlu1 %v14686_v38, %s9441_s17 }
 0x6b0   : > { %v8924_v18 = vpop.permute.xlu1 %8923 }
 0x6b1   : > { %v8925_v44 = vunpack.i.l.bf16 %v8924_v18 }
 0x6b2   : > { %v12474_v34 = vpop.permute.xlu0 %8928  ;;  %2404 = vrot.lane.b32.xlu0 %v14687_v31, %s9441_s17  ;;  %v6478_v31 = vrot.slane %v6375_v39, 1 }
 0x6b3   : > { %2414 = vrot.lane.b32.xlu1 %v14688_v7, %s9441_s17  ;;  %v5134_v7 = vld [vmem:[%s14391_s7 + $0x100] sm:$0xff]  ;;  %v8930_v62 = vunpack.i.l.bf16 %v12474_v34 }
 0x6b4   : > { %v12482_v49 = vpop.permute.xlu1 %8948 }
 0x6b5   : > { %v8950_v17 = vunpack.i.l.bf16 %v12482_v49  ;;  %v8951_v4 = vunpack.i.h.bf16 %v12482_v49  ;;  %v14706_v49 = vld [vmem:[#allocation12_spill] sm:$0xff] }
 0x6b6   : > { %v12484_v33 = vpop.permute.xlu0 %8933  ;;  %2408 = vrot.lane.b32.xlu0 %v14689_v54, %s9441_s17  ;;  %v5135_v54 = vld [vmem:[%s14391_s7 + $0x108] sm:$0xff] }
 0x6b7   : > { %2418 = vrot.lane.b32.xlu1 %v14690_v22, %s9441_s17 }
 0x6b8   : > { %v12492_v53 = vpop.permute.xlu1 %8958 }
 0x6ba   : > { %v12494_v50 = vpop.permute.xlu0 %8938  ;;  %2412 = vrot.lane.b32.xlu0 %v14692_v60, %s9441_s17 }
 0x6bb   : > { %2422 = vrot.lane.b32.xlu1 %v14694_v3, %s9441_s17  ;;  %v8940_v35 = vunpack.i.l.bf16 %v12494_v50  ;;  %v8941_v19 = vunpack.i.h.bf16 %v12494_v50  ;;  %v14702_v50 = vld [vmem:[#allocation13_spill] sm:$0xff]  ;;  %v8926_v3 = vunpack.i.h.bf16 %v8924_v18  ;;  %v5046_v18 = vsel %vm14705_vm2, %v12163_v25, %v8950_v17 }
 0x6bc   : > { %v12503_v26 = vpop.permute.xlu1 %8963  ;;  %v14703_v60 = vmax.f32 %v14702_v50, 0.0  ;;  %vm14735_vm2 = vcmask 1045504  }
 0x6bd   : > { %v5062_v39 = vsel %vm1826_vm9, %v8940_v35, %v8925_v44  ;;  %v8965_v9 = vunpack.i.l.bf16 %v12503_v26  ;;  %v5054_v25 = vsel %vm4422_vm10, %v5046_v18, %v8940_v35  ;;  %v5047_v35 = vsel %vm14708_vm5, %v12180_v24, %v8951_v4  ;;  %vm14736_vm5 = vmmov %vm14717_vm1 }
 0x6be   : > { %v8944_v58 = vpop.permute.xlu0 %8943  ;;  %2416 = vrot.lane.b32.xlu0 %v14696_v37, %s9441_s17  ;;  %v8773_v37 = vpack.c.bf16 %v5135_v54, %v5134_v7  ;;  %v14707_v7 = vmax.f32 %v14706_v49, 0.0  ;;  %v6479_v54 = vsel %vm14676_vm4, %v6476_v11, %v6478_v31  ;;  %v5055_v4 = vsel %vm4422_vm10, %v5047_v35, %v8941_v19 }
 0x6bf   : > { %2426 = vrot.lane.b32.xlu1 %v14698_v45, %s9441_s17  ;;  %v8945_v47 = vunpack.i.l.bf16 %v8944_v58  ;;  %v8946_v22 = vunpack.i.h.bf16 %v8944_v58  ;;  %v8960_v45 = vunpack.i.l.bf16 %v12492_v53  ;;  %v9052_v31 = vpack.i.bf16 %v6479_v54, %v6477_v28  ;;  %v14711_v28 = vld [vmem:[#allocation15_spill] sm:$0xff] }
 0x6c0   : > { %v12533_v10 = vpop.permute.xlu1 %8973 }
 0x6c1   : > { %v5070_v20 = vsel %vm3832_vm12, %v5062_v39, %v8945_v47  ;;  %v5063_v47 = vsel %vm1826_vm9, %v8941_v19, %v8926_v3  ;;  %v8776_v39 = vpack.c.bf16 %v5137_v13, %v5136_v43  ;;  %v5064_v11 = vsel %vm1826_vm9, %v8960_v45, %v8930_v62  ;;  %v5139_v3 = vld [vmem:[%s14391_s7 + $0x128] sm:$0xff]  ;;  %v5140_v19 = vld [vmem:[%s14391_s7 + $0x130] sm:$0xff] }
 0x6c2   : > { %v12515_v38 = vpop.permute.xlu0 %8953  ;;  %2420 = vrot.lane.b32.xlu0 %v14701_v23, %s9441_s17  ;;  %v5071_v17 = vsel %vm3832_vm12, %v5063_v47, %v8946_v22  ;;  %v8975_v23 = vunpack.i.l.bf16 %v12533_v10  ;;  %v5138_v22 = vld [vmem:[%s14391_s7 + $0x120] sm:$0xff]  ;;  %v5072_v18 = vsel %vm3832_vm12, %v5064_v11, %v8965_v9  ;;  %v8976_v47 = vunpack.i.h.bf16 %v12533_v10 }
 0x6c3   : > { %v8955_v48 = vunpack.i.l.bf16 %v12515_v38  ;;  %2430 = vrot.lane.b32.xlu1 %v14703_v60, %s9441_s17  ;;  %v8956_v51 = vunpack.i.h.bf16 %v12515_v38  ;;  %v8779_v13 = vpack.c.bf16 %v5139_v3, %v5138_v22  ;;  %v14715_v9 = vld [vmem:[#allocation17_spill] sm:$0xff]  ;;  %v5145_v22 = vld [vmem:[%s14391_s7 + $0x158] sm:$0xff]  ;;  %v14721_v3 = vld [vmem:[#allocation18_spill] sm:$0xff] }
 0x6c5   : > { %v5078_v58 = vsel %vm4425_vm11, %v5070_v20, %v8955_v48  ;;  %v5079_v60 = vsel %vm4425_vm11, %v5071_v17, %v8956_v51  ;;  %v8931_v20 = vunpack.i.h.bf16 %v12474_v34  ;;  %v5080_v34 = vsel %vm4425_vm11, %v5072_v18, %v8975_v23  ;;  %v5148_v18 = vld [vmem:[%s14391_s7 + $0x170] sm:$0xff] }
 0x6c6   : > { %v8969_v44 = vpop.permute.xlu0 %8968  ;;  %5243 = vmatprep.mubr.f32.mxu1 %v5078_v58  ;;  %2424 = vrot.lane.b32.xlu0 %v14707_v7, %s9441_s17  ;;  %v14709_v58 = vld [vmem:[#allocation14_spill] sm:$0xff] }
 0x6c7   : > { %9058 = vrot.lane.b32.xlu1 %v9057_v55, %s14549_s16  ;;  %v8970_v50 = vunpack.i.l.bf16 %v8969_v44  ;;  %5244 = vmatmul.mubr.f32.vlgmr.msra.gmra.mrb[12].mxu1 %v5054_v25  ;;  %v8961_v55 = vunpack.i.h.bf16 %v12492_v53  ;;  %v8966_v53 = vunpack.i.h.bf16 %v12503_v26  ;;  %v14710_v24 = vmax.f32 %v14709_v58, 0.0  ;;  %v5147_v58 = vld [vmem:[%s14391_s7 + $0x168] sm:$0xff] }
 0x6c8   : > { %5248 = vmatprep.mubr.f32.mxu1 %v5079_v60  ;;  %8774 = vmatpush1.bf16.msra.mxu1 %v8773_v37  ;;  %v14712_v37 = vmax.f32 %v14711_v28, 0.0  ;;  %v8971_v43 = vunpack.i.h.bf16 %v8969_v44  ;;  %v5141_v44 = vld [vmem:[%s14391_s7 + $0x138] sm:$0xff] }
 0x6c9   : > { %8775 = vmatprep.subr.bf16.mxu1 %v14671_v27  ;;  %v5048_v26 = vsel %vm14713_vm15, %v12182_v12, %v8970_v50  ;;  %v5065_v49 = vsel %vm1826_vm9, %v8961_v55, %v8931_v20  ;;  %v14716_v12 = vmax.f32 %v14715_v9, 0.0  ;;  %v8782_v62 = vpack.c.bf16 %v5141_v44, %v5140_v19  ;;  %v5142_v50 = vld [vmem:[%s14391_s7 + $0x140] sm:$0xff]  ;;  %v14718_v60 = vld [vmem:[#allocation16_spill] sm:$0xff]  ;;  %v14729_v44 = vld [vmem:[#allocation19_spill] sm:$0xff] }
 0x6ca   : > { %2428 = vrot.lane.b32.xlu0 %v14710_v24, %s9441_s17  ;;  %v5056_v7 = vsel %vm4422_vm10, %v5048_v26, %v8960_v45  ;;  %v5073_v25 = vsel %vm3832_vm12, %v5065_v49, %v8966_v53  ;;  %v5049_v54 = vsel %vm14717_vm1, %v12189_v0, %v8971_v43  ;;  %v5143_v45 = vld [vmem:[%s14391_s7 + $0x148] sm:$0xff]  ;;  %v14720_v0 = vmax.f32 %v11485_v16, 0.0  ;;  %v5146_v53 = vld [vmem:[%s14391_s7 + $0x160] sm:$0xff]  ;;  %v6424_v28 = vld [vmem:[#allocation6 + $0x198] sm:$0xff] }
 0x6cb   : > { %2434 = vrot.lane.b32.xlu1 %v14712_v37, %s9441_s17  ;;  %5249 = vmatmul.mubr.f32.gmra.mrb[14].mxu1 %v5055_v4  ;;  %v5081_v17 = vsel %vm4425_vm11, %v5073_v25, %v8976_v47  ;;  %v5057_v35 = vsel %vm4422_vm10, %v5049_v54, %v8961_v55  ;;  %v8785_v11 = vpack.c.bf16 %v5143_v45, %v5142_v50  ;;  %v14722_v20 = vmax.f32 %v14721_v3, 0.0  ;;  %v12649_v37 = vld [vmem:[#allocation6 + $0x1a0] sm:$0xff]  ;;  %v5152_v25 = vld [vmem:[%s14391_s7 + $0x190] sm:$0xff]  ;;  %v12690_v50 = vld [vmem:[#allocation5 + $0x98] sm:$0x3] }
 0x6cc   : > { %5253 = vmatprep.mubr.f32.mxu1 %v5080_v34  ;;  %8777 = vmatpush1.bf16.msra.mxu1 %v8776_v39  ;;  %v14719_v39 = vmax.f32 %v14718_v60, 0.0  ;;  %v14723_v16 = vmax.f32 %v11492_v21, 0.0  ;;  %v14724_v24 = vmax.f32 %v11488_v59, 0.0  ;;  %v14725_v21 = vmax.f32 %v11580_v36, 0.0  ;;  %v5149_v59 = vld [vmem:[%s14391_s7 + $0x178] sm:$0xff]  ;;  %v5150_v19 = vld [vmem:[%s14391_s7 + $0x180] sm:$0xff]  ;;  %vm14737_vm15 = vmmov %vm14717_vm1 }
 0x6cd   : > { %8778 = vmatprep.subr.bf16.mxu1 %v14671_v27  ;;  %v8791_v4 = vpack.c.bf16 %v5147_v58, %v5146_v53  ;;  %v14726_v43 = vmax.f32 %v11496_v52, 0.0  ;;  %v14727_v36 = vld [vmem:[#allocation20_spill] sm:$0xff]  ;;  %v6651_v26 = vrot.slane %v6424_v28, 1  ;;  %v8794_v49 = vpack.c.bf16 %v5149_v59, %v5148_v18  ;;  %v5151_v52 = vld [vmem:[%s14391_s7 + $0x188] sm:$0xff]  ;;  %v14732_v54 = vld [vmem:[#allocation21_spill] sm:$0xff] }
 0x6ce   : > { %9053 = vrot.lane.b32.xlu0 %v9052_v31, %s14714_s14  ;;  %v5144_v31 = vld [vmem:[%s14391_s7 + $0x150] sm:$0xff]  ;;  %v14728_v34 = vmax.f32 %v14727_v36, 0.0  ;;  %v14730_v9 = vmax.f32 %v14729_v44, 0.0  ;;  %v6656_v45 = vrot.slane %v6424_v28, 2  ;;  %v6657_v60 = vrot.slane %v12649_v37, 2 }
 0x6cf   : > { %2438 = vrot.lane.b32.xlu1 %v14716_v12, %s9441_s17  ;;  %5254 = vmatmul.mubr.f32.gmra.mrb[16].mxu1 %v5056_v7  ;;  %v8788_v55 = vpack.c.bf16 %v5145_v22, %v5144_v31  ;;  %v8797_v7 = vpack.c.bf16 %v5151_v52, %v5150_v19  ;;  %v5155_v31 = vld [vmem:[%s14391_s7 + $0x1a8] sm:$0xff] }
 0x6d0   : > { %5258 = vmatprep.mubr.f32.mxu1 %v5081_v17  ;;  %8780 = vmatpush1.bf16.msra.mxu1 %v8779_v13  ;;  %v6652_v13 = vrot.slane %v12649_v37, 1  ;;  %v5153_v17 = vld [vmem:[%s14391_s7 + $0x198] sm:$0xff]  ;;  %v6658_v22 = vsel %vm14735_vm2, %v6656_v45, %v6657_v60  ;;  %vm14740_vm2 = vmmov %vm14717_vm1 }
 0x6d1   : > { %8781 = vmatprep.subr.bf16.mxu1 %v14671_v27 }
 0x6d2   : > { %2432 = vrot.lane.b32.xlu0 %v14719_v39, %s9441_s17  ;;  %v6653_v12 = vsel %vm14731_vm13, %v6651_v26, %v6652_v13  ;;  %v8800_v39 = vpack.c.bf16 %v5153_v17, %v5152_v25  ;;  %vm14738_vm13 = vmmov %vm14717_vm1 }
 0x6d3   : > { %2442 = vrot.lane.b32.xlu1 %v14720_v0, %s9441_s17  ;;  %5259 = vmatmul.mubr.f32.gmra.mrb[18].mxu1 %v5057_v35  ;;  %v4872_v0 = vrot.slane %v12420_v32, 1  ;;  %v4873_v35 = vrot.slane %v12690_v50, 1 }
 0x6d4   : > { %8783 = vmatpush1.bf16.msra.mxu1 %v8782_v62  ;;  %v14733_v62 = vmax.f32 %v14732_v54, 0.0 }
 0x6d5   : > { %8784 = vmatprep.subr.bf16.mxu1 %v14671_v27 }
 0x6d6   : > { %2436 = vrot.lane.b32.xlu0 %v14722_v20, %s9441_s17  ;;  %v4874_v20 = vsel %vm14676_vm4, %v4872_v0, %v4873_v35 }
 0x6d7   : > { %2446 = vrot.lane.b32.xlu1 %v14723_v16, %s9441_s17  ;;  %v9067_v16 = vpack.i.bf16 %v4874_v20, %v12447_v63 }
 0x6d8   : > { %8786 = vmatpush1.bf16.msra.mxu1 %v8785_v11  ;;  %v5154_v11 = vld [vmem:[%s14391_s7 + $0x1a0] sm:$0xff] }
 0x6d9   : > { %8787 = vmatprep.subr.bf16.mxu1 %v14671_v27  ;;  %v8803_v3 = vpack.c.bf16 %v5155_v31, %v5154_v11 }
 0x6da   : > { %2440 = vrot.lane.b32.xlu0 %v14724_v24, %s9441_s17 }
 0x6db   : > { %2450 = vrot.lane.b32.xlu1 %v14725_v21, %s9441_s17 }
 0x6dc   : > { %8789 = vmatpush1.bf16.msra.mxu1 %v8788_v55  ;;  %v12712_v55 = vpop.permute.xlu1 %8978 }
 0x6dd   : > { %8790 = vmatprep.subr.bf16.mxu1 %v14671_v27 }
 0x6de   : > { %2444 = vrot.lane.b32.xlu0 %v14726_v43, %s9441_s17 }
 0x6df   : > { %2454 = vrot.lane.b32.xlu1 %v14728_v34, %s9441_s17 }
 0x6e0   : > { %8792 = vmatpush1.bf16.msra.mxu1 %v8791_v4 }
 0x6e1   : > { %8793 = vmatprep.subr.bf16.mxu1 %v14671_v27 }
 0x6e2   : > { %2448 = vrot.lane.b32.xlu0 %v14730_v9, %s9441_s17 }
 0x6e3   : > { %7201 = vrot.lane.b32.xlu1 %v6424_v28, %s9441_s17 }
 0x6e4   : > { %8795 = vmatpush1.bf16.msra.mxu1 %v8794_v49 }
 0x6e5   : > { %8796 = vmatprep.subr.bf16.mxu1 %v14671_v27 }
 0x6e6   : > { %2452 = vrot.lane.b32.xlu0 %v14733_v62, %s9441_s17 }
 0x6e7   : > { %7297 = vrot.lane.b32.xlu1 %v6653_v12, %s14734_s29 }
 0x6e8   : > { %8798 = vmatpush1.bf16.msra.mxu1 %v8797_v7 }
 0x6e9   : > { %8799 = vmatprep.subr.bf16.mxu1 %v14671_v27 }
 0x6eb   : > { %9063 = vrot.lane.b32.xlu1 %v12423_v29, %s9452_s21 }
 0x6ec   : > { %8801 = vmatpush1.bf16.msra.mxu1 %v8800_v39 }
 0x6ed   : > { %8802 = vmatprep.subr.bf16.mxu1 %v14671_v27 }
 0x6ef   : > { %7393 = vrot.lane.b32.xlu1 %v6658_v22, %s9450_s27 }
 0x6f0   : > { %8804 = vmatpush1.bf16.msra.mxu1 %v8803_v3 }
 0x6f3   : > { %9068 = vrot.lane.b32.xlu1 %v9067_v16, %s9452_s21 }
 0x700   : > { %v12714_v53 = vpop.permute.xlu0 %8988 }
 0x701   : > { %v8984_v29 = vpop.permute.xlu1 %8983  ;;  %v8991_v38 = vunpack.i.h.bf16 %v12714_v53 }
 0x702   : > { %v8985_v49 = vunpack.i.l.bf16 %v8984_v29  ;;  %v8986_v7 = vunpack.i.h.bf16 %v8984_v29 }
 0x704   : > { %v8994_v24 = vpop.permute.xlu0 %8993 }
 0x705   : > { %v9019_v58 = vpop.permute.xlu1 %9018  ;;  %v8995_v29 = vunpack.i.l.bf16 %v8994_v24 }
 0x706   : > { %v9020_v19 = vunpack.i.l.bf16 %v9019_v58  ;;  %v9021_v62 = vunpack.i.h.bf16 %v9019_v58 }
 0x708   : > { %v12716_v28 = vpop.permute.xlu0 %8998  ;;  %v5050_v35 = vsel %vm14736_vm5, %v12191_v1, %v9020_v19  ;;  %vm14742_vm5 = vmmov %vm14717_vm1 }
 0x709   : > { %v2403_v21 = vpop.permute.xlu1 %2402 }
 0x70a   : > { %2495 = vst.msk [vmem:[#allocation6 + $0x51] sm:$0xff] %vm2489_vm7, %v2403_v21 }
 0x70c   : > { %v12721_v18 = vpop.permute.xlu0 %9003 }
 0x70d   : > { %v12719_v4 = vpop.permute.xlu1 %9028 }
 0x710   : > { %v9009_v59 = vpop.permute.xlu0 %9008 }
 0x711   : > { %v12723_v63 = vpop.permute.xlu1 %9033  ;;  %v9010_v34 = vunpack.i.l.bf16 %v9009_v59  ;;  %v9011_v52 = vunpack.i.h.bf16 %v9009_v59  ;;  %v5051_v59 = vsel %vm14737_vm15, %v12395_v14, %v9021_v62  ;;  %vm14743_vm15 = vmmov %vm14717_vm1 }
 0x712   : > { %v9035_v39 = vunpack.i.l.bf16 %v12723_v63  ;;  %v9036_v21 = vunpack.i.h.bf16 %v12723_v63 }
 0x713   : > { %v5066_v54 = vsel %vm1826_vm9, %v9010_v34, %v8985_v49  ;;  %v5067_v11 = vsel %vm1826_vm9, %v9011_v52, %v8986_v7  ;;  %v5058_v20 = vsel %vm4422_vm10, %v5050_v35, %v9010_v34  ;;  %v8996_v34 = vunpack.i.h.bf16 %v8994_v24 }
 0x714   : > { %v9014_v36 = vpop.permute.xlu0 %9013 }
 0x715   : > { %v9039_v43 = vpop.permute.xlu1 %9038  ;;  %v9015_v26 = vunpack.i.l.bf16 %v9014_v36  ;;  %v9016_v44 = vunpack.i.h.bf16 %v9014_v36  ;;  %v5068_v36 = vsel %vm1826_vm9, %v9035_v39, %v8995_v29  ;;  %v5069_v63 = vsel %vm1826_vm9, %v9036_v21, %v8996_v34 }
 0x716   : > { %v9040_v31 = vunpack.i.l.bf16 %v9039_v43  ;;  %v8981_v29 = vunpack.i.h.bf16 %v12712_v55 }
 0x717   : > { %v5074_v45 = vsel %vm3832_vm12, %v5066_v54, %v9015_v26  ;;  %v5075_v16 = vsel %vm3832_vm12, %v5067_v11, %v9016_v44  ;;  %v9041_v26 = vunpack.i.h.bf16 %v9039_v43  ;;  %v5059_v44 = vsel %vm4422_vm10, %v5051_v59, %v9011_v52 }
 0x718   : > { %v12725_v12 = vpop.permute.xlu0 %9023  ;;  %v8935_v11 = vunpack.i.l.bf16 %v12484_v33 }
 0x719   : > { %v2407_v9 = vpop.permute.xlu1 %2406  ;;  %v9026_v25 = vunpack.i.h.bf16 %v12725_v12  ;;  %v9025_v17 = vunpack.i.l.bf16 %v12725_v12 }
 0x71a   : > { %2497 = vst.msk [vmem:[#allocation6 + $0x69] sm:$0xff] %vm2489_vm7, %v2407_v9  ;;  %v5076_v9 = vsel %vm3832_vm12, %v5068_v36, %v9040_v31  ;;  %v8980_v31 = vunpack.i.l.bf16 %v12712_v55 }
 0x71b   : > { %v5082_v0 = vsel %vm4425_vm11, %v5074_v45, %v9025_v17  ;;  %v5083_v1 = vsel %vm4425_vm11, %v5075_v16, %v9026_v25 }
 0x71c   : > { %v2401_v3 = vpop.permute.xlu0 %2400  ;;  %5263 = vmatprep.mubr.f32.mxu1 %v5082_v0  ;;  %v5077_v0 = vsel %vm3832_vm12, %v5069_v63, %v9041_v26 }
 0x71d   : > { %v12739_v22 = vpop.permute.xlu1 %9048  ;;  %2494 = vst.msk [vmem:[#allocation6 + $0x49] sm:$0xff] %vm2489_vm7, %v2401_v3  ;;  %5264 = vmatmul.mubr.f32.gmra.mrb[20].mxu1 %v5058_v20 }
 0x71e   : > { %v9050_v58 = vunpack.i.l.bf16 %v12739_v22  ;;  %5268 = vmatprep.mubr.f32.mxu1 %v5083_v1  ;;  %v9051_v7 = vunpack.i.h.bf16 %v12739_v22 }
 0x720   : > { %v9044_v19 = vpop.permute.xlu0 %9043  ;;  %v5084_v14 = vsel %vm4425_vm11, %v5076_v9, %v9050_v58  ;;  %v5085_v35 = vsel %vm4425_vm11, %v5077_v0, %v9051_v7  ;;  %vm14739_vm11 = vcmask 261120  }
 0x721   : > { %v2411_v49 = vpop.permute.xlu1 %2410  ;;  %v9046_v54 = vunpack.i.h.bf16 %v9044_v19  ;;  %v9045_v45 = vunpack.i.l.bf16 %v9044_v19  ;;  %5269 = vmatmul.mubr.f32.gmra.mrb[22].mxu1 %v5059_v44  ;;  %v5086_v16 = vsel %vm14739_vm11, %v8955_v48, %v8935_v11  ;;  %vm14741_vm4 = vmmov %vm14739_vm11 }
 0x722   : > { %2499 = vst.msk [vmem:[#allocation6 + $0x81] sm:$0xff] %vm2489_vm7, %v2411_v49  ;;  %5273 = vmatprep.mubr.f32.mxu1 %v5084_v14 }
 0x723   : > { %v5052_v24 = vsel %vm14717_vm1, %v12397_v15, %v9045_v45  ;;  %v5053_v15 = vsel %vm14738_vm13, %v12404_v6, %v9046_v54  ;;  %v8936_v6 = vunpack.i.h.bf16 %v12484_v33  ;;  %v9030_v33 = vunpack.i.l.bf16 %v12719_v4  ;;  %vm14744_vm1 = vmmov %vm14741_vm4 }
 0x724   : > { %v2405_v52 = vpop.permute.xlu0 %2404  ;;  %v5060_v62 = vsel %vm4422_vm10, %v5052_v24, %v9035_v39  ;;  %v5061_v20 = vsel %vm4422_vm10, %v5053_v15, %v9036_v21  ;;  %v5094_v21 = vsel %vm4419_vm14, %v5086_v16, %v8980_v31  ;;  %vm14745_vm13 = vmmov %vm14740_vm2  ;;  %v9000_v15 = vunpack.i.l.bf16 %v12716_v28 }
 0x725   : > { %v2415_v43 = vpop.permute.xlu1 %2414  ;;  %2496 = vst.msk [vmem:[#allocation6 + $0x61] sm:$0xff] %vm2489_vm7, %v2405_v52  ;;  %5274 = vmatmul.mubr.f32.gmra.mrb[24].mxu1 %v5060_v62  ;;  %v5087_v48 = vsel %vm14741_vm4, %v8956_v51, %v8936_v6  ;;  %v9031_v51 = vunpack.i.h.bf16 %v12719_v4  ;;  %vm14746_vm11 = vmmov %vm14744_vm1  ;;  %v9001_v16 = vunpack.i.h.bf16 %v12716_v28 }
 0x726   : > { %2501 = vst.msk [vmem:[#allocation6 + $0x99] sm:$0xff] %vm2489_vm7, %v2415_v43  ;;  %5278 = vmatprep.mubr.f32.mxu1 %v5085_v35  ;;  %v5095_v34 = vsel %vm4419_vm14, %v5087_v48, %v8981_v29  ;;  %vm14747_vm4 = vmmov %vm14744_vm1 }
 0x728   : > { %v2409_v3 = vpop.permute.xlu0 %2408 }
 0x729   : > { %v2419_v39 = vpop.permute.xlu1 %2418  ;;  %2498 = vst.msk [vmem:[#allocation6 + $0x79] sm:$0xff] %vm2489_vm7, %v2409_v3  ;;  %5279 = vmatmul.mubr.f32.gmra.mrb[26].mxu1 %v5061_v20 }
 0x72a   : > { %2503 = vst.msk [vmem:[#allocation6 + $0xb1] sm:$0xff] %vm2489_vm7, %v2419_v39  ;;  %8379 = vmatprep.mubr.msk.f32.mxu1 %vm14740_vm2, %v12239_v41  ;;  %v8990_v41 = vunpack.i.l.bf16 %v12714_v53  ;;  %v5090_v39 = vsel %vm14747_vm4, %v9025_v17, %v9000_v15  ;;  %v7691_v15 = vld [vmem:[%s14393_s9 + $0x28] sm:$0xff] }
 0x72c   : > { %v2413_v59 = vpop.permute.xlu0 %2412 }
 0x72d   : > { %v2423_v1 = vpop.permute.xlu1 %2422  ;;  %2500 = vst.msk [vmem:[#allocation6 + $0x91] sm:$0xff] %vm2489_vm7, %v2413_v59  ;;  %5349 = vmatmul.mubr.f32.vlgmr.msra.gmra.mrb[28].mxu1 %v5094_v21  ;;  %v4876_v59 = vrot.slane %v12690_v50, 2  ;;  %v9005_v21 = vunpack.i.l.bf16 %v12721_v18  ;;  %v9006_v50 = vunpack.i.h.bf16 %v12721_v18 }
 0x72e   : > { %2505 = vst.msk [vmem:[#allocation6 + $0xc9] sm:$0xff] %vm2489_vm7, %v2423_v1  ;;  %8380 = vmatprep.mubr.msk.f32.mxu1 %vm14742_vm5, %v12210_v30  ;;  %v5088_v30 = vsel %vm14744_vm1, %v8975_v23, %v8990_v41  ;;  %vm14748_vm5 = vmmov %vm14740_vm2  ;;  %v4875_v1 = vrot.slane %v12420_v32, 2 }
 0x72f   : > { %v5096_v19 = vsel %vm4419_vm14, %v5088_v30, %v9030_v33 }
 0x730   : > { %v2417_v36 = vpop.permute.xlu0 %2416 }
 0x731   : > { %v2427_v55 = vpop.permute.xlu1 %2426  ;;  %2502 = vst.msk [vmem:[#allocation6 + $0xa9] sm:$0xff] %vm2489_vm7, %v2417_v36  ;;  %5354 = vmatmul.mubr.f32.gmra.mrb[30].mxu1 %v5095_v34 }
 0x732   : > { %2507 = vst.msk [vmem:[#allocation6 + $0xe1] sm:$0xff] %vm2489_vm7, %v2427_v55  ;;  %8381 = vmatprep.mubr.msk.f32.mxu1 %vm14743_vm15, %v12347_v40  ;;  %v5089_v40 = vsel %vm14746_vm11, %v8976_v47, %v8991_v38  ;;  %vm14750_vm15 = vmmov %vm14740_vm2 }
 0x733   : > { %v5097_v4 = vsel %vm4419_vm14, %v5089_v40, %v9031_v51  ;;  %vm14752_vm11 = vmmov %vm14740_vm2 }
 0x734   : > { %v2421_v49 = vpop.permute.xlu0 %2420 }
 0x735   : > { %v2431_v26 = vpop.permute.xlu1 %2430  ;;  %2504 = vst.msk [vmem:[#allocation6 + $0xc1] sm:$0xff] %vm2489_vm7, %v2421_v49  ;;  %5359 = vmatmul.mubr.f32.gmra.mrb[32].mxu1 %v5096_v19 }
 0x736   : > { %2509 = vst.msk [vmem:[#allocation6 + $0xf9] sm:$0xff] %vm2489_vm7, %v2431_v26  ;;  %8382 = vmatprep.mubr.msk.f32.mxu1 %vm14745_vm13, %v12432_v2  ;;  %vm14751_vm13 = vcmask 1045504  }
 0x737   : > { %v4877_v12 = vsel %vm14751_vm13, %v4875_v1, %v4876_v59  ;;  %vm14755_vm4 = vmmov %vm14751_vm13 }
 0x738   : > { %v2425_v23 = vpop.permute.xlu0 %2424 }
 0x739   : > { %v12811_v53 = vpop.permute.xlu1 %9058  ;;  %2506 = vst.msk [vmem:[#allocation6 + $0xd9] sm:$0xff] %vm2489_vm7, %v2425_v23  ;;  %5364 = vmatmul.mubr.f32.gmra.mrb[34].mxu1 %v5097_v4  ;;  %v7686_v4 = vld [vmem:[%s14393_s9] sm:$0xff] }
 0x73a   : > { %8383 = vmatprep.mubr.msk.f32.mxu1 %vm14740_vm2, %v12440_v57  ;;  %vm14753_vm2 = vmmov %vm14744_vm1 }
 0x73b   : > { %v5093_v41 = vsel %vm14753_vm2, %v9051_v7, %v9006_v50 }
 0x73c   : > { %v2429_v9 = vpop.permute.xlu0 %2428 }
 0x73d   : > { %v2435_v44 = vpop.permute.xlu1 %2434  ;;  %2508 = vst.msk [vmem:[#allocation6 + $0xf1] sm:$0xff] %vm2489_vm7, %v2429_v9 }
 0x73e   : > { %2511 = vst.msk [vmem:[#allocation6 + $0x111] sm:$0xff] %vm2489_vm7, %v2435_v44  ;;  %v7687_v44 = vld [vmem:[%s14393_s9 + $0x8] sm:$0xff] }
 0x740   : > { %v12819_v10 = vpop.permute.xlu0 %9053 }
 0x741   : > { %v2439_v2 = vpop.permute.xlu1 %2438 }
 0x742   : > { %2513 = vst.msk [vmem:[#allocation6 + $0x129] sm:$0xff] %vm2489_vm7, %v2439_v2  ;;  %v8806_v2 = vpack.c.bf16 %v7687_v44, %v7686_v4 }
 0x744   : > { %v2433_v54 = vpop.permute.xlu0 %2432  ;;  %8807 = vmatpush1.bf16.msra.mxu0 %v8806_v2 }
 0x745   : > { %v2443_v47 = vpop.permute.xlu1 %2442  ;;  %2510 = vst.msk [vmem:[#allocation6 + $0x109] sm:$0xff] %vm2489_vm7, %v2433_v54  ;;  %8808 = vmatprep.subr.bf16.mxu0 %v14671_v27 }
 0x746   : > { %2515 = vst.msk [vmem:[#allocation6 + $0x141] sm:$0xff] %vm2489_vm7, %v2443_v47 }
 0x748   : > { %v2437_v14 = vpop.permute.xlu0 %2436 }
 0x749   : > { %v2447_v45 = vpop.permute.xlu1 %2446  ;;  %2512 = vst.msk [vmem:[#allocation6 + $0x121] sm:$0xff] %vm2489_vm7, %v2437_v14  ;;  %v7689_v14 = vld [vmem:[%s14393_s9 + $0x18] sm:$0xff] }
 0x74a   : > { %2517 = vst.msk [vmem:[#allocation6 + $0x159] sm:$0xff] %vm2489_vm7, %v2447_v45  ;;  %v7688_v45 = vld [vmem:[%s14393_s9 + $0x10] sm:$0xff] }
 0x74c   : > { %v2441_v24 = vpop.permute.xlu0 %2440 }
 0x74d   : > { %v2451_v57 = vpop.permute.xlu1 %2450  ;;  %2514 = vst.msk [vmem:[#allocation6 + $0x139] sm:$0xff] %vm2489_vm7, %v2441_v24  ;;  %v8809_v24 = vpack.c.bf16 %v7689_v14, %v7688_v45 }
 0x74e   : > { %2519 = vst.msk [vmem:[#allocation6 + $0x171] sm:$0xff] %vm2489_vm7, %v2451_v57 }
 0x74f   : > { %8810 = vmatpush1.bf16.msra.mxu0 %v8809_v24 }
 0x750   : > { %v2445_v43 = vpop.permute.xlu0 %2444  ;;  %8811 = vmatprep.subr.bf16.mxu0 %v14671_v27 }
 0x751   : > { %v2455_v63 = vpop.permute.xlu1 %2454  ;;  %2516 = vst.msk [vmem:[#allocation6 + $0x151] sm:$0xff] %vm2489_vm7, %v2445_v43 }
 0x752   : > { %2521 = vst.msk [vmem:[#allocation6 + $0x189] sm:$0xff] %vm2489_vm7, %v2455_v63 }
 0x754   : > { %v2449_v62 = vpop.permute.xlu0 %2448 }
 0x755   : > { %v12830_v52 = vpop.permute.xlu1 %7201  ;;  %2518 = vst.msk [vmem:[#allocation6 + $0x169] sm:$0xff] %vm2489_vm7, %v2449_v62  ;;  %v12888_v62 = vld [vmem:[%s14392_s8] ss:$0 sm:$0xff] }
 0x758   : > { %v2453_v35 = vpop.permute.xlu0 %2452 }
 0x759   : > { %v12833_v0 = vpop.permute.xlu1 %7297  ;;  %2520 = vst.msk [vmem:[#allocation6 + $0x181] sm:$0xff] %vm2489_vm7, %v2453_v35  ;;  %vm14749_vm7 = vmmov %vm14744_vm1  ;;  %v7690_v35 = vld [vmem:[%s14393_s9 + $0x20] sm:$0xff] }
 0x75a   : > { %v5091_v29 = vsel %vm14749_vm7, %v9026_v25, %v9001_v16  ;;  %v7692_v16 = vld [vmem:[%s14393_s9 + $0x30] sm:$0xff] }
 0x75d   : > { %v9064_v11 = vpop.permute.xlu1 %9063 }
 0x75e   : > { %v9065_v31 = vunpack.i.l.bf16 %v9064_v11  ;;  %v9066_v3 = vunpack.i.h.bf16 %v9064_v11 }
 0x760   : > { %v5098_v20 = vsel %vm4419_vm14, %v5090_v39, %v9065_v31  ;;  %v5099_v17 = vsel %vm4419_vm14, %v5091_v29, %v9066_v3  ;;  %v8812_v31 = vpack.c.bf16 %v7691_v15, %v7690_v35  ;;  %v7693_v29 = vld [vmem:[%s14393_s9 + $0x38] sm:$0xff] }
 0x761   : > { %v12842_v6 = vpop.permute.xlu1 %7393  ;;  %5369 = vmatmul.mubr.f32.gmra.mrb[36].mxu1 %v5098_v20 }
 0x762   : > { %8384 = vmatprep.mubr.msk.f32.mxu1 %vm14748_vm5, %v12435_v42  ;;  %v5092_v42 = vsel %vm14744_vm1, %v9050_v58, %v9005_v21  ;;  %8813 = vmatpush1.bf16.msra.mxu0 %v8812_v31  ;;  %vm14759_vm1 = vmmov %vm14755_vm4 }
 0x763   : > { %8814 = vmatprep.subr.bf16.mxu0 %v14671_v27  ;;  %vm14760_vm13 = vmmov %vm14759_vm1 }
 0x765   : > { %v9069_v48 = vpop.permute.xlu1 %9068  ;;  %5374 = vmatmul.mubr.f32.gmra.mrb[38].mxu1 %v5099_v17  ;;  %v8815_v17 = vpack.c.bf16 %v7693_v29, %v7692_v16 }
 0x766   : > { %v9070_v28 = vunpack.i.l.bf16 %v9069_v48  ;;  %8385 = vmatprep.mubr.msk.f32.mxu1 %vm14750_vm15, %v12457_v46  ;;  %v9071_v25 = vunpack.i.h.bf16 %v9069_v48  ;;  %vm14758_vm15 = vmmov %vm14755_vm4 }
 0x767   : > { %8816 = vmatpush1.bf16.msra.mxu0 %v8815_v17 }
 0x768   : > { %v5100_v32 = vsel %vm4419_vm14, %v5092_v42, %v9070_v28  ;;  %v5101_v46 = vsel %vm4419_vm14, %v5093_v41, %v9071_v25  ;;  %8817 = vmatprep.subr.bf16.mxu0 %v14671_v27  ;;  %v7694_v42 = vld [vmem:[%s14393_s9 + $0x40] sm:$0xff]  ;;  %vm14754_vm14 = vcmask 1046528  }
 0x769   : > { %5379 = vmatmul.mubr.f32.gmra.mrb[40].mxu1 %v5100_v32  ;;  %vm14756_vm5 = vmmov %vm14754_vm14 }
 0x76a   : > { %8386 = vmatprep.mubr.msk.f32.mxu1 %vm14752_vm11, %v4877_v12  ;;  %v7695_v12 = vld [vmem:[%s14393_s9 + $0x48] sm:$0xff]  ;;  %vm14757_vm7 = vmmov %vm14756_vm5 }
 0x76b   : > { %vm14761_vm11 = vmmov %vm14756_vm5 }
 0x76c   : > { %vm14762_vm2 = vmmov %vm14756_vm5 }
 0x76d   : > { %5384 = vmatmul.mubr.f32.gmra.mrb[42].mxu1 %v5101_v46  ;;  %v8818_v46 = vpack.c.bf16 %v7695_v12, %v7694_v42 }
 0x76f   : > { %8819 = vmatpush1.bf16.msra.mxu0 %v8818_v46 }
 0x770   : > { %8820 = vmatprep.subr.bf16.mxu0 %v14671_v27 }
 0x79a   : > { %v8543_v33 = vpop.f32.mrb[12].mxu1 }
 0x79b   : > { %v8544_v55 = vpop.f32.mrb[13].mxu1 }
 0x79c   : > { %v8545_v58 = vadd.f32 %v8544_v55, %v8543_v33 }
 0x79e   : > { %v8546_v36 = vpop.f32.mrb[14].mxu1  ;;  %v5246_v3 = vadd.f32 %v8545_v58, %v12888_v62 }
 0x79f   : > { %v8547_v34 = vpop.f32.mrb[15].mxu1 }
 0x7a0   : > { %v8548_v38 = vadd.f32 %v8547_v34, %v8546_v36 }
 0x7a2   : > { %v8549_v30 = vpop.f32.mrb[16].mxu1  ;;  %v5251_v48 = vadd.f32 %v8548_v38, %v12888_v62 }
 0x7a3   : > { %v8550_v51 = vpop.f32.mrb[17].mxu1 }
 0x7a4   : > { %v8551_v26 = vadd.f32 %v8550_v51, %v8549_v30 }
 0x7a6   : > { %v8552_v18 = vpop.f32.mrb[18].mxu1  ;;  %v5256_v34 = vadd.f32 %v8551_v26, %v12888_v62 }
 0x7a7   : > { %v8553_v49 = vpop.f32.mrb[19].mxu1 }
 0x7a8   : > { %v8554_v19 = vadd.f32 %v8553_v49, %v8552_v18 }
 0x7aa   : > { %v5261_v30 = vadd.f32 %v8554_v19, %v12888_v62 }
 0x7f0   : > { %v8555_v40 = vpop.f32.mrb[20].mxu1 }
 0x7f1   : > { %v8556_v23 = vpop.f32.mrb[21].mxu1 }
 0x7f2   : > { %v12866_v22 = vadd.f32 %v8556_v23, %v8555_v40 }
 0x7f4   : > { %v8558_v7 = vpop.f32.mrb[22].mxu1 }
 0x7f5   : > { %v8559_v9 = vpop.f32.mrb[23].mxu1 }
 0x7f6   : > { %v12874_v47 = vadd.f32 %v8559_v9, %v8558_v7 }
 0x7f8   : > { %v8561_v54 = vpop.f32.mrb[24].mxu1 }
 0x7f9   : > { %v8562_v57 = vpop.f32.mrb[25].mxu1 }
 0x7fa   : > { %v12883_v63 = vadd.f32 %v8562_v57, %v8561_v54 }
 0x7fc   : > { %v8564_v43 = vpop.f32.mrb[26].mxu1 }
 0x7fd   : > { %v8565_v11 = vpop.f32.mrb[27].mxu1 }
 0x7fe   : > { %v12897_v39 = vadd.f32 %v8565_v11, %v8564_v43 }
 0x800   : > { %v5350_v20 = vpop.f32.mrb[28].mxu1 }
 0x801   : > { %v5351_v1 = vadd.f32 %v5350_v20, %v5246_v3  ;;  %v5352_v59 = vpop.f32.mrb[29].mxu1 }
 0x803   : > { %v5389_v21 = vmax.f32 %v5351_v1, 0.0 }
 0x804   : > { %v5355_v28 = vpop.f32.mrb[30].mxu1 }
 0x805   : > { %v5405_v25 = vcombine.high %v5389_v21, %v5389_v21  ;;  %v5412_v32 = vrot.slane %v5389_v21, %v12090_v5  ;;  %v5356_v50 = vadd.f32 %v5355_v28, %v5251_v48  ;;  %v5357_v41 = vpop.f32.mrb[31].mxu1 }
 0x807   : > { %v5419_v33 = vrot.slane %v5405_v25, %v12090_v5  ;;  %v5420_v55 = vcombine.high %v5412_v32, %v5412_v32  ;;  %v5428_v58 = vrot.slane %v5412_v32, %v12090_v5  ;;  %v5390_v36 = vmax.f32 %v5356_v50, 0.0 }
 0x808   : > { %v5360_v38 = vpop.f32.mrb[32].mxu1 }
 0x809   : > { %v5421_v51 = vcombine.high %v5419_v33, %v5419_v33  ;;  %v5435_v18 = vrot.slane %v5419_v33, %v12090_v5  ;;  %v5442_v49 = vrot.slane %v5420_v55, %v12090_v5  ;;  %v5450_v40 = vcombine.high %v5428_v58, %v5428_v58  ;;  %v5362_v23 = vpop.f32.mrb[33].mxu1 }
 0x80a   : > { %v5800_v7 = vrot.slane %v5428_v58, %v12102_v56  ;;  %v5454_v4 = vcombine.high %v5390_v36, %v5390_v36  ;;  %v5461_v44 = vrot.slane %v5390_v36, %v12090_v5  ;;  %v5361_v9 = vadd.f32 %v5360_v38, %v5256_v34 }
 0x80b   : > { %v5449_v26 = vrot.slane %v5421_v51, %v12090_v5  ;;  %v5451_v2 = vcombine.high %v5435_v18, %v5435_v18  ;;  %v5452_v54 = vcombine.high %v5442_v49, %v5442_v49  ;;  %v5804_v19 = vrot.slane %v5442_v49, %v12102_v56  ;;  %v7696_v49 = vld [vmem:[%s14393_s9 + $0x50] sm:$0xff] }
 0x80c   : > { %v5808_v45 = vrot.slane %v5450_v40, %v12102_v56  ;;  %v5816_v14 = vrot.slane %v5435_v18, %v12102_v56  ;;  %v5468_v57 = vrot.slane %v5454_v4, %v12090_v5  ;;  %v5469_v24 = vcombine.high %v5461_v44, %v5461_v44  ;;  %v5365_v43 = vpop.f32.mrb[34].mxu1  ;;  %v7697_v40 = vld [vmem:[%s14393_s9 + $0x58] sm:$0xff] }
 0x80d   : > { %v5453_v35 = vcombine.high %v5449_v26, %v5449_v26  ;;  %v5812_v15 = vrot.slane %v5452_v54, %v12102_v56  ;;  %v5820_v11 = vrot.slane %v5449_v26, %v12102_v56  ;;  %v5824_v31 = vrot.slane %v5451_v2, %v12102_v56  ;;  %v5367_v3 = vpop.f32.mrb[35].mxu1  ;;  %v7698_v26 = vld [vmem:[%s14393_s9 + $0x60] sm:$0xff] }
 0x80e   : > { %v6053_v20 = vcombine.low %v5800_v7, %v5804_v19  ;;  %v5470_v16 = vcombine.high %v5468_v57, %v5468_v57  ;;  %v5477_v29 = vrot.slane %v5461_v44, %v12090_v5  ;;  %v5484_v1 = vrot.slane %v5468_v57, %v12090_v5  ;;  %v7700_v57 = vld [vmem:[%s14393_s9 + $0x70] sm:$0xff] }
 0x80f   : > { %v5828_v59 = vrot.slane %v5453_v35, %v12102_v56  ;;  %v6054_v17 = vcombine.low %v5808_v45, %v5812_v15  ;;  %v6070_v21 = vcombine.low %v5816_v14, %v5820_v11  ;;  %v5491_v48 = vrot.slane %v5469_v24, %v12090_v5  ;;  %v7699_v14 = vld [vmem:[%s14393_s9 + $0x68] sm:$0xff]  ;;  %v7701_v24 = vld [vmem:[%s14393_s9 + $0x78] sm:$0xff] }
 0x810   : > { %v6061_v28 = vrot.slane %v6053_v20, %v10549_v8  ;;  %v5498_v42 = vrot.slane %v5470_v16, %v12090_v5  ;;  %v5499_v12 = vcombine.high %v5477_v29, %v5477_v29  ;;  %v5500_v25 = vcombine.high %v5484_v1, %v5484_v1  ;;  %v12978_v20 = vld [vmem:[%s14393_s9 + $0x80] sm:$0xff]  ;;  %v12983_v16 = vld [vmem:[%s14393_s9 + $0x88] sm:$0xff] }
 0x811   : > { %v6068_v32 = vrot.slane %v6054_v17, %v10549_v8  ;;  %v6071_v50 = vcombine.low %v5824_v31, %v5828_v59  ;;  %v6078_v41 = vrot.slane %v6070_v21, %v10549_v8  ;;  %v5501_v46 = vcombine.high %v5491_v48, %v5491_v48 }
 0x812   : > { %v5502_v33 = vcombine.high %v5498_v42, %v5498_v42  ;;  %v5832_v55 = vrot.slane %v5477_v29, %v12102_v56  ;;  %v5836_v58 = vrot.slane %v5491_v48, %v12102_v56  ;;  %v5840_v36 = vrot.slane %v5499_v12, %v12102_v56 }
 0x813   : > { %v6069_v34 = vcombine.low %v6061_v28, %v6068_v32  ;;  %v6085_v38 = vrot.slane %v6071_v50, %v10549_v8  ;;  %v5844_v51 = vrot.slane %v5501_v46, %v12102_v56  ;;  %v5848_v18 = vrot.slane %v5484_v1, %v12102_v56 }
 0x814   : > { %v5852_v23 = vrot.slane %v5498_v42, %v12102_v56  ;;  %v5856_v7 = vrot.slane %v5500_v25, %v12102_v56  ;;  %v5860_v4 = vrot.slane %v5502_v33, %v12102_v56  ;;  %v6087_v44 = vcombine.low %v5832_v55, %v5836_v58 }
 0x815   : > { %v6086_v2 = vcombine.low %v6078_v41, %v6085_v38  ;;  %6341 = vst.msk [vmem:[#allocation6 + $0x19] sm:$0xff] %vm1826_vm9, %v6069_v34  ;;  %6343 = vst.msk [vmem:[#allocation6 + $0x31] sm:$0xff] %vm1826_vm9, %v6069_v34  ;;  %v6088_v54 = vcombine.low %v5840_v36, %v5844_v51  ;;  %v5391_v19 = vmax.f32 %v5361_v9, 0.0  ;;  %v5366_v45 = vadd.f32 %v5365_v43, %v5261_v30 }
 0x816   : > { %v6095_v35 = vrot.slane %v6087_v44, %v10549_v8  ;;  %v6104_v15 = vcombine.low %v5848_v18, %v5852_v23  ;;  %v6105_v11 = vcombine.low %v5856_v7, %v5860_v4  ;;  %v8821_v31 = vpack.c.bf16 %v7697_v40, %v7696_v49 }
 0x817   : > { %6342 = vst.msk [vmem:[#allocation6 + $0x21] sm:$0xff] %vm1826_vm9, %v6086_v2  ;;  %6344 = vst.msk [vmem:[#allocation6 + $0x39] sm:$0xff] %vm1826_vm9, %v6086_v2  ;;  %v6102_v30 = vrot.slane %v6088_v54, %v10549_v8  ;;  %v5503_v9 = vcombine.high %v5391_v19, %v5391_v19  ;;  %v5510_v43 = vrot.slane %v5391_v19, %v12090_v5  ;;  %v5392_v3 = vmax.f32 %v5366_v45, 0.0 }
 0x818   : > { %v6112_v29 = vrot.slane %v6104_v15, %v10549_v8  ;;  %v6119_v1 = vrot.slane %v6105_v11, %v10549_v8  ;;  %8822 = vmatpush1.bf16.msra.mxu0 %v8821_v31  ;;  %v8824_v59 = vpack.c.bf16 %v7699_v14, %v7698_v26  ;;  %v8827_v17 = vpack.c.bf16 %v7701_v24, %v7700_v57 }
 0x819   : > { %v6103_v21 = vcombine.low %v6095_v35, %v6102_v30  ;;  %v5517_v48 = vrot.slane %v5503_v9, %v12090_v5  ;;  %v5518_v28 = vcombine.high %v5510_v43, %v5510_v43  ;;  %v5526_v42 = vrot.slane %v5510_v43, %v12090_v5  ;;  %8823 = vmatprep.subr.bf16.mxu0 %v14671_v27 }
 0x81a   : > { %v6120_v12 = vcombine.low %v6112_v29, %v6119_v1  ;;  %v5552_v25 = vcombine.high %v5392_v3, %v5392_v3  ;;  %v5559_v32 = vrot.slane %v5392_v3, %v12090_v5  ;;  %v8830_v50 = vpack.c.bf16 %v12983_v16, %v12978_v20 }
 0x81b   : > { %6345 = vst.msk [vmem:[#allocation6 + $0x49] sm:$0xff] %vm1826_vm9, %v6103_v21  ;;  %6347 = vst.msk [vmem:[#allocation6 + $0x61] sm:$0xff] %vm1826_vm9, %v6103_v21  ;;  %v5519_v41 = vcombine.high %v5517_v48, %v5517_v48  ;;  %v5533_v46 = vrot.slane %v5517_v48, %v12090_v5  ;;  %v5540_v33 = vrot.slane %v5518_v28, %v12090_v5 }
 0x81c   : > { %v5548_v55 = vcombine.high %v5526_v42, %v5526_v42  ;;  %6346 = vst.msk [vmem:[#allocation6 + $0x51] sm:$0xff] %vm1826_vm9, %v6120_v12  ;;  %6348 = vst.msk [vmem:[#allocation6 + $0x69] sm:$0xff] %vm1826_vm9, %v6120_v12  ;;  %v5864_v58 = vrot.slane %v5526_v42, %v12102_v56  ;;  %v5566_v36 = vrot.slane %v5552_v25, %v12090_v5  ;;  %v13002_v51 = vld [vmem:[#allocation6 + $0x30] sm:$0xff]  ;;  %8825 = vmatpush1.bf16.msra.mxu0 %v8824_v59 }
 0x81d   : > { %v5567_v34 = vcombine.high %v5559_v32, %v5559_v32  ;;  %v5575_v38 = vrot.slane %v5559_v32, %v12090_v5  ;;  %v5547_v18 = vrot.slane %v5519_v41, %v12090_v5  ;;  %v5549_v49 = vcombine.high %v5533_v46, %v5533_v46  ;;  %7141 = vrot.lane.b32.xlu1 %v13002_v51, %s9441_s17 }
 0x81e   : > { %v5550_v40 = vcombine.high %v5540_v33, %v5540_v33  ;;  %v5868_v23 = vrot.slane %v5540_v33, %v12102_v56  ;;  %v5872_v7 = vrot.slane %v5548_v55, %v12102_v56  ;;  %v5880_v4 = vrot.slane %v5533_v46, %v12102_v56  ;;  %8826 = vmatprep.subr.bf16.mxu0 %v14671_v27  ;;  %v13017_v15 = vld [vmem:[#allocation6 + $0x38] sm:$0xff]  ;;  %v13028_v21 = vld [vmem:[#allocation6 + $0x20] sm:$0xff] }
 0x81f   : > { %v5568_v44 = vcombine.high %v5566_v36, %v5566_v36  ;;  %v5582_v26 = vrot.slane %v5566_v36, %v12090_v5  ;;  %v5551_v2 = vcombine.high %v5547_v18, %v5547_v18  ;;  %v5884_v19 = vrot.slane %v5547_v18, %v12102_v56  ;;  %v13039_v55 = vld [vmem:[#allocation6 + $0x18] sm:$0xff] }
 0x820   : > { %v5876_v54 = vrot.slane %v5550_v40, %v12102_v56  ;;  %v5888_v45 = vrot.slane %v5549_v49, %v12102_v56  ;;  %v6121_v14 = vcombine.low %v5864_v58, %v5868_v23  ;;  %v5589_v57 = vrot.slane %v5567_v34, %v12090_v5  ;;  %8828 = vmatpush1.bf16.msra.mxu0 %v8827_v17 }
 0x821   : > { %v5596_v24 = vrot.slane %v5568_v44, %v12090_v5  ;;  %v5597_v35 = vcombine.high %v5575_v38, %v5575_v38  ;;  %v5892_v11 = vrot.slane %v5551_v2, %v12102_v56  ;;  %v6138_v30 = vcombine.low %v5880_v4, %v5884_v19  ;;  %7143 = vrot.lane.b32.xlu1 %v13017_v15, %s9441_s17 }
 0x822   : > { %v6122_v31 = vcombine.low %v5872_v7, %v5876_v54  ;;  %v5598_v9 = vcombine.high %v5582_v26, %v5582_v26  ;;  %v6129_v43 = vrot.slane %v6121_v14, %v10549_v8  ;;  %v5599_v3 = vcombine.high %v5589_v57, %v5589_v57  ;;  %8829 = vmatprep.subr.bf16.mxu0 %v14671_v27  ;;  %v13034_v25 = vld [vmem:[#allocation6 + $0x48] sm:$0xff]  ;;  %v13051_v23 = vld [vmem:[#allocation6 + $0x60] sm:$0xff] }
 0x823   : > { %v5600_v20 = vcombine.high %v5596_v24, %v5596_v24  ;;  %v5896_v16 = vrot.slane %v5575_v38, %v12102_v56  ;;  %v6139_v1 = vcombine.low %v5888_v45, %v5892_v11  ;;  %v6146_v59 = vrot.slane %v6138_v30, %v10549_v8  ;;  %v6378_v7 = vld [vmem:[#allocation6 + $0x28] sm:$0x3] }
 0x824   : > { %v6136_v29 = vrot.slane %v6122_v31, %v10549_v8  ;;  %v5900_v17 = vrot.slane %v5589_v57, %v12102_v56  ;;  %v5904_v48 = vrot.slane %v5597_v35, %v12102_v56  ;;  %v5908_v28 = vrot.slane %v5599_v3, %v12102_v56  ;;  %8831 = vmatpush1.bf16.msra.mxu0 %v8830_v50 }
 0x825   : > { %v5912_v42 = vrot.slane %v5582_v26, %v12102_v56  ;;  %v5916_v12 = vrot.slane %v5596_v24, %v12102_v56  ;;  %v6153_v41 = vrot.slane %v6139_v1, %v10549_v8  ;;  %v5920_v46 = vrot.slane %v5598_v9, %v12102_v56  ;;  %7145 = vrot.lane.b32.xlu1 %v13034_v25, %s9441_s17  ;;  %v6381_v9 = vld [vmem:[#allocation6 + $0x40] sm:$0x3] }
 0x826   : > { %v6137_v32 = vcombine.low %v6129_v43, %v6136_v29  ;;  %v5924_v33 = vrot.slane %v5600_v20, %v12102_v56  ;;  %v6155_v58 = vcombine.low %v5896_v16, %v5900_v17  ;;  %v6156_v36 = vcombine.low %v5904_v48, %v5908_v28  ;;  %8832 = vmatprep.subr.bf16.mxu0 %v14671_v27 }
 0x827   : > { %v6172_v34 = vcombine.low %v5912_v42, %v5916_v12  ;;  %v9072_v38 = vpack.i.bf16 %v13028_v21, %v13039_v55  ;;  %v6154_v50 = vcombine.low %v6146_v59, %v6153_v41  ;;  %v6486_v26 = vrot.slane %v13017_v15, 1  ;;  %v13095_v41 = vld [vmem:[#allocation6 + $0x50] sm:$0xff] }
 0x828   : > { %6349 = vst.msk [vmem:[#allocation6 + $0x79] sm:$0xff] %vm1826_vm9, %v6137_v32  ;;  %6351 = vst.msk [vmem:[#allocation6 + $0x91] sm:$0xff] %vm1826_vm9, %v6137_v32  ;;  %v6173_v18 = vcombine.low %v5920_v46, %v5924_v33  ;;  %v6163_v49 = vrot.slane %v6155_v58, %v10549_v8  ;;  %v6170_v40 = vrot.slane %v6156_v36, %v10549_v8  ;;  %v6485_v19 = vrot.slane %v13002_v51, 1  ;;  %v13097_v46 = vld [vmem:[#allocation6 + $0x68] sm:$0xff] }
 0x829   : > { %9073 = vrot.lane.b32.xlu0 %v9072_v38, %s9456_s22  ;;  %6350 = vst.msk [vmem:[#allocation6 + $0x81] sm:$0xff] %vm1826_vm9, %v6154_v50  ;;  %6352 = vst.msk [vmem:[#allocation6 + $0x99] sm:$0xff] %vm1826_vm9, %v6154_v50  ;;  %v6180_v4 = vrot.slane %v6172_v34, %v10549_v8  ;;  %7149 = vrot.lane.b32.xlu1 %v13051_v23, %s9441_s17  ;;  %v9077_v54 = vpack.i.bf16 %v13017_v15, %v13002_v51  ;;  %v6561_v14 = vrot.slane %v13028_v21, 2 }
 0x82a   : > { %v6187_v44 = vrot.slane %v6173_v18, %v10549_v8  ;;  %v6171_v2 = vcombine.low %v6163_v49, %v6170_v40  ;;  %v6481_v57 = vrot.slane %v13028_v21, 1  ;;  %v6483_v24 = vrot.slane %v6378_v7, 1 }
 0x82b   : > { %v6487_v35 = vsel %vm14754_vm14, %v6485_v19, %v6486_v26  ;;  %v6566_v11 = vrot.slane %v13017_v15, 2  ;;  %v6560_v31 = vrot.slane %v13039_v55, 2  ;;  %v6480_v30 = vrot.slane %v13039_v55, 1  ;;  %vm14763_vm14 = vmmov %vm14759_vm1 }
 0x82c   : > { %v6188_v45 = vcombine.low %v6180_v4, %v6187_v44  ;;  %6353 = vst.msk [vmem:[#allocation6 + $0xa9] sm:$0xff] %vm1826_vm9, %v6171_v2  ;;  %6355 = vst.msk [vmem:[#allocation6 + $0xc1] sm:$0xff] %vm1826_vm9, %v6171_v2  ;;  %v6565_v43 = vrot.slane %v13002_v51, 2  ;;  %v6484_v16 = vsel %vm14757_vm7, %v6481_v57, %v6483_v24  ;;  %v6563_v29 = vrot.slane %v6378_v7, 2 }
 0x82d   : > { %9078 = vrot.lane.b32.xlu0 %v9077_v54, %s9456_s22  ;;  %7237 = vrot.lane.b32.xlu1 %v6487_v35, %s14734_s29  ;;  %v6562_v3 = vsel %vm14755_vm4, %v6560_v31, %v6561_v14  ;;  %v6482_v20 = vsel %vm14756_vm5, %v6480_v30, %v6481_v57  ;;  %v6568_v1 = vrot.slane %v6381_v9, 2  ;;  %v5266_v51 = vadd.f32 %v12866_v22, %v12888_v62  ;;  %vm14764_vm4 = vmmov %vm14759_vm1 }
 0x82e   : > { %6354 = vst.msk [vmem:[#allocation6 + $0xb1] sm:$0xff] %vm1826_vm9, %v6188_v45  ;;  %6356 = vst.msk [vmem:[#allocation6 + $0xc9] sm:$0xff] %vm1826_vm9, %v6188_v45  ;;  %v13081_v15 = vsel %vm14758_vm15, %v6565_v43, %v6566_v11  ;;  %v13085_v59 = vpack.i.bf16 %v6484_v16, %v6482_v20  ;;  %v6488_v17 = vrot.slane %v6381_v9, 1  ;;  %v6564_v28 = vsel %vm14759_vm1, %v6561_v14, %v6563_v29 }
 0x82f   : > { %v13093_v32 = vsel %vm14760_vm13, %v6566_v11, %v6568_v1  ;;  %v5271_v22 = vadd.f32 %v12874_v47, %v12888_v62  ;;  %v5276_v36 = vadd.f32 %v12883_v63, %v12888_v62  ;;  %v13108_v34 = vadd.f32 %v12897_v39, %v12888_v62  ;;  %v13118_v62 = vld [vmem:[#allocation6 + $0x58] sm:$0x3]  ;;  %vm14765_vm5 = vmmov %vm14762_vm2 }
 0x830   : > { %v6489_v58 = vsel %vm14761_vm11, %v6486_v26, %v6488_v17  ;;  %v9092_v38 = vpack.i.bf16 %v6564_v28, %v6562_v3  ;;  %v9112_v18 = vpack.i.bf16 %v13095_v41, %v13034_v25  ;;  %v9117_v49 = vpack.i.bf16 %v13097_v46, %v13051_v23  ;;  %vm14766_vm7 = vmmov %vm14762_vm2 }
 0x831   : > { %7045 = vrot.lane.b32.xlu0 %v6562_v3, %s9457_s24  ;;  %7333 = vrot.lane.b32.xlu1 %v13081_v15, %s9450_s27  ;;  %v9107_v63 = vpack.i.bf16 %v13093_v32, %v13081_v15  ;;  %v13120_v39 = vpack.i.bf16 %v6489_v58, %v6487_v35  ;;  %v6490_v44 = vrot.slane %v13034_v25, 1  ;;  %v6491_v26 = vrot.slane %v13095_v41, 1  ;;  %vm14767_vm15 = vmmov %vm14759_vm1 }
 0x832   : > { %v6493_v57 = vrot.slane %v13118_v62, 1  ;;  %v6570_v24 = vrot.slane %v13034_v25, 2  ;;  %v6571_v35 = vrot.slane %v13095_v41, 2  ;;  %v6573_v11 = vrot.slane %v13118_v62, 2  ;;  %vm14768_vm13 = vmmov %vm14762_vm2 }
 0x833   : > { %vm14769_vm11 = vmmov %vm14762_vm2 }
 0x834   : > { %v5370_v48 = vpop.f32.mrb[36].mxu1 }
 0x835   : > { %9083 = vrot.lane.b32.xlu0 %v13085_v59, %s9453_s30  ;;  %v5371_v42 = vadd.f32 %v5370_v48, %v5266_v51  ;;  %v5372_v12 = vpop.f32.mrb[37].mxu1  ;;  %7335 = vrot.lane.b32.xlu1 %v13093_v32, %s9450_s27 }
 0x837   : > { %v5393_v33 = vmax.f32 %v5371_v42, 0.0 }
 0x838   : > { %v5375_v50 = vpop.f32.mrb[38].mxu1 }
 0x839   : > { %7047 = vrot.lane.b32.xlu0 %v6564_v28, %s9457_s24  ;;  %v5601_v47 = vcombine.high %v5393_v33, %v5393_v33  ;;  %v5608_v40 = vrot.slane %v5393_v33, %v12090_v5  ;;  %v5376_v7 = vadd.f32 %v5375_v50, %v5271_v22  ;;  %v5377_v4 = vpop.f32.mrb[39].mxu1  ;;  %9093 = vrot.lane.b32.xlu1 %v9092_v38, %s14549_s16 }
 0x83b   : > { %v5615_v2 = vrot.slane %v5601_v47, %v12090_v5  ;;  %v5616_v54 = vcombine.high %v5608_v40, %v5608_v40  ;;  %v5624_v19 = vrot.slane %v5608_v40, %v12090_v5  ;;  %v5394_v45 = vmax.f32 %v5376_v7, 0.0 }
 0x83c   : > { %v5380_v14 = vpop.f32.mrb[40].mxu1 }
 0x83d   : > { %v5617_v31 = vcombine.high %v5615_v2, %v5615_v2  ;;  %v5631_v30 = vrot.slane %v5615_v2, %v12090_v5  ;;  %v5638_v9 = vrot.slane %v5616_v54, %v12090_v5  ;;  %v5646_v43 = vcombine.high %v5624_v19, %v5624_v19  ;;  %7239 = vrot.lane.b32.xlu0 %v6489_v58, %s14734_s29  ;;  %v5382_v3 = vpop.f32.mrb[41].mxu1 }
 0x83e   : > { %v5928_v20 = vrot.slane %v5624_v19, %v12102_v56  ;;  %v5650_v16 = vcombine.high %v5394_v45, %v5394_v45  ;;  %v5657_v29 = vrot.slane %v5394_v45, %v12090_v5  ;;  %v5381_v1 = vadd.f32 %v5380_v14, %v5276_v36  ;;  %9108 = vrot.lane.b32.xlu1 %v9107_v63, %s14549_s16 }
 0x83f   : > { %v5645_v51 = vrot.slane %v5617_v31, %v12090_v5  ;;  %v5647_v17 = vcombine.high %v5631_v30, %v5631_v30  ;;  %v5648_v48 = vcombine.high %v5638_v9, %v5638_v9  ;;  %v5932_v28 = vrot.slane %v5638_v9, %v12102_v56 }
 0x840   : > { %v5936_v42 = vrot.slane %v5646_v43, %v12102_v56  ;;  %v5944_v12 = vrot.slane %v5631_v30, %v12102_v56  ;;  %v5664_v22 = vrot.slane %v5650_v16, %v12090_v5  ;;  %v5665_v33 = vcombine.high %v5657_v29, %v5657_v29  ;;  %v5385_v58 = vpop.f32.mrb[42].mxu1 }
 0x841   : > { %v5649_v38 = vcombine.high %v5645_v51, %v5645_v51  ;;  %v5940_v50 = vrot.slane %v5648_v48, %v12102_v56  ;;  %v5948_v36 = vrot.slane %v5645_v51, %v12102_v56  ;;  %v5952_v47 = vrot.slane %v5647_v17, %v12102_v56  ;;  %9088 = vrot.lane.b32.xlu0 %v13085_v59, %s14714_s14  ;;  %v5387_v40 = vpop.f32.mrb[43].mxu1 }
 0x842   : > { %v6189_v63 = vcombine.low %v5928_v20, %v5932_v28  ;;  %v5666_v7 = vcombine.high %v5664_v22, %v5664_v22  ;;  %v5673_v4 = vrot.slane %v5657_v29, %v12090_v5  ;;  %v5680_v2 = vrot.slane %v5664_v22, %v12090_v5  ;;  %7147 = vrot.lane.b32.xlu1 %v13095_v41, %s9441_s17 }
 0x843   : > { %v5956_v54 = vrot.slane %v5649_v38, %v12102_v56  ;;  %v6190_v19 = vcombine.low %v5936_v42, %v5940_v50  ;;  %v6206_v45 = vcombine.low %v5944_v12, %v5948_v36  ;;  %v5687_v14 = vrot.slane %v5665_v33, %v12090_v5 }
 0x844   : > { %v6197_v31 = vrot.slane %v6189_v63, %v10549_v8  ;;  %v5694_v59 = vrot.slane %v5666_v7, %v12090_v5  ;;  %v5695_v30 = vcombine.high %v5673_v4, %v5673_v4  ;;  %v5696_v9 = vcombine.high %v5680_v2, %v5680_v2  ;;  %v13175_v7 = vld [vmem:[#allocation6 + $0x78] sm:$0xff] }
 0x845   : > { %v6204_v43 = vrot.slane %v6190_v19, %v10549_v8  ;;  %v6207_v3 = vcombine.low %v5952_v47, %v5956_v54  ;;  %v6214_v20 = vrot.slane %v6206_v45, %v10549_v8  ;;  %v5697_v16 = vcombine.high %v5687_v14, %v5687_v14  ;;  %7049 = vrot.lane.b32.xlu0 %v13081_v15, %s9457_s24 }
 0x846   : > { %v5698_v29 = vcombine.high %v5694_v59, %v5694_v59  ;;  %v5960_v51 = vrot.slane %v5673_v4, %v12102_v56  ;;  %v5964_v17 = vrot.slane %v5687_v14, %v12102_v56  ;;  %v5968_v48 = vrot.slane %v5695_v30, %v12102_v56  ;;  %7151 = vrot.lane.b32.xlu1 %v13097_v46, %s9441_s17 }
 0x847   : > { %v6205_v28 = vcombine.low %v6197_v31, %v6204_v43  ;;  %v6221_v42 = vrot.slane %v6207_v3, %v10549_v8  ;;  %v5972_v12 = vrot.slane %v5697_v16, %v12102_v56  ;;  %v5976_v22 = vrot.slane %v5680_v2, %v12102_v56 }
 0x848   : > { %v5980_v33 = vrot.slane %v5694_v59, %v12102_v56  ;;  %v5984_v15 = vrot.slane %v5696_v9, %v12102_v56  ;;  %v5988_v38 = vrot.slane %v5698_v29, %v12102_v56  ;;  %v6223_v50 = vcombine.low %v5960_v51, %v5964_v17 }
 0x849   : > { %v6222_v36 = vcombine.low %v6214_v20, %v6221_v42  ;;  %6357 = vst.msk [vmem:[#allocation6 + $0xd9] sm:$0xff] %vm1826_vm9, %v6205_v28  ;;  %6359 = vst.msk [vmem:[#allocation6 + $0xf1] sm:$0xff] %vm1826_vm9, %v6205_v28  ;;  %v6224_v47 = vcombine.low %v5968_v48, %v5972_v12  ;;  %v5395_v40 = vmax.f32 %v5381_v1, 0.0  ;;  %v5386_v63 = vadd.f32 %v5385_v58, %v13108_v34  ;;  %v13205_v20 = vld [vmem:[#allocation6 + $0x90] sm:$0xff] }
 0x84a   : > { %9098 = vrot.lane.b32.xlu0 %v13120_v39, %s9453_s30  ;;  %v6231_v4 = vrot.slane %v6223_v50, %v10549_v8  ;;  %v6240_v2 = vcombine.low %v5976_v22, %v5980_v33  ;;  %v6241_v54 = vcombine.low %v5984_v15, %v5988_v38  ;;  %7153 = vrot.lane.b32.xlu1 %v13175_v7, %s9441_s17  ;;  %v6496_v59 = vrot.slane %v13097_v46, 1 }
 0x84b   : > { %v13185_v1 = vsel %vm14762_vm2, %v6490_v44, %v6491_v26  ;;  %6358 = vst.msk [vmem:[#allocation6 + $0xe1] sm:$0xff] %vm1826_vm9, %v6222_v36  ;;  %6360 = vst.msk [vmem:[#allocation6 + $0xf9] sm:$0xff] %vm1826_vm9, %v6222_v36  ;;  %v6238_v34 = vrot.slane %v6224_v47, %v10549_v8  ;;  %v5699_v58 = vcombine.high %v5395_v40, %v5395_v40  ;;  %v5396_v45 = vmax.f32 %v5386_v63, 0.0 }
 0x84c   : > { %v5706_v19 = vrot.slane %v5395_v40, %v12090_v5  ;;  %v6248_v14 = vrot.slane %v6240_v2, %v10549_v8  ;;  %v6255_v31 = vrot.slane %v6241_v54, %v10549_v8  ;;  %v13198_v44 = vsel %vm14763_vm14, %v6570_v24, %v6571_v35  ;;  %vm14770_vm2 = vmmov %vm14759_vm1 }
 0x84d   : > { %v6239_v30 = vcombine.low %v6231_v4, %v6238_v34  ;;  %v5713_v9 = vrot.slane %v5699_v58, %v12090_v5  ;;  %v5748_v29 = vcombine.high %v5396_v45, %v5396_v45  ;;  %v5755_v51 = vrot.slane %v5396_v45, %v12090_v5  ;;  %vm14771_vm14 = vmmov %vm14759_vm1 }
 0x84e   : > { %v5714_v43 = vcombine.high %v5706_v19, %v5706_v19  ;;  %v5722_v3 = vrot.slane %v5706_v19, %v12090_v5  ;;  %7051 = vrot.lane.b32.xlu0 %v13093_v32, %s9457_s24  ;;  %v6256_v16 = vcombine.low %v6248_v14, %v6255_v31  ;;  %7157 = vrot.lane.b32.xlu1 %v13205_v20, %s9441_s17 }
 0x84f   : > { %v13215_v24 = vsel %vm14764_vm4, %v6571_v35, %v6573_v11  ;;  %6361 = vst.msk [vmem:[#allocation6 + $0x109] sm:$0xff] %vm1826_vm9, %v6239_v30  ;;  %6363 = vst.msk [vmem:[#allocation6 + $0x121] sm:$0xff] %vm1826_vm9, %v6239_v30  ;;  %v5715_v32 = vcombine.high %v5713_v9, %v5713_v9  ;;  %v5729_v17 = vrot.slane %v5713_v9, %v12090_v5 }
 0x850   : > { %v5736_v48 = vrot.slane %v5714_v43, %v12090_v5  ;;  %v5744_v28 = vcombine.high %v5722_v3, %v5722_v3  ;;  %6362 = vst.msk [vmem:[#allocation6 + $0x111] sm:$0xff] %vm1826_vm9, %v6256_v16  ;;  %6364 = vst.msk [vmem:[#allocation6 + $0x129] sm:$0xff] %vm1826_vm9, %v6256_v16  ;;  %v5992_v42 = vrot.slane %v5722_v3, %v12102_v56 }
 0x851   : > { %v5762_v12 = vrot.slane %v5748_v29, %v12090_v5  ;;  %v5763_v35 = vcombine.high %v5755_v51, %v5755_v51  ;;  %v5771_v11 = vrot.slane %v5755_v51, %v12090_v5  ;;  %v5743_v22 = vrot.slane %v5715_v32, %v12090_v5  ;;  %vm14772_vm4 = vmmov %vm14765_vm5 }
 0x852   : > { %v5745_v33 = vcombine.high %v5729_v17, %v5729_v17  ;;  %v5746_v15 = vcombine.high %v5736_v48, %v5736_v48  ;;  %v5996_v38 = vrot.slane %v5736_v48, %v12102_v56  ;;  %9103 = vrot.lane.b32.xlu0 %v13120_v39, %s14714_s14  ;;  %v6000_v50 = vrot.slane %v5744_v28, %v12102_v56 }
 0x853   : > { %v6008_v36 = vrot.slane %v5729_v17, %v12102_v56  ;;  %v5764_v47 = vcombine.high %v5762_v12, %v5762_v12  ;;  %v5778_v40 = vrot.slane %v5762_v12, %v12090_v5  ;;  %7241 = vrot.lane.b32.xlu1 %v13185_v1, %s14734_s29  ;;  %v5747_v63 = vcombine.high %v5743_v22, %v5743_v22 }
 0x854   : > { %v6004_v4 = vrot.slane %v5746_v15, %v12102_v56  ;;  %v6012_v2 = vrot.slane %v5743_v22, %v12102_v56  ;;  %v6016_v54 = vrot.slane %v5745_v33, %v12102_v56  ;;  %v6257_v34 = vcombine.low %v5992_v42, %v5996_v38  ;;  %v7704_v38 = vld [vmem:[%s14393_s9 + $0x90] sm:$0xff] }
 0x855   : > { %v5785_v39 = vrot.slane %v5763_v35, %v12090_v5  ;;  %v5792_v58 = vrot.slane %v5764_v47, %v12090_v5  ;;  %v5793_v19 = vcombine.high %v5771_v11, %v5771_v11  ;;  %v6020_v45 = vrot.slane %v5747_v63, %v12102_v56 }
 0x856   : > { %v6258_v14 = vcombine.low %v6000_v50, %v6004_v4  ;;  %v6274_v31 = vcombine.low %v6008_v36, %v6012_v2  ;;  %v5794_v30 = vcombine.high %v5778_v40, %v5778_v40  ;;  %9113 = vrot.lane.b32.xlu0 %v9112_v18, %s9456_s22  ;;  %v6265_v9 = vrot.slane %v6257_v34, %v10549_v8  ;;  %v7706_v4 = vld [vmem:[%s14393_s9 + $0xa0] sm:$0xff]  ;;  %v7707_v2 = vld [vmem:[%s14393_s9 + $0xa8] sm:$0xff]  ;;  %v6387_v34 = vld [vmem:[#allocation6 + $0x70] sm:$0x3] }
 0x857   : > { %v5795_v43 = vcombine.high %v5785_v39, %v5785_v39  ;;  %v5796_v3 = vcombine.high %v5792_v58, %v5792_v58  ;;  %v6024_v16 = vrot.slane %v5771_v11, %v12102_v56  ;;  %7337 = vrot.lane.b32.xlu1 %v13198_v44, %s9450_s27  ;;  %v6275_v29 = vcombine.low %v6016_v54, %v6020_v45  ;;  %v7709_v45 = vld [vmem:[%s14393_s9 + $0xb8] sm:$0xff] }
 0x858   : > { %v6272_v5 = vrot.slane %v6258_v14, %v10549_v8  ;;  %v6282_v51 = vrot.slane %v6274_v31, %v10549_v8  ;;  %v6028_v32 = vrot.slane %v5785_v39, %v12102_v56  ;;  %v6032_v17 = vrot.slane %v5793_v19, %v12102_v56 }
 0x859   : > { %v6036_v25 = vrot.slane %v5795_v43, %v12102_v56  ;;  %v6040_v18 = vrot.slane %v5778_v40, %v12102_v56  ;;  %v6044_v48 = vrot.slane %v5792_v58, %v12102_v56  ;;  %v6289_v42 = vrot.slane %v6275_v29, %v10549_v8  ;;  %v7711_v43 = vld [vmem:[%s14393_s9 + $0xc8] sm:$0xff] }
 0x85a   : > { %v6273_v28 = vcombine.low %v6265_v9, %v6272_v5  ;;  %v6048_v12 = vrot.slane %v5794_v30, %v12102_v56  ;;  %v6052_v35 = vrot.slane %v5796_v3, %v12102_v56  ;;  %9118 = vrot.lane.b32.xlu0 %v9117_v49, %s9456_s22  ;;  %v6291_v11 = vcombine.low %v6024_v16, %v6028_v32  ;;  %v7705_v56 = vld [vmem:[%s14393_s9 + $0x98] sm:$0xff]  ;;  %v7710_v9 = vld [vmem:[%s14393_s9 + $0xc0] sm:$0xff] }
 0x85b   : > { %v6292_v22 = vcombine.low %v6032_v17, %v6036_v25  ;;  %v6308_v33 = vcombine.low %v6040_v18, %v6044_v48  ;;  %7339 = vrot.lane.b32.xlu1 %v13215_v24, %s9450_s27  ;;  %v6495_v15 = vrot.slane %v13051_v23, 1  ;;  %v6290_v50 = vcombine.low %v6282_v51, %v6289_v42  ;;  %v6390_v48 = vld [vmem:[#allocation6 + $0x88] sm:$0x3] }
 0x85c   : > { %6365 = vst.msk [vmem:[#allocation6 + $0x139] sm:$0xff] %vm1826_vm9, %v6273_v28  ;;  %6367 = vst.msk [vmem:[#allocation6 + $0x151] sm:$0xff] %vm1826_vm9, %v6273_v28  ;;  %v6309_v49 = vcombine.low %v6048_v12, %v6052_v35  ;;  %v6299_v36 = vrot.slane %v6291_v11, %v10549_v8  ;;  %v6494_v40 = vsel %vm14765_vm5, %v6491_v26, %v6493_v57  ;;  %v6576_v26 = vrot.slane %v13097_v46, 2  ;;  %v13345_v46 = vld [vmem:[#allocation6 + $0x98] sm:$0xff] }
 0x85d   : > { %v6306_v47 = vrot.slane %v6292_v22, %v10549_v8  ;;  %v6497_v63 = vsel %vm14766_vm7, %v6495_v15, %v6496_v59  ;;  %6366 = vst.msk [vmem:[#allocation6 + $0x141] sm:$0xff] %vm1826_vm9, %v6290_v50  ;;  %6368 = vst.msk [vmem:[#allocation6 + $0x159] sm:$0xff] %vm1826_vm9, %v6290_v50  ;;  %v6316_v41 = vrot.slane %v6308_v33, %v10549_v8  ;;  %v6575_v58 = vrot.slane %v13051_v23, 2 }
 0x85e   : > { %v6323_v62 = vrot.slane %v6309_v49, %v10549_v8  ;;  %7243 = vrot.lane.b32.xlu0 %v6494_v40, %s14734_s29  ;;  %v8833_v57 = vpack.c.bf16 %v7705_v56, %v7704_v38  ;;  %v8836_v19 = vpack.c.bf16 %v7707_v2, %v7706_v4  ;;  %v7708_v8 = vld [vmem:[%s14393_s9 + $0xb0] sm:$0xff]  ;;  %v6578_v14 = vrot.slane %v6387_v34, 2  ;;  %vm14773_vm5 = vmmov %vm14772_vm4  ;;  %v6393_v49 = vld [vmem:[#allocation6 + $0xa0] sm:$0x3] }
 0x85f   : > { %v6307_v54 = vcombine.low %v6299_v36, %v6306_v47  ;;  %7245 = vrot.lane.b32.xlu1 %v6497_v63, %s14734_s29  ;;  %v6577_v23 = vsel %vm14767_vm15, %v6575_v58, %v6576_v26  ;;  %v9122_v31 = vpack.i.bf16 %v6494_v40, %v13185_v1  ;;  %v8839_v30 = vpack.c.bf16 %v7709_v45, %v7708_v8  ;;  %vm14774_vm7 = vmmov %vm14759_vm1  ;;  %v13405_v45 = vld [vmem:[#allocation6 + $0xb0] sm:$0xff] }
 0x860   : > { %v6324_v39 = vcombine.low %v6316_v41, %v6323_v62  ;;  %8834 = vmatpush1.bf16.msra.mxu0 %v8833_v57  ;;  %v6579_v3 = vsel %vm14759_vm1, %v6576_v26, %v6578_v14  ;;  %v8842_v1 = vpack.c.bf16 %v7711_v43, %v7710_v9  ;;  %v9132_v16 = vpack.i.bf16 %v13215_v24, %v13198_v44  ;;  %vm14775_vm15 = vmmov %vm14759_vm1  ;;  %v9405_v9 = vld [vmem:[#allocation6] sm:$0xff] }
 0x861   : > { %6369 = vst.msk [vmem:[#allocation6 + $0x169] sm:$0xff] %vm1826_vm9, %v6307_v54  ;;  %6371 = vst.msk [vmem:[#allocation6 + $0x181] sm:$0xff] %vm1826_vm9, %v6307_v54  ;;  %8835 = vmatprep.subr.bf16.mxu0 %v14671_v27  ;;  %v6498_v5 = vrot.slane %v6387_v34, 1  ;;  %v9147_v51 = vpack.i.bf16 %v6579_v3, %v6577_v23  ;;  %v6500_v17 = vrot.slane %v13175_v7, 1  ;;  %v6580_v42 = vrot.slane %v13175_v7, 2 }
 0x862   : > { %6370 = vst.msk [vmem:[#allocation6 + $0x171] sm:$0xff] %vm1826_vm9, %v6324_v39  ;;  %6372 = vst.msk [vmem:[#allocation6 + $0x189] sm:$0xff] %vm1826_vm9, %v6324_v39  ;;  %7053 = vrot.lane.b32.xlu0 %v13198_v44, %s9457_s24  ;;  %v7712_v44 = vld [vmem:[%s14393_s9 + $0xd0] sm:$0xff]  ;;  %v6583_v35 = vrot.slane %v6390_v48, 2  ;;  %v9157_v11 = vpack.i.bf16 %v13345_v46, %v13205_v20  ;;  %v6503_v22 = vrot.slane %v6390_v48, 1  ;;  %v6506_v15 = vrot.slane %v13345_v46, 1 }
 0x863   : > { %7341 = vrot.lane.b32.xlu1 %v6577_v23, %s9450_s27  ;;  %v6499_v29 = vsel %vm14768_vm13, %v6496_v59, %v6498_v5  ;;  %v13350_v59 = vld [vmem:[#allocation6 + $0xa8] sm:$0xff]  ;;  %v6586_v50 = vrot.slane %v13345_v46, 2  ;;  %v6585_v36 = vrot.slane %v13205_v20, 2  ;;  %v6508_v26 = vrot.slane %v6393_v49, 1  ;;  %vm14776_vm1 = vmmov %vm14772_vm4 }
 0x864   : > { %8837 = vmatpush1.bf16.msra.mxu0 %v8836_v19  ;;  %v9055_v8 = vunpack.i.l.bf16 %v12819_v10  ;;  %v9060_v14 = vunpack.i.l.bf16 %v12811_v53  ;;  %vm7720_vm13 = vcmask 719872   ;;  %v9056_v5 = vunpack.i.h.bf16 %v12819_v10  ;;  %v13425_v10 = vld [vmem:[#allocation6 + $0xd8] sm:$0xff]  ;;  %v9406_v48 = vld [vmem:[#allocation6 + $0x8] sm:$0xff] }
 0x865   : > { %8838 = vmatprep.subr.bf16.mxu0 %v14671_v27  ;;  %v6587_v40 = vsel %vm14774_vm7, %v6585_v36, %v6586_v50  ;;  %v6509_v54 = vsel %vm14776_vm1, %v6506_v15, %v6508_v26  ;;  %v6510_v36 = vrot.slane %v13350_v59, 1 }
 0x866   : > { %9123 = vrot.lane.b32.xlu0 %v9122_v31, %s9453_s30  ;;  %v7429_v43 = vsel %vm560_vm6, %v9405_v9, %v9055_v8 }
 0x867   : > { %7343 = vrot.lane.b32.xlu1 %v6579_v3, %s9450_s27 }
 0x868   : > { %8840 = vmatpush1.bf16.msra.mxu0 %v8839_v30 }
 0x869   : > { %8841 = vmatprep.subr.bf16.mxu0 %v14671_v27  ;;  %v13340_v27 = vld [vmem:[#allocation6 + $0x80] sm:$0xff] }
 0x86a   : > { %7055 = vrot.lane.b32.xlu0 %v13215_v24, %s9457_s24  ;;  %v13355_v24 = vld [vmem:[#allocation6 + $0xc0] sm:$0xff]  ;;  %v6501_v32 = vrot.slane %v13340_v27, 1  ;;  %v6581_v18 = vrot.slane %v13340_v27, 2  ;;  %v9152_v28 = vpack.i.bf16 %v13340_v27, %v13175_v7  ;;  %v6505_v7 = vrot.slane %v13205_v20, 1 }
 0x86b   : > { %9133 = vrot.lane.b32.xlu1 %v9132_v16, %s14549_s16  ;;  %v13414_v16 = vld [vmem:[#allocation6 + $0xc8] sm:$0xff] }
 0x86c   : > { %8843 = vmatpush1.bf16.msra.mxu0 %v8842_v1  ;;  %v6502_v25 = vsel %vm14769_vm11, %v6500_v17, %v6501_v32  ;;  %v6582_v12 = vsel %vm14770_vm2, %v6580_v42, %v6581_v18  ;;  %v6584_v33 = vsel %vm14771_vm14, %v6581_v18, %v6583_v35  ;;  %v6504_v38 = vsel %vm14772_vm4, %v6501_v32, %v6503_v22  ;;  %vm14779_vm4 = vmmov %vm14776_vm1 }
 0x86d   : > { %7869 = vmatprep.subr.mxu0 %v14620_v61  ;;  %v9137_v61 = vpack.i.bf16 %v6499_v29, %v6497_v63  ;;  %v6507_v56 = vsel %vm14773_vm5, %v6505_v7, %v6506_v15  ;;  %v6588_v63 = vrot.slane %v6393_v49, 2  ;;  %v9162_v4 = vpack.i.bf16 %v6504_v38, %v6502_v25  ;;  %v13436_v15 = vld [vmem:[#allocation6 + $0xf0] sm:$0xff]  ;;  %vm14780_vm5 = vmmov %vm14774_vm7 }
 0x86e   : > { %7247 = vrot.lane.b32.xlu0 %v6499_v29, %s14734_s29  ;;  %v9172_v62 = vpack.i.bf16 %v6584_v33, %v6582_v12  ;;  %vm14777_vm11 = vcmask 392192   ;;  %vm7557_vm2 = vcmask 982016   ;;  %v6511_v7 = vrot.slane %v13405_v45, 1  ;;  %vm14781_vm7 = vmmov %vm14780_vm5 }
 0x86f   : > { %9148 = vrot.lane.b32.xlu1 %v9147_v51, %s14549_s16  ;;  %v6589_v41 = vsel %vm14775_vm15, %v6586_v50, %v6588_v63  ;;  %v9177_v51 = vpack.i.bf16 %v6509_v54, %v6507_v56  ;;  %vm14778_vm14 = vmmov %vm14777_vm11 }
 0x870   : > { %7870 = vmatpush1.msra.mxu0 %v7712_v44  ;;  %v9187_v34 = vpack.i.bf16 %v6589_v41, %v6587_v40  ;;  %vm14782_vm15 = vmmov %vm14776_vm1 }
 0x872   : > { %9128 = vrot.lane.b32.xlu0 %v9122_v31, %s14714_s14 }
 0x873   : > { %7155 = vrot.lane.b32.xlu1 %v13340_v27, %s9441_s17 }
 0x876   : > { %7057 = vrot.lane.b32.xlu0 %v6577_v23, %s9457_s24 }
 0x877   : > { %7159 = vrot.lane.b32.xlu1 %v13345_v46, %s9441_s17 }
 0x87a   : > { %9138 = vrot.lane.b32.xlu0 %v9137_v61, %s9453_s30 }
 0x87b   : > { %7161 = vrot.lane.b32.xlu1 %v13350_v59, %s9441_s17 }
 0x87e   : > { %7059 = vrot.lane.b32.xlu0 %v6579_v3, %s9457_s24 }
 0x87f   : > { %7165 = vrot.lane.b32.xlu1 %v13355_v24, %s9441_s17 }
 0x882   : > { %9143 = vrot.lane.b32.xlu0 %v9137_v61, %s14714_s14  ;;  %v7461_v61 = vsel %vm14777_vm11, %v7429_v43, %v9060_v14  ;;  %v9197_v14 = vpack.i.bf16 %v13414_v16, %v13355_v24  ;;  %v6515_v43 = vrot.slane %v13355_v24, 1  ;;  %vm14783_vm11 = vmmov %vm14780_vm5 }
 0x883   : > { %7249 = vrot.lane.b32.xlu1 %v6502_v25, %s14734_s29  ;;  %v9061_v25 = vunpack.i.h.bf16 %v12811_v53 }
 0x886   : > { %9153 = vrot.lane.b32.xlu0 %v9152_v28, %s9456_s22  ;;  %v7430_v28 = vsel %vm560_vm6, %v9406_v48, %v9056_v5 }
 0x887   : > { %7345 = vrot.lane.b32.xlu1 %v6582_v12, %s9450_s27 }
 0x88a   : > { %9158 = vrot.lane.b32.xlu0 %v9157_v11, %s9456_s22 }
 0x88b   : > { %7347 = vrot.lane.b32.xlu1 %v6584_v33, %s9450_s27 }
 0x88e   : > { %7251 = vrot.lane.b32.xlu0 %v6504_v38, %s14734_s29 }
 0x88f   : > { %7253 = vrot.lane.b32.xlu1 %v6507_v56, %s14734_s29  ;;  %v7142_v47 = vpop.permute.xlu1 %7141 }
 0x892   : > { %7061 = vrot.lane.b32.xlu0 %v6582_v12, %s9457_s24 }
 0x893   : > { %7349 = vrot.lane.b32.xlu1 %v6587_v40, %s9450_s27  ;;  %v13387_v2 = vpop.permute.xlu1 %7143 }
 0x896   : > { %9163 = vrot.lane.b32.xlu0 %v9162_v4, %s9453_s30 }
 0x897   : > { %7351 = vrot.lane.b32.xlu1 %v6589_v41, %s9450_s27  ;;  %v13392_v20 = vpop.permute.xlu1 %7145 }
 0x89a   : > { %7063 = vrot.lane.b32.xlu0 %v6584_v33, %s9457_s24  ;;  %v7462_v33 = vsel %vm14778_vm14, %v7430_v28, %v9061_v25 }
 0x89b   : > { %9173 = vrot.lane.b32.xlu1 %v9172_v62, %s14549_s16  ;;  %v9074_v57 = vpop.permute.xlu0 %9073  ;;  %v13397_v39 = vpop.permute.xlu1 %7149  ;;  %v6396_v62 = vld [vmem:[#allocation6 + $0xb8] sm:$0x3] }
 0x89c   : > { %v9075_v3 = vunpack.i.l.bf16 %v9074_v57  ;;  %v9076_v42 = vunpack.i.h.bf16 %v9074_v57  ;;  %v9192_v57 = vpack.i.bf16 %v13405_v45, %v13350_v59  ;;  %v6593_v8 = vrot.slane %v6396_v62, 2 }
 0x89e   : > { %7255 = vrot.lane.b32.xlu0 %v6509_v54, %s14734_s29  ;;  %v7493_v18 = vsel %vm3857_vm0, %v7461_v61, %v9075_v3  ;;  %v7494_v38 = vsel %vm3857_vm0, %v7462_v33, %v9076_v42  ;;  %v6590_v54 = vrot.slane %v13350_v59, 2 }
 0x89f   : > { %9188 = vrot.lane.b32.xlu1 %v9187_v34, %s14549_s16  ;;  %v13401_v58 = vpop.permute.xlu0 %9078  ;;  %v7238_v19 = vpop.permute.xlu1 %7237 }
 0x8a2   : > { %9168 = vrot.lane.b32.xlu0 %v9162_v4, %s14714_s14  ;;  %v6512_v4 = vsel %vm14779_vm4, %v6510_v36, %v6511_v7  ;;  %vm14784_vm4 = vmmov %vm14780_vm5 }
 0x8a3   : > { %7163 = vrot.lane.b32.xlu1 %v13405_v45, %s9441_s17  ;;  %v7046_v23 = vpop.permute.xlu0 %7045  ;;  %v7334_v30 = vpop.permute.xlu1 %7333 }
 0x8a4   : > { %v7590_v31 = vsel %vm1826_vm9, %v7046_v23, %v7142_v47 }
 0x8a5   : > { %v7622_v1 = vsel %vm3806_vm8, %v7590_v31, %v7238_v19  ;;  %v6513_v31 = vrot.slane %v6396_v62, 1  ;;  %v9081_v62 = vunpack.i.h.bf16 %v13401_v58 }
 0x8a6   : > { %7065 = vrot.lane.b32.xlu0 %v6587_v40, %s9457_s24  ;;  %v7654_v29 = vsel %vm3832_vm12, %v7622_v1, %v7334_v30 }
 0x8a7   : > { %7167 = vrot.lane.b32.xlu1 %v13414_v16, %s9441_s17  ;;  %v9084_v44 = vpop.permute.xlu0 %9083  ;;  %8388 = vmatprep.mubr.msk.f32.mxu0 %vm7720_vm13, %v7654_v29  ;;  %v7336_v17 = vpop.permute.xlu1 %7335  ;;  %v6514_v1 = vsel %vm14782_vm15, %v6511_v7, %v6513_v31 }
 0x8a8   : > { %v9085_v32 = vunpack.i.l.bf16 %v9084_v44  ;;  %v9086_v35 = vunpack.i.h.bf16 %v9084_v44  ;;  %v6399_v44 = vld [vmem:[#allocation6 + $0xd0] sm:$0x3]  ;;  %v9202_v42 = vpack.i.bf16 %v6514_v1, %v6512_v4 }
 0x8a9   : > { %v6598_v28 = vrot.slane %v6399_v44, 2 }
 0x8aa   : > { %9178 = vrot.lane.b32.xlu0 %v9177_v51, %s9453_s30  ;;  %v7525_v12 = vsel %vm4422_vm10, %v7493_v18, %v9085_v32  ;;  %v7526_v49 = vsel %vm4422_vm10, %v7494_v38, %v9086_v35 }
 0x8ab   : > { %7169 = vrot.lane.b32.xlu1 %v13425_v10, %s9441_s17  ;;  %v7048_v11 = vpop.permute.xlu0 %7047  ;;  %v7558_v22 = vsel %vm7557_vm2, %v7525_v12, %v7046_v23  ;;  %v13432_v53 = vpop.permute.xlu1 %9093 }
 0x8ac   : > { %7882 = vmatmul.mubr.f32.vlgmr.msra.gmra.mrb[32].mxu0 %v7558_v22  ;;  %v7591_v56 = vsel %vm1826_vm9, %v7048_v11, %v13387_v2  ;;  %v7559_v2 = vsel %vm7557_vm2, %v7526_v49, %v7048_v11  ;;  %v9095_v61 = vunpack.i.l.bf16 %v13432_v53  ;;  %v9096_v7 = vunpack.i.h.bf16 %v13432_v53 }
 0x8ae   : > { %7067 = vrot.lane.b32.xlu0 %v6589_v41, %s9457_s24  ;;  %v6591_v41 = vrot.slane %v13405_v45, 2  ;;  %v6516_v45 = vrot.slane %v13414_v16, 1 }
 0x8af   : > { %7173 = vrot.lane.b32.xlu1 %v13436_v15, %s9441_s17  ;;  %v7240_v50 = vpop.permute.xlu0 %7239 }
 0x8b0   : > { %v7623_v47 = vsel %vm3806_vm8, %v7591_v56, %v7240_v50  ;;  %v13447_v40 = vpop.permute.xlu1 %9108  ;;  %v6592_v19 = vsel %vm14780_vm5, %v6590_v54, %v6591_v41  ;;  %v6594_v59 = vsel %vm14781_vm7, %v6591_v41, %v6593_v8  ;;  %v13478_v29 = vsel %vm14776_vm1, %v6515_v43, %v6516_v45  ;;  %vm14785_vm5 = vmmov %vm14778_vm14 }
 0x8b1   : > { %v7655_v63 = vsel %vm3832_vm12, %v7623_v47, %v7336_v17  ;;  %v6595_v17 = vrot.slane %v13355_v24, 2  ;;  %v9080_v24 = vunpack.i.l.bf16 %v13401_v58  ;;  %v9212_v36 = vpack.i.bf16 %v6594_v59, %v6592_v19  ;;  %vm14786_vm7 = vmmov %vm14776_vm1 }
 0x8b2   : > { %9183 = vrot.lane.b32.xlu0 %v9177_v51, %s14714_s14  ;;  %8389 = vmatprep.mubr.msk.f32.mxu0 %vm7720_vm13, %v7655_v63  ;;  %v6596_v51 = vrot.slane %v13414_v16, 2  ;;  %v6518_v63 = vrot.slane %v6399_v44, 1  ;;  %vm14787_vm15 = vmmov %vm14785_vm5 }
 0x8b3   : > { %7257 = vrot.lane.b32.xlu1 %v6512_v4, %s14734_s29  ;;  %v9089_v26 = vpop.permute.xlu0 %9088  ;;  %7887 = vmatmul.mubr.f32.gmra.mrb[34].mxu0 %v7559_v2  ;;  %vm14788_vm1 = vmmov %vm14785_vm5 }
 0x8b4   : > { %v13459_v34 = vpop.permute.xlu1 %7147  ;;  %v9090_v3 = vunpack.i.l.bf16 %v9089_v26  ;;  %v6597_v48 = vsel %vm14783_vm11, %v6595_v17, %v6596_v51  ;;  %v9091_v11 = vunpack.i.h.bf16 %v9089_v26  ;;  %v6519_v26 = vsel %vm14786_vm7, %v6516_v45, %v6518_v63  ;;  %vm14789_vm11 = vmmov %vm14786_vm7 }
 0x8b6   : > { %9193 = vrot.lane.b32.xlu0 %v9192_v57, %s9456_s22  ;;  %v7431_v25 = vsel %vm560_vm6, %v13039_v55, %v9090_v3  ;;  %v13498_v55 = vsel %vm14784_vm4, %v6596_v51, %v6598_v28  ;;  %v7432_v49 = vsel %vm560_vm6, %v13028_v21, %v9091_v11  ;;  %v9407_v51 = vld [vmem:[#allocation6 + $0x30] sm:$0xff] }
 0x8b7   : > { %7353 = vrot.lane.b32.xlu1 %v6592_v19, %s9450_s27  ;;  %v7050_v23 = vpop.permute.xlu0 %7049  ;;  %v7463_v35 = vsel %vm14778_vm14, %v7431_v25, %v9095_v61  ;;  %v7464_v21 = vsel %vm14785_vm5, %v7432_v49, %v9096_v7  ;;  %v9227_v57 = vpack.i.bf16 %v13498_v55, %v6597_v48  ;;  %v13545_v25 = vld [vmem:[#allocation6 + $0xf8] sm:$0xff]  ;;  %vm14790_vm14 = vmmov %vm14784_vm4 }
 0x8b8   : > { %v13466_v30 = vpop.permute.xlu1 %7151  ;;  %v7495_v33 = vsel %vm3857_vm0, %v7463_v35, %v9080_v24  ;;  %v7592_v38 = vsel %vm1826_vm9, %v7050_v23, %v13392_v20  ;;  %vm14791_vm5 = vmmov %vm14786_vm7 }
 0x8b9   : > { %vm14792_vm7 = vmmov %vm14791_vm5 }
 0x8ba   : > { %9198 = vrot.lane.b32.xlu0 %v9197_v14, %s9456_s22 }
 0x8bb   : > { %7355 = vrot.lane.b32.xlu1 %v6594_v59, %s9450_s27 }
 0x8bc   : > { %v9099_v9 = vpop.permute.xlu0 %9098  ;;  %v13474_v5 = vpop.permute.xlu1 %7153 }
 0x8bd   : > { %v9100_v16 = vunpack.i.l.bf16 %v9099_v9  ;;  %v9101_v53 = vunpack.i.h.bf16 %v9099_v9  ;;  %v13533_v9 = vld [vmem:[#allocation6 + $0xe0] sm:$0xff] }
 0x8be   : > { %7259 = vrot.lane.b32.xlu0 %v6514_v1, %s14734_s29 }
 0x8bf   : > { %7261 = vrot.lane.b32.xlu1 %v13478_v29, %s14734_s29  ;;  %v7527_v50 = vsel %vm4422_vm10, %v7495_v33, %v9100_v16 }
 0x8c0   : > { %v7052_v32 = vpop.permute.xlu0 %7051  ;;  %v13487_v18 = vpop.permute.xlu1 %7157  ;;  %v7560_v20 = vsel %vm7557_vm2, %v7527_v50, %v7050_v23 }
 0x8c1   : > { %v7593_v8 = vsel %vm1826_vm9, %v7052_v32, %v13459_v34 }
 0x8c2   : > { %7069 = vrot.lane.b32.xlu0 %v6592_v19, %s9457_s24  ;;  %v7496_v19 = vsel %vm3857_vm0, %v7464_v21, %v9081_v62  ;;  %v6520_v21 = vrot.slane %v13425_v10, 1 }
 0x8c3   : > { %7357 = vrot.lane.b32.xlu1 %v6597_v48, %s9450_s27  ;;  %v7528_v14 = vsel %vm4422_vm10, %v7496_v19, %v9101_v53  ;;  %v6402_v19 = vld [vmem:[#allocation6 + $0xe8] sm:$0x3] }
 0x8c4   : > { %v13492_v12 = vpop.permute.xlu0 %9103  ;;  %v7561_v43 = vsel %vm7557_vm2, %v7528_v14, %v7052_v32  ;;  %v9110_v32 = vunpack.i.l.bf16 %v13447_v40  ;;  %v6600_v14 = vrot.slane %v13425_v10, 2 }
 0x8c5   : > { %v7242_v22 = vpop.permute.xlu1 %7241  ;;  %v9106_v28 = vunpack.i.h.bf16 %v13492_v12 }
 0x8c6   : > { %9203 = vrot.lane.b32.xlu0 %v9202_v42, %s9453_s30  ;;  %v7624_v47 = vsel %vm3806_vm8, %v7592_v38, %v7242_v22  ;;  %v13557_v22 = vld [vmem:[#allocation6 + $0x108] sm:$0xff]  ;;  %v9111_v38 = vunpack.i.h.bf16 %v13447_v40 }
 0x8c7   : > { %7359 = vrot.lane.b32.xlu1 %v13498_v55, %s9450_s27 }
 0x8c8   : > { %v13506_v56 = vpop.permute.xlu0 %9113 }
 0x8c9   : > { %v7338_v4 = vpop.permute.xlu1 %7337  ;;  %v9115_v61 = vunpack.i.l.bf16 %v13506_v56  ;;  %v9116_v7 = vunpack.i.h.bf16 %v13506_v56  ;;  %v13571_v56 = vld [vmem:[#allocation6 + $0x120] sm:$0xff] }
 0x8ca   : > { %7071 = vrot.lane.b32.xlu0 %v6594_v59, %s9457_s24  ;;  %v7656_v41 = vsel %vm3832_vm12, %v7624_v47, %v7338_v4  ;;  %v9105_v59 = vunpack.i.l.bf16 %v13492_v12  ;;  %v9408_v12 = vld [vmem:[#allocation6 + $0x38] sm:$0xff]  ;;  %v6521_v4 = vrot.slane %v13533_v9, 1 }
 0x8cb   : > { %8390 = vmatprep.mubr.msk.f32.mxu0 %vm7720_vm13, %v7656_v41  ;;  %9213 = vrot.lane.b32.xlu1 %v9212_v36, %s14549_s16  ;;  %v7434_v33 = vsel %vm560_vm6, %v9408_v12, %v9106_v28  ;;  %v6606_v28 = vrot.slane %v13545_v25, 2 }
 0x8cc   : > { %v13517_v2 = vpop.permute.xlu0 %9118  ;;  %7892 = vmatmul.mubr.f32.gmra.mrb[36].mxu0 %v7560_v20  ;;  %v7433_v44 = vsel %vm560_vm6, %v9407_v51, %v9105_v59  ;;  %v7466_v63 = vsel %vm14788_vm1, %v7434_v33, %v9111_v38  ;;  %v6603_v59 = vrot.slane %v6402_v19, 2  ;;  %v6525_v51 = vrot.slane %v13436_v15, 1 }
 0x8cd   : > { %v7340_v54 = vpop.permute.xlu1 %7339  ;;  %v7498_v41 = vsel %vm3857_vm0, %v7466_v63, %v9116_v7 }
 0x8ce   : > { %7263 = vrot.lane.b32.xlu0 %v6519_v26, %s14734_s29 }
 0x8cf   : > { %9228 = vrot.lane.b32.xlu1 %v9227_v57, %s14549_s16  ;;  %v6522_v57 = vsel %vm14789_vm11, %v6520_v21, %v6521_v4  ;;  %vm14794_vm11 = vmmov %vm14784_vm4 }
 0x8d0   : > { %v7244_v23 = vpop.permute.xlu0 %7243 }
 0x8d1   : > { %v7625_v31 = vsel %vm3806_vm8, %v7593_v8, %v7244_v23  ;;  %v7246_v58 = vpop.permute.xlu1 %7245  ;;  %v9232_v23 = vpack.i.bf16 %v13533_v9, %v13425_v10 }
 0x8d2   : > { %9208 = vrot.lane.b32.xlu0 %v9202_v42, %s14714_s14  ;;  %v7657_v45 = vsel %vm3832_vm12, %v7625_v31, %v7340_v54  ;;  %v6601_v54 = vrot.slane %v13533_v9, 2 }
 0x8d3   : > { %8391 = vmatprep.mubr.msk.f32.mxu0 %vm7720_vm13, %v7657_v45  ;;  %7171 = vrot.lane.b32.xlu1 %v13533_v9, %s9441_s17  ;;  %v6526_v9 = vrot.slane %v13545_v25, 1 }
 0x8d4   : > { %v7054_v34 = vpop.permute.xlu0 %7053  ;;  %7897 = vmatmul.mubr.f32.gmra.mrb[38].mxu0 %v7561_v43  ;;  %v9237_v43 = vpack.i.bf16 %v13545_v25, %v13436_v15  ;;  %v6604_v10 = vsel %vm14784_vm4, %v6601_v54, %v6603_v59 }
 0x8d5   : > { %v7594_v3 = vsel %vm1826_vm9, %v7054_v34, %v13397_v39  ;;  %v7342_v1 = vpop.permute.xlu1 %7341  ;;  %v9217_v39 = vpack.i.bf16 %v6519_v26, %v13478_v29 }
 0x8d6   : > { %7073 = vrot.lane.b32.xlu0 %v6597_v48, %s9457_s24  ;;  %v7626_v17 = vsel %vm3806_vm8, %v7594_v3, %v7246_v58  ;;  %v7465_v48 = vsel %vm14787_vm15, %v7433_v44, %v9110_v32  ;;  %v6602_v58 = vsel %vm14790_vm14, %v6600_v14, %v6601_v54  ;;  %v13613_v32 = vsel %vm14792_vm7, %v6525_v51, %v6526_v9  ;;  %vm14793_vm15 = vmmov %vm14784_vm4 }
 0x8d7   : > { %v7658_v16 = vsel %vm3832_vm12, %v7626_v17, %v7342_v1  ;;  %7175 = vrot.lane.b32.xlu1 %v13545_v25, %s9441_s17  ;;  %v7497_v11 = vsel %vm3857_vm0, %v7465_v48, %v9115_v61  ;;  %v9409_v48 = vld [vmem:[#allocation6 + $0x48] sm:$0xff]  ;;  %vm14795_vm14 = vmmov %vm14788_vm1 }
 0x8d8   : > { %v9124_v42 = vpop.permute.xlu0 %9123  ;;  %8392 = vmatprep.mubr.msk.f32.mxu0 %vm7720_vm13, %v7658_v16  ;;  %v6405_v16 = vld [vmem:[#allocation6 + $0x100] sm:$0x3]  ;;  %vm14796_vm4 = vmmov %vm14791_vm5 }
 0x8d9   : > { %v9125_v35 = vunpack.i.l.bf16 %v9124_v42  ;;  %v7344_v24 = vpop.permute.xlu1 %7343  ;;  %v9126_v50 = vunpack.i.h.bf16 %v9124_v42  ;;  %v6608_v33 = vrot.slane %v6405_v16, 2  ;;  %vm14798_vm7 = vmmov %vm14788_vm1 }
 0x8da   : > { %9218 = vrot.lane.b32.xlu0 %v9217_v39, %s9453_s30 }
 0x8db   : > { %v7529_v29 = vsel %vm4422_vm10, %v7497_v11, %v9125_v35  ;;  %7177 = vrot.lane.b32.xlu1 %v13557_v22, %s9441_s17  ;;  %v7530_v53 = vsel %vm4422_vm10, %v7498_v41, %v9126_v50  ;;  %v6605_v35 = vrot.slane %v13436_v15, 2  ;;  %v9120_v15 = vunpack.i.l.bf16 %v13517_v2 }
 0x8dc   : > { %v7056_v49 = vpop.permute.xlu0 %7055  ;;  %v7562_v36 = vsel %vm7557_vm2, %v7529_v29, %v7054_v34  ;;  %v6523_v34 = vrot.slane %v6402_v19, 1 }
 0x8dd   : > { %7902 = vmatmul.mubr.f32.gmra.mrb[40].mxu0 %v7562_v36  ;;  %v13566_v47 = vpop.permute.xlu1 %9133  ;;  %v7595_v40 = vsel %vm1826_vm9, %v7056_v49, %v13466_v30  ;;  %v7563_v30 = vsel %vm7557_vm2, %v7530_v53, %v7056_v49  ;;  %v6607_v12 = vsel %vm14793_vm15, %v6605_v35, %v6606_v28  ;;  %v13632_v36 = vsel %vm14794_vm11, %v6606_v28, %v6608_v33  ;;  %v9410_v53 = vld [vmem:[#allocation6 + $0x50] sm:$0xff]  ;;  %v13678_v33 = vld [vmem:[#allocation6 + $0x128] sm:$0xff]  ;;  %vm14799_vm15 = vmmov %vm14796_vm4 }
 0x8de   : > { %7075 = vrot.lane.b32.xlu0 %v13498_v55, %s9457_s24  ;;  %v6524_v61 = vsel %vm14791_vm5, %v6521_v4, %v6523_v34  ;;  %v9136_v4 = vunpack.i.h.bf16 %v13566_v47  ;;  %vm14797_vm5 = vmmov %vm14788_vm1 }
 0x8df   : > { %7181 = vrot.lane.b32.xlu1 %v13571_v56, %s9441_s17  ;;  %v9242_v29 = vpack.i.bf16 %v6524_v61, %v6522_v57 }
 0x8e0   : > { %v7248_v20 = vpop.permute.xlu0 %7247 }
 0x8e1   : > { %v7627_v55 = vsel %vm3806_vm8, %v7595_v40, %v7248_v20  ;;  %v13582_v62 = vpop.permute.xlu1 %9148 }
 0x8e2   : > { %v7659_v26 = vsel %vm3832_vm12, %v7627_v55, %v7344_v24  ;;  %9223 = vrot.lane.b32.xlu0 %v9217_v39, %s14714_s14  ;;  %v9135_v39 = vunpack.i.l.bf16 %v13566_v47  ;;  %v9252_v55 = vpack.i.bf16 %v6604_v10, %v6602_v58 }
 0x8e3   : > { %8393 = vmatprep.mubr.msk.f32.mxu0 %vm7720_vm13, %v7659_v26  ;;  %7265 = vrot.lane.b32.xlu1 %v6522_v57, %s14734_s29  ;;  %v6528_v57 = vrot.slane %v6405_v16, 1 }
 0x8e4   : > { %v9129_v8 = vpop.permute.xlu0 %9128  ;;  %7907 = vmatmul.mubr.f32.gmra.mrb[42].mxu0 %v7563_v30 }
 0x8e5   : > { %v13594_v31 = vpop.permute.xlu1 %7155  ;;  %v9130_v44 = vunpack.i.l.bf16 %v9129_v8  ;;  %v9131_v50 = vunpack.i.h.bf16 %v9129_v8  ;;  %v6529_v14 = vsel %vm14796_vm4, %v6526_v9, %v6528_v57 }
 0x8e6   : > { %9233 = vrot.lane.b32.xlu0 %v9232_v23, %s9456_s22  ;;  %v9121_v23 = vunpack.i.h.bf16 %v13517_v2 }
 0x8e7   : > { %7361 = vrot.lane.b32.xlu1 %v6602_v58, %s9450_s27  ;;  %v7435_v24 = vsel %vm560_vm6, %v9409_v48, %v9130_v44  ;;  %v7436_v21 = vsel %vm560_vm6, %v9410_v53, %v9131_v50  ;;  %v13666_v44 = vld [vmem:[#allocation6 + $0x110] sm:$0xff] }
 0x8e8   : > { %v7058_v45 = vpop.permute.xlu0 %7057  ;;  %v7467_v25 = vsel %vm14788_vm1, %v7435_v24, %v9135_v39  ;;  %v7468_v47 = vsel %vm14795_vm14, %v7436_v21, %v9136_v4  ;;  %v9411_v39 = vld [vmem:[#allocation6 + $0x60] sm:$0xff]  ;;  %vm14800_vm1 = vmmov %vm14794_vm11 }
 0x8e9   : > { %v13601_v3 = vpop.permute.xlu1 %7159  ;;  %v7499_v63 = vsel %vm3857_vm0, %v7467_v25, %v9120_v15  ;;  %v7596_v41 = vsel %vm1826_vm9, %v7058_v45, %v13474_v5  ;;  %vm14801_vm11 = vmmov %vm14800_vm1 }
 0x8ea   : > { %9238 = vrot.lane.b32.xlu0 %v9237_v43, %s9456_s22  ;;  %v7500_v43 = vsel %vm3857_vm0, %v7468_v47, %v9121_v23  ;;  %vm14802_vm14 = vmmov %vm14796_vm4 }
 0x8eb   : > { %7363 = vrot.lane.b32.xlu1 %v6604_v10, %s9450_s27 }
 0x8ec   : > { %v9139_v1 = vpop.permute.xlu0 %9138 }
 0x8ed   : > { %v13609_v17 = vpop.permute.xlu1 %7161  ;;  %v9140_v7 = vunpack.i.l.bf16 %v9139_v1  ;;  %v9141_v19 = vunpack.i.h.bf16 %v9139_v1 }
 0x8ee   : > { %7267 = vrot.lane.b32.xlu0 %v6524_v61, %s14734_s29 }
 0x8ef   : > { %7269 = vrot.lane.b32.xlu1 %v13613_v32, %s14734_s29  ;;  %v7531_v20 = vsel %vm4422_vm10, %v7499_v63, %v9140_v7  ;;  %v13690_v63 = vld [vmem:[#allocation6 + $0x138] sm:$0xff] }
 0x8f0   : > { %v7060_v42 = vpop.permute.xlu0 %7059  ;;  %v7564_v5 = vsel %vm7557_vm2, %v7531_v20, %v7058_v45  ;;  %v9151_v20 = vunpack.i.h.bf16 %v13582_v62 }
 0x8f1   : > { %v13621_v11 = vpop.permute.xlu1 %7165  ;;  %v7597_v45 = vsel %vm1826_vm9, %v7060_v42, %v13594_v31 }
 0x8f2   : > { %7077 = vrot.lane.b32.xlu0 %v6602_v58, %s9457_s24  ;;  %v9267_v58 = vpack.i.bf16 %v13632_v36, %v6607_v12 }
 0x8f3   : > { %7365 = vrot.lane.b32.xlu1 %v6607_v12, %s9450_s27 }
 0x8f4   : > { %v13627_v38 = vpop.permute.xlu0 %9143 }
 0x8f5   : > { %v7250_v49 = vpop.permute.xlu1 %7249  ;;  %v9145_v9 = vunpack.i.l.bf16 %v13627_v38  ;;  %v9146_v25 = vunpack.i.h.bf16 %v13627_v38  ;;  %v9412_v38 = vld [vmem:[#allocation6 + $0x68] sm:$0xff] }
 0x8f6   : > { %9243 = vrot.lane.b32.xlu0 %v9242_v29, %s9453_s30  ;;  %v7628_v26 = vsel %vm3806_vm8, %v7596_v41, %v7250_v49 }
 0x8f7   : > { %7367 = vrot.lane.b32.xlu1 %v13632_v36, %s9450_s27  ;;  %v7437_v35 = vsel %vm560_vm6, %v9411_v39, %v9145_v9  ;;  %v7438_v4 = vsel %vm560_vm6, %v9412_v38, %v9146_v25 }
 0x8f8   : > { %v13640_v40 = vpop.permute.xlu0 %9153  ;;  %v7470_v57 = vsel %vm14798_vm7, %v7438_v4, %v9151_v20 }
 0x8f9   : > { %v7346_v54 = vpop.permute.xlu1 %7345  ;;  %v9155_v48 = vunpack.i.l.bf16 %v13640_v40  ;;  %v9156_v41 = vunpack.i.h.bf16 %v13640_v40  ;;  %v13704_v40 = vld [vmem:[#allocation6 + $0x150] sm:$0xff] }
 0x8fa   : > { %7079 = vrot.lane.b32.xlu0 %v6604_v10, %s9457_s24  ;;  %v7660_v30 = vsel %vm3832_vm12, %v7628_v26, %v7346_v54  ;;  %v7532_v10 = vsel %vm4422_vm10, %v7500_v43, %v9141_v19  ;;  %v6531_v54 = vrot.slane %v13666_v44, 1  ;;  %v6530_v19 = vrot.slane %v13557_v22, 1  ;;  %v6408_v43 = vld [vmem:[#allocation6 + $0x118] sm:$0x3] }
 0x8fb   : > { %9253 = vrot.lane.b32.xlu1 %v9252_v55, %s14549_s16  ;;  %8394 = vmatprep.mubr.msk.f32.mxu0 %vm7720_vm13, %v7660_v30  ;;  %v7565_v61 = vsel %vm7557_vm2, %v7532_v10, %v7060_v42  ;;  %v9150_v42 = vunpack.i.l.bf16 %v13582_v62  ;;  %v7502_v30 = vsel %vm3857_vm0, %v7470_v57, %v9156_v41  ;;  %v6610_v10 = vrot.slane %v13557_v22, 2 }
 0x8fc   : > { %v13651_v8 = vpop.permute.xlu0 %9158  ;;  %7912 = vmatmul.mubr.f32.gmra.mrb[44].mxu0 %v7564_v5  ;;  %v6613_v9 = vrot.slane %v6408_v43, 2 }
 0x8fd   : > { %v7348_v59 = vpop.permute.xlu1 %7347 }
 0x8fe   : > { %7271 = vrot.lane.b32.xlu0 %v6529_v14, %s14734_s29 }
 0x8ff   : > { %9268 = vrot.lane.b32.xlu1 %v9267_v58, %s14549_s16  ;;  %v6532_v58 = vsel %vm14799_vm15, %v6530_v19, %v6531_v54  ;;  %vm14804_vm15 = vmmov %vm14800_vm1 }
 0x900   : > { %v7252_v34 = vpop.permute.xlu0 %7251 }
 0x901   : > { %v7629_v1 = vsel %vm3806_vm8, %v7597_v45, %v7252_v34  ;;  %v7254_v2 = vpop.permute.xlu1 %7253  ;;  %v9272_v34 = vpack.i.bf16 %v13666_v44, %v13557_v22 }
 0x902   : > { %9248 = vrot.lane.b32.xlu0 %v9242_v29, %s14714_s14  ;;  %v7661_v51 = vsel %vm3832_vm12, %v7629_v1, %v7348_v59  ;;  %v6611_v59 = vrot.slane %v13666_v44, 2 }
 0x903   : > { %8395 = vmatprep.mubr.msk.f32.mxu0 %vm7720_vm13, %v7661_v51  ;;  %7179 = vrot.lane.b32.xlu1 %v13666_v44, %s9441_s17 }
 0x904   : > { %v7062_v31 = vpop.permute.xlu0 %7061  ;;  %7917 = vmatmul.mubr.f32.gmra.mrb[46].mxu0 %v7565_v61  ;;  %v9277_v61 = vpack.i.bf16 %v13678_v33, %v13571_v56  ;;  %v6614_v22 = vsel %vm14801_vm11, %v6611_v59, %v6613_v9  ;;  %vm14806_vm11 = vmmov %vm14796_vm4 }
 0x905   : > { %v7598_v28 = vsel %vm1826_vm9, %v7062_v31, %v13487_v18  ;;  %v7350_v16 = vpop.permute.xlu1 %7349  ;;  %v9257_v18 = vpack.i.bf16 %v6529_v14, %v13613_v32 }
 0x906   : > { %7081 = vrot.lane.b32.xlu0 %v6607_v12, %s9457_s24  ;;  %v7630_v24 = vsel %vm3806_vm8, %v7598_v28, %v7254_v2  ;;  %v7469_v12 = vsel %vm14797_vm5, %v7437_v35, %v9150_v42  ;;  %v6612_v2 = vsel %vm14800_vm1, %v6610_v10, %v6611_v59  ;;  %v6535_v35 = vrot.slane %v13571_v56, 1  ;;  %vm14803_vm5 = vmmov %vm14800_vm1 }
 0x907   : > { %v7662_v7 = vsel %vm3832_vm12, %v7630_v24, %v7350_v16  ;;  %7183 = vrot.lane.b32.xlu1 %v13678_v33, %s9441_s17  ;;  %v7501_v49 = vsel %vm3857_vm0, %v7469_v12, %v9155_v48  ;;  %v6536_v16 = vrot.slane %v13678_v33, 1  ;;  %v6615_v12 = vrot.slane %v13571_v56, 2  ;;  %vm14805_vm1 = vmmov %vm14798_vm7 }
 0x908   : > { %v9164_v29 = vpop.permute.xlu0 %9163  ;;  %8396 = vmatprep.mubr.msk.f32.mxu0 %vm7720_vm13, %v7662_v7  ;;  %v6616_v7 = vrot.slane %v13678_v33, 2  ;;  %v9160_v56 = vunpack.i.l.bf16 %v13651_v8 }
 0x909   : > { %v9165_v15 = vunpack.i.l.bf16 %v9164_v29  ;;  %v7352_v50 = vpop.permute.xlu1 %7351  ;;  %v9166_v53 = vunpack.i.h.bf16 %v9164_v29  ;;  %v13746_v25 = vsel %vm14796_vm4, %v6535_v35, %v6536_v16  ;;  %v13800_v35 = vld [vmem:[#allocation6 + $0x140] sm:$0xff]  ;;  %vm14808_vm4 = vmmov %vm14805_vm1 }
 0x90a   : > { %9258 = vrot.lane.b32.xlu0 %v9257_v18, %s9453_s30  ;;  %v6617_v4 = vsel %vm14803_vm5, %v6615_v12, %v6616_v7  ;;  %vm14809_vm5 = vmmov %vm14806_vm11 }
 0x90b   : > { %v7533_v32 = vsel %vm4422_vm10, %v7501_v49, %v9165_v15  ;;  %7185 = vrot.lane.b32.xlu1 %v13690_v63, %s9441_s17  ;;  %v7534_v47 = vsel %vm4422_vm10, %v7502_v30, %v9166_v53 }
 0x90c   : > { %v7064_v21 = vpop.permute.xlu0 %7063  ;;  %v7566_v55 = vsel %vm7557_vm2, %v7533_v32, %v7062_v31  ;;  %v6533_v31 = vrot.slane %v6408_v43, 1 }
 0x90d   : > { %7922 = vmatmul.mubr.f32.gmra.mrb[48].mxu0 %v7566_v55  ;;  %v13699_v26 = vpop.permute.xlu1 %9173  ;;  %v7599_v62 = vsel %vm1826_vm9, %v7064_v21, %v13601_v3  ;;  %v7567_v3 = vsel %vm7557_vm2, %v7534_v47, %v7064_v21 }
 0x90e   : > { %7083 = vrot.lane.b32.xlu0 %v13632_v36, %s9457_s24  ;;  %v6534_v24 = vsel %vm14802_vm14, %v6531_v54, %v6533_v31  ;;  %v9175_v29 = vunpack.i.l.bf16 %v13699_v26  ;;  %v9176_v30 = vunpack.i.h.bf16 %v13699_v26  ;;  %vm14807_vm14 = vmmov %vm14805_vm1 }
 0x90f   : > { %7189 = vrot.lane.b32.xlu1 %v13704_v40, %s9441_s17  ;;  %v9282_v20 = vpack.i.bf16 %v6534_v24, %v6532_v58 }
 0x910   : > { %v7256_v5 = vpop.permute.xlu0 %7255 }
 0x911   : > { %v7631_v36 = vsel %vm3806_vm8, %v7599_v62, %v7256_v5  ;;  %v13715_v23 = vpop.permute.xlu1 %9188 }
 0x912   : > { %v7663_v14 = vsel %vm3832_vm12, %v7631_v36, %v7352_v50  ;;  %9263 = vrot.lane.b32.xlu0 %v9257_v18, %s14714_s14  ;;  %v6411_v18 = vld [vmem:[#allocation6 + $0x130] sm:$0x3]  ;;  %v9413_v50 = vld [vmem:[#allocation6 + $0x78] sm:$0xff]  ;;  %v9292_v36 = vpack.i.bf16 %v6614_v22, %v6612_v2 }
 0x913   : > { %8397 = vmatprep.mubr.msk.f32.mxu0 %vm7720_vm13, %v7663_v14  ;;  %7273 = vrot.lane.b32.xlu1 %v6532_v58, %s14734_s29  ;;  %v6618_v41 = vrot.slane %v6411_v18, 2  ;;  %v6538_v58 = vrot.slane %v6411_v18, 1  ;;  %v9414_v18 = vld [vmem:[#allocation6 + $0x90] sm:$0xff] }
 0x914   : > { %v9169_v45 = vpop.permute.xlu0 %9168  ;;  %7927 = vmatmul.mubr.f32.gmra.mrb[50].mxu0 %v7567_v3 }
 0x915   : > { %v13727_v1 = vpop.permute.xlu1 %7163  ;;  %v9170_v48 = vunpack.i.l.bf16 %v9169_v45  ;;  %v9171_v21 = vunpack.i.h.bf16 %v9169_v45  ;;  %v13765_v57 = vsel %vm14804_vm15, %v6616_v7, %v6618_v41 }
 0x916   : > { %9273 = vrot.lane.b32.xlu0 %v9272_v34, %s9456_s22  ;;  %v6539_v34 = vsel %vm14806_vm11, %v6536_v16, %v6538_v58  ;;  %v9307_v10 = vpack.i.bf16 %v13765_v57, %v6617_v4 }
 0x917   : > { %7369 = vrot.lane.b32.xlu1 %v6612_v2, %s9450_s27  ;;  %v7439_v49 = vsel %vm560_vm6, %v9413_v50, %v9170_v48  ;;  %v7440_v19 = vsel %vm560_vm6, %v13340_v27, %v9171_v21  ;;  %v9161_v27 = vunpack.i.h.bf16 %v13651_v8 }
 0x918   : > { %v7066_v51 = vpop.permute.xlu0 %7065  ;;  %v7471_v33 = vsel %vm14798_vm7, %v7439_v49, %v9175_v29  ;;  %v7472_v26 = vsel %vm14805_vm1, %v7440_v19, %v9176_v30  ;;  %v13812_v49 = vld [vmem:[#allocation6 + $0x158] sm:$0xff]  ;;  %v9191_v30 = vunpack.i.h.bf16 %v13715_v23  ;;  %vm14810_vm7 = vmmov %vm14804_vm15 }
 0x919   : > { %v13734_v28 = vpop.permute.xlu1 %7167  ;;  %v7503_v54 = vsel %vm3857_vm0, %v7471_v33, %v9160_v56  ;;  %v7600_v62 = vsel %vm1826_vm9, %v7066_v51, %v13609_v17  ;;  %v7504_v9 = vsel %vm3857_vm0, %v7472_v26, %v9161_v27  ;;  %vm14811_vm15 = vmmov %vm14810_vm7 }
 0x91a   : > { %9278 = vrot.lane.b32.xlu0 %v9277_v61, %s9456_s22  ;;  %vm14812_vm1 = vmmov %vm14809_vm5 }
 0x91b   : > { %7371 = vrot.lane.b32.xlu1 %v6614_v22, %s9450_s27  ;;  %vm14813_vm11 = vmmov %vm14812_vm1 }
 0x91c   : > { %v9179_v39 = vpop.permute.xlu0 %9178 }
 0x91d   : > { %v13742_v42 = vpop.permute.xlu1 %7169  ;;  %v9180_v32 = vunpack.i.l.bf16 %v9179_v39  ;;  %v9181_v43 = vunpack.i.h.bf16 %v9179_v39 }
 0x91e   : > { %7275 = vrot.lane.b32.xlu0 %v6534_v24, %s14734_s29 }
 0x91f   : > { %7277 = vrot.lane.b32.xlu1 %v13746_v25, %s14734_s29  ;;  %v7535_v47 = vsel %vm4422_vm10, %v7503_v54, %v9180_v32  ;;  %v7536_v31 = vsel %vm4422_vm10, %v7504_v9, %v9181_v43  ;;  %v9312_v9 = vpack.i.bf16 %v13800_v35, %v13690_v63 }
 0x920   : > { %v7068_v15 = vpop.permute.xlu0 %7067  ;;  %v7568_v17 = vsel %vm7557_vm2, %v7535_v47, %v7066_v51 }
 0x921   : > { %v13754_v38 = vpop.permute.xlu1 %7173  ;;  %v7601_v51 = vsel %vm1826_vm9, %v7068_v15, %v13727_v1  ;;  %v7569_v48 = vsel %vm7557_vm2, %v7536_v31, %v7068_v15  ;;  %v9190_v15 = vunpack.i.l.bf16 %v13715_v23 }
 0x922   : > { %7085 = vrot.lane.b32.xlu0 %v6612_v2, %s9457_s24 }
 0x923   : > { %7373 = vrot.lane.b32.xlu1 %v6617_v4, %s9450_s27 }
 0x924   : > { %v13760_v53 = vpop.permute.xlu0 %9183 }
 0x925   : > { %v7258_v55 = vpop.permute.xlu1 %7257  ;;  %v9185_v16 = vunpack.i.l.bf16 %v13760_v53  ;;  %v9186_v41 = vunpack.i.h.bf16 %v13760_v53 }
 0x926   : > { %9283 = vrot.lane.b32.xlu0 %v9282_v20, %s9453_s30  ;;  %v7632_v14 = vsel %vm3806_vm8, %v7600_v62, %v7258_v55  ;;  %v13824_v55 = vld [vmem:[#allocation6 + $0x168] sm:$0xff] }
 0x927   : > { %7375 = vrot.lane.b32.xlu1 %v13765_v57, %s9450_s27  ;;  %v7441_v29 = vsel %vm560_vm6, %v9414_v18, %v9185_v16  ;;  %v7442_v53 = vsel %vm560_vm6, %v13345_v46, %v9186_v41  ;;  %v9317_v16 = vpack.i.bf16 %v13812_v49, %v13704_v40  ;;  %v6417_v41 = vld [vmem:[#allocation6 + $0x160] sm:$0x3] }
 0x928   : > { %v13773_v5 = vpop.permute.xlu0 %9193  ;;  %v7474_v46 = vsel %vm14808_vm4, %v7442_v53, %v9191_v30  ;;  %v6628_v53 = vrot.slane %v6417_v41, 2 }
 0x929   : > { %v7354_v59 = vpop.permute.xlu1 %7353  ;;  %v9195_v12 = vunpack.i.l.bf16 %v13773_v5  ;;  %v9196_v54 = vunpack.i.h.bf16 %v13773_v5  ;;  %v13839_v5 = vld [vmem:[#allocation6 + $0x180] sm:$0xff] }
 0x92a   : > { %7087 = vrot.lane.b32.xlu0 %v6614_v22, %s9457_s24  ;;  %v7664_v3 = vsel %vm3832_vm12, %v7632_v14, %v7354_v59  ;;  %v6541_v14 = vrot.slane %v13800_v35, 1 }
 0x92b   : > { %9293 = vrot.lane.b32.xlu1 %v9292_v36, %s14549_s16  ;;  %8398 = vmatprep.mubr.msk.f32.mxu0 %vm7720_vm13, %v7664_v3  ;;  %v7506_v58 = vsel %vm3857_vm0, %v7474_v46, %v9196_v54 }
 0x92c   : > { %v13785_v45 = vpop.permute.xlu0 %9198  ;;  %7932 = vmatmul.mubr.f32.gmra.mrb[52].mxu0 %v7568_v17  ;;  %v6540_v17 = vrot.slane %v13690_v63, 1 }
 0x92d   : > { %v7356_v2 = vpop.permute.xlu1 %7355 }
 0x92e   : > { %7279 = vrot.lane.b32.xlu0 %v6539_v34, %s14734_s29  ;;  %v6542_v27 = vsel %vm14809_vm5, %v6540_v17, %v6541_v14  ;;  %vm14815_vm5 = vmmov %vm14810_vm7  ;;  %v9416_v17 = vld [vmem:[#allocation6 + $0xb0] sm:$0xff] }
 0x92f   : > { %9308 = vrot.lane.b32.xlu1 %v9307_v10, %s14549_s16  ;;  %v6414_v10 = vld [vmem:[#allocation6 + $0x148] sm:$0x3] }
 0x930   : > { %v7260_v61 = vpop.permute.xlu0 %7259 }
 0x931   : > { %v7633_v22 = vsel %vm3806_vm8, %v7601_v51, %v7260_v61  ;;  %v7262_v8 = vpop.permute.xlu1 %7261  ;;  %v6620_v51 = vrot.slane %v13690_v63, 2 }
 0x932   : > { %9288 = vrot.lane.b32.xlu0 %v9282_v20, %s14714_s14  ;;  %v7665_v39 = vsel %vm3832_vm12, %v7633_v22, %v7356_v2  ;;  %v6623_v22 = vrot.slane %v6414_v10, 2 }
 0x933   : > { %8399 = vmatprep.mubr.msk.f32.mxu0 %vm7720_vm13, %v7665_v39  ;;  %7187 = vrot.lane.b32.xlu1 %v13800_v35, %s9441_s17  ;;  %v6543_v39 = vrot.slane %v6414_v10, 1 }
 0x934   : > { %v7070_v1 = vpop.permute.xlu0 %7069  ;;  %7937 = vmatmul.mubr.f32.gmra.mrb[54].mxu0 %v7569_v48 }
 0x935   : > { %v7602_v24 = vsel %vm1826_vm9, %v7070_v1, %v13621_v11  ;;  %v7358_v7 = vpop.permute.xlu1 %7357  ;;  %v9297_v11 = vpack.i.bf16 %v6539_v34, %v13746_v25  ;;  %v6621_v34 = vrot.slane %v13800_v35, 2 }
 0x936   : > { %7089 = vrot.lane.b32.xlu0 %v6617_v4, %s9457_s24  ;;  %v7634_v50 = vsel %vm3806_vm8, %v7602_v24, %v7262_v8  ;;  %v7473_v4 = vsel %vm14807_vm14, %v7441_v29, %v9190_v15  ;;  %v6544_v29 = vsel %vm14812_vm1, %v6541_v14, %v6543_v39  ;;  %v6626_v15 = vrot.slane %v13812_v49, 2  ;;  %vm14814_vm14 = vmmov %vm14810_vm7 }
 0x937   : > { %v7666_v33 = vsel %vm3832_vm12, %v7634_v50, %v7358_v7  ;;  %7191 = vrot.lane.b32.xlu1 %v13812_v49, %s9441_s17  ;;  %v7505_v21 = vsel %vm3857_vm0, %v7473_v4, %v9195_v12  ;;  %v6622_v31 = vsel %vm14810_vm7, %v6620_v51, %v6621_v34  ;;  %v6624_v63 = vsel %vm14811_vm15, %v6621_v34, %v6623_v22  ;;  %vm14816_vm7 = vmmov %vm14808_vm4 }
 0x938   : > { %v9204_v32 = vpop.permute.xlu0 %9203  ;;  %8400 = vmatprep.mubr.msk.f32.mxu0 %vm7720_vm13, %v7666_v33  ;;  %v6545_v7 = vrot.slane %v13704_v40, 1  ;;  %v9322_v30 = vpack.i.bf16 %v6544_v29, %v6542_v27  ;;  %v13900_v46 = vsel %vm14815_vm5, %v6626_v15, %v6628_v53  ;;  %v6548_v34 = vrot.slane %v6417_v41, 1  ;;  %vm14817_vm15 = vmmov %vm14812_vm1 }
 0x939   : > { %v9205_v20 = vunpack.i.l.bf16 %v9204_v32  ;;  %v7360_v56 = vpop.permute.xlu1 %7359  ;;  %v9206_v62 = vunpack.i.h.bf16 %v9204_v32  ;;  %v6625_v32 = vrot.slane %v13704_v40, 2  ;;  %v9200_v40 = vunpack.i.l.bf16 %v13785_v45  ;;  %vm14818_vm1 = vmmov %vm14808_vm4 }
 0x93a   : > { %9298 = vrot.lane.b32.xlu0 %v9297_v11, %s9453_s30  ;;  %v9201_v51 = vunpack.i.h.bf16 %v13785_v45 }
 0x93b   : > { %v7537_v25 = vsel %vm4422_vm10, %v7505_v21, %v9205_v20  ;;  %7193 = vrot.lane.b32.xlu1 %v13824_v55, %s9441_s17  ;;  %v7538_v3 = vsel %vm4422_vm10, %v7506_v58, %v9206_v62  ;;  %v9415_v20 = vld [vmem:[#allocation6 + $0xa8] sm:$0xff]  ;;  %v6627_v21 = vsel %vm14814_vm14, %v6625_v32, %v6626_v15  ;;  %v9417_v32 = vld [vmem:[#allocation6 + $0xc0] sm:$0xff]  ;;  %vm14819_vm14 = vmmov %vm14818_vm1 }
 0x93c   : > { %v7072_v47 = vpop.permute.xlu0 %7071  ;;  %v7570_v19 = vsel %vm7557_vm2, %v7537_v25, %v7070_v1  ;;  %v6546_v1 = vrot.slane %v13812_v49, 1  ;;  %v9347_v22 = vpack.i.bf16 %v13900_v46, %v6627_v21 }
 0x93d   : > { %7942 = vmatmul.mubr.f32.gmra.mrb[56].mxu0 %v7570_v19  ;;  %v13834_v36 = vpop.permute.xlu1 %9213  ;;  %v7603_v23 = vsel %vm1826_vm9, %v7072_v47, %v13734_v28  ;;  %v7571_v28 = vsel %vm7557_vm2, %v7538_v3, %v7072_v47 }
 0x93e   : > { %7091 = vrot.lane.b32.xlu0 %v13765_v57, %s9457_s24  ;;  %v13881_v50 = vsel %vm14813_vm11, %v6545_v7, %v6546_v1  ;;  %v9215_v33 = vunpack.i.l.bf16 %v13834_v36  ;;  %v9216_v58 = vunpack.i.h.bf16 %v13834_v36 }
 0x93f   : > { %7197 = vrot.lane.b32.xlu1 %v13839_v5, %s9441_s17 }
 0x940   : > { %v7264_v59 = vpop.permute.xlu0 %7263 }
 0x941   : > { %v7635_v57 = vsel %vm3806_vm8, %v7603_v23, %v7264_v59  ;;  %v13850_v26 = vpop.permute.xlu1 %9228 }
 0x942   : > { %v7667_v43 = vsel %vm3832_vm12, %v7635_v57, %v7360_v56  ;;  %9303 = vrot.lane.b32.xlu0 %v9297_v11, %s14714_s14 }
 0x943   : > { %8401 = vmatprep.mubr.msk.f32.mxu0 %vm7720_vm13, %v7667_v43  ;;  %7281 = vrot.lane.b32.xlu1 %v6542_v27, %s14734_s29  ;;  %v9332_v43 = vpack.i.bf16 %v6624_v63, %v6622_v31 }
 0x944   : > { %v9209_v2 = vpop.permute.xlu0 %9208  ;;  %7947 = vmatmul.mubr.f32.gmra.mrb[58].mxu0 %v7571_v28 }
 0x945   : > { %v13862_v61 = vpop.permute.xlu1 %7171  ;;  %v9210_v18 = vunpack.i.l.bf16 %v9209_v2  ;;  %v9211_v47 = vunpack.i.h.bf16 %v9209_v2 }
 0x946   : > { %9313 = vrot.lane.b32.xlu0 %v9312_v9, %s9456_s22 }
 0x947   : > { %7377 = vrot.lane.b32.xlu1 %v6622_v31, %s9450_s27  ;;  %v7443_v4 = vsel %vm560_vm6, %v9415_v20, %v9210_v18  ;;  %v7444_v57 = vsel %vm560_vm6, %v9416_v17, %v9211_v47 }
 0x948   : > { %v7074_v8 = vpop.permute.xlu0 %7073  ;;  %v7475_v54 = vsel %vm14808_vm4, %v7443_v4, %v9215_v33  ;;  %v7476_v36 = vsel %vm14816_vm7, %v7444_v57, %v9216_v58  ;;  %vm14820_vm4 = vmmov %vm14815_vm5 }
 0x949   : > { %v13869_v48 = vpop.permute.xlu1 %7175  ;;  %v7507_v14 = vsel %vm3857_vm0, %v7475_v54, %v9200_v40  ;;  %v7604_v23 = vsel %vm1826_vm9, %v7074_v8, %v13742_v42  ;;  %v7508_v39 = vsel %vm3857_vm0, %v7476_v36, %v9201_v51  ;;  %v13946_v54 = vld [vmem:[#allocation6 + $0x188] sm:$0xff]  ;;  %v6630_v36 = vrot.slane %v13824_v55, 2  ;;  %vm14821_vm5 = vmmov %vm14820_vm4 }
 0x94a   : > { %9318 = vrot.lane.b32.xlu0 %v9317_v16, %s9456_s22  ;;  %vm14822_vm7 = vmmov %vm14813_vm11 }
 0x94b   : > { %7379 = vrot.lane.b32.xlu1 %v6624_v63, %s9450_s27 }
 0x94c   : > { %v9219_v24 = vpop.permute.xlu0 %9218 }
 0x94d   : > { %v13877_v12 = vpop.permute.xlu1 %7177  ;;  %v9220_v25 = vunpack.i.l.bf16 %v9219_v24  ;;  %v9221_v2 = vunpack.i.h.bf16 %v9219_v24 }
 0x94e   : > { %7283 = vrot.lane.b32.xlu0 %v6544_v29, %s14734_s29  ;;  %v13934_v29 = vld [vmem:[#allocation6 + $0x170] sm:$0xff] }
 0x94f   : > { %7285 = vrot.lane.b32.xlu1 %v13881_v50, %s14734_s29  ;;  %v7539_v3 = vsel %vm4422_vm10, %v7507_v14, %v9220_v25  ;;  %v7540_v24 = vsel %vm4422_vm10, %v7508_v39, %v9221_v2  ;;  %v9230_v25 = vunpack.i.l.bf16 %v13850_v26 }
 0x950   : > { %v7076_v11 = vpop.permute.xlu0 %7075  ;;  %v7572_v42 = vsel %vm7557_vm2, %v7539_v3, %v7074_v8  ;;  %v9418_v3 = vld [vmem:[#allocation6 + $0xc8] sm:$0xff] }
 0x951   : > { %v13889_v56 = vpop.permute.xlu1 %7181  ;;  %v7605_v8 = vsel %vm1826_vm9, %v7076_v11, %v13862_v61  ;;  %v7573_v15 = vsel %vm7557_vm2, %v7540_v24, %v7076_v11  ;;  %v6551_v11 = vrot.slane %v13934_v29, 1 }
 0x952   : > { %7093 = vrot.lane.b32.xlu0 %v6622_v31, %s9457_s24  ;;  %v6549_v31 = vsel %vm14817_vm15, %v6546_v1, %v6548_v34  ;;  %v9231_v34 = vunpack.i.h.bf16 %v13850_v26  ;;  %vm14823_vm15 = vmmov %vm14820_vm4 }
 0x953   : > { %7381 = vrot.lane.b32.xlu1 %v6627_v21, %s9450_s27  ;;  %v9337_v40 = vpack.i.bf16 %v6549_v31, %v13881_v50  ;;  %v6631_v50 = vrot.slane %v13934_v29, 2 }
 0x954   : > { %v13895_v62 = vpop.permute.xlu0 %9223 }
 0x955   : > { %v7266_v19 = vpop.permute.xlu1 %7265  ;;  %v9225_v1 = vunpack.i.l.bf16 %v13895_v62  ;;  %v6632_v51 = vsel %vm14820_vm4, %v6630_v36, %v6631_v50 }
 0x956   : > { %9323 = vrot.lane.b32.xlu0 %v9322_v30, %s9453_s30  ;;  %v7636_v27 = vsel %vm3806_vm8, %v7604_v23, %v7266_v19 }
 0x957   : > { %7383 = vrot.lane.b32.xlu1 %v13900_v46, %s9450_s27  ;;  %v7445_v20 = vsel %vm560_vm6, %v9417_v32, %v9225_v1  ;;  %v6643_v32 = vrot.slane %v13839_v5, 2 }
 0x958   : > { %v13908_v59 = vpop.permute.xlu0 %9233  ;;  %v7477_v14 = vsel %vm14818_vm1, %v7445_v20, %v9230_v25  ;;  %vm14824_vm1 = vmmov %vm14822_vm7 }
 0x959   : > { %v7362_v28 = vpop.permute.xlu1 %7361  ;;  %v9235_v4 = vunpack.i.l.bf16 %v13908_v59  ;;  %v9236_v57 = vunpack.i.h.bf16 %v13908_v59 }
 0x95a   : > { %7095 = vrot.lane.b32.xlu0 %v6624_v63, %s9457_s24  ;;  %v7668_v10 = vsel %vm3832_vm12, %v7636_v27, %v7362_v28  ;;  %v6420_v27 = vld [vmem:[#allocation6 + $0x178] sm:$0x3] }
 0x95b   : > { %9333 = vrot.lane.b32.xlu1 %v9332_v43, %s14549_s16  ;;  %8402 = vmatprep.mubr.msk.f32.mxu0 %vm7720_vm13, %v7668_v10 }
 0x95c   : > { %v13919_v9 = vpop.permute.xlu0 %9238  ;;  %7952 = vmatmul.mubr.f32.gmra.mrb[60].mxu0 %v7572_v42 }
 0x95d   : > { %v7364_v16 = vpop.permute.xlu1 %7363 }
 0x95e   : > { %7287 = vrot.lane.b32.xlu0 %v6549_v31, %s14734_s29  ;;  %v6633_v31 = vrot.slane %v6420_v27, 2 }
 0x95f   : > { %9348 = vrot.lane.b32.xlu1 %v9347_v22, %s14549_s16 }
 0x960   : > { %v7268_v63 = vpop.permute.xlu0 %7267 }
 0x961   : > { %v7637_v7 = vsel %vm3806_vm8, %v7605_v8, %v7268_v63  ;;  %v7270_v45 = vpop.permute.xlu1 %7269 }
 0x962   : > { %9328 = vrot.lane.b32.xlu0 %v9322_v30, %s14714_s14  ;;  %v7669_v18 = vsel %vm3832_vm12, %v7637_v7, %v7364_v16  ;;  %v9226_v30 = vunpack.i.h.bf16 %v13895_v62  ;;  %v7509_v62 = vsel %vm3857_vm0, %v7477_v14, %v9235_v4  ;;  %v13992_v7 = vsel %vm14821_vm5, %v6631_v50, %v6633_v31  ;;  %v9419_v50 = vld [vmem:[#allocation6 + $0xd8] sm:$0xff]  ;;  %vm14827_vm5 = vmmov %vm14819_vm14 }
 0x963   : > { %8403 = vmatprep.mubr.msk.f32.mxu0 %vm7720_vm13, %v7669_v18  ;;  %7195 = vrot.lane.b32.xlu1 %v13934_v29, %s9441_s17  ;;  %v9352_v18 = vpack.i.bf16 %v13934_v29, %v13824_v55  ;;  %v9357_v4 = vpack.i.bf16 %v13946_v54, %v13839_v5 }
 0x964   : > { %v7078_v61 = vpop.permute.xlu0 %7077  ;;  %7957 = vmatmul.mubr.f32.gmra.mrb[62].mxu0 %v7573_v15  ;;  %v7446_v17 = vsel %vm560_vm6, %v9418_v3, %v9226_v30 }
 0x965   : > { %v7606_v41 = vsel %vm1826_vm9, %v7078_v61, %v13754_v38  ;;  %v7366_v33 = vpop.permute.xlu1 %7365  ;;  %v7478_v59 = vsel %vm14819_vm14, %v7446_v17, %v9231_v34 }
 0x966   : > { %7097 = vrot.lane.b32.xlu0 %v6627_v21, %s9457_s24  ;;  %v7638_v53 = vsel %vm3806_vm8, %v7606_v41, %v7270_v45  ;;  %v6550_v21 = vrot.slane %v13824_v55, 1  ;;  %v7510_v22 = vsel %vm3857_vm0, %v7478_v59, %v9236_v57  ;;  %v6638_v45 = vrot.slane %v13839_v5, 1 }
 0x967   : > { %v7670_v38 = vsel %vm3832_vm12, %v7638_v53, %v7366_v33  ;;  %7199 = vrot.lane.b32.xlu1 %v13946_v54, %s9441_s17  ;;  %v6423_v33 = vld [vmem:[#allocation6 + $0x190] sm:$0x3]  ;;  %v6553_v53 = vrot.slane %v6420_v27, 1 }
 0x968   : > { %v9244_v47 = vpop.permute.xlu0 %9243  ;;  %8404 = vmatprep.mubr.msk.f32.mxu0 %vm7720_vm13, %v7670_v38  ;;  %v13963_v23 = vsel %vm14813_vm11, %v6550_v21, %v6551_v11  ;;  %v6646_v38 = vrot.slane %v6423_v33, 2  ;;  %vm14825_vm11 = vmmov %vm14820_vm4  ;;  %v6641_v31 = vrot.slane %v6423_v33, 1 }
 0x969   : > { %v9245_v19 = vunpack.i.l.bf16 %v9244_v47  ;;  %v7368_v58 = vpop.permute.xlu1 %7367  ;;  %v9246_v28 = vunpack.i.h.bf16 %v9244_v47  ;;  %v6554_v21 = vsel %vm14824_vm1, %v6551_v11, %v6553_v53  ;;  %v9372_v11 = vpack.i.bf16 %v13992_v7, %v6632_v51  ;;  %vm14826_vm4 = vmmov %vm14824_vm1 }
 0x96a   : > { %9338 = vrot.lane.b32.xlu0 %v9337_v40, %s9453_s30 }
 0x96b   : > { %v7541_v43 = vsel %vm4422_vm10, %v7509_v62, %v9245_v19  ;;  %7289 = vrot.lane.b32.xlu1 %v13963_v23, %s14734_s29  ;;  %v7542_v39 = vsel %vm4422_vm10, %v7510_v22, %v9246_v28  ;;  %v9362_v28 = vpack.i.bf16 %v6554_v21, %v13963_v23 }
 0x96c   : > { %v7080_v10 = vpop.permute.xlu0 %7079  ;;  %v7574_v42 = vsel %vm7557_vm2, %v7541_v43, %v7078_v61  ;;  %v6644_v61 = vrot.slane %v13946_v54, 2  ;;  %v14047_v43 = vld [vmem:[%s14394_s10] ss:$0 sm:$0xff] }
 0x96d   : > { %7962 = vmatmul.mubr.f32.gmra.mrb[64].mxu0 %v7574_v42  ;;  %v13974_v2 = vpop.permute.xlu1 %9253  ;;  %v7607_v26 = vsel %vm1826_vm9, %v7080_v10, %v13869_v48  ;;  %v7575_v48 = vsel %vm7557_vm2, %v7542_v39, %v7080_v10  ;;  %v9240_v42 = vunpack.i.l.bf16 %v13919_v9 }
 0x96e   : > { %7099 = vrot.lane.b32.xlu0 %v13900_v46, %s9457_s24  ;;  %v6639_v46 = vrot.slane %v13946_v54, 1  ;;  %v14019_v30 = vsel %vm14823_vm15, %v6643_v32, %v6644_v61  ;;  %v14032_v19 = vsel %vm14825_vm11, %v6644_v61, %v6646_v38  ;;  %v9255_v14 = vunpack.i.l.bf16 %v13974_v2  ;;  %v14084_v54 = vld [vmem:[#allocation6 + $0x1a8] sm:$0x3]  ;;  %vm14829_vm15 = vmmov %vm14827_vm5 }
 0x96f   : > { %7385 = vrot.lane.b32.xlu1 %v6632_v51, %s9450_s27  ;;  %v9256_v39 = vunpack.i.h.bf16 %v13974_v2 }
 0x970   : > { %v7272_v16 = vpop.permute.xlu0 %7271  ;;  %v14008_v41 = vsel %vm14822_vm7, %v6638_v45, %v6639_v46  ;;  %vm14828_vm7 = vmmov %vm14824_vm1 }
 0x971   : > { %v7639_v8 = vsel %vm3806_vm8, %v7607_v26, %v7272_v16  ;;  %v13986_v63 = vpop.permute.xlu1 %9268  ;;  %v9420_v26 = vld [vmem:[#allocation6 + $0x1a0] sm:$0xff]  ;;  %vm14830_vm1 = vmmov %vm14827_vm5 }
 0x972   : > { %v7671_v24 = vsel %vm3832_vm12, %v7639_v8, %v7368_v58  ;;  %9343 = vrot.lane.b32.xlu0 %v9337_v40, %s14714_s14 }
 0x973   : > { %8405 = vmatprep.mubr.msk.f32.mxu0 %vm7720_vm13, %v7671_v24  ;;  %7387 = vrot.lane.b32.xlu1 %v13992_v7, %s9450_s27 }
 0x974   : > { %v9249_v1 = vpop.permute.xlu0 %9248  ;;  %7967 = vmatmul.mubr.f32.gmra.mrb[66].mxu0 %v7575_v48 }
 0x975   : > { %v14001_v15 = vpop.permute.xlu1 %7179  ;;  %v9250_v47 = vunpack.i.l.bf16 %v9249_v1  ;;  %v9251_v36 = vunpack.i.h.bf16 %v9249_v1  ;;  %v9421_v1 = vld [vmem:[#allocation6 + $0xe0] sm:$0xff] }
 0x976   : > { %9353 = vrot.lane.b32.xlu0 %v9352_v18, %s9456_s22 }
 0x977   : > { %7293 = vrot.lane.b32.xlu1 %v14008_v41, %s14734_s29  ;;  %v7447_v3 = vsel %vm560_vm6, %v9419_v50, %v9250_v47  ;;  %v7448_v18 = vsel %vm560_vm6, %v9421_v1, %v9251_v36 }
 0x978   : > { %v7082_v20 = vpop.permute.xlu0 %7081  ;;  %v7479_v27 = vsel %vm14819_vm14, %v7447_v3, %v9255_v14  ;;  %v7480_v38 = vsel %vm14827_vm5, %v7448_v18, %v9256_v39  ;;  %v9271_v18 = vunpack.i.h.bf16 %v13986_v63  ;;  %vm14831_vm14 = vmmov %vm14830_vm1 }
 0x979   : > { %v14015_v25 = vpop.permute.xlu1 %7183  ;;  %v7511_v16 = vsel %vm3857_vm0, %v7479_v27, %v9240_v42  ;;  %v7608_v23 = vsel %vm1826_vm9, %v7082_v20, %v13877_v12  ;;  %v6642_v12 = vsel %vm14826_vm4, %v6639_v46, %v6641_v31  ;;  %v9241_v46 = vunpack.i.h.bf16 %v13919_v9  ;;  %vm14832_vm4 = vmmov %vm14830_vm1 }
 0x97a   : > { %9358 = vrot.lane.b32.xlu0 %v9357_v4, %s9456_s22  ;;  %vm14833_vm5 = vmmov %vm14830_vm1 }
 0x97b   : > { %7389 = vrot.lane.b32.xlu1 %v14019_v30, %s9450_s27 }
 0x97c   : > { %v14023_v40 = vpop.permute.xlu0 %9258 }
 0x97d   : > { %v14028_v5 = vpop.permute.xlu1 %7185  ;;  %v9260_v34 = vunpack.i.l.bf16 %v14023_v40  ;;  %v9261_v47 = vunpack.i.h.bf16 %v14023_v40 }
 0x97e   : > { %7291 = vrot.lane.b32.xlu0 %v6554_v21, %s14734_s29 }
 0x97f   : > { %7391 = vrot.lane.b32.xlu1 %v14032_v19, %s9450_s27  ;;  %v7883_v62 = vpop.f32.mrb[32].mxu0  ;;  %v7543_v45 = vsel %vm4422_vm10, %v7511_v16, %v9260_v34 }
 0x980   : > { %v14037_v58 = vpop.permute.xlu0 %7083  ;;  %v7885_v17 = vpop.f32.mrb[33].mxu0  ;;  %v7576_v53 = vsel %vm7557_vm2, %v7543_v45, %v7082_v20  ;;  %v7512_v20 = vsel %vm3857_vm0, %v7480_v38, %v9241_v46 }
 0x981   : > { %v14041_v57 = vpop.permute.xlu1 %7189  ;;  %v7609_v40 = vsel %vm1826_vm9, %v14037_v58, %v14001_v15  ;;  %v7544_v3 = vsel %vm4422_vm10, %v7512_v20, %v9261_v47 }
 0x982   : > { %7101 = vrot.lane.b32.xlu0 %v6632_v51, %s9457_s24  ;;  %v7884_v51 = vadd.f32 %v14047_v43, %v7883_v62  ;;  %v6654_v62 = vrot.slane %v14084_v54, 1  ;;  %v7577_v15 = vsel %vm7557_vm2, %v7544_v3, %v14037_v58 }
 0x983   : > { %9373 = vrot.lane.b32.xlu1 %v9372_v11, %s14549_s16 }
 0x984   : > { %v14053_v10 = vpop.permute.xlu0 %9263  ;;  %v8042_v32 = vmax.f32 %v7884_v51, 0.0  ;;  %v6655_v34 = vsel %vm14828_vm7, %v6652_v13, %v6654_v62  ;;  %v9422_v51 = vld [vmem:[#allocation6 + $0xf0] sm:$0xff]  ;;  %vm14834_vm7 = vmmov %vm14830_vm1 }
 0x985   : > { %v7274_v59 = vpop.permute.xlu1 %7273  ;;  %v9265_v27 = vunpack.i.l.bf16 %v14053_v10 }
 0x986   : > { %9363 = vrot.lane.b32.xlu0 %v9362_v28, %s9453_s30  ;;  %v7888_v22 = vpop.f32.mrb[34].mxu0  ;;  %v7640_v61 = vsel %vm3806_vm8, %v7608_v23, %v7274_v59 }
 0x987   : > { %7203 = vrot.lane.b32.xlu1 %v9420_v26, %s9441_s17  ;;  %v7889_v8 = vadd.f32 %v14047_v43, %v7888_v22  ;;  %v7890_v24 = vpop.f32.mrb[35].mxu0  ;;  %v9270_v22 = vunpack.i.l.bf16 %v13986_v63  ;;  %v9266_v26 = vunpack.i.h.bf16 %v14053_v10 }
 0x988   : > { %v14064_v48 = vpop.permute.xlu0 %9273  ;;  %v9423_v24 = vld [vmem:[#allocation6 + $0xf8] sm:$0xff] }
 0x989   : > { %v7370_v33 = vpop.permute.xlu1 %7369  ;;  %v8043_v4 = vmax.f32 %v7889_v8, 0.0  ;;  %v9275_v31 = vunpack.i.l.bf16 %v14064_v48  ;;  %v7450_v45 = vsel %vm560_vm6, %v9423_v24, %v9266_v26  ;;  %v9276_v1 = vunpack.i.h.bf16 %v14064_v48 }
 0x98a   : > { %7103 = vrot.lane.b32.xlu0 %v13992_v7, %s9457_s24  ;;  %v7672_v2 = vsel %vm3832_vm12, %v7640_v61, %v7370_v33  ;;  %v6659_v48 = vrot.slane %v14084_v54, 2 }
 0x98b   : > { %7011 = vrot.lane.b32.xlu1 %v6642_v12, %s9453_s30  ;;  %8406 = vmatprep.mubr.msk.f32.mxu0 %vm7720_vm13, %v7672_v2  ;;  %v14080_v21 = vpack.c.bf16 %v8043_v4, %v8042_v32 }
 0x98c   : > { %v14082_v14 = vpop.permute.xlu0 %9278  ;;  %7972 = vmatmul.mubr.f32.gmra.mrb[68].mxu0 %v7576_v53 }
 0x98d   : > { %v7372_v7 = vpop.permute.xlu1 %7371 }
 0x98e   : > { %7295 = vrot.lane.b32.xlu0 %v6642_v12, %s14734_s29 }
 0x990   : > { %v7276_v50 = vpop.permute.xlu0 %7275 }
 0x991   : > { %v7641_v11 = vsel %vm3806_vm8, %v7609_v40, %v7276_v50  ;;  %v7278_v17 = vpop.permute.xlu1 %7277 }
 0x992   : > { %9368 = vrot.lane.b32.xlu0 %v9362_v28, %s14714_s14  ;;  %v7673_v9 = vsel %vm3832_vm12, %v7641_v11, %v7372_v7  ;;  %v7449_v28 = vsel %vm560_vm6, %v9422_v51, %v9265_v27  ;;  %v9424_v51 = vld [vmem:[#allocation6 + $0x108] sm:$0xff]  ;;  %s8456_s14 = sshll.u32 %s14843_s26, 3 }
 0x993   : > { %8407 = vmatprep.mubr.msk.f32.mxu0 %vm7720_vm13, %v7673_v9  ;;  %v7481_v39 = vsel %vm14829_vm15, %v7449_v28, %v9270_v22  ;;  %vm14835_vm15 = vmmov %vm14830_vm1  ;;  %s440_s21 = scalar_lea.vmem %s14397_s13, %s8456_s14 }
 0x994   : > { %v7086_v42 = vpop.permute.xlu0 %7085  ;;  %7977 = vmatmul.mubr.f32.gmra.mrb[70].mxu0 %v7577_v15  ;;  %v7513_v8 = vsel %vm3857_vm0, %v7481_v39, %v9275_v31 }
 0x995   : > { %v7610_v36 = vsel %vm1826_vm9, %v7086_v42, %v13889_v56  ;;  %v7374_v59 = vpop.permute.xlu1 %7373 }
 0x996   : > { %7299 = vrot.lane.b32.xlu0 %v6655_v34, %s14734_s29  ;;  %v7642_v13 = vsel %vm3806_vm8, %v7610_v36, %v7278_v17 }
 0x997   : > { %v7674_v58 = vsel %vm3832_vm12, %v7642_v13, %v7374_v59 }
 0x998   : > { %v9284_v16 = vpop.permute.xlu0 %9283  ;;  %8408 = vmatprep.mubr.msk.f32.mxu0 %vm7720_vm13, %v7674_v58 }
 0x999   : > { %v9285_v56 = vunpack.i.l.bf16 %v9284_v16  ;;  %v7376_v23 = vpop.permute.xlu1 %7375  ;;  %v9286_v61 = vunpack.i.h.bf16 %v9284_v16  ;;  %v9280_v16 = vunpack.i.l.bf16 %v14082_v14 }
 0x99a   : > { %7105 = vrot.lane.b32.xlu0 %v14019_v30, %s9457_s24  ;;  %v7482_v30 = vsel %vm14830_vm1, %v7450_v45, %v9271_v18 }
 0x99b   : > { %v7545_v10 = vsel %vm4422_vm10, %v7513_v8, %v9285_v56  ;;  %v7514_v12 = vsel %vm3857_vm0, %v7482_v30, %v9276_v1 }
 0x99c   : > { %v7088_v33 = vpop.permute.xlu0 %7087  ;;  %v7578_v32 = vsel %vm7557_vm2, %v7545_v10, %v7086_v42  ;;  %v7546_v38 = vsel %vm4422_vm10, %v7514_v12, %v9286_v61 }
 0x99d   : > { %7982 = vmatmul.mubr.f32.gmra.mrb[72].mxu0 %v7578_v32  ;;  %v14123_v4 = vpop.permute.xlu1 %9293  ;;  %v7611_v63 = vsel %vm1826_vm9, %v7088_v33, %v14015_v25  ;;  %v7579_v54 = vsel %vm7557_vm2, %v7546_v38, %v7088_v33  ;;  %v6660_v25 = vsel %vm14825_vm11, %v6657_v60, %v6659_v48  ;;  %vm14836_vm11 = vmmov %vm14830_vm1 }
 0x99e   : > { %7009 = vrot.lane.b32.xlu0 %v14008_v41, %s9453_s30  ;;  %v9295_v42 = vunpack.i.l.bf16 %v14123_v4  ;;  %v9296_v45 = vunpack.i.h.bf16 %v14123_v4 }
 0x99f   : > { %v7893_v2 = vpop.f32.mrb[36].mxu0 }
 0x9a0   : > { %v7280_v53 = vpop.permute.xlu0 %7279  ;;  %v7895_v47 = vpop.f32.mrb[37].mxu0  ;;  %v7894_v40 = vadd.f32 %v14047_v43, %v7893_v2 }
 0x9a1   : > { %v7643_v46 = vsel %vm3806_vm8, %v7611_v63, %v7280_v53  ;;  %v14134_v7 = vpop.permute.xlu1 %9308 }
 0x9a2   : > { %v7675_v41 = vsel %vm3832_vm12, %v7643_v46, %v7376_v23  ;;  %7107 = vrot.lane.b32.xlu0 %v14032_v19, %s9457_s24  ;;  %v8044_v27 = vmax.f32 %v7894_v40, 0.0 }
 0x9a3   : > { %8409 = vmatprep.mubr.msk.f32.mxu0 %vm7720_vm13, %v7675_v41 }
 0x9a4   : > { %v9289_v62 = vpop.permute.xlu0 %9288  ;;  %7987 = vmatmul.mubr.f32.gmra.mrb[74].mxu0 %v7579_v54 }
 0x9a5   : > { %v7188_v20 = vpop.permute.xlu1 %7187  ;;  %v9290_v60 = vunpack.i.l.bf16 %v9289_v62  ;;  %v9291_v56 = vunpack.i.h.bf16 %v9289_v62 }
 0x9a6   : > { %7395 = vrot.lane.b32.xlu0 %v6660_v25, %s9450_s27 }
 0x9a7   : > { %v7898_v50 = vpop.f32.mrb[38].mxu0  ;;  %v7451_v28 = vsel %vm560_vm6, %v9424_v51, %v9290_v60  ;;  %v7452_v32 = vsel %vm560_vm6, %v13666_v44, %v9291_v56  ;;  %v9281_v44 = vunpack.i.h.bf16 %v14082_v14 }
 0x9a8   : > { %v7090_v3 = vpop.permute.xlu0 %7089  ;;  %v7899_v11 = vadd.f32 %v14047_v43, %v7898_v50  ;;  %v7900_v19 = vpop.f32.mrb[39].mxu0  ;;  %v7483_v22 = vsel %vm14831_vm14, %v7451_v28, %v9295_v42  ;;  %v7484_v4 = vsel %vm14832_vm4, %v7452_v32, %v9296_v45  ;;  %vm14837_vm14 = vmmov %vm14830_vm1 }
 0x9a9   : > { %v14147_v17 = vpop.permute.xlu1 %7191  ;;  %v7515_v24 = vsel %vm3857_vm0, %v7483_v22, %v9280_v16  ;;  %v7612_v1 = vsel %vm1826_vm9, %v7090_v3, %v14028_v5  ;;  %v7516_v41 = vsel %vm3857_vm0, %v7484_v4, %v9281_v44  ;;  %v9426_v16 = vld [vmem:[#allocation6 + $0x128] sm:$0xff]  ;;  %vm14838_vm4 = vmmov %vm14830_vm1 }
 0x9aa   : > { %v8045_v9 = vmax.f32 %v7899_v11, 0.0 }
 0x9ac   : > { %v14149_v34 = vpack.c.bf16 %v8045_v9, %v8044_v27  ;;  %v9299_v37 = vpop.permute.xlu0 %9298 }
 0x9ad   : > { %v14151_v15 = vpop.permute.xlu1 %7193  ;;  %v9300_v26 = vunpack.i.l.bf16 %v9299_v37  ;;  %v9301_v53 = vunpack.i.h.bf16 %v9299_v37 }
 0x9af   : > { %v7547_v33 = vsel %vm4422_vm10, %v7515_v24, %v9300_v26  ;;  %v7548_v62 = vsel %vm4422_vm10, %v7516_v41, %v9301_v53 }
 0x9b0   : > { %v7092_v36 = vpop.permute.xlu0 %7091  ;;  %v7903_v59 = vpop.f32.mrb[40].mxu0  ;;  %v7580_v5 = vsel %vm7557_vm2, %v7547_v33, %v7090_v3 }
 0x9b1   : > { %v7905_v31 = vpop.f32.mrb[41].mxu0  ;;  %v14155_v13 = vpop.permute.xlu1 %7197  ;;  %v7904_v23 = vadd.f32 %v14047_v43, %v7903_v59  ;;  %v7613_v54 = vsel %vm1826_vm9, %v7092_v36, %v7188_v20  ;;  %v7581_v19 = vsel %vm7557_vm2, %v7548_v62, %v7092_v36  ;;  %v9425_v20 = vld [vmem:[#allocation6 + $0x120] sm:$0xff]  ;;  %v9310_v59 = vunpack.i.l.bf16 %v14134_v7  ;;  %v9427_v62 = vld [vmem:[#allocation6 + $0x138] sm:$0xff] }
 0x9b3   : > { %v8046_v2 = vmax.f32 %v7904_v23, 0.0 }
 0x9b4   : > { %v9304_v58 = vpop.permute.xlu0 %9303 }
 0x9b5   : > { %v7282_v39 = vpop.permute.xlu1 %7281  ;;  %v9305_v3 = vunpack.i.l.bf16 %v9304_v58  ;;  %v9306_v51 = vunpack.i.h.bf16 %v9304_v58 }
 0x9b6   : > { %v7644_v30 = vsel %vm3806_vm8, %v7612_v1, %v7282_v39 }
 0x9b7   : > { %v7908_v8 = vpop.f32.mrb[42].mxu0  ;;  %v7453_v37 = vsel %vm560_vm6, %v9425_v20, %v9305_v3  ;;  %v7454_v56 = vsel %vm560_vm6, %v9426_v16, %v9306_v51 }
 0x9b8   : > { %v7909_v10 = vadd.f32 %v14047_v43, %v7908_v8  ;;  %v7910_v18 = vpop.f32.mrb[43].mxu0  ;;  %v9314_v61 = vpop.permute.xlu0 %9313  ;;  %v7485_v22 = vsel %vm14833_vm5, %v7453_v37, %v9310_v59  ;;  %v9311_v8 = vunpack.i.h.bf16 %v14134_v7  ;;  %vm14839_vm5 = vmmov %vm14830_vm1 }
 0x9b9   : > { %v7378_v12 = vpop.permute.xlu1 %7377  ;;  %v9315_v60 = vunpack.i.l.bf16 %v9314_v61  ;;  %v9316_v39 = vunpack.i.h.bf16 %v9314_v61 }
 0x9ba   : > { %v8047_v48 = vmax.f32 %v7909_v10, 0.0  ;;  %v7676_v63 = vsel %vm3832_vm12, %v7644_v30, %v7378_v12  ;;  %v7486_v10 = vsel %vm14834_vm7, %v7454_v56, %v9311_v8 }
 0x9bb   : > { %8410 = vmatprep.mubr.msk.f32.mxu0 %vm7720_vm13, %v7676_v63  ;;  %v7518_v18 = vsel %vm3857_vm0, %v7486_v10, %v9316_v39 }
 0x9bc   : > { %v14173_v38 = vpack.c.bf16 %v8047_v48, %v8046_v2  ;;  %v14175_v47 = vpop.permute.xlu0 %9318  ;;  %7992 = vmatmul.mubr.f32.gmra.mrb[76].mxu0 %v7580_v5 }
 0x9bd   : > { %v7380_v46 = vpop.permute.xlu1 %7379 }
 0x9c0   : > { %v7284_v25 = vpop.permute.xlu0 %7283 }
 0x9c1   : > { %v7645_v40 = vsel %vm3806_vm8, %v7613_v54, %v7284_v25  ;;  %v7286_v50 = vpop.permute.xlu1 %7285 }
 0x9c2   : > { %v7677_v11 = vsel %vm3832_vm12, %v7645_v40, %v7380_v46 }
 0x9c3   : > { %8411 = vmatprep.mubr.msk.f32.mxu0 %vm7720_vm13, %v7677_v11 }
 0x9c4   : > { %v7094_v27 = vpop.permute.xlu0 %7093  ;;  %7997 = vmatmul.mubr.f32.gmra.mrb[78].mxu0 %v7581_v19 }
 0x9c5   : > { %v7614_v14 = vsel %vm1826_vm9, %v7094_v27, %v14041_v57  ;;  %v7382_v9 = vpop.permute.xlu1 %7381  ;;  %v7517_v57 = vsel %vm3857_vm0, %v7485_v22, %v9315_v60 }
 0x9c6   : > { %v7646_v42 = vsel %vm3806_vm8, %v7614_v14, %v7286_v50 }
 0x9c7   : > { %v7678_v28 = vsel %vm3832_vm12, %v7646_v42, %v7382_v9  ;;  %v9320_v9 = vunpack.i.l.bf16 %v14175_v47 }
 0x9c8   : > { %v9324_v31 = vpop.permute.xlu0 %9323  ;;  %8412 = vmatprep.mubr.msk.f32.mxu0 %vm7720_vm13, %v7678_v28 }
 0x9c9   : > { %v9325_v36 = vunpack.i.l.bf16 %v9324_v31  ;;  %v7384_v26 = vpop.permute.xlu1 %7383  ;;  %v9326_v58 = vunpack.i.h.bf16 %v9324_v31 }
 0x9cb   : > { %v7549_v23 = vsel %vm4422_vm10, %v7517_v57, %v9325_v36  ;;  %v7550_v61 = vsel %vm4422_vm10, %v7518_v18, %v9326_v58 }
 0x9cc   : > { %v7096_v24 = vpop.permute.xlu0 %7095  ;;  %v7582_v45 = vsel %vm7557_vm2, %v7549_v23, %v7094_v27 }
 0x9cd   : > { %8002 = vmatmul.mubr.f32.gmra.mrb[80].mxu0 %v7582_v45  ;;  %v9334_v1 = vpop.permute.xlu1 %9333  ;;  %v7615_v32 = vsel %vm1826_vm9, %v7096_v24, %v14147_v17  ;;  %v7583_v63 = vsel %vm7557_vm2, %v7550_v61, %v7096_v24 }
 0x9ce   : > { %v9335_v46 = vunpack.i.l.bf16 %v9334_v1  ;;  %v9336_v23 = vunpack.i.h.bf16 %v9334_v1 }
 0x9cf   : > { %v7913_v33 = vpop.f32.mrb[44].mxu0 }
 0x9d0   : > { %v7288_v30 = vpop.permute.xlu0 %7287  ;;  %v7915_v12 = vpop.f32.mrb[45].mxu0  ;;  %v7914_v17 = vadd.f32 %v14047_v43, %v7913_v33 }
 0x9d1   : > { %v7647_v7 = vsel %vm3806_vm8, %v7615_v32, %v7288_v30  ;;  %v14204_v2 = vpop.permute.xlu1 %9348 }
 0x9d2   : > { %v7679_v48 = vsel %vm3832_vm12, %v7647_v7, %v7384_v26  ;;  %v8048_v3 = vmax.f32 %v7914_v17, 0.0  ;;  %v9321_v7 = vunpack.i.h.bf16 %v14175_v47 }
 0x9d3   : > { %8413 = vmatprep.mubr.msk.f32.mxu0 %vm7720_vm13, %v7679_v48 }
 0x9d4   : > { %v9329_v5 = vpop.permute.xlu0 %9328  ;;  %8007 = vmatmul.mubr.f32.gmra.mrb[82].mxu0 %v7583_v63 }
 0x9d5   : > { %v9330_v4 = vunpack.i.l.bf16 %v9329_v5  ;;  %v7196_v53 = vpop.permute.xlu1 %7195  ;;  %v9331_v56 = vunpack.i.h.bf16 %v9329_v5 }
 0x9d7   : > { %v7918_v44 = vpop.f32.mrb[46].mxu0  ;;  %v7455_v40 = vsel %vm560_vm6, %v9427_v62, %v9330_v4  ;;  %v7456_v45 = vsel %vm560_vm6, %v13800_v35, %v9331_v56 }
 0x9d8   : > { %v7098_v41 = vpop.permute.xlu0 %7097  ;;  %v7919_v54 = vadd.f32 %v14047_v43, %v7918_v44  ;;  %v7920_v25 = vpop.f32.mrb[47].mxu0  ;;  %v7487_v19 = vsel %vm14835_vm15, %v7455_v40, %v9335_v46  ;;  %v7488_v32 = vsel %vm14830_vm1, %v7456_v45, %v9336_v23 }
 0x9d9   : > { %v14212_v50 = vpop.permute.xlu1 %7199  ;;  %v7519_v60 = vsel %vm3857_vm0, %v7487_v19, %v9320_v9  ;;  %v7616_v42 = vsel %vm1826_vm9, %v7098_v41, %v14151_v15  ;;  %v7520_v1 = vsel %vm3857_vm0, %v7488_v32, %v9321_v7 }
 0x9da   : > { %v8049_v11 = vmax.f32 %v7919_v54, 0.0  ;;  %v9428_v54 = vld [vmem:[#allocation6 + $0x150] sm:$0xff] }
 0x9dc   : > { %v14215_v27 = vpack.c.bf16 %v8049_v11, %v8048_v3  ;;  %v9339_v14 = vpop.permute.xlu0 %9338  ;;  %v9350_v3 = vunpack.i.l.bf16 %v14204_v2 }
 0x9dd   : > { %v9340_v20 = vunpack.i.l.bf16 %v9339_v14  ;;  %v7290_v37 = vpop.permute.xlu1 %7289  ;;  %v9341_v30 = vunpack.i.h.bf16 %v9339_v14 }
 0x9de   : > { %v7648_v36 = vsel %vm3806_vm8, %v7616_v42, %v7290_v37 }
 0x9df   : > { %v7551_v28 = vsel %vm4422_vm10, %v7519_v60, %v9340_v20  ;;  %v7552_v35 = vsel %vm4422_vm10, %v7520_v1, %v9341_v30 }
 0x9e0   : > { %v7100_v59 = vpop.permute.xlu0 %7099  ;;  %v7923_v51 = vpop.f32.mrb[48].mxu0  ;;  %v7584_v57 = vsel %vm7557_vm2, %v7551_v28, %v7098_v41 }
 0x9e1   : > { %v7925_v31 = vpop.f32.mrb[49].mxu0  ;;  %v7386_v22 = vpop.permute.xlu1 %7385  ;;  %v7924_v39 = vadd.f32 %v14047_v43, %v7923_v51  ;;  %v7617_v48 = vsel %vm1826_vm9, %v7100_v59, %v7196_v53  ;;  %v7585_v46 = vsel %vm7557_vm2, %v7552_v35, %v7100_v59  ;;  %v9351_v59 = vunpack.i.h.bf16 %v14204_v2 }
 0x9e2   : > { %v7680_v26 = vsel %vm3832_vm12, %v7648_v36, %v7386_v22 }
 0x9e3   : > { %8414 = vmatprep.mubr.msk.f32.mxu0 %vm7720_vm13, %v7680_v26  ;;  %v8050_v10 = vmax.f32 %v7924_v39, 0.0 }
 0x9e4   : > { %v9344_v16 = vpop.permute.xlu0 %9343  ;;  %8012 = vmatmul.mubr.f32.gmra.mrb[84].mxu0 %v7584_v57 }
 0x9e5   : > { %v7388_v33 = vpop.permute.xlu1 %7387  ;;  %v9345_v17 = vunpack.i.l.bf16 %v9344_v16  ;;  %v9346_v11 = vunpack.i.h.bf16 %v9344_v16 }
 0x9e7   : > { %v7928_v15 = vpop.f32.mrb[50].mxu0  ;;  %v7457_v53 = vsel %vm560_vm6, %v9428_v54, %v9345_v17  ;;  %v7458_v37 = vsel %vm560_vm6, %v13812_v49, %v9346_v11 }
 0x9e8   : > { %v7929_v8 = vadd.f32 %v14047_v43, %v7928_v15  ;;  %v9354_v58 = vpop.permute.xlu0 %9353  ;;  %v7930_v24 = vpop.f32.mrb[51].mxu0  ;;  %v7489_v20 = vsel %vm14836_vm11, %v7457_v53, %v9350_v3  ;;  %v7490_v36 = vsel %vm14837_vm14, %v7458_v37, %v9351_v59 }
 0x9e9   : > { %v7294_v5 = vpop.permute.xlu1 %7293  ;;  %v9355_v25 = vunpack.i.l.bf16 %v9354_v58  ;;  %v9356_v60 = vunpack.i.h.bf16 %v9354_v58 }
 0x9ea   : > { %v8051_v18 = vmax.f32 %v7929_v8, 0.0 }
 0x9eb   : > { %v7522_v22 = vsel %vm3857_vm0, %v7490_v36, %v9356_v60 }
 0x9ec   : > { %v14231_v61 = vpack.c.bf16 %v8051_v18, %v8050_v10  ;;  %v14233_v12 = vpop.permute.xlu0 %9358 }
 0x9ed   : > { %v7390_v40 = vpop.permute.xlu1 %7389  ;;  %v9360_v17 = vunpack.i.l.bf16 %v14233_v12 }
 0x9f0   : > { %v7292_v63 = vpop.permute.xlu0 %7291 }
 0x9f1   : > { %v7649_v4 = vsel %vm3806_vm8, %v7617_v48, %v7292_v63  ;;  %v7392_v39 = vpop.permute.xlu1 %7391 }
 0x9f2   : > { %v7681_v44 = vsel %vm3832_vm12, %v7649_v4, %v7388_v33 }
 0x9f3   : > { %8415 = vmatprep.mubr.msk.f32.mxu0 %vm7720_vm13, %v7681_v44 }
 0x9f4   : > { %v7102_v41 = vpop.permute.xlu0 %7101  ;;  %8017 = vmatmul.mubr.f32.gmra.mrb[86].mxu0 %v7585_v46 }
 0x9f5   : > { %v7618_v47 = vsel %vm1826_vm9, %v7102_v41, %v14155_v13  ;;  %v7521_v13 = vsel %vm3857_vm0, %v7489_v20, %v9355_v25  ;;  %v9374_v45 = vpop.permute.xlu1 %9373 }
 0x9f6   : > { %v7650_v62 = vsel %vm3806_vm8, %v7618_v47, %v7294_v5  ;;  %v9375_v1 = vunpack.i.l.bf16 %v9374_v45 }
 0x9f7   : > { %v7682_v19 = vsel %vm3832_vm12, %v7650_v62, %v7390_v40 }
 0x9f8   : > { %v9364_v14 = vpop.permute.xlu0 %9363  ;;  %8416 = vmatprep.mubr.msk.f32.mxu0 %vm7720_vm13, %v7682_v19 }
 0x9f9   : > { %v9365_v9 = vunpack.i.l.bf16 %v9364_v14  ;;  %v9366_v51 = vunpack.i.h.bf16 %v9364_v14  ;;  %v7204_v53 = vpop.permute.xlu1 %7203 }
 0x9fb   : > { %v7553_v42 = vsel %vm4422_vm10, %v7521_v13, %v9365_v9  ;;  %v7554_v49 = vsel %vm4422_vm10, %v7522_v22, %v9366_v51 }
 0x9fc   : > { %v7104_v28 = vpop.permute.xlu0 %7103  ;;  %v7586_v31 = vsel %vm7557_vm2, %v7553_v42, %v7102_v41 }
 0x9fd   : > { %8022 = vmatmul.mubr.f32.gmra.mrb[88].mxu0 %v7586_v31  ;;  %v7619_v57 = vsel %vm1826_vm9, %v7104_v28, %v14212_v50  ;;  %v7587_v23 = vsel %vm7557_vm2, %v7554_v49, %v7104_v28  ;;  %v7012_v14 = vpop.permute.xlu1 %7011 }
 0x9ff   : > { %v7933_v26 = vpop.f32.mrb[52].mxu0 }
 0xa00   : > { %v7296_v16 = vpop.permute.xlu0 %7295  ;;  %v7935_v56 = vpop.f32.mrb[53].mxu0  ;;  %v7934_v24 = vadd.f32 %v14047_v43, %v7933_v26 }
 0xa01   : > { %v7651_v2 = vsel %vm3806_vm8, %v7619_v57, %v7296_v16 }
 0xa02   : > { %v7683_v15 = vsel %vm3832_vm12, %v7651_v2, %v7392_v39  ;;  %v8052_v30 = vmax.f32 %v7934_v24, 0.0 }
 0xa03   : > { %8417 = vmatprep.mubr.msk.f32.mxu0 %vm7720_vm13, %v7683_v15 }
 0xa04   : > { %v9369_v8 = vpop.permute.xlu0 %9368  ;;  %8027 = vmatmul.mubr.f32.gmra.mrb[90].mxu0 %v7587_v23 }
 0xa05   : > { %v9370_v58 = vunpack.i.l.bf16 %v9369_v8  ;;  %v9371_v48 = vunpack.i.h.bf16 %v9369_v8 }
 0xa07   : > { %v7938_v50 = vpop.f32.mrb[54].mxu0  ;;  %v7459_v32 = vsel %vm560_vm6, %v13824_v55, %v9370_v58  ;;  %v7460_v46 = vsel %vm560_vm6, %v13934_v29, %v9371_v48  ;;  %vm14307_vm6 = vmpackc.low %vm487_vm3, %vm487_vm3 }
 0xa08   : > { %v7300_v10 = vpop.permute.xlu0 %7299  ;;  %v7939_v18 = vadd.f32 %v14047_v43, %v7938_v50  ;;  %v7940_v33 = vpop.f32.mrb[55].mxu0  ;;  %v7491_v4 = vsel %vm14838_vm4, %v7459_v32, %v9375_v1 }
 0xa09   : > { %v7523_v47 = vsel %vm3857_vm0, %v7491_v4, %v9360_v17 }
 0xa0a   : > { %v8053_v7 = vmax.f32 %v7939_v18, 0.0 }
 0xa0c   : > { %v14270_v63 = vpack.c.bf16 %v8053_v7, %v8052_v30  ;;  %v7106_v5 = vpop.permute.xlu0 %7105 }
 0xa0d   : > { %v7620_v35 = vsel %vm1826_vm9, %v7106_v5, %v12830_v52  ;;  %v9376_v52 = vunpack.i.h.bf16 %v9374_v45 }
 0xa0e   : > { %v7652_v44 = vsel %vm3806_vm8, %v7620_v35, %v12833_v0 }
 0xa0f   : > { %v7684_v55 = vsel %vm3832_vm12, %v7652_v44, %v12842_v6  ;;  %v7492_v0 = vsel %vm14839_vm5, %v7460_v46, %v9376_v52  ;;  %v9361_v6 = vunpack.i.h.bf16 %v14233_v12  ;;  %v14327_v46 = vld [vmem:[%s14395_s11] sm:$0x7] }
 0xa10   : > { %v7010_v41 = vpop.permute.xlu0 %7009  ;;  %8418 = vmatprep.mubr.msk.f32.mxu0 %vm7720_vm13, %v7684_v55  ;;  %v7943_v54 = vpop.f32.mrb[56].mxu0  ;;  %8599 = vmatprep.mubr.msk.f32.mxu1 %vm487_vm3, %v14327_v46 }
 0xa11   : > { %v7555_v25 = vsel %vm4422_vm10, %v7523_v47, %v7010_v41  ;;  %v7945_v62 = vpop.f32.mrb[57].mxu0  ;;  %v7524_v11 = vsel %vm3857_vm0, %v7492_v0, %v9361_v6  ;;  %v7944_v19 = vadd.f32 %v14047_v43, %v7943_v54 }
 0xa12   : > { %v7588_v40 = vsel %vm7557_vm2, %v7555_v25, %v7106_v5  ;;  %v7556_v42 = vsel %vm4422_vm10, %v7524_v11, %v7012_v14  ;;  %v9458_v62 = vmov 0  }
 0xa13   : > { %8032 = vmatmul.mubr.f32.gmra.mrb[92].mxu0 %v7588_v40  ;;  %v8054_v12 = vmax.f32 %v7944_v19, 0.0  ;;  %9377 = vset.pattern.permute.xlu1 %v9458_v62 }
 0xa14   : > { %v7108_v3 = vpop.permute.xlu0 %7107  ;;  %9378 = vset.pattern.permute.xlu0 %v9458_v62 }
 0xa15   : > { %v7621_v29 = vsel %vm1826_vm9, %v7108_v3, %v7204_v53  ;;  %v7589_v28 = vsel %vm7557_vm2, %v7556_v42, %v7108_v3 }
 0xa16   : > { %v7653_v37 = vsel %vm3806_vm8, %v7621_v29, %v7300_v10 }
 0xa17   : > { %v7948_v9 = vpop.f32.mrb[58].mxu0 }
 0xa18   : > { %v7949_v20 = vadd.f32 %v14047_v43, %v7948_v9  ;;  %v7396_v13 = vpop.permute.xlu0 %7395  ;;  %v7950_v60 = vpop.f32.mrb[59].mxu0 }
 0xa19   : > { %v7685_v59 = vsel %vm3832_vm12, %v7653_v37, %v7396_v13 }
 0xa1a   : > { %v8055_v51 = vmax.f32 %v7949_v20, 0.0  ;;  %8419 = vmatprep.mubr.msk.f32.mxu0 %vm7720_vm13, %v7685_v59 }
 0xa1b   : > { %8037 = vmatmul.mubr.f32.gmra.mrb[94].mxu0 %v7589_v28 }
 0xa1c   : > { %v14297_v31 = vpack.c.bf16 %v8055_v51, %v8054_v12 }
 0xa2f   : > { %v7953_v36 = vpop.f32.mrb[60].mxu0 }
 0xa30   : > { %v7955_v22 = vpop.f32.mrb[61].mxu0  ;;  %v7954_v26 = vadd.f32 %v14047_v43, %v7953_v36 }
 0xa32   : > { %v8056_v56 = vmax.f32 %v7954_v26, 0.0 }
 0xa37   : > { %v7958_v57 = vpop.f32.mrb[62].mxu0 }
 0xa38   : > { %v7959_v16 = vadd.f32 %v14047_v43, %v7958_v57  ;;  %v7960_v49 = vpop.f32.mrb[63].mxu0 }
 0xa3a   : > { %v8057_v39 = vmax.f32 %v7959_v16, 0.0 }
 0xa3c   : > { %v14301_v2 = vpack.c.bf16 %v8057_v39, %v8056_v56 }
 0xa40   : > { %v7963_v15 = vpop.f32.mrb[64].mxu0 }
 0xa41   : > { %v7965_v23 = vpop.f32.mrb[65].mxu0  ;;  %v7964_v8 = vadd.f32 %v14047_v43, %v7963_v15 }
 0xa43   : > { %v8058_v50 = vmax.f32 %v7964_v8, 0.0 }
 0xa47   : > { %v7968_v58 = vpop.f32.mrb[66].mxu0 }
 0xa48   : > { %v7969_v24 = vadd.f32 %v14047_v43, %v7968_v58  ;;  %v7970_v45 = vpop.f32.mrb[67].mxu0 }
 0xa4a   : > { %v8059_v10 = vmax.f32 %v7969_v24, 0.0 }
 0xa4c   : > { %v8844_v33 = vpack.c.bf16 %v8059_v10, %v8058_v50 }
 0xa4e   : > { %8846 = vmatprep.subr.msk.bf16.mxu1 %vm14307_vm6, %v8844_v33 }
 0xa4f   : > { %8849 = vmatpush3.bf16.xpose.msk.msra.mxu1 %vm14307_vm6, %v14080_v21 }
 0xa5f   : > { %v7973_v32 = vpop.f32.mrb[68].mxu0 }
 0xa60   : > { %v7975_v30 = vpop.f32.mrb[69].mxu0  ;;  %v7974_v7 = vadd.f32 %v14047_v43, %v7973_v32 }
 0xa62   : > { %v8060_v35 = vmax.f32 %v7974_v7, 0.0 }
 0xa67   : > { %v7978_v1 = vpop.f32.mrb[70].mxu0 }
 0xa68   : > { %v7979_v48 = vadd.f32 %v14047_v43, %v7978_v1  ;;  %v7980_v5 = vpop.f32.mrb[71].mxu0 }
 0xa6a   : > { %v8061_v4 = vmax.f32 %v7979_v48, 0.0 }
 0xa6c   : > { %v8850_v17 = vpack.c.bf16 %v8061_v4, %v8060_v35 }
 0xa6e   : > { %8852 = vmatprep.subr.msk.bf16.mxu1 %vm14307_vm6, %v8850_v17 }
 0xa6f   : > { %8855 = vmatpush3.bf16.xpose.msk.msra.mxu1 %vm14307_vm6, %v14149_v34  ;;  %v8075_v34 = vld [vmem:[%s14396_s12] sm:$0x7] }
 0xa70   : > { %v7983_v44 = vpop.f32.mrb[72].mxu0  ;;  %8078 = vperm.xlu1 %9377, %v8075_v34  }
 0xa71   : > { %v7985_v21 = vpop.f32.mrb[73].mxu0  ;;  %v7984_v55 = vadd.f32 %v14047_v43, %v7983_v44 }
 0xa73   : > { %v8062_v52 = vmax.f32 %v7984_v55, 0.0 }
 0xa77   : > { %v7988_v41 = vpop.f32.mrb[74].mxu0 }
 0xa78   : > { %v7989_v47 = vadd.f32 %v14047_v43, %v7988_v41  ;;  %v7990_v54 = vpop.f32.mrb[75].mxu0 }
 0xa7a   : > { %v8063_v53 = vmax.f32 %v7989_v47, 0.0 }
 0xa7c   : > { %v8856_v25 = vpack.c.bf16 %v8063_v53, %v8062_v52 }
 0xa7e   : > { %8858 = vmatprep.subr.msk.bf16.mxu1 %vm14307_vm6, %v8856_v25 }
 0xa7f   : > { %8861 = vmatpush3.bf16.xpose.msk.msra.mxu1 %vm14307_vm6, %v14173_v38 }
 0xa8f   : > { %v7993_v40 = vpop.f32.mrb[76].mxu0 }
 0xa90   : > { %v7995_v0 = vpop.f32.mrb[77].mxu0  ;;  %v7994_v6 = vadd.f32 %v14047_v43, %v7993_v40 }
 0xa92   : > { %v8064_v19 = vmax.f32 %v7994_v6, 0.0 }
 0xa97   : > { %v7998_v3 = vpop.f32.mrb[78].mxu0 }
 0xa98   : > { %v7999_v29 = vadd.f32 %v14047_v43, %v7998_v3  ;;  %v8000_v11 = vpop.f32.mrb[79].mxu0 }
 0xa9a   : > { %v8065_v14 = vmax.f32 %v7999_v29, 0.0 }
 0xa9c   : > { %v8862_v9 = vpack.c.bf16 %v8065_v14, %v8064_v19 }
 0xa9e   : > { %8864 = vmatprep.subr.msk.bf16.mxu1 %vm14307_vm6, %v8862_v9 }
 0xa9f   : > { %8867 = vmatpush3.bf16.xpose.msk.msra.mxu1 %vm14307_vm6, %v14215_v27 }
 0xaa0   : > { %v8003_v38 = vpop.f32.mrb[80].mxu0 }
 0xaa1   : > { %v8005_v20 = vpop.f32.mrb[81].mxu0  ;;  %v8004_v13 = vadd.f32 %v14047_v43, %v8003_v38 }
 0xaa3   : > { %v8066_v59 = vmax.f32 %v8004_v13, 0.0 }
 0xaa7   : > { %v8008_v37 = vpop.f32.mrb[82].mxu0 }
 0xaa8   : > { %v8009_v60 = vadd.f32 %v14047_v43, %v8008_v37  ;;  %v8010_v42 = vpop.f32.mrb[83].mxu0 }
 0xaaa   : > { %v8067_v12 = vmax.f32 %v8009_v60, 0.0 }
 0xaac   : > { %v8868_v51 = vpack.c.bf16 %v8067_v12, %v8066_v59 }
 0xaae   : > { %8870 = vmatprep.subr.msk.bf16.mxu1 %vm14307_vm6, %v8868_v51 }
 0xaaf   : > { %8873 = vmatpush3.bf16.xpose.msk.msra.mxu1 %vm14307_vm6, %v14231_v61 }
 0xab7   : > { %v8013_v28 = vpop.f32.mrb[84].mxu0 }
 0xab8   : > { %v8015_v27 = vpop.f32.mrb[85].mxu0  ;;  %v8014_v36 = vadd.f32 %v14047_v43, %v8013_v28 }
 0xaba   : > { %v8068_v16 = vmax.f32 %v8014_v36, 0.0 }
 0xac7   : > { %v8018_v22 = vpop.f32.mrb[86].mxu0 }
 0xac8   : > { %v8019_v26 = vadd.f32 %v14047_v43, %v8018_v22  ;;  %v8020_v57 = vpop.f32.mrb[87].mxu0 }
 0xaca   : > { %v8069_v49 = vmax.f32 %v8019_v26, 0.0 }
 0xacc   : > { %v8874_v56 = vpack.c.bf16 %v8069_v49, %v8068_v16 }
 0xace   : > { %8876 = vmatprep.subr.msk.bf16.mxu1 %vm14307_vm6, %v8874_v56 }
 0xacf   : > { %8879 = vmatpush3.bf16.xpose.msk.msra.mxu1 %vm14307_vm6, %v14270_v63 }
 0xad0   : > { %v8023_v39 = vpop.f32.mrb[88].mxu0 }
 0xad1   : > { %v8025_v61 = vpop.f32.mrb[89].mxu0  ;;  %v8024_v15 = vadd.f32 %v14047_v43, %v8023_v39 }
 0xad3   : > { %v8070_v24 = vmax.f32 %v8024_v15, 0.0 }
 0xad7   : > { %v8028_v23 = vpop.f32.mrb[90].mxu0 }
 0xad8   : > { %v8029_v8 = vadd.f32 %v14047_v43, %v8028_v23  ;;  %v8030_v58 = vpop.f32.mrb[91].mxu0 }
 0xada   : > { %v8071_v45 = vmax.f32 %v8029_v8, 0.0 }
 0xadc   : > { %v8880_v50 = vpack.c.bf16 %v8071_v45, %v8070_v24 }
 0xade   : > { %8882 = vmatprep.subr.msk.bf16.mxu1 %vm14307_vm6, %v8880_v50 }
 0xadf   : > { %8885 = vmatpush3.bf16.xpose.msk.msra.mxu1 %vm14307_vm6, %v14297_v31 }
 0xae6   : > { %v8033_v63 = vpop.f32.mrb[92].mxu0 }
 0xae7   : > { %v8035_v10 = vpop.f32.mrb[93].mxu0  ;;  %v8034_v33 = vadd.f32 %v14047_v43, %v8033_v63 }
 0xae9   : > { %v8072_v1 = vmax.f32 %v8034_v33, 0.0 }
 0xaee   : > { %v8038_v32 = vpop.f32.mrb[94].mxu0 }
 0xaef   : > { %v8039_v30 = vadd.f32 %v14047_v43, %v8038_v32  ;;  %v8040_v7 = vpop.f32.mrb[95].mxu0  ;;  %v8079_v31 = vpop.permute.xlu1 %8078 }
 0xaf1   : > { %v8073_v48 = vmax.f32 %v8039_v30, 0.0 }
 0xaf3   : > { %v8886_v5 = vpack.c.bf16 %v8073_v48, %v8072_v1 }
 0xaf5   : > { %8888 = vmatprep.subr.msk.bf16.mxu1 %vm14307_vm6, %v8886_v5 }
 0xaf6   : > { %8891 = vmatpush3.bf16.xpose.msk.msra.mxu1 %vm14307_vm6, %v14301_v2 }
 0xafd   : > { %8600 = vmatmul.mubr.msk.f32.vlgmr.msra.gmra.mrb[44].mxu1 %vm487_vm3, %v14327_v46 }
 0xbd0   : > { %v8246_v35 = vpop.f32.mrb[44].mxu1 }
 0xbd1   : > { %v8247_v4 = vadd.f32 %v8246_v35, %v8079_v31  ;;  %v8248_v17 = vpop.f32.mrb[45].mxu1 }
 0xbd2   : > { %v8249_v43 = vadd.f32 %v8248_v17, %v8079_v31 }
 0xbd4   : > { %v8253_v44 = vcombine.low %v8247_v4, %v8249_v43 }
 0xbd6   : > { %8255 = vst [vmem:[%s440_s21] sm:$0x77] %v8253_v44 }
 0xbd7 PF: > { %s23_s25 = sadd.s32 1, %s9435_s25  }
 0xbd8   : > { %p20_p4 = scmp.ge.s32.totalorder %s23_s25, 4  }
 0xbda   :  { %22 = sbr.rel (!%p20_p4) target bundleno = 1 (0x1), region = 112 }

</bundles_post_ra>
